<compile_context>
chip_gen: v5e
topology: v5e:2x2
jax: 0.10.0
libtpu: 0.0.40
codegen_flags: <defaults>
</compile_context>

<pallas_src>
import functools
import numpy as np
import jax
import jax.numpy as jnp
from jax.experimental import pallas as pl
from jax.experimental.pallas import tpu as pltpu


def _round_up(x, m):
    return ((x + m - 1) // m) * m


def _cdiv(a, b):
    return (a + b - 1) // b


# ----------------------------------------------------------------------------
# Deterministic parameter construction (replaces librosa_mel_fn / hann_window)
# ----------------------------------------------------------------------------
def _hz_to_mel(freqs):
    # Slaney mel scale (librosa default: htk=False)
    freqs = np.asarray(freqs, dtype=np.float64)
    f_min, f_sp = 0.0, 200.0 / 3.0
    mels = (freqs - f_min) / f_sp
    min_log_hz = 1000.0
    min_log_mel = (min_log_hz - f_min) / f_sp
    logstep = np.log(6.4) / 27.0
    log_t = freqs >= min_log_hz
    mels = np.where(
        log_t,
        min_log_mel + np.log(np.maximum(freqs, 1e-10) / min_log_hz) / logstep,
        mels,
    )
    return mels


def _mel_to_hz(mels):
    mels = np.asarray(mels, dtype=np.float64)
    f_min, f_sp = 0.0, 200.0 / 3.0
    freqs = f_min + f_sp * mels
    min_log_hz = 1000.0
    min_log_mel = (min_log_hz - f_min) / f_sp
    logstep = np.log(6.4) / 27.0
    log_t = mels >= min_log_mel
    freqs = np.where(log_t, min_log_hz * np.exp(logstep * (mels - min_log_mel)), freqs)
    return freqs


def librosa_mel_fn(sr, n_fft, n_mels, fmin, fmax):
    """Slaney-normalized triangular mel filterbank, [n_mels, n_fft//2 + 1]."""
    if fmax is None:
        fmax = sr / 2.0
    fftfreqs = np.linspace(0.0, sr / 2.0, n_fft // 2 + 1)
    mel_f = _mel_to_hz(np.linspace(_hz_to_mel(fmin), _hz_to_mel(fmax), n_mels + 2))
    fdiff = np.diff(mel_f)
    ramps = mel_f[:, None] - fftfreqs[None, :]
    lower = -ramps[:-2] / fdiff[:-1, None]
    upper = ramps[2:] / fdiff[1:, None]
    weights = np.maximum(0.0, np.minimum(lower, upper))
    enorm = 2.0 / (mel_f[2 : n_mels + 2] - mel_f[:n_mels])
    weights = weights * enorm[:, None]
    return weights.astype(np.float32)


def hann_window_periodic(win_length):
    # torch.hann_window default periodic=True
    n = np.arange(win_length, dtype=np.float64)
    return (0.5 - 0.5 * np.cos(2.0 * np.pi * n / win_length)).astype(np.float32)


# ----------------------------------------------------------------------------
# Pallas kernel: in-kernel framing (slab DMA) -> hop-decomposed windowed DFT
#                -> power -> mel projection -> log10 clamp
# ----------------------------------------------------------------------------
def audio2mel_kernel(hops_hbm, basis_ref, melt_ref, out_ref, slab_ref, sem_ref,
                     *, tm, hop, n_chunks):
    # hops_hbm : [B, NH, hop]           f32, HBM (memory_space=pl.ANY), hop-chunked audio
    # basis_ref: [n_fft, n_cols]        bf16, window-folded [cos | nyq | -sin] DFT basis
    # melt_ref : [n_cols, n_mels_pad]   bf16, column-duplicated transposed mel filterbank
    # out_ref  : [tm, n_mels_pad]       f32, lane-dense output block
    # slab_ref : [tm + slack, hop]      f32 VMEM scratch (audio slab for this block)
    b = pl.program_id(0)
    r = pl.program_id(1)

    # Fetch the contiguous audio slab covering frames [r*tm, (r+1)*tm) of batch b.
    # TODO(synk): double-buffer this DMA across grid steps; kept synchronous because it is
    # small (<~0.5 MiB) next to the per-block MXU time and it stays megacore-safe.
    cp = pltpu.make_async_copy(
        hops_hbm.at[b, pl.ds(r * tm, slab_ref.shape[0])], slab_ref, sem_ref)
    cp.start()
    cp.wait()

    # Hop-decomposed windowed DFT: frame f = concat_j hop_row[f + j]  (n_fft = n_chunks*hop)
    # => frames @ basis = sum_j slab[j : j+tm] @ basis[j*hop : (j+1)*hop]
    spec = None
    for j in range(n_chunks):
        a_j = slab_ref[j:j + tm, :].astype(jnp.bfloat16)          # [tm, hop]
        b_j = basis_ref[j * hop:(j + 1) * hop, :]                 # [hop, n_cols]
        part = jnp.dot(a_j, b_j, preferred_element_type=jnp.float32)
        spec = part if spec is None else spec + part              # [tm, n_cols] f32

    # |X|^2: re/im sum is folded into the column-duplicated mel matrix, so just square.
    sq = (spec * spec).astype(jnp.bfloat16)                       # [tm, n_cols]
    mel = jnp.dot(sq, melt_ref[...], preferred_element_type=jnp.float32)   # [tm, n_mels_pad]
    out_ref[...] = jnp.log10(jnp.maximum(mel, 1e-5))


class Audio2MelPallas:
    def __init__(self, n_fft=1024, hop_length=256, win_length=1024,
                 sampling_rate=16000, n_mel_channels=80, mel_fmin=0.0,
                 mel_fmax=None, block_rows=512):
        assert win_length == n_fft, "kernel assumes win_length == n_fft (as in defaults)"
        assert n_fft % hop_length == 0, "kernel assumes hop divides n_fft (defaults 1024/256)"
        assert n_fft % 2 == 0
        self.n_fft = n_fft
        self.hop = hop_length
        self.n_chunks = n_fft // hop_length
        self.n_mels = n_mel_channels
        self.block_rows = block_rows
        self.slack = _round_up(max(self.n_chunks - 1, 0), 8)      # extra hop-rows per slab

        n_freq = n_fft // 2 + 1
        f_half = n_fft // 2                                       # Nyquist packed at col f_half
        self.n_cols = _round_up(2 * f_half, 128)                  # 1024 for defaults (no waste)
        self.n_mels_pad = _round_up(n_mel_channels, 128)          # lane-dense output width

        # Window-folded DFT basis with Nyquist packed into the unused sin(k=0) slot:
        #   cols [0, f_half)        : win * cos(2*pi*n*k/N),  k = 0..f_half-1
        #   col   f_half            : win * cos(pi*n)          (k = N/2; its sin part is 0)
        #   cols (f_half, 2*f_half) : win * -sin(2*pi*n*k/N),  k = 1..f_half-1
        window = hann_window_periodic(win_length).astype(np.float64)
        n = np.arange(n_fft, dtype=np.float64)
        k = np.arange(n_freq, dtype=np.float64)
        ang = 2.0 * np.pi * np.outer(n, k) / n_fft                # [n_fft, n_freq]
        cosw = window[:, None] * np.cos(ang)
        sinw = window[:, None] * (-np.sin(ang))
        basis = np.zeros((n_fft, self.n_cols), dtype=np.float32)
        basis[:, :f_half] = cosw[:, :f_half]
        basis[:, f_half] = cosw[:, f_half]                        # Nyquist (cos only)
        basis[:, f_half + 1:2 * f_half] = sinw[:, 1:f_half]
        self.basis = jnp.asarray(basis).astype(jnp.bfloat16)      # MXU operand

        # Column-duplicated, host-transposed mel filterbank (bf16 single-pass MXU operand):
        # row c -> mel[:, c] for c<f_half ; row f_half -> mel[:, f_half] ; row f_half+c -> mel[:, c]
        melw = librosa_mel_fn(sr=sampling_rate, n_fft=n_fft, n_mels=n_mel_channels,
                              fmin=mel_fmin, fmax=mel_fmax)       # [n_mels, n_freq]
        melt = np.zeros((self.n_cols, self.n_mels_pad), dtype=np.float32)
        melt[:f_half, :n_mel_channels] = melw[:, :f_half].T
        melt[f_half, :n_mel_channels] = melw[:, f_half]
        melt[f_half + 1:2 * f_half, :n_mel_channels] = melw[:, 1:f_half].T
        self.mel_t = jnp.asarray(melt).astype(jnp.bfloat16)

    def __call__(self, audioin):
        # audioin: [B, 1, T] float32
        n_fft, hop = self.n_fft, self.hop
        p = (n_fft - hop) // 2
        audio = jnp.pad(audioin, ((0, 0), (0, 0), (p, p)), mode="reflect")[:, 0, :]
        B, L = audio.shape
        n_frames = 1 + (L - n_fft) // hop

        # Row-block size (frames per grid step). Per-generation knob; keep >=2 grid steps
        # when possible so both v7x TensorCores are busy.
        rows = _round_up(n_frames, 128)
        tm = min(self.block_rows, rows)
        nblk = _cdiv(n_frames, tm)
        if B * nblk < 2 and rows >= 256:
            tm = max(128, _round_up(rows // 2, 128))
            nblk = _cdiv(n_frames, tm)

        # Hop-chunked audio (pure reshape + pad: no frame duplication in HBM).
        nh = nblk * tm + self.slack
        used = (n_frames + self.n_chunks - 1) * hop               # samples covered by frames
        hops = jnp.pad(audio[:, :used], ((0, 0), (0, nh * hop - used)))
        hops = hops.reshape(B, nh, hop)                           # f32, stays in HBM

        kernel = functools.partial(audio2mel_kernel, tm=tm, hop=hop,
                                   n_chunks=self.n_chunks)
        # Note: basis/mel BlockSpecs always index (0,0) so they are DMA'd once; default
        # double-buffering of these constants only costs ~2.5 MiB VMEM, well within the
        # explicit 32 MiB limit below, so pipeline_mode=pl.Buffered(1) is not needed.
        out = pl.pallas_call(
            kernel,
            out_shape=jax.ShapeDtypeStruct((B, nblk * tm, self.n_mels_pad), jnp.float32),
            grid_spec=pltpu.PrefetchScalarGridSpec(
                num_scalar_prefetch=0,
                grid=(B, nblk),
                in_specs=[
                    pl.BlockSpec(memory_space=pl.ANY),                                # audio hops (HBM)
                    pl.BlockSpec((n_fft, self.n_cols), lambda b, r: (0, 0)),          # DFT basis (resident)
                    pl.BlockSpec((self.n_cols, self.n_mels_pad), lambda b, r: (0, 0)),  # mel^T (resident)
                ],
                out_specs=pl.BlockSpec((None, tm, self.n_mels_pad),
                                       lambda b, r: (b, r, 0)),
                scratch_shapes=[
                    pltpu.VMEM((tm + self.slack, hop), jnp.float32),   # audio slab
                    pltpu.SemaphoreType.DMA(()),
                ],
            ),
            compiler_params=pltpu.CompilerParams(
                dimension_semantics=("parallel", "parallel"),
                vmem_limit_bytes=32 * 1024 * 1024,
            ),
        )(hops, self.basis, self.mel_t)

        # strip padding and restore torch layout [B, n_mel_channels, n_frames]
        out = out[:, :n_frames, :self.n_mels]
        return jnp.transpose(out, (0, 2, 1))


if __name__ == "__main__":
    # Module defaults (n_fft=1024, hop=256, win=1024, n_mels=80), small audio:
    # B=2, T=4096 -> output [2, 80, 16]
    key = jax.random.PRNGKey(0)
    B, T = 2, 4096
    audioin = jax.random.normal(key, (B, 1, T), dtype=jnp.float32)

    a2m = Audio2MelPallas()
    log_mel = jax.block_until_ready(a2m(audioin))

    p = (a2m.n_fft - a2m.hop) // 2
    n_frames = 1 + (T + 2 * p - a2m.n_fft) // a2m.hop
    assert log_mel.shape == (B, a2m.n_mels, n_frames), log_mel.shape
    assert bool(jnp.all(jnp.isfinite(log_mel)))

    # Loose numerical sanity check against a pure-JAX f32 rFFT reference
    # (kernel uses bf16 MXU operands, so allow a small log-mel tolerance).
    audio = jnp.pad(audioin, ((0, 0), (0, 0), (p, p)), mode="reflect")[:, 0, :]
    idx = (np.arange(n_frames)[:, None] * a2m.hop
           + np.arange(a2m.n_fft)[None, :])
    win = jnp.asarray(hann_window_periodic(a2m.n_fft))
    fr = audio[:, idx] * win
    spec = jnp.fft.rfft(fr.astype(jnp.float32), axis=-1)
    power = jnp.real(spec) ** 2 + jnp.imag(spec) ** 2
    melw = jnp.asarray(librosa_mel_fn(16000, a2m.n_fft, a2m.n_mels, 0.0, None))
    ref = jnp.log10(jnp.clip(
        jnp.einsum("mf,bnf->bmn", melw, power,
                   precision=jax.lax.Precision.HIGHEST), 1e-5))
    max_err = float(jnp.max(jnp.abs(ref - log_mel)))
    assert max_err < 0.3, max_err

    print("KERNEL_OK")
</pallas_src>

<mosaic_0001>
module attributes {stable_mosaic.version = 11 : i64} {
  func.func @audio2mel_kernel(%arg0: i32, %arg1: i32, %arg2: memref<2x136x256xf32, #tpu.memory_space<any>>, %arg3: memref<1024x1024xbf16, #tpu.memory_space<vmem>>, %arg4: memref<1024x128xbf16, #tpu.memory_space<vmem>>, %arg5: memref<1x128x128xf32, #tpu.memory_space<vmem>>, %arg6: memref<136x256xf32, #tpu.memory_space<vmem>>, %arg7: memref<!tpu.dma_semaphore, #tpu.memory_space<semaphore_mem>>) attributes {dimension_semantics = [#tpu.dimension_semantics<parallel>, #tpu.dimension_semantics<parallel>], iteration_bounds = array<i64: 2, 1>, scalar_prefetch = 0 : i64, scratch_operands = 2 : i64, tpu.core_type = #tpu.core_type<tc>, window_params = [{}, {pipeline_mode = #tpu.pipeline_mode<synchronous>, transform_indices = @transform_1, window_bounds = array<i64: 1024, 1024>}, {pipeline_mode = #tpu.pipeline_mode<synchronous>, transform_indices = @transform_2, window_bounds = array<i64: 1024, 128>}, {transform_indices = @transform_3, window_bounds = array<i64: 1, 128, 128>}]} {
    %c128_i32 = arith.constant 128 : i32
    %0 = arith.muli %arg1, %c128_i32 : i32
    %c0_i32 = arith.constant 0 : i32
    %1 = tpu.memref_slice %arg2[%arg0, %0, %c0_i32] : memref<2x136x256xf32, #tpu.memory_space<any>> -> memref<1x136x256xf32, #tpu.memory_space<any>>
    %2 = tpu.memref_squeeze %1 : memref<1x136x256xf32, #tpu.memory_space<any>> -> memref<136x256xf32, #tpu.memory_space<any>>
    tpu.enqueue_dma source(%2 : memref<136x256xf32, #tpu.memory_space<any>>) target(%arg6 : memref<136x256xf32, #tpu.memory_space<vmem>>) target_semaphore(%arg7 : memref<!tpu.dma_semaphore, #tpu.memory_space<semaphore_mem>>)
    %c0_i32_0 = arith.constant 0 : i32
    %3 = tpu.memref_slice %arg2[%arg0, %0, %c0_i32_0] : memref<2x136x256xf32, #tpu.memory_space<any>> -> memref<1x136x256xf32, #tpu.memory_space<any>>
    %4 = tpu.memref_squeeze %3 : memref<1x136x256xf32, #tpu.memory_space<any>> -> memref<136x256xf32, #tpu.memory_space<any>>
    tpu.wait_dma2 semaphore(%arg7 : memref<!tpu.dma_semaphore, #tpu.memory_space<semaphore_mem>>) src(%4 : memref<136x256xf32, #tpu.memory_space<any>>) dst(%arg6 : memref<136x256xf32, #tpu.memory_space<vmem>>)
    %c0 = arith.constant 0 : index
    %c0_1 = arith.constant 0 : index
    %5 = vector.load %arg6[%c0, %c0_1] : memref<136x256xf32, #tpu.memory_space<vmem>>, vector<128x256xf32>
    %6 = arith.truncf %5 : vector<128x256xf32> to vector<128x256xbf16>
    %c0_2 = arith.constant 0 : index
    %c0_3 = arith.constant 0 : index
    %7 = vector.load %arg3[%c0_2, %c0_3] : memref<1024x1024xbf16, #tpu.memory_space<vmem>>, vector<256x1024xbf16>
    %cst = arith.constant dense<0.000000e+00> : vector<128x1024xf32>
    %8 = tpu.matmul %6, %7, %cst {dimension_numbers = #tpu.dot_dimension_numbers<[1], [0], [0], [1], [0, 0, 1, 1], [], []>} : vector<128x256xbf16>, vector<256x1024xbf16>, vector<128x1024xf32> -> vector<128x1024xf32>
    %c1 = arith.constant 1 : index
    %c0_4 = arith.constant 0 : index
    %9 = vector.load %arg6[%c1, %c0_4] : memref<136x256xf32, #tpu.memory_space<vmem>>, vector<128x256xf32>
    %10 = arith.truncf %9 : vector<128x256xf32> to vector<128x256xbf16>
    %c256 = arith.constant 256 : index
    %c0_5 = arith.constant 0 : index
    %11 = vector.load %arg3[%c256, %c0_5] : memref<1024x1024xbf16, #tpu.memory_space<vmem>>, vector<256x1024xbf16>
    %cst_6 = arith.constant dense<0.000000e+00> : vector<128x1024xf32>
    %12 = tpu.matmul %10, %11, %cst_6 {dimension_numbers = #tpu.dot_dimension_numbers<[1], [0], [0], [1], [0, 0, 1, 1], [], []>} : vector<128x256xbf16>, vector<256x1024xbf16>, vector<128x1024xf32> -> vector<128x1024xf32>
    %13 = arith.addf %8, %12 : vector<128x1024xf32>
    %c2 = arith.constant 2 : index
    %c0_7 = arith.constant 0 : index
    %14 = vector.load %arg6[%c2, %c0_7] : memref<136x256xf32, #tpu.memory_space<vmem>>, vector<128x256xf32>
    %15 = arith.truncf %14 : vector<128x256xf32> to vector<128x256xbf16>
    %c512 = arith.constant 512 : index
    %c0_8 = arith.constant 0 : index
    %16 = vector.load %arg3[%c512, %c0_8] : memref<1024x1024xbf16, #tpu.memory_space<vmem>>, vector<256x1024xbf16>
    %cst_9 = arith.constant dense<0.000000e+00> : vector<128x1024xf32>
    %17 = tpu.matmul %15, %16, %cst_9 {dimension_numbers = #tpu.dot_dimension_numbers<[1], [0], [0], [1], [0, 0, 1, 1], [], []>} : vector<128x256xbf16>, vector<256x1024xbf16>, vector<128x1024xf32> -> vector<128x1024xf32>
    %18 = arith.addf %13, %17 : vector<128x1024xf32>
    %c3 = arith.constant 3 : index
    %c0_10 = arith.constant 0 : index
    %19 = vector.load %arg6[%c3, %c0_10] : memref<136x256xf32, #tpu.memory_space<vmem>>, vector<128x256xf32>
    %20 = arith.truncf %19 : vector<128x256xf32> to vector<128x256xbf16>
    %c768 = arith.constant 768 : index
    %c0_11 = arith.constant 0 : index
    %21 = vector.load %arg3[%c768, %c0_11] : memref<1024x1024xbf16, #tpu.memory_space<vmem>>, vector<256x1024xbf16>
    %cst_12 = arith.constant dense<0.000000e+00> : vector<128x1024xf32>
    %22 = tpu.matmul %20, %21, %cst_12 {dimension_numbers = #tpu.dot_dimension_numbers<[1], [0], [0], [1], [0, 0, 1, 1], [], []>} : vector<128x256xbf16>, vector<256x1024xbf16>, vector<128x1024xf32> -> vector<128x1024xf32>
    %23 = arith.addf %18, %22 : vector<128x1024xf32>
    %24 = arith.mulf %23, %23 : vector<128x1024xf32>
    %25 = arith.truncf %24 : vector<128x1024xf32> to vector<128x1024xbf16>
    %c0_13 = arith.constant 0 : index
    %c0_14 = arith.constant 0 : index
    %26 = vector.load %arg4[%c0_13, %c0_14] : memref<1024x128xbf16, #tpu.memory_space<vmem>>, vector<1024x128xbf16>
    %cst_15 = arith.constant dense<0.000000e+00> : vector<128x128xf32>
    %27 = tpu.matmul %25, %26, %cst_15 {dimension_numbers = #tpu.dot_dimension_numbers<[1], [0], [0], [1], [0, 0, 1, 1], [], []>} : vector<128x1024xbf16>, vector<1024x128xbf16>, vector<128x128xf32> -> vector<128x128xf32>
    %cst_16 = arith.constant 9.99999974E-6 : f32
    %28 = vector.broadcast %cst_16 : f32 to vector<128x128xf32>
    %29 = arith.maximumf %27, %28 : vector<128x128xf32>
    %30 = math.log %29 : vector<128x128xf32>
    %cst_17 = arith.constant 0.434294492 : f32
    %31 = vector.broadcast %cst_17 : f32 to vector<128x128xf32>
    %32 = arith.mulf %30, %31 : vector<128x128xf32>
    %c0_18 = arith.constant 0 : index
    %c0_19 = arith.constant 0 : index
    %c0_20 = arith.constant 0 : index
    %33 = vector.load %arg5[%c0_18, %c0_19, %c0_20] : memref<1x128x128xf32, #tpu.memory_space<vmem>>, vector<1x128x128xf32>
    %34 = vector.shape_cast %33 : vector<1x128x128xf32> to vector<128x128xf32>
    %35 = vector.shape_cast %32 : vector<128x128xf32> to vector<1x128x128xf32>
    tpu.vector_store %arg5[%c0_18, %c0_19, %c0_20], %35 {strides = array<i32>} : memref<1x128x128xf32, #tpu.memory_space<vmem>>, vector<1x128x128xf32>,
    return
  }
  func.func @transform_1(%arg0: i32, %arg1: i32) -> (i32, i32) {
    %c0_i32 = arith.constant 0 : i32
    %c0_i32_0 = arith.constant 0 : i32
    %c0_i32_1 = arith.constant 0 : i32
    return %c0_i32, %c0_i32_0 : i32, i32
  }
  func.func @transform_2(%arg0: i32, %arg1: i32) -> (i32, i32) {
    %c0_i32 = arith.constant 0 : i32
    %c0_i32_0 = arith.constant 0 : i32
    %c0_i32_1 = arith.constant 0 : i32
    return %c0_i32, %c0_i32_0 : i32, i32
  }
  func.func @transform_3(%arg0: i32, %arg1: i32) -> (i32, i32, i32) {
    %c0_i32 = arith.constant 0 : i32
    %c0_i32_0 = arith.constant 0 : i32
    return %arg0, %arg1, %c0_i32 : i32, i32, i32
  }
}

</mosaic_0001>

<bundles_post_ra>
// kernel: tpu_custom_call.1
= control target key start
LH: loop header
LB: loop body
LE: loop exit
PB: predicated region body
PF: predicated region fallthrough
CT: control target
= control target key end

     0   :  { %8 = vsyncpa [#allocation5], 0  ;;  %s14421_s0 = inlined_call_operand.hbm [shape: f32[2,136,256], index: 0, kind: input, shape index: {}]   ;;  %s14422_s1 = inlined_call_operand.hbm [shape: bf16[1024,1024], index: 1, kind: input, shape index: {}]   ;;  %s14423_s2 = inlined_call_operand.hbm [shape: bf16[1024,128], index: 2, kind: input, shape index: {}]   ;;  %s14424_s3 = inlined_call_operand.hbm [shape: f32[2,128,128], index: 3, kind: output, shape index: {}]  }
   0x1   :  { %9 = vsyncpa [#allocation8], 0 }
   0x2   :  { %10 = vsyncpa [#allocation6], 0 }
   0x3   :  { %12 = vsyncpa [#allocation6 + $0x1], 0  ;;  %s11614_s12 = smov 0   ;;  %s11616_s13 = smov 0  }
   0x4   :  { %s11618_s14 = smov 0   ;;  %s11620_s15 = smov 0  }
   0x5   :  { %s11622_s16 = smov 0   ;;  %s11624_s17 = smov 0  }
   0x6 LB: > { %s8394_s18 = sadd.s32 4294967295, %s11583_s17   ;;  %s8395_s19 = sadd.s32 4294967294, %s11583_s17   ;;  %s11583_s17 = sphi %s11624_s17, %s18_s17   ;;  %s11579_s16 = sphi %s11622_s16, %s15396_s16   ;;  %s11575_s15 = sphi %s11620_s15, %s15395_s15   ;;  %s11571_s14 = sphi %s11618_s14, %s15394_s14   ;;  %s11567_s13 = sphi %s11616_s13, %s15393_s13   ;;  %s11563_s12 = sphi %s11614_s12, %s15392_s12  }
   0x7   : > { %s30_s20 = sadd.s32 1, %s11579_s16  ;;  %s81_s21 = sadd.s32 1, %s11571_s14 }
   0x8   : > { %p32_p0 = scmp.ge.s32.totalorder %s30_s20, 2  ;;  %p91_p1 = scmp.ne.s32.totalorder %s11571_s14, %s11567_s13 }
   0x9   : > { %p92_p2 = scmp.eq.s32.totalorder %s8394_s18, 1  ;;  %p97_p3 = scmp.ne.s32.totalorder %s11567_s13, %s11563_s12 }
   0xa   : > { %s15398_s20 = smov (%p32_p0, %s30_s20), 0  ;;  %p98_p5 = scmp.eq.s32.totalorder %s8395_s19, 1 }
   0xb   : > { %p11654_p4 = por %p92_p2, %p91_p1  ;;  %s76_s23 = ssub.s32 %s11579_s16, %s15398_s20 }
   0xc   : > { %p8396_p6 = scmp.ge.s32.totalorder %s11583_s17, 1  ;;  %p79_p7 = scmp.eq.s32.totalorder %s76_s23, 0 }
   0xd   : > { %p11661_p8 = por %p98_p5, %p97_p3  ;;  %p105_p9 = scmp.lt.s32.totalorder %s11583_s17, 3 }
   0xe   : > { %s11667_s25 = scalar_select %p79_p7, %s11571_s14, %s81_s21  }
   0xf   : > { %p11669_p10 = pnand %p8396_p6, %p105_p9  ;;  %p11673_p11 = scmp.eq.s32.totalorder %s8394_s18, 0 }
  0x10   : > { %s116_s30 = sshll.u32 %s14422_s1, 4  ;;  %s11585_s4 = smov [#allocation4]   ;;  %s117_s30 = int_to_ptr.hbm [resolvable:$true] %s116_s30 }
  0x11   : > { %p11302_p12 = pneg %p11669_p10  ;;  %s118_s5 = sshll.u32 %s11585_s4, 4  ;;  %s119_s5 = int_to_ptr.vmem [resolvable:$true] %s118_s5 }
  0x12   : > { %s130_s8 = sshll.u32 %s14423_s2, 4  ;;  %s11586_s9 = smov 512   ;;  %s131_s8 = int_to_ptr.hbm [resolvable:$true] %s130_s8 }
  0x13   : > { %p11303_p13 = pnand %p11673_p11, %p11302_p12  ;;  %s11587_s10 = smov 32  }
  0x14   : > { %s11588_s11 = smov [#allocation7]   ;;  %s11589_s19 = smov 64  }
  0x15   : > { %11305 = dma.hbm_to_vmem [thread:$0]  (!%p11303_p13), %s117_s30, 65536, %s119_s5, [#allocation5], %s11586_s9, %s11586_s9, %s11587_s10  }
  0x16   : > { %s132_s18 = sshll.u32 %s11588_s11, 4  ;;  %s11590_s21 = smov 4   ;;  %s133_s18 = int_to_ptr.vmem [resolvable:$true] %s132_s18 }
  0x17   : > { %11308 = dma.hbm_to_vmem [thread:$0]  (!%p11303_p13), %s131_s8, 8192, %s133_s18, [#allocation8], %s11589_s19, %s11589_s19, %s11590_s21  }
  0x18   : > { %148 = sbr.rel (%p11669_p10) target bundleno = 2538 (0x9ea), region = 28 }
  0x1d   : > { %11548 = dma.done.wait (%p11673_p11), [#allocation5], 65536  }
  0x1e   : > { %11550 = vsyncadd (%p11673_p11), [#allocation5], 4294901760 }
  0x1f   : > { %11552 = dma.done.wait (%p11673_p11), [#allocation8], 8192  }
  0x20   : > { %11554 = vsyncadd (%p11673_p11), [#allocation8], 4294959104  ;;  %s168_s23 = sand.u32 1, %s11567_s13   ;;  %s10714_s28 = smul.u32 272, %s11575_s15 }
  0x21   : > { %s8402_s26 = sshll.u32 %s168_s23, 7  ;;  %s11591_s6 = smov [#allocation2]  }
  0x22   : > { %s179_s4 = scalar_lea.hbm %s14421_s0, %s10714_s28  ;;  %s189_s7 = sshll.u32 %s11591_s6, 4  ;;  %s190_s7 = int_to_ptr.vmem [resolvable:$true] %s189_s7 }
  0x23   : > { %s187_s5 = sshll.u32 %s179_s4, 4  ;;  %s11475_s11 = scalar_lea.hbm %s14421_s0, 544  ;;  %s188_s5 = int_to_ptr.hbm [resolvable:$true] %s187_s5 }
  0x24   : > { %s11471_s8 = sshra.s32 %s188_s5, 4  ;;  %s11472_s8 = int_to_ptr.hbm [resolvable:$true] %s11471_s8 }
  0x25   : > { %s11473_s27 = scalar_lea.hbm %s11472_s8, 272  ;;  %p11476_p1 = scmp.lt.s32.totalorder %s11472_s8, %s14421_s0 }
  0x26   : > { %p11474_p0 = scmp.ne.s32.totalorder %s11472_s8, %s11473_s27  ;;  %p11477_p2 = scmp.lt.s32.totalorder %s11475_s11, %s11473_s27 }
  0x28   : > { %p11478_p3 = por %p11477_p2, %p11476_p1 }
  0x2a   : > { %p11479_p5 = pnand %p11478_p3, %p11474_p0 }
  0x2c   : > { %11482 = shalt.err (!%p11479_p5)  }
  0x2d   : > { %192 = dma.hbm_to_vmem [thread:$0]  %s188_s5, 4352, %s190_s7, [#allocation3] }
  0x2e   : > { %s11710_s21 = scalar_lea.vmem [#allocation9], %s8402_s26 }
  0x2f   : > { %11555 = dma.done.wait [#allocation3], 4352 }
  0x30   : > { %11556 = vsyncadd [#allocation3], 4294962944  ;;  %v8630_v0 = vld [vmem:[#allocation4 + $0x5c0] sm:$0xf]  ;;  %v10899_v5 = vld [vmem:[#allocation4 + $0x5c4] sm:$0xf] }
  0x31   : > { %v10903_v1 = vld [vmem:[#allocation4 + $0x5dc] sm:$0xf0]  ;;  %v8632_v6 = vld [vmem:[#allocation4 + $0x5e0] sm:$0xf0]  ;;  %vm553_vm0 = vsmask.f32 7424 }
  0x32   : > { %v8886_v2 = vld [vmem:[#allocation4 + $0x7c0] sm:$0xf]  ;;  %v8631_v3 = vor.u32 %v10903_v1, %v8630_v0  ;;  %v8635_v8 = vor.u32 %v10899_v5, %v8632_v6  ;;  %v10963_v9 = vld [vmem:[#allocation4 + $0x7c4] sm:$0xf]  ;;  %vm3708_vm1 = vcmask 1046528   ;;  %s11291_s28 = sshll.u32 %s11575_s15, 7 }
  0x33   : > { %v10967_v4 = vld [vmem:[#allocation4 + $0x7dc] sm:$0xf0]  ;;  %v8888_v10 = vld [vmem:[#allocation4 + $0x7e0] sm:$0xf0]  ;;  %vm5447_vm2 = vsmask.f32 6400  ;;  %s8296_s30 = scalar_lea.hbm %s14424_s3, %s11291_s28 }
  0x34   : > { %v8887_v7 = vor.u32 %v10967_v4, %v8886_v2  ;;  %v8598_v11 = vld [vmem:[#allocation4 + $0x580] sm:$0xf]  ;;  %1346 = vmatpush.bf16.msra.mxu0 %v8631_v3  ;;  %v8891_v12 = vor.u32 %v10963_v9, %v8888_v10  ;;  %1444 = vmatpush.bf16.msra.mxu2 %v8635_v8  ;;  %v10891_v18 = vld [vmem:[#allocation4 + $0x584] sm:$0xf]  ;;  %s8297_s4 = sshll.u32 %s11710_s21, 4  ;;  %s8299_s5 = sshll.u32 %s8296_s30, 4  ;;  %s8298_s4 = int_to_ptr.vmem [resolvable:$true] %s8297_s4  ;;  %s8300_s5 = int_to_ptr.hbm [resolvable:$true] %s8299_s5 }
  0x35   : > { %v10895_v13 = vld [vmem:[#allocation4 + $0x59c] sm:$0xf0]  ;;  %v8600_v19 = vld [vmem:[#allocation4 + $0x5a0] sm:$0xf0]  ;;  %s8283_s6 = scalar_lea.sflag [#allocation6], %s168_s23  ;;  %s11509_s7 = sshra.s32 %s8300_s5, 4  ;;  %s11510_s7 = int_to_ptr.hbm [resolvable:$true] %s11509_s7 }
  0x36   : > { %v8854_v14 = vld [vmem:[#allocation4 + $0x780] sm:$0xf]  ;;  %1395 = vmatpush.bf16.msra.mxu1 %v8887_v7  ;;  %v8599_v16 = vor.u32 %v10895_v13, %v8598_v11  ;;  %v10955_v20 = vld [vmem:[#allocation4 + $0x784] sm:$0xf]  ;;  %1493 = vmatpush.bf16.msra.mxu3 %v8891_v12  ;;  %v8603_v21 = vor.u32 %v10891_v18, %v8600_v19  ;;  %s11511_s15 = scalar_lea.hbm %s11510_s7, 128  ;;  %s11515_s9 = scalar_lea.hbm %s14424_s3, 256 }
  0x37   : > { %v10959_v15 = vld [vmem:[#allocation4 + $0x79c] sm:$0xf0]  ;;  %v8856_v22 = vld [vmem:[#allocation4 + $0x7a0] sm:$0xf0]  ;;  %p11512_p6 = scmp.ne.s32.totalorder %s11510_s7, %s11511_s15  ;;  %p11516_p10 = scmp.lt.s32.totalorder %s11510_s7, %s14424_s3 }
  0x38   : > { %v8855_v17 = vor.u32 %v10959_v15, %v8854_v14  ;;  %v8566_v23 = vld [vmem:[#allocation4 + $0x540] sm:$0xf]  ;;  %v8859_v25 = vor.u32 %v10955_v20, %v8856_v22  ;;  %v10883_v28 = vld [vmem:[#allocation4 + $0x544] sm:$0xf]  ;;  %1347 = vmatpush.bf16.msra.mxu0 %v8599_v16  ;;  %1445 = vmatpush.bf16.msra.mxu2 %v8603_v21  ;;  %v373_v16 = vld [vmem:[#allocation2] sm:$0xfe]  ;;  %p11517_p11 = scmp.lt.s32.totalorder %s11515_s9, %s11511_s15 }
  0x39   : > { %v10887_v24 = vld [vmem:[#allocation4 + $0x55c] sm:$0xf0]  ;;  %v8568_v30 = vld [vmem:[#allocation4 + $0x560] sm:$0xf0]  ;;  %p11513_p7 = pnand %p11512_p6, %p11654_p4 }
  0x3a   : > { %v8822_v26 = vld [vmem:[#allocation4 + $0x740] sm:$0xf]  ;;  %v8567_v29 = vor.u32 %v10887_v24, %v8566_v23  ;;  %v10947_v31 = vld [vmem:[#allocation4 + $0x744] sm:$0xf]  ;;  %1396 = vmatpush.bf16.msra.mxu1 %v8855_v17  ;;  %v8571_v34 = vor.u32 %v10883_v28, %v8568_v30  ;;  %1494 = vmatpush.bf16.msra.mxu3 %v8859_v25  ;;  %v377_v23 = vld [vmem:[#allocation2 + $0x20] sm:$0xff]  ;;  %p11518_p12 = por %p11517_p11, %p11516_p10 }
  0x3b   : > { %v10951_v27 = vld [vmem:[#allocation4 + $0x75c] sm:$0xf0]  ;;  %v8824_v32 = vld [vmem:[#allocation4 + $0x760] sm:$0xf0]  ;;  %p11514_p9 = pneg %p11513_p7 }
  0x3c   : > { %v8823_v33 = vor.u32 %v10951_v27, %v8822_v26  ;;  %v8534_v35 = vld [vmem:[#allocation4 + $0x500] sm:$0xf]  ;;  %v8827_v38 = vor.u32 %v10947_v31, %v8824_v32  ;;  %v10875_v40 = vld [vmem:[#allocation4 + $0x504] sm:$0xf]  ;;  %1348 = vmatpush.bf16.msra.mxu0 %v8567_v29  ;;  %1446 = vmatpush.bf16.msra.mxu2 %v8571_v34  ;;  %v374_v26 = vld [vmem:[#allocation2 + $0x8] sm:$0xfe] }
  0x3d   : > { %v10879_v36 = vld [vmem:[#allocation4 + $0x51c] sm:$0xf0]  ;;  %v8536_v41 = vld [vmem:[#allocation4 + $0x520] sm:$0xf0]  ;;  %v376_v31 = vld [vmem:[#allocation2 + $0x18] sm:$0xff]  ;;  %p11519_p13 = pnand %p11518_p12, %p11514_p9 }
  0x3e   : > { %v8790_v37 = vld [vmem:[#allocation4 + $0x700] sm:$0xf]  ;;  %v10939_v42 = vld [vmem:[#allocation4 + $0x704] sm:$0xf]  ;;  %v8535_v44 = vor.u32 %v10879_v36, %v8534_v35  ;;  %1397 = vmatpush.bf16.msra.mxu1 %v8823_v33  ;;  %v8539_v46 = vor.u32 %v10875_v40, %v8536_v41  ;;  %1495 = vmatpush.bf16.msra.mxu3 %v8827_v38  ;;  %v378_v32 = vld [vmem:[#allocation2 + $0x28] sm:$0xff]  ;;  %v408_v38 = vpack.c.bf16 %v376_v31, %v374_v26 }
  0x3f   : > { %v10943_v39 = vld [vmem:[#allocation4 + $0x71c] sm:$0xf0]  ;;  %v8792_v43 = vld [vmem:[#allocation4 + $0x720] sm:$0xf0]  ;;  %v380_v33 = vld [vmem:[#allocation2 + $0x38] sm:$0xff] }
  0x40   : > { %v8791_v45 = vor.u32 %v10943_v39, %v8790_v37  ;;  %v8502_v47 = vld [vmem:[#allocation4 + $0x4c0] sm:$0xf]  ;;  %v8795_v50 = vor.u32 %v10939_v42, %v8792_v43  ;;  %v10867_v52 = vld [vmem:[#allocation4 + $0x4c4] sm:$0xf]  ;;  %1349 = vmatpush.bf16.msra.mxu0 %v8535_v44  ;;  %1447 = vmatpush.bf16.msra.mxu2 %v8539_v46  ;;  %v11714_v39 = vpack.c.bf16 %v380_v33, %v378_v32  ;;  %v10900_v43 = vld [vmem:[#allocation4 + $0x5cc] sm:$0xf] }
  0x41   : > { %v10871_v48 = vld [vmem:[#allocation4 + $0x4dc] sm:$0xf0]  ;;  %v8504_v53 = vld [vmem:[#allocation4 + $0x4e0] sm:$0xf0]  ;;  %v569_v46 = vshll.u32 %v408_v38, 16 }
  0x42   : > { %v8758_v49 = vld [vmem:[#allocation4 + $0x6c0] sm:$0xf]  ;;  %v10931_v54 = vld [vmem:[#allocation4 + $0x6c4] sm:$0xf]  ;;  %v8503_v56 = vor.u32 %v10871_v48, %v8502_v47  ;;  %1398 = vmatpush.bf16.msra.mxu1 %v8791_v45  ;;  %v8507_v58 = vor.u32 %v10867_v52, %v8504_v53  ;;  %1496 = vmatpush.bf16.msra.mxu3 %v8795_v50  ;;  %14546 = vst [vmem:[#allocation19_spill] sm:$0xff] %v11714_v39  ;;  %v567_v45 = vshrl.u32 %v408_v38, 16 }
  0x43   : > { %v10935_v51 = vld [vmem:[#allocation4 + $0x6dc] sm:$0xf0]  ;;  %v8760_v55 = vld [vmem:[#allocation4 + $0x6e0] sm:$0xf0]  ;;  %v14449_v47 = vshll.u32 %v11714_v39, 16 }
  0x44   : > { %v8759_v57 = vor.u32 %v10935_v51, %v8758_v49  ;;  %v8470_v59 = vld [vmem:[#allocation4 + $0x480] sm:$0xf]  ;;  %v8763_v62 = vor.u32 %v10931_v54, %v8760_v55  ;;  %v10859_v0 = vld [vmem:[#allocation4 + $0x484] sm:$0xf]  ;;  %1350 = vmatpush.bf16.msra.mxu0 %v8503_v56  ;;  %1448 = vmatpush.bf16.msra.mxu2 %v8507_v58  ;;  %v8640_v48 = vld [vmem:[#allocation4 + $0x5e8] sm:$0xf0] }
  0x45   : > { %v10863_v60 = vld [vmem:[#allocation4 + $0x49c] sm:$0xf0]  ;;  %v8472_v1 = vld [vmem:[#allocation4 + $0x4a0] sm:$0xf0]  ;;  %v10964_v53 = vld [vmem:[#allocation4 + $0x7cc] sm:$0xf] }
  0x46   : > { %v8726_v61 = vld [vmem:[#allocation4 + $0x680] sm:$0xf]  ;;  %v10923_v2 = vld [vmem:[#allocation4 + $0x684] sm:$0xf]  ;;  %v8471_v5 = vor.u32 %v10863_v60, %v8470_v59  ;;  %1399 = vmatpush.bf16.msra.mxu1 %v8759_v57  ;;  %v8475_v10 = vor.u32 %v10859_v0, %v8472_v1  ;;  %1497 = vmatpush.bf16.msra.mxu3 %v8763_v62  ;;  %v8896_v54 = vld [vmem:[#allocation4 + $0x7e8] sm:$0xf0]  ;;  %v8643_v59 = vor.u32 %v10900_v43, %v8640_v48 }
  0x47   : > { %v10927_v63 = vld [vmem:[#allocation4 + $0x69c] sm:$0xf0]  ;;  %v8728_v3 = vld [vmem:[#allocation4 + $0x6a0] sm:$0xf0]  ;;  %v571_v56 = vrot.slane %v569_v46, 1  ;;  %v11724_v57 = vrot.slane %v14449_v47, 1  ;;  %v8899_v0 = vor.u32 %v10964_v53, %v8896_v54 }
  0x48   : > { %v8438_v4 = vld [vmem:[#allocation4 + $0x440] sm:$0xf]  ;;  %v8727_v9 = vor.u32 %v10927_v63, %v8726_v61  ;;  %v10851_v11 = vld [vmem:[#allocation4 + $0x444] sm:$0xf]  ;;  %v8731_v14 = vor.u32 %v10923_v2, %v8728_v3  ;;  %1351 = vmatpush.bf16.msra.mxu0 %v8471_v5  ;;  %1449 = vmatpush.bf16.msra.mxu2 %v8475_v10  ;;  %v8638_v60 = vld [vmem:[#allocation4 + $0x5c8] sm:$0xf] }
  0x49   : > { %v10855_v6 = vld [vmem:[#allocation4 + $0x45c] sm:$0xf0]  ;;  %v8440_v12 = vld [vmem:[#allocation4 + $0x460] sm:$0xf0]  ;;  %v10904_v61 = vld [vmem:[#allocation4 + $0x5e4] sm:$0xf0]  ;;  %v572_v63 = vor.u32 %v571_v56, %v567_v45 }
  0x4a   : > { %v8694_v7 = vld [vmem:[#allocation4 + $0x640] sm:$0xf]  ;;  %v10915_v13 = vld [vmem:[#allocation4 + $0x644] sm:$0xf]  ;;  %v8439_v27 = vor.u32 %v10855_v6, %v8438_v4  ;;  %v8443_v29 = vor.u32 %v10851_v11, %v8440_v12  ;;  %1400 = vmatpush.bf16.msra.mxu1 %v8727_v9  ;;  %1498 = vmatpush.bf16.msra.mxu3 %v8731_v14  ;;  %v8894_v62 = vld [vmem:[#allocation4 + $0x7c8] sm:$0xf] }
  0x4b   : > { %v10919_v8 = vld [vmem:[#allocation4 + $0x65c] sm:$0xf0]  ;;  %v8696_v15 = vld [vmem:[#allocation4 + $0x660] sm:$0xf0]  ;;  %v10968_v1 = vld [vmem:[#allocation4 + $0x7e4] sm:$0xf0] }
  0x4c   : > { %v375_v17 = vld [vmem:[#allocation2 + $0x10] sm:$0xff]  ;;  %v8695_v28 = vor.u32 %v10919_v8, %v8694_v7  ;;  %v8699_v40 = vor.u32 %v10915_v13, %v8696_v15  ;;  %1352 = vmatpush.bf16.msra.mxu0 %v8439_v27  ;;  %1450 = vmatpush.bf16.msra.mxu2 %v8443_v29  ;;  %v10892_v2 = vld [vmem:[#allocation4 + $0x58c] sm:$0xf]  ;;  %v11732_v7 = vsel %vm553_vm0, %v572_v63, %v11724_v57  ;;  %v381_v9 = vld [vmem:[#allocation2 + $0x40] sm:$0xff] }
  0x4d   : > { %v8406_v18 = vld [vmem:[#allocation4 + $0x400] sm:$0xf]  ;;  %v10843_v22 = vld [vmem:[#allocation4 + $0x404] sm:$0xf]  ;;  %v407_v25 = vpack.c.bf16 %v375_v17, %v373_v16  ;;  %v8608_v3 = vld [vmem:[#allocation4 + $0x5a8] sm:$0xf0]  ;;  %v8639_v8 = vor.u32 %v10904_v61, %v8638_v60  ;;  %v8895_v12 = vor.u32 %v10968_v1, %v8894_v62 }
  0x4e   : > { %v10847_v19 = vld [vmem:[#allocation4 + $0x41c] sm:$0xf0]  ;;  %v8408_v34 = vld [vmem:[#allocation4 + $0x420] sm:$0xf0]  ;;  %1401 = vmatpush.bf16.msra.mxu1 %v8695_v28  ;;  %1499 = vmatpush.bf16.msra.mxu3 %v8699_v40  ;;  %v10956_v5 = vld [vmem:[#allocation4 + $0x78c] sm:$0xf]  ;;  %v8611_v14 = vor.u32 %v10892_v2, %v8608_v3 }
  0x4f   : > { %v8662_v20 = vld [vmem:[#allocation4 + $0x600] sm:$0xf]  ;;  %v10907_v35 = vld [vmem:[#allocation4 + $0x604] sm:$0xf]  ;;  %v555_v36 = vshrl.u32 %v407_v25, 16  ;;  %v557_v37 = vshll.u32 %v407_v25, 16  ;;  %v8407_v49 = vor.u32 %v10847_v19, %v8406_v18  ;;  %v8411_v51 = vor.u32 %v10843_v22, %v8408_v34 }
  0x50   : > { %v10911_v21 = vld [vmem:[#allocation4 + $0x61c] sm:$0xf0]  ;;  %v8664_v41 = vld [vmem:[#allocation4 + $0x620] sm:$0xf0]  ;;  %v8864_v6 = vld [vmem:[#allocation4 + $0x7a8] sm:$0xf0] }
  0x51   : > { %v379_v24 = vld [vmem:[#allocation2 + $0x30] sm:$0xff]  ;;  %v559_v44 = vrot.slane %v557_v37, 1  ;;  %v8663_v50 = vor.u32 %v10911_v21, %v8662_v20  ;;  %v8667_v58 = vor.u32 %v10907_v35, %v8664_v41  ;;  %1353 = vmatpush.bf16.msra.mxu0 %v8407_v49  ;;  %1451 = vmatpush.bf16.msra.mxu2 %v8411_v51  ;;  %v382_v11 = vld [vmem:[#allocation2 + $0x48] sm:$0xff]  ;;  %v384_v13 = vld [vmem:[#allocation2 + $0x58] sm:$0xff]  ;;  %v8867_v17 = vor.u32 %v10956_v5, %v8864_v6 }
  0x52   : > { %v11712_v30 = vpack.c.bf16 %v379_v24, %v377_v23  ;;  %v383_v10 = vld [vmem:[#allocation2 + $0x50] sm:$0xff]  ;;  %v8606_v15 = vld [vmem:[#allocation4 + $0x588] sm:$0xf]  ;;  %v11740_v21 = vpack.c.bf16 %v384_v13, %v382_v11  ;;  %v10884_v23 = vld [vmem:[#allocation4 + $0x54c] sm:$0xf]  ;;  %v14450_v37 = vshrl.u32 %v11714_v39, 16 }
  0x53   : > { %v560_v55 = vor.u32 %v559_v44, %v555_v36  ;;  %1402 = vmatpush.bf16.msra.mxu1 %v8663_v50  ;;  %1500 = vmatpush.bf16.msra.mxu3 %v8667_v58  ;;  %v10896_v16 = vld [vmem:[#allocation4 + $0x5a4] sm:$0xf0]  ;;  %v11737_v20 = vpack.c.bf16 %v383_v10, %v381_v9  ;;  %v8576_v24 = vld [vmem:[#allocation4 + $0x568] sm:$0xf0]  ;;  %v385_v50 = vld [vmem:[#allocation2 + $0x60] sm:$0xff] }
  0x54   : > { %14545 = vst [vmem:[#allocation18_spill] sm:$0xff] %v11712_v30  ;;  %v14451_v42 = vshll.u32 %v11712_v30, 16  ;;  %v8862_v18 = vld [vmem:[#allocation4 + $0x788] sm:$0xf]  ;;  %v8607_v22 = vor.u32 %v10896_v16, %v8606_v15  ;;  %v8579_v26 = vor.u32 %v10884_v23, %v8576_v24  ;;  %v10948_v29 = vld [vmem:[#allocation4 + $0x74c] sm:$0xf]  ;;  %v588_v45 = vor.u32 %v14450_v37, %v11724_v57 }
  0x55   : > { %1640 = vmatpush.bf16.msrb.mxu2 %v8643_v59  ;;  %v10960_v19 = vld [vmem:[#allocation4 + $0x7a4] sm:$0xf0]  ;;  %14547 = vst [vmem:[#allocation20_spill] sm:$0xff] %v11737_v20  ;;  %1542 = vmatpush.bf16.msrb.mxu0 %v8639_v8  ;;  %v8832_v31 = vld [vmem:[#allocation4 + $0x768] sm:$0xf0]  ;;  %v14452_v32 = vshrl.u32 %v11712_v30, 16 }
  0x56   : > { %v11720_v52 = vrot.slane %v14451_v42, 1  ;;  %1403 = vmatmul.bf16.vlgmr.msra.gmra.mxu1 %v11732_v7  ;;  %1501 = vmatmul.bf16.vlgmr.msra.gmra.mxu3 %v11732_v7  ;;  %14548 = vst [vmem:[#allocation21_spill] sm:$0xff] %v11740_v21  ;;  %v8863_v25 = vor.u32 %v10960_v19, %v8862_v18  ;;  %v8574_v27 = vld [vmem:[#allocation4 + $0x548] sm:$0xf]  ;;  %v14447_v33 = vshll.u32 %v11737_v20, 16  ;;  %v8835_v34 = vor.u32 %v10948_v29, %v8832_v31  ;;  %v387_v51 = vld [vmem:[#allocation2 + $0x70] sm:$0xff] }
  0x57   : > { %1689 = vmatpush.bf16.msrb.mxu3 %v8899_v0  ;;  %1591 = vmatpush.bf16.msrb.mxu1 %v8895_v12  ;;  %v10888_v28 = vld [vmem:[#allocation4 + $0x564] sm:$0xf0]  ;;  %v14445_v38 = vshll.u32 %v11740_v21, 16  ;;  %v11765_v54 = vpack.c.bf16 %v387_v51, %v385_v50  ;;  %v10876_v56 = vld [vmem:[#allocation4 + $0x50c] sm:$0xf]  ;;  %v14448_v3 = vshrl.u32 %v11737_v20, 16 }
  0x58   : > { %v11728_v4 = vsel %vm553_vm0, %v560_v55, %v11720_v52  ;;  %v8830_v35 = vld [vmem:[#allocation4 + $0x748] sm:$0xf]  ;;  %v8575_v40 = vor.u32 %v10888_v28, %v8574_v27  ;;  %v580_v43 = vor.u32 %v14452_v32, %v11720_v52  ;;  %v584_v44 = vrot.slane %v14447_v33, 1  ;;  %v386_v52 = vld [vmem:[#allocation2 + $0x68] sm:$0xff]  ;;  %v8544_v57 = vld [vmem:[#allocation4 + $0x528] sm:$0xf0] }
  0x59   : > { %1354 = vmatmul.bf16.vlgmr.msra.gmra.mxu0 %v11728_v4  ;;  %1452 = vmatmul.bf16.vlgmr.msra.gmra.mxu2 %v11728_v4  ;;  %v10952_v36 = vld [vmem:[#allocation4 + $0x764] sm:$0xf0]  ;;  %v592_v46 = vrot.slane %v14445_v38, 1  ;;  %14549 = vst [vmem:[#allocation22_spill] sm:$0xff] %v11765_v54  ;;  %v8547_v59 = vor.u32 %v10876_v56, %v8544_v57  ;;  %v10940_v61 = vld [vmem:[#allocation4 + $0x70c] sm:$0xf] }
  0x5a   : > { %1641 = vmatpush.bf16.msrb.mxu2 %v8611_v14  ;;  %1543 = vmatpush.bf16.msrb.mxu0 %v8607_v22  ;;  %v8831_v41 = vor.u32 %v10952_v36, %v8830_v35  ;;  %v11757_v48 = vsel %vm553_vm0, %v580_v43, %v584_v44  ;;  %v388_v53 = vld [vmem:[#allocation2 + $0x78] sm:$0xff]  ;;  %v14443_v5 = vshll.u32 %v11765_v54, 16  ;;  %v14446_v8 = vshrl.u32 %v11740_v21, 16  ;;  %v389_v16 = vld [vmem:[#allocation2 + $0x80] sm:$0xff]  ;;  %v390_v18 = vld [vmem:[#allocation2 + $0x88] sm:$0xff] }
  0x5b   : > { %1690 = vmatpush.bf16.msrb.mxu3 %v8867_v17  ;;  %1592 = vmatpush.bf16.msrb.mxu1 %v8863_v25  ;;  %v11760_v49 = vsel %vm553_vm0, %v588_v45, %v592_v46  ;;  %v11768_v55 = vpack.c.bf16 %v388_v53, %v386_v52  ;;  %v8542_v58 = vld [vmem:[#allocation4 + $0x508] sm:$0xf]  ;;  %v8800_v62 = vld [vmem:[#allocation4 + $0x728] sm:$0xf0]  ;;  %v596_v10 = vor.u32 %v14448_v3, %v584_v44  ;;  %v391_v17 = vld [vmem:[#allocation2 + $0x90] sm:$0xff] }
  0x5c   : > { %v10880_v60 = vld [vmem:[#allocation4 + $0x524] sm:$0xf0]  ;;  %v8803_v0 = vor.u32 %v10940_v61, %v8800_v62  ;;  %v600_v11 = vrot.slane %v14443_v5, 1  ;;  %v604_v12 = vor.u32 %v14446_v8, %v592_v46  ;;  %v11791_v22 = vpack.c.bf16 %v391_v17, %v389_v16  ;;  %v10868_v24 = vld [vmem:[#allocation4 + $0x4cc] sm:$0xf] }
  0x5d   : > { %14550 = vst [vmem:[#allocation23_spill] sm:$0xff] %v11768_v55  ;;  %v8543_v63 = vor.u32 %v10880_v60, %v8542_v58  ;;  %v8798_v1 = vld [vmem:[#allocation4 + $0x708] sm:$0xf]  ;;  %v14441_v9 = vshll.u32 %v11768_v55, 16  ;;  %v8512_v25 = vld [vmem:[#allocation4 + $0x4e8] sm:$0xf0] }
  0x5e   : > { %1642 = vmatpush.bf16.msrb.mxu2 %v8579_v26  ;;  %1544 = vmatpush.bf16.msrb.mxu0 %v8575_v40  ;;  %v10944_v2 = vld [vmem:[#allocation4 + $0x724] sm:$0xf0]  ;;  %v11783_v14 = vsel %vm553_vm0, %v596_v10, %v600_v11  ;;  %14551 = vst [vmem:[#allocation24_spill] sm:$0xff] %v11791_v22  ;;  %v8515_v27 = vor.u32 %v10868_v24, %v8512_v25  ;;  %v10932_v29 = vld [vmem:[#allocation4 + $0x6cc] sm:$0xf]  ;;  %v14439_v43 = vshll.u32 %v11791_v22, 16 }
  0x5f   : > { %1691 = vmatpush.bf16.msrb.mxu3 %v8835_v34  ;;  %1593 = vmatpush.bf16.msrb.mxu1 %v8831_v41  ;;  %v8799_v6 = vor.u32 %v10944_v2, %v8798_v1  ;;  %v608_v13 = vrot.slane %v14441_v9, 1  ;;  %v392_v19 = vld [vmem:[#allocation2 + $0x98] sm:$0xff]  ;;  %v14444_v41 = vshrl.u32 %v11765_v54, 16  ;;  %v14442_v45 = vshrl.u32 %v11768_v55, 16  ;;  %v393_v58 = vld [vmem:[#allocation2 + $0xa0] sm:$0xff]  ;;  %v394_v60 = vld [vmem:[#allocation2 + $0xa8] sm:$0xff] }
  0x60   : > { %v11794_v23 = vpack.c.bf16 %v392_v19, %v390_v18  ;;  %v8510_v26 = vld [vmem:[#allocation4 + $0x4c8] sm:$0xf]  ;;  %v8768_v31 = vld [vmem:[#allocation4 + $0x6e8] sm:$0xf0]  ;;  %v616_v51 = vrot.slane %v14439_v43, 1  ;;  %v14440_v19 = vshrl.u32 %v11791_v22, 16 }
  0x61   : > { %v11786_v15 = vsel %vm553_vm0, %v604_v12, %v608_v13  ;;  %v10872_v28 = vld [vmem:[#allocation4 + $0x4e4] sm:$0xf0]  ;;  %v8771_v35 = vor.u32 %v10932_v29, %v8768_v31  ;;  %v612_v50 = vor.u32 %v14444_v41, %v600_v11  ;;  %v620_v52 = vor.u32 %v14442_v45, %v608_v13  ;;  %v8480_v1 = vld [vmem:[#allocation4 + $0x4a8] sm:$0xf0] }
  0x62   : > { %1643 = vmatpush.bf16.msrb.mxu2 %v8547_v59  ;;  %1545 = vmatpush.bf16.msrb.mxu0 %v8543_v63  ;;  %14552 = vst [vmem:[#allocation25_spill] sm:$0xff] %v11794_v23  ;;  %v8511_v34 = vor.u32 %v10872_v28, %v8510_v26  ;;  %v8766_v36 = vld [vmem:[#allocation4 + $0x6c8] sm:$0xf]  ;;  %v14437_v46 = vshll.u32 %v11794_v23, 16  ;;  %v395_v59 = vld [vmem:[#allocation2 + $0xb0] sm:$0xff]  ;;  %v14438_v26 = vshrl.u32 %v11794_v23, 16  ;;  %v628_v28 = vor.u32 %v14440_v19, %v616_v51 }
  0x63   : > { %1692 = vmatpush.bf16.msrb.mxu3 %v8803_v0  ;;  %1594 = vmatpush.bf16.msrb.mxu1 %v8799_v6  ;;  %v10936_v40 = vld [vmem:[#allocation4 + $0x6e4] sm:$0xf0]  ;;  %v11809_v56 = vsel %vm553_vm0, %v612_v50, %v616_v51  ;;  %v11817_v62 = vpack.c.bf16 %v395_v59, %v393_v58  ;;  %v10860_v0 = vld [vmem:[#allocation4 + $0x48c] sm:$0xf]  ;;  %v398_v50 = vld [vmem:[#allocation2 + $0xc8] sm:$0xff] }
  0x64   : > { %v8767_v44 = vor.u32 %v10936_v40, %v8766_v36  ;;  %v624_v53 = vrot.slane %v14437_v46, 1  ;;  %v396_v61 = vld [vmem:[#allocation2 + $0xb8] sm:$0xff]  ;;  %v8483_v6 = vor.u32 %v10860_v0, %v8480_v1  ;;  %v397_v40 = vld [vmem:[#allocation2 + $0xc0] sm:$0xff] }
  0x65   : > { %14553 = vst [vmem:[#allocation26_spill] sm:$0xff] %v11817_v62  ;;  %v11820_v63 = vpack.c.bf16 %v396_v61, %v394_v60  ;;  %v8478_v2 = vld [vmem:[#allocation4 + $0x488] sm:$0xf]  ;;  %v10924_v11 = vld [vmem:[#allocation4 + $0x68c] sm:$0xf]  ;;  %v14433_v24 = vshll.u32 %v11817_v62, 16 }
  0x66   : > { %1408 = vmatmul.bf16.gmra.mxu1 %v11760_v49  ;;  %1506 = vmatmul.bf16.gmra.mxu3 %v11760_v49  ;;  %v11812_v57 = vsel %vm553_vm0, %v620_v52, %v624_v53  ;;  %v10864_v10 = vld [vmem:[#allocation4 + $0x4a4] sm:$0xf0]  ;;  %v8736_v12 = vld [vmem:[#allocation4 + $0x6a8] sm:$0xf0]  ;;  %v636_v31 = vor.u32 %v14438_v26, %v624_v53 }
  0x67   : > { %1644 = vmatpush.bf16.msrb.mxu2 %v8515_v27  ;;  %1546 = vmatpush.bf16.msrb.mxu0 %v8511_v34  ;;  %14554 = vst [vmem:[#allocation27_spill] sm:$0xff] %v11820_v63  ;;  %v8479_v13 = vor.u32 %v10864_v10, %v8478_v2  ;;  %v8739_v16 = vor.u32 %v10924_v11, %v8736_v12  ;;  %v8734_v17 = vld [vmem:[#allocation4 + $0x688] sm:$0xf]  ;;  %v14431_v27 = vshll.u32 %v11820_v63, 16  ;;  %v632_v29 = vrot.slane %v14433_v24, 1 }
  0x68   : > { %1693 = vmatpush.bf16.msrb.mxu3 %v8771_v35  ;;  %1595 = vmatpush.bf16.msrb.mxu1 %v8767_v44  ;;  %v10928_v18 = vld [vmem:[#allocation4 + $0x6a4] sm:$0xf0]  ;;  %v399_v44 = vld [vmem:[#allocation2 + $0xd0] sm:$0xff]  ;;  %v10852_v58 = vld [vmem:[#allocation4 + $0x44c] sm:$0xf] }
  0x69   : > { %1359 = vmatmul.bf16.gmra.mxu0 %v11757_v48  ;;  %1457 = vmatmul.bf16.gmra.mxu2 %v11757_v48  ;;  %v8735_v25 = vor.u32 %v10928_v18, %v8734_v17  ;;  %v640_v34 = vrot.slane %v14431_v27, 1  ;;  %v11835_v35 = vsel %vm553_vm0, %v628_v28, %v632_v29  ;;  %v400_v52 = vld [vmem:[#allocation2 + $0xd8] sm:$0xff]  ;;  %v11843_v51 = vpack.c.bf16 %v399_v44, %v397_v40 }
  0x6a   : > { %v11846_v53 = vpack.c.bf16 %v400_v52, %v398_v50  ;;  %v8448_v59 = vld [vmem:[#allocation4 + $0x468] sm:$0xf0]  ;;  %v8446_v60 = vld [vmem:[#allocation4 + $0x448] sm:$0xf]  ;;  %v14432_v18 = vshrl.u32 %v11820_v63, 16 }
  0x6b   : > { %1645 = vmatpush.bf16.msrb.mxu2 %v8483_v6  ;;  %1547 = vmatpush.bf16.msrb.mxu0 %v8479_v13  ;;  %v11838_v36 = vsel %vm553_vm0, %v636_v31, %v640_v34  ;;  %14555 = vst [vmem:[#allocation28_spill] sm:$0xff] %v11843_v51  ;;  %v8451_v61 = vor.u32 %v10852_v58, %v8448_v59  ;;  %v10856_v0 = vld [vmem:[#allocation4 + $0x464] sm:$0xf0]  ;;  %v10916_v1 = vld [vmem:[#allocation4 + $0x64c] sm:$0xf]  ;;  %v14434_v13 = vshrl.u32 %v11817_v62, 16 }
  0x6c   : > { %1694 = vmatpush.bf16.msrb.mxu3 %v8739_v16  ;;  %1596 = vmatpush.bf16.msrb.mxu1 %v8735_v25  ;;  %14556 = vst [vmem:[#allocation29_spill] sm:$0xff] %v11846_v53  ;;  %v8704_v2 = vld [vmem:[#allocation4 + $0x668] sm:$0xf0]  ;;  %v8447_v6 = vor.u32 %v10856_v0, %v8446_v60  ;;  %v8702_v11 = vld [vmem:[#allocation4 + $0x648] sm:$0xf]  ;;  %v14426_v16 = vshll.u32 %v11843_v51, 16  ;;  %v652_v40 = vor.u32 %v14432_v18, %v640_v34 }
  0x6d   : > { %v8707_v10 = vor.u32 %v10916_v1, %v8704_v2  ;;  %v10920_v12 = vld [vmem:[#allocation4 + $0x664] sm:$0xf0]  ;;  %v14425_v25 = vshll.u32 %v11846_v53, 16  ;;  %v644_v28 = vor.u32 %v14434_v13, %v632_v29  ;;  %v401_v58 = vld [vmem:[#allocation2 + $0xe0] sm:$0xff]  ;;  %v403_v59 = vld [vmem:[#allocation2 + $0xf0] sm:$0xff] }
  0x6e   : > { %v8703_v17 = vor.u32 %v10920_v12, %v8702_v11  ;;  %v648_v31 = vrot.slane %v14426_v16, 1  ;;  %v402_v60 = vld [vmem:[#allocation2 + $0xe8] sm:$0xff]  ;;  %v11869_v29 = vpack.c.bf16 %v403_v59, %v401_v58  ;;  %v10844_v0 = vld [vmem:[#allocation4 + $0x40c] sm:$0xf]  ;;  %v8414_v2 = vld [vmem:[#allocation4 + $0x408] sm:$0xf] }
  0x6f   : > { %1646 = vmatpush.bf16.msrb.mxu2 %v8451_v61  ;;  %1548 = vmatpush.bf16.msrb.mxu0 %v8447_v6  ;;  %v656_v44 = vrot.slane %v14425_v25, 1  ;;  %v404_v61 = vld [vmem:[#allocation2 + $0xf8] sm:$0xff]  ;;  %v14430_v16 = vshrl.u32 %v11843_v51, 16 }
  0x70   : > { %1695 = vmatpush.bf16.msrb.mxu3 %v8707_v10  ;;  %1597 = vmatpush.bf16.msrb.mxu1 %v8703_v17  ;;  %v11861_v50 = vsel %vm553_vm0, %v644_v28, %v648_v31  ;;  %14557 = vst [vmem:[#allocation30_spill] sm:$0xff] %v11869_v29  ;;  %v11872_v34 = vpack.c.bf16 %v404_v61, %v402_v60  ;;  %v8416_v1 = vld [vmem:[#allocation4 + $0x428] sm:$0xf0]  ;;  %v10848_v10 = vld [vmem:[#allocation4 + $0x424] sm:$0xf0]  ;;  %v14428_v58 = vshll.u32 %v11869_v29, 16 }
  0x71   : > { %v11864_v52 = vsel %vm553_vm0, %v652_v40, %v656_v44  ;;  %v8419_v6 = vor.u32 %v10844_v0, %v8416_v1  ;;  %v10908_v11 = vld [vmem:[#allocation4 + $0x60c] sm:$0xf]  ;;  %v8415_v17 = vor.u32 %v10848_v10, %v8414_v2  ;;  %v8670_v40 = vld [vmem:[#allocation4 + $0x608] sm:$0xf]  ;;  %v14429_v60 = vshrl.u32 %v11846_v53, 16 }
  0x72   : > { %14558 = vst [vmem:[#allocation31_spill] sm:$0xff] %v11872_v34  ;;  %v8672_v12 = vld [vmem:[#allocation4 + $0x628] sm:$0xf0]  ;;  %v10912_v25 = vld [vmem:[#allocation4 + $0x624] sm:$0xf0]  ;;  %v14427_v61 = vshll.u32 %v11872_v34, 16  ;;  %v660_v0 = vor.u32 %v14430_v16, %v648_v31 }
  0x73   : > { %v8675_v28 = vor.u32 %v10908_v11, %v8672_v12  ;;  %1647 = vmatpush.bf16.msrb.mxu2 %v8419_v6  ;;  %v8671_v59 = vor.u32 %v10912_v25, %v8670_v40  ;;  %1549 = vmatpush.bf16.msrb.mxu0 %v8415_v17  ;;  %v664_v1 = vrot.slane %v14428_v58, 1  ;;  %v668_v2 = vor.u32 %v14429_v60, %v656_v44  ;;  %v405_v11 = vld [vmem:[#allocation2 + $0x100] sm:$0x1]  ;;  %v406_v12 = vld [vmem:[#allocation2 + $0x108] sm:$0x1] }
  0x74   : > { %v672_v6 = vrot.slane %v14427_v61, 1  ;;  %v423_v31 = vpack.c.bf16 %v405_v11, %v405_v11  ;;  %v424_v44 = vpack.c.bf16 %v406_v12, %v406_v12  ;;  %v10901_v17 = vld [vmem:[#allocation4 + $0x5d4] sm:$0xf]  ;;  %v8646_v40 = vld [vmem:[#allocation4 + $0x5d0] sm:$0xf]  ;;  %v14436_v16 = vshrl.u32 %v11869_v29, 16 }
  0x75   : > { %1696 = vmatpush.bf16.msrb.mxu3 %v8675_v28  ;;  %1598 = vmatpush.bf16.msrb.mxu1 %v8671_v59  ;;  %v11887_v25 = vsel %vm553_vm0, %v660_v0, %v664_v1  ;;  %v8648_v28 = vld [vmem:[#allocation4 + $0x5f0] sm:$0xf0]  ;;  %v10905_v0 = vld [vmem:[#allocation4 + $0x5ec] sm:$0xf0]  ;;  %v14435_v18 = vshrl.u32 %v11872_v34, 16 }
  0x76   : > { %1413 = vmatmul.bf16.gmra.mxu1 %v11786_v15  ;;  %1511 = vmatmul.bf16.gmra.mxu3 %v11786_v15  ;;  %v11890_v10 = vsel %vm553_vm0, %v668_v2, %v672_v6  ;;  %v8651_v59 = vor.u32 %v10901_v17, %v8648_v28  ;;  %v10965_v61 = vld [vmem:[#allocation4 + $0x7d4] sm:$0xf]  ;;  %v8647_v58 = vor.u32 %v10905_v0, %v8646_v40  ;;  %v678_v27 = vshll.u32 %v423_v31, 16  ;;  %v8902_v11 = vld [vmem:[#allocation4 + $0x7d0] sm:$0xf] }
  0x77   : > { %v8904_v2 = vld [vmem:[#allocation4 + $0x7f0] sm:$0xf0]  ;;  %v686_v24 = vshll.u32 %v424_v44, 16  ;;  %v10969_v12 = vld [vmem:[#allocation4 + $0x7ec] sm:$0xf0]  ;;  %v676_v17 = vor.u32 %v14436_v16, %v664_v1 }
  0x78   : > { %v8907_v60 = vor.u32 %v10965_v61, %v8904_v2  ;;  %1836 = vmatpush.bf16.msra.mxu2 %v8651_v59  ;;  %1738 = vmatpush.bf16.msra.mxu0 %v8647_v58  ;;  %v8903_v13 = vor.u32 %v10969_v12, %v8902_v11  ;;  %v680_v28 = vrot.slane %v678_v27, 1  ;;  %v684_v61 = vor.u32 %v14435_v18, %v672_v6  ;;  %v10893_v27 = vld [vmem:[#allocation4 + $0x594] sm:$0xf]  ;;  %v8614_v58 = vld [vmem:[#allocation4 + $0x590] sm:$0xf] }
  0x79   : > { %1364 = vmatmul.bf16.gmra.mxu0 %v11783_v14  ;;  %1462 = vmatmul.bf16.gmra.mxu2 %v11783_v14  ;;  %v688_v40 = vrot.slane %v686_v24, 1  ;;  %v10897_v1 = vld [vmem:[#allocation4 + $0x5ac] sm:$0xf0]  ;;  %v10957_v24 = vld [vmem:[#allocation4 + $0x794] sm:$0xf] }
  0x7a   : > { %1885 = vmatpush.bf16.msra.mxu3 %v8907_v60  ;;  %1787 = vmatpush.bf16.msra.mxu1 %v8903_v13  ;;  %v11903_v31 = vsel %vm553_vm0, %v676_v17, %v680_v28  ;;  %v8616_v13 = vld [vmem:[#allocation4 + $0x5b0] sm:$0xf0]  ;;  %v8615_v44 = vor.u32 %v10897_v1, %v8614_v58  ;;  %v8870_v2 = vld [vmem:[#allocation4 + $0x790] sm:$0xf] }
  0x7b   : > { %v11906_v59 = vsel %vm553_vm0, %v684_v61, %v688_v40  ;;  %v8619_v60 = vor.u32 %v10893_v27, %v8616_v13  ;;  %v8872_v6 = vld [vmem:[#allocation4 + $0x7b0] sm:$0xf0]  ;;  %v10961_v11 = vld [vmem:[#allocation4 + $0x7ac] sm:$0xf0] }
  0x7c   : > { %v8875_v0 = vor.u32 %v10957_v24, %v8872_v6  ;;  %1739 = vmatpush.bf16.msra.mxu0 %v8615_v44  ;;  %v8871_v12 = vor.u32 %v10961_v11, %v8870_v2  ;;  %v10885_v40 = vld [vmem:[#allocation4 + $0x554] sm:$0xf]  ;;  %v8582_v13 = vld [vmem:[#allocation4 + $0x550] sm:$0xf] }
  0x7d   : > { %1837 = vmatpush.bf16.msra.mxu2 %v8619_v60  ;;  %v8584_v27 = vld [vmem:[#allocation4 + $0x570] sm:$0xf0]  ;;  %v10889_v60 = vld [vmem:[#allocation4 + $0x56c] sm:$0xf0] }
  0x7e   : > { %1886 = vmatpush.bf16.msra.mxu3 %v8875_v0  ;;  %1788 = vmatpush.bf16.msra.mxu1 %v8871_v12  ;;  %v8587_v58 = vor.u32 %v10885_v40, %v8584_v27  ;;  %v10949_v1 = vld [vmem:[#allocation4 + $0x754] sm:$0xf]  ;;  %v8583_v44 = vor.u32 %v10889_v60, %v8582_v13  ;;  %v10953_v18 = vld [vmem:[#allocation4 + $0x76c] sm:$0xf0] }
  0x7f   : > { %v8840_v24 = vld [vmem:[#allocation4 + $0x770] sm:$0xf0] }
  0x80   : > { %v8843_v0 = vor.u32 %v10949_v1, %v8840_v24  ;;  %1740 = vmatpush.bf16.msra.mxu0 %v8583_v44  ;;  %v8552_v1 = vld [vmem:[#allocation4 + $0x530] sm:$0xf0]  ;;  %v10881_v24 = vld [vmem:[#allocation4 + $0x52c] sm:$0xf0] }
  0x81   : > { %1838 = vmatpush.bf16.msra.mxu2 %v8587_v58  ;;  %v10877_v58 = vld [vmem:[#allocation4 + $0x514] sm:$0xf] }
  0x82   : > { %1887 = vmatpush.bf16.msra.mxu3 %v8843_v0  ;;  %v8808_v44 = vld [vmem:[#allocation4 + $0x730] sm:$0xf0] }
  0x86   : > { %1418 = vmatmul.bf16.gmra.mxu1 %v11812_v57  ;;  %1516 = vmatmul.bf16.gmra.mxu3 %v11812_v57 }
  0x89   : > { %1369 = vmatmul.bf16.gmra.mxu0 %v11809_v56  ;;  %1467 = vmatmul.bf16.gmra.mxu2 %v11809_v56 }
  0x96   : > { %1423 = vmatmul.bf16.gmra.mxu1 %v11838_v36  ;;  %1521 = vmatmul.bf16.gmra.mxu3 %v11838_v36 }
  0x99   : > { %1374 = vmatmul.bf16.gmra.mxu0 %v11835_v35  ;;  %1472 = vmatmul.bf16.gmra.mxu2 %v11835_v35 }
  0xa6   : > { %1428 = vmatmul.bf16.gmra.mxu1 %v11864_v52  ;;  %1526 = vmatmul.bf16.gmra.mxu3 %v11864_v52 }
  0xa9   : > { %1379 = vmatmul.bf16.gmra.mxu0 %v11861_v50  ;;  %1477 = vmatmul.bf16.gmra.mxu2 %v11861_v50 }
  0xb6   : > { %1433 = vmatmul.bf16.gmra.mxu1 %v11890_v10  ;;  %1531 = vmatmul.bf16.gmra.mxu3 %v11890_v10 }
  0xb9   : > { %1384 = vmatmul.bf16.gmra.mxu0 %v11887_v25  ;;  %1482 = vmatmul.bf16.gmra.mxu2 %v11887_v25 }
  0xc6   : > { %1438 = vmatmul.bf16.gmra.mxu1 %v11906_v59  ;;  %1536 = vmatmul.bf16.gmra.mxu3 %v11906_v59 }
  0xc9   : > { %1389 = vmatmul.bf16.gmra.mxu0 %v11903_v31  ;;  %1487 = vmatmul.bf16.gmra.mxu2 %v11903_v31 }
  0xd3   : > { %v1404_v28 = vpop.f32.mrf.mxu1 }
  0xd6   : > { %v1355_v17 = vpop.f32.mrf.mxu0  ;;  %1599 = vmatmul.bf16.vlgmr.msrb.gmra.mxu1 %v11732_v7  ;;  %1697 = vmatmul.bf16.vlgmr.msrb.gmra.mxu3 %v11732_v7 }
  0xd7   : > { %v11912_v61 = vadd.f32 %v1404_v28, %v1355_v17  ;;  %v8838_v28 = vld [vmem:[#allocation4 + $0x750] sm:$0xf] }
  0xd8   : > { %v8839_v46 = vor.u32 %v10953_v18, %v8838_v28  ;;  %v8550_v18 = vld [vmem:[#allocation4 + $0x510] sm:$0xf] }
  0xd9   : > { %1550 = vmatmul.bf16.vlgmr.msrb.gmra.mxu0 %v11728_v4  ;;  %1648 = vmatmul.bf16.vlgmr.msrb.gmra.mxu2 %v11728_v4  ;;  %v1502_v2 = vpop.f32.mrf.mxu3 }
  0xda   : > { %1789 = vmatpush.bf16.msra.mxu1 %v8839_v46  ;;  %v8555_v46 = vor.u32 %v10877_v58, %v8552_v1 }
  0xdb   : > { %v1406_v17 = vpop.f32.mrf.mxu1 }
  0xdc   : > { %v1453_v6 = vpop.f32.mrf.mxu2  ;;  %1839 = vmatpush.bf16.msra.mxu2 %v8555_v46  ;;  %v10869_v46 = vld [vmem:[#allocation4 + $0x4d4] sm:$0xf] }
  0xdd   : > { %v11918_v12 = vadd.f32 %v1502_v2, %v1453_v6  ;;  %v10941_v6 = vld [vmem:[#allocation4 + $0x714] sm:$0xf]  ;;  %v8551_v2 = vor.u32 %v10881_v24, %v8550_v18 }
  0xde   : > { %v1357_v11 = vpop.f32.mrf.mxu0 }
  0xdf   : > { %v11920_v16 = vadd.f32 %v1406_v17, %v1357_v11  ;;  %v8811_v11 = vor.u32 %v10941_v6, %v8808_v44  ;;  %1741 = vmatpush.bf16.msra.mxu0 %v8551_v2  ;;  %v8520_v6 = vld [vmem:[#allocation4 + $0x4f0] sm:$0xf0]  ;;  %v8518_v44 = vld [vmem:[#allocation4 + $0x4d0] sm:$0xf] }
  0xe0   : > { %v10933_v2 = vld [vmem:[#allocation4 + $0x6d4] sm:$0xf] }
  0xe1   : > { %v1504_v27 = vpop.f32.mrf.mxu3  ;;  %1888 = vmatpush.bf16.msra.mxu3 %v8811_v11  ;;  %v8776_v11 = vld [vmem:[#allocation4 + $0x6f0] sm:$0xf0] }
  0xe3   : > { %v1409_v13 = vpop.f32.mrf.mxu1 }
  0xe4   : > { %v1455_v40 = vpop.f32.mrf.mxu2 }
  0xe5   : > { %v11922_v43 = vadd.f32 %v1504_v27, %v1455_v40  ;;  %v8806_v27 = vld [vmem:[#allocation4 + $0x710] sm:$0xf] }
  0xe6   : > { %v1360_v26 = vpop.f32.mrf.mxu0  ;;  %1604 = vmatmul.bf16.gmra.mxu1 %v11760_v49  ;;  %1702 = vmatmul.bf16.gmra.mxu3 %v11760_v49 }
  0xe7   : > { %v11924_v60 = vadd.f32 %v1409_v13, %v1360_v26  ;;  %v10945_v13 = vld [vmem:[#allocation4 + $0x72c] sm:$0xf0] }
  0xe8   : > { %v8807_v9 = vor.u32 %v10945_v13, %v8806_v27 }
  0xe9   : > { %1555 = vmatmul.bf16.gmra.mxu0 %v11757_v48  ;;  %1653 = vmatmul.bf16.gmra.mxu2 %v11757_v48  ;;  %v1507_v26 = vpop.f32.mrf.mxu3 }
  0xea   : > { %1790 = vmatpush.bf16.msra.mxu1 %v8807_v9  ;;  %v8523_v9 = vor.u32 %v10869_v46, %v8520_v6 }
  0xeb   : > { %v1411_v40 = vpop.f32.mrf.mxu1 }
  0xec   : > { %v1458_v0 = vpop.f32.mrf.mxu2  ;;  %1840 = vmatpush.bf16.msra.mxu2 %v8523_v9  ;;  %v10861_v9 = vld [vmem:[#allocation4 + $0x494] sm:$0xf] }
  0xed   : > { %v11930_v28 = vadd.f32 %v1507_v26, %v1458_v0  ;;  %v10873_v0 = vld [vmem:[#allocation4 + $0x4ec] sm:$0xf0] }
  0xee   : > { %v1362_v17 = vpop.f32.mrf.mxu0 }
  0xef   : > { %v11932_v19 = vadd.f32 %v1411_v40, %v1362_v17  ;;  %v8519_v17 = vor.u32 %v10873_v0, %v8518_v44  ;;  %v8779_v40 = vor.u32 %v10933_v2, %v8776_v11  ;;  %v8488_v2 = vld [vmem:[#allocation4 + $0x4b0] sm:$0xf0]  ;;  %v8486_v11 = vld [vmem:[#allocation4 + $0x490] sm:$0xf] }
  0xf1   : > { %v1509_v1 = vpop.f32.mrf.mxu3  ;;  %1742 = vmatpush.bf16.msra.mxu0 %v8519_v17  ;;  %1889 = vmatpush.bf16.msra.mxu3 %v8779_v40  ;;  %v10925_v17 = vld [vmem:[#allocation4 + $0x694] sm:$0xf] }
  0xf2   : > { %v8744_v40 = vld [vmem:[#allocation4 + $0x6b0] sm:$0xf0] }
  0xf3   : > { %v1414_v18 = vpop.f32.mrf.mxu1 }
  0xf4   : > { %v1460_v58 = vpop.f32.mrf.mxu2 }
  0xf5   : > { %v11934_v5 = vadd.f32 %v1509_v1, %v1460_v58  ;;  %v8774_v1 = vld [vmem:[#allocation4 + $0x6d0] sm:$0xf] }
  0xf6   : > { %v1365_v45 = vpop.f32.mrf.mxu0  ;;  %1609 = vmatmul.bf16.gmra.mxu1 %v11786_v15  ;;  %1707 = vmatmul.bf16.gmra.mxu3 %v11786_v15 }
  0xf7   : > { %v11936_v24 = vadd.f32 %v1414_v18, %v1365_v45  ;;  %v10937_v18 = vld [vmem:[#allocation4 + $0x6ec] sm:$0xf0] }
  0xf8   : > { %v8775_v38 = vor.u32 %v10937_v18, %v8774_v1 }
  0xf9   : > { %1560 = vmatmul.bf16.gmra.mxu0 %v11783_v14  ;;  %1658 = vmatmul.bf16.gmra.mxu2 %v11783_v14  ;;  %v1512_v45 = vpop.f32.mrf.mxu3 }
  0xfa   : > { %1791 = vmatpush.bf16.msra.mxu1 %v8775_v38  ;;  %v8491_v38 = vor.u32 %v10861_v9, %v8488_v2 }
  0xfb   : > { %v1416_v58 = vpop.f32.mrf.mxu1 }
  0xfc   : > { %v1463_v26 = vpop.f32.mrf.mxu2  ;;  %1841 = vmatpush.bf16.msra.mxu2 %v8491_v38  ;;  %v10853_v38 = vld [vmem:[#allocation4 + $0x454] sm:$0xf] }
  0xfd   : > { %v11942_v13 = vadd.f32 %v1512_v45, %v1463_v26  ;;  %v10865_v26 = vld [vmem:[#allocation4 + $0x4ac] sm:$0xf0] }
  0xfe   : > { %v1367_v27 = vpop.f32.mrf.mxu0 }
  0xff   : > { %v11944_v41 = vadd.f32 %v1416_v58, %v1367_v27  ;;  %v8487_v27 = vor.u32 %v10865_v26, %v8486_v11  ;;  %v8747_v58 = vor.u32 %v10925_v17, %v8744_v40  ;;  %v8456_v17 = vld [vmem:[#allocation4 + $0x470] sm:$0xf0]  ;;  %v8454_v40 = vld [vmem:[#allocation4 + $0x450] sm:$0xf] }
 0x101   : > { %v1514_v6 = vpop.f32.mrf.mxu3  ;;  %1743 = vmatpush.bf16.msra.mxu0 %v8487_v27  ;;  %1890 = vmatpush.bf16.msra.mxu3 %v8747_v58  ;;  %v10917_v27 = vld [vmem:[#allocation4 + $0x654] sm:$0xf] }
 0x102   : > { %v8712_v58 = vld [vmem:[#allocation4 + $0x670] sm:$0xf0] }
 0x103   : > { %v1419_v44 = vpop.f32.mrf.mxu1 }
 0x104   : > { %v1465_v46 = vpop.f32.mrf.mxu2 }
 0x105   : > { %v11946_v33 = vadd.f32 %v1514_v6, %v1465_v46  ;;  %v8742_v6 = vld [vmem:[#allocation4 + $0x690] sm:$0xf] }
 0x106   : > { %v1370_v8 = vpop.f32.mrf.mxu0  ;;  %1614 = vmatmul.bf16.gmra.mxu1 %v11812_v57  ;;  %1712 = vmatmul.bf16.gmra.mxu3 %v11812_v57 }
 0x107   : > { %v11948_v0 = vadd.f32 %v1419_v44, %v1370_v8  ;;  %v10929_v44 = vld [vmem:[#allocation4 + $0x6ac] sm:$0xf0] }
 0x108   : > { %v8743_v47 = vor.u32 %v10929_v44, %v8742_v6 }
 0x109   : > { %1565 = vmatmul.bf16.gmra.mxu0 %v11809_v56  ;;  %1663 = vmatmul.bf16.gmra.mxu2 %v11809_v56  ;;  %v1517_v8 = vpop.f32.mrf.mxu3 }
 0x10a   : > { %1792 = vmatpush.bf16.msra.mxu1 %v8743_v47  ;;  %v8459_v47 = vor.u32 %v10853_v38, %v8456_v17 }
 0x10b   : > { %v1421_v46 = vpop.f32.mrf.mxu1 }
 0x10c   : > { %v1468_v45 = vpop.f32.mrf.mxu2  ;;  %1842 = vmatpush.bf16.msra.mxu2 %v8459_v47  ;;  %v10845_v47 = vld [vmem:[#allocation4 + $0x414] sm:$0xf] }
 0x10d   : > { %v11954_v18 = vadd.f32 %v1517_v8, %v1468_v45  ;;  %v10857_v45 = vld [vmem:[#allocation4 + $0x46c] sm:$0xf0] }
 0x10e   : > { %v1372_v1 = vpop.f32.mrf.mxu0 }
 0x10f   : > { %v11956_v3 = vadd.f32 %v1421_v46, %v1372_v1  ;;  %v8455_v1 = vor.u32 %v10857_v45, %v8454_v40  ;;  %v8715_v46 = vor.u32 %v10917_v27, %v8712_v58  ;;  %v8424_v27 = vld [vmem:[#allocation4 + $0x430] sm:$0xf0]  ;;  %v8422_v58 = vld [vmem:[#allocation4 + $0x410] sm:$0xf] }
 0x111   : > { %v1519_v2 = vpop.f32.mrf.mxu3  ;;  %1744 = vmatpush.bf16.msra.mxu0 %v8455_v1  ;;  %1891 = vmatpush.bf16.msra.mxu3 %v8715_v46  ;;  %v10909_v1 = vld [vmem:[#allocation4 + $0x614] sm:$0xf] }
 0x112   : > { %v8680_v46 = vld [vmem:[#allocation4 + $0x630] sm:$0xf0] }
 0x113   : > { %v1424_v11 = vpop.f32.mrf.mxu1 }
 0x114   : > { %v1470_v9 = vpop.f32.mrf.mxu2 }
 0x115   : > { %v11958_v42 = vadd.f32 %v1519_v2, %v1470_v9  ;;  %v8710_v2 = vld [vmem:[#allocation4 + $0x650] sm:$0xf] }
 0x116   : > { %v1375_v37 = vpop.f32.mrf.mxu0  ;;  %1619 = vmatmul.bf16.gmra.mxu1 %v11838_v36  ;;  %1717 = vmatmul.bf16.gmra.mxu3 %v11838_v36 }
 0x117   : > { %v11960_v26 = vadd.f32 %v1424_v11, %v1375_v37  ;;  %v10921_v11 = vld [vmem:[#allocation4 + $0x66c] sm:$0xf0] }
 0x118   : > { %v8711_v34 = vor.u32 %v10921_v11, %v8710_v2 }
 0x119   : > { %1570 = vmatmul.bf16.gmra.mxu0 %v11835_v35  ;;  %1668 = vmatmul.bf16.gmra.mxu2 %v11835_v35  ;;  %v1522_v37 = vpop.f32.mrf.mxu3 }
 0x11a   : > { %1793 = vmatpush.bf16.msra.mxu1 %v8711_v34  ;;  %v8427_v34 = vor.u32 %v10845_v47, %v8424_v27 }
 0x11b   : > { %v1426_v9 = vpop.f32.mrf.mxu1 }
 0x11c   : > { %v1473_v8 = vpop.f32.mrf.mxu2  ;;  %1843 = vmatpush.bf16.msra.mxu2 %v8427_v34  ;;  %v10902_v34 = vld [vmem:[#allocation4 + $0x5dc] sm:$0xf] }
 0x11d   : > { %v11966_v44 = vadd.f32 %v1522_v37, %v1473_v8  ;;  %v10849_v8 = vld [vmem:[#allocation4 + $0x42c] sm:$0xf0] }
 0x11e   : > { %v1377_v6 = vpop.f32.mrf.mxu0 }
 0x11f   : > { %v11968_v32 = vadd.f32 %v1426_v9, %v1377_v6  ;;  %v8423_v6 = vor.u32 %v10849_v8, %v8422_v58  ;;  %v8683_v9 = vor.u32 %v10909_v1, %v8680_v46  ;;  %v8656_v1 = vld [vmem:[#allocation4 + $0x5f8] sm:$0xf0]  ;;  %v8654_v46 = vld [vmem:[#allocation4 + $0x5d8] sm:$0xf] }
 0x121   : > { %v1524_v17 = vpop.f32.mrf.mxu3  ;;  %1745 = vmatpush.bf16.msra.mxu0 %v8423_v6  ;;  %1892 = vmatpush.bf16.msra.mxu3 %v8683_v9  ;;  %v10966_v6 = vld [vmem:[#allocation4 + $0x7dc] sm:$0xf] }
 0x122   : > { %v8912_v9 = vld [vmem:[#allocation4 + $0x7f8] sm:$0xf0] }
 0x123   : > { %v1429_v40 = vpop.f32.mrf.mxu1 }
 0x124   : > { %v1475_v38 = vpop.f32.mrf.mxu2 }
 0x125   : > { %v11970_v53 = vadd.f32 %v1524_v17, %v1475_v38  ;;  %v8678_v17 = vld [vmem:[#allocation4 + $0x610] sm:$0xf] }
 0x126   : > { %v1380_v29 = vpop.f32.mrf.mxu0  ;;  %1624 = vmatmul.bf16.gmra.mxu1 %v11864_v52  ;;  %1722 = vmatmul.bf16.gmra.mxu3 %v11864_v52 }
 0x127   : > { %v11972_v45 = vadd.f32 %v1429_v40, %v1380_v29  ;;  %v10913_v40 = vld [vmem:[#allocation4 + $0x62c] sm:$0xf0] }
 0x128   : > { %v8679_v63 = vor.u32 %v10913_v40, %v8678_v17 }
 0x129   : > { %1575 = vmatmul.bf16.gmra.mxu0 %v11861_v50  ;;  %1673 = vmatmul.bf16.gmra.mxu2 %v11861_v50  ;;  %v1527_v29 = vpop.f32.mrf.mxu3 }
 0x12a   : > { %1794 = vmatpush.bf16.msra.mxu1 %v8679_v63  ;;  %v8659_v63 = vor.u32 %v10902_v34, %v8656_v1 }
 0x12b   : > { %v1431_v38 = vpop.f32.mrf.mxu1 }
 0x12c   : > { %v1478_v37 = vpop.f32.mrf.mxu2  ;;  %2032 = vmatpush.bf16.msrb.mxu2 %v8659_v63  ;;  %v10894_v63 = vld [vmem:[#allocation4 + $0x59c] sm:$0xf] }
 0x12d   : > { %v11978_v11 = vadd.f32 %v1527_v29, %v1478_v37  ;;  %v10906_v37 = vld [vmem:[#allocation4 + $0x5f4] sm:$0xf0] }
 0x12e   : > { %v1382_v2 = vpop.f32.mrf.mxu0 }
 0x12f   : > { %v11980_v51 = vadd.f32 %v1431_v38, %v1382_v2  ;;  %v8655_v2 = vor.u32 %v10906_v37, %v8654_v46  ;;  %v8915_v38 = vor.u32 %v10966_v6, %v8912_v9  ;;  %v8624_v6 = vld [vmem:[#allocation4 + $0x5b8] sm:$0xf0]  ;;  %v8622_v9 = vld [vmem:[#allocation4 + $0x598] sm:$0xf] }
 0x131   : > { %v1529_v27 = vpop.f32.mrf.mxu3  ;;  %1934 = vmatpush.bf16.msrb.mxu0 %v8655_v2  ;;  %2081 = vmatpush.bf16.msrb.mxu3 %v8915_v38  ;;  %v10958_v2 = vld [vmem:[#allocation4 + $0x79c] sm:$0xf] }
 0x132   : > { %v8880_v38 = vld [vmem:[#allocation4 + $0x7b8] sm:$0xf0] }
 0x133   : > { %v1434_v58 = vpop.f32.mrf.mxu1 }
 0x134   : > { %v1480_v47 = vpop.f32.mrf.mxu2 }
 0x135   : > { %v11982_v23 = vadd.f32 %v1529_v27, %v1480_v47  ;;  %v8910_v27 = vld [vmem:[#allocation4 + $0x7d8] sm:$0xf] }
 0x136   : > { %v1385_v62 = vpop.f32.mrf.mxu0  ;;  %1629 = vmatmul.bf16.gmra.mxu1 %v11890_v10  ;;  %1727 = vmatmul.bf16.gmra.mxu3 %v11890_v10 }
 0x137   : > { %v11984_v8 = vadd.f32 %v1434_v58, %v1385_v62  ;;  %v10970_v58 = vld [vmem:[#allocation4 + $0x7f4] sm:$0xf0] }
 0x138   : > { %v8911_v55 = vor.u32 %v10970_v58, %v8910_v27 }
 0x139   : > { %1580 = vmatmul.bf16.gmra.mxu0 %v11887_v25  ;;  %1678 = vmatmul.bf16.gmra.mxu2 %v11887_v25  ;;  %v1532_v62 = vpop.f32.mrf.mxu3 }
 0x13a   : > { %1983 = vmatpush.bf16.msrb.mxu1 %v8911_v55  ;;  %v8627_v55 = vor.u32 %v10894_v63, %v8624_v6 }
 0x13b   : > { %v1436_v47 = vpop.f32.mrf.mxu1 }
 0x13c   : > { %v1483_v29 = vpop.f32.mrf.mxu2  ;;  %2033 = vmatpush.bf16.msrb.mxu2 %v8627_v55  ;;  %v10886_v55 = vld [vmem:[#allocation4 + $0x55c] sm:$0xf] }
 0x13d   : > { %v11990_v40 = vadd.f32 %v1532_v62, %v1483_v29  ;;  %v10898_v29 = vld [vmem:[#allocation4 + $0x5b4] sm:$0xf0] }
 0x13e   : > { %v1387_v17 = vpop.f32.mrf.mxu0 }
 0x13f   : > { %v11992_v22 = vadd.f32 %v1436_v47, %v1387_v17  ;;  %v8623_v17 = vor.u32 %v10898_v29, %v8622_v9  ;;  %v8883_v47 = vor.u32 %v10958_v2, %v8880_v38  ;;  %v8592_v2 = vld [vmem:[#allocation4 + $0x578] sm:$0xf0]  ;;  %v8590_v38 = vld [vmem:[#allocation4 + $0x558] sm:$0xf] }
 0x141   : > { %v1534_v1 = vpop.f32.mrf.mxu3  ;;  %1935 = vmatpush.bf16.msrb.mxu0 %v8623_v17  ;;  %2082 = vmatpush.bf16.msrb.mxu3 %v8883_v47  ;;  %v10950_v17 = vld [vmem:[#allocation4 + $0x75c] sm:$0xf] }
 0x142   : > { %v8848_v47 = vld [vmem:[#allocation4 + $0x778] sm:$0xf0] }
 0x143   : > { %v1439_v46 = vpop.f32.mrf.mxu1 }
 0x144   : > { %v1485_v34 = vpop.f32.mrf.mxu2 }
 0x145   : > { %v11994_v21 = vadd.f32 %v1534_v1, %v1485_v34  ;;  %v8878_v1 = vld [vmem:[#allocation4 + $0x798] sm:$0xf] }
 0x146   : > { %v1390_v54 = vpop.f32.mrf.mxu0  ;;  %1634 = vmatmul.bf16.gmra.mxu1 %v11906_v59  ;;  %1732 = vmatmul.bf16.gmra.mxu3 %v11906_v59 }
 0x147   : > { %v11996_v37 = vadd.f32 %v1439_v46, %v1390_v54  ;;  %v10962_v46 = vld [vmem:[#allocation4 + $0x7b4] sm:$0xf0] }
 0x148   : > { %v8879_v39 = vor.u32 %v10962_v46, %v8878_v1 }
 0x149   : > { %14559 = vst [vmem:[#allocation32_spill] sm:$0xff] %v11996_v37  ;;  %1585 = vmatmul.bf16.gmra.mxu0 %v11903_v31  ;;  %1683 = vmatmul.bf16.gmra.mxu2 %v11903_v31  ;;  %v1537_v54 = vpop.f32.mrf.mxu3 }
 0x14a   : > { %1984 = vmatpush.bf16.msrb.mxu1 %v8879_v39  ;;  %v8595_v39 = vor.u32 %v10886_v55, %v8592_v2 }
 0x14b   : > { %v1441_v34 = vpop.f32.mrf.mxu1 }
 0x14c   : > { %v1488_v62 = vpop.f32.mrf.mxu2  ;;  %2034 = vmatpush.bf16.msrb.mxu2 %v8595_v39  ;;  %v10878_v39 = vld [vmem:[#allocation4 + $0x51c] sm:$0xf] }
 0x14d   : > { %v12002_v58 = vadd.f32 %v1537_v54, %v1488_v62  ;;  %v10890_v62 = vld [vmem:[#allocation4 + $0x574] sm:$0xf0] }
 0x14e   : > { %v1392_v27 = vpop.f32.mrf.mxu0 }
 0x14f   : > { %14560 = vst [vmem:[#allocation33_spill] sm:$0xff] %v12002_v58  ;;  %v12004_v20 = vadd.f32 %v1441_v34, %v1392_v27  ;;  %v8591_v27 = vor.u32 %v10890_v62, %v8590_v38  ;;  %v8851_v34 = vor.u32 %v10950_v17, %v8848_v47  ;;  %v8560_v17 = vld [vmem:[#allocation4 + $0x538] sm:$0xf0]  ;;  %v8558_v47 = vld [vmem:[#allocation4 + $0x518] sm:$0xf] }
 0x151   : > { %14561 = vst [vmem:[#allocation34_spill] sm:$0xff] %v12004_v20  ;;  %v1539_v6 = vpop.f32.mrf.mxu3  ;;  %1936 = vmatpush.bf16.msrb.mxu0 %v8591_v27  ;;  %2083 = vmatpush.bf16.msrb.mxu3 %v8851_v34  ;;  %v10942_v27 = vld [vmem:[#allocation4 + $0x71c] sm:$0xf] }
 0x152   : > { %v8816_v34 = vld [vmem:[#allocation4 + $0x738] sm:$0xf0] }
 0x153   : > { %v1600_v9 = vpop.f32.mrf.mxu1 }
 0x154   : > { %v1490_v63 = vpop.f32.mrf.mxu2 }
 0x155   : > { %v12006_v37 = vadd.f32 %v1539_v6, %v1490_v63  ;;  %v8846_v6 = vld [vmem:[#allocation4 + $0x758] sm:$0xf] }
 0x156   : > { %v1551_v30 = vpop.f32.mrf.mxu0  ;;  %1795 = vmatmul.bf16.vlgmr.msra.gmra.mxu1 %v11732_v7  ;;  %1893 = vmatmul.bf16.vlgmr.msra.gmra.mxu3 %v11732_v7 }
 0x157   : > { %14562 = vst [vmem:[#allocation35_spill] sm:$0xff] %v12006_v37  ;;  %v12008_v29 = vadd.f32 %v1600_v9, %v1551_v30  ;;  %v10954_v9 = vld [vmem:[#allocation4 + $0x774] sm:$0xf0] }
 0x158   : > { %v8847_v37 = vor.u32 %v10954_v9, %v8846_v6 }
 0x159   : > { %14563 = vst [vmem:[#allocation36_spill] sm:$0xff] %v12008_v29  ;;  %1746 = vmatmul.bf16.vlgmr.msra.gmra.mxu0 %v11728_v4  ;;  %1844 = vmatmul.bf16.vlgmr.msra.gmra.mxu2 %v11728_v4  ;;  %v1698_v30 = vpop.f32.mrf.mxu3 }
 0x15a   : > { %1985 = vmatpush.bf16.msrb.mxu1 %v8847_v37  ;;  %v8563_v37 = vor.u32 %v10878_v39, %v8560_v17 }
 0x15b   : > { %v1602_v63 = vpop.f32.mrf.mxu1 }
 0x15c   : > { %v1649_v54 = vpop.f32.mrf.mxu2  ;;  %2035 = vmatpush.bf16.msrb.mxu2 %v8563_v37  ;;  %v10870_v37 = vld [vmem:[#allocation4 + $0x4dc] sm:$0xf] }
 0x15d   : > { %v12014_v46 = vadd.f32 %v1698_v30, %v1649_v54  ;;  %v10882_v54 = vld [vmem:[#allocation4 + $0x534] sm:$0xf0] }
 0x15e   : > { %v1553_v1 = vpop.f32.mrf.mxu0 }
 0x15f   : > { %14564 = vst [vmem:[#allocation37_spill] sm:$0xff] %v12014_v46  ;;  %v12016_v29 = vadd.f32 %v1602_v63, %v1553_v1  ;;  %v8559_v1 = vor.u32 %v10882_v54, %v8558_v47  ;;  %v8819_v63 = vor.u32 %v10942_v27, %v8816_v34  ;;  %v8528_v27 = vld [vmem:[#allocation4 + $0x4f8] sm:$0xf0]  ;;  %v8526_v34 = vld [vmem:[#allocation4 + $0x4d8] sm:$0xf] }
 0x161   : > { %14565 = vst [vmem:[#allocation38_spill] sm:$0xff] %v12016_v29  ;;  %v1700_v2 = vpop.f32.mrf.mxu3  ;;  %1937 = vmatpush.bf16.msrb.mxu0 %v8559_v1  ;;  %2084 = vmatpush.bf16.msrb.mxu3 %v8819_v63  ;;  %v10934_v1 = vld [vmem:[#allocation4 + $0x6dc] sm:$0xf] }
 0x162   : > { %v8784_v63 = vld [vmem:[#allocation4 + $0x6f8] sm:$0xf0] }
 0x163   : > { %v1605_v38 = vpop.f32.mrf.mxu1 }
 0x164   : > { %v1651_v55 = vpop.f32.mrf.mxu2 }
 0x165   : > { %v12018_v58 = vadd.f32 %v1700_v2, %v1651_v55  ;;  %v8814_v2 = vld [vmem:[#allocation4 + $0x718] sm:$0xf] }
 0x166   : > { %v1556_v20 = vpop.f32.mrf.mxu0  ;;  %1800 = vmatmul.bf16.gmra.mxu1 %v11760_v49  ;;  %1898 = vmatmul.bf16.gmra.mxu3 %v11760_v49 }
 0x167   : > { %14566 = vst [vmem:[#allocation39_spill] sm:$0xff] %v12018_v58  ;;  %v12020_v62 = vadd.f32 %v1605_v38, %v1556_v20  ;;  %v10946_v38 = vld [vmem:[#allocation4 + $0x734] sm:$0xf0] }
 0x168   : > { %v8815_v58 = vor.u32 %v10946_v38, %v8814_v2 }
 0x169   : > { %14567 = vst [vmem:[#allocation40_spill] sm:$0xff] %v12020_v62  ;;  %1751 = vmatmul.bf16.gmra.mxu0 %v11757_v48  ;;  %1849 = vmatmul.bf16.gmra.mxu2 %v11757_v48  ;;  %v1703_v20 = vpop.f32.mrf.mxu3 }
 0x16a   : > { %1986 = vmatpush.bf16.msrb.mxu1 %v8815_v58  ;;  %v8531_v58 = vor.u32 %v10870_v37, %v8528_v27 }
 0x16b   : > { %v1607_v55 = vpop.f32.mrf.mxu1 }
 0x16c   : > { %v1654_v30 = vpop.f32.mrf.mxu2  ;;  %2036 = vmatpush.bf16.msrb.mxu2 %v8531_v58  ;;  %v10862_v58 = vld [vmem:[#allocation4 + $0x49c] sm:$0xf] }
 0x16d   : > { %v12026_v9 = vadd.f32 %v1703_v20, %v1654_v30  ;;  %v10874_v30 = vld [vmem:[#allocation4 + $0x4f4] sm:$0xf0] }
 0x16e   : > { %v1558_v6 = vpop.f32.mrf.mxu0 }
 0x16f   : > { %14568 = vst [vmem:[#allocation41_spill] sm:$0xff] %v12026_v9  ;;  %v12028_v62 = vadd.f32 %v1607_v55, %v1558_v6  ;;  %v8527_v6 = vor.u32 %v10874_v30, %v8526_v34  ;;  %v8787_v55 = vor.u32 %v10934_v1, %v8784_v63  ;;  %v8496_v1 = vld [vmem:[#allocation4 + $0x4b8] sm:$0xf0]  ;;  %v8494_v63 = vld [vmem:[#allocation4 + $0x498] sm:$0xf] }
 0x171   : > { %14569 = vst [vmem:[#allocation42_spill] sm:$0xff] %v12028_v62  ;;  %v1705_v17 = vpop.f32.mrf.mxu3  ;;  %1938 = vmatpush.bf16.msrb.mxu0 %v8527_v6  ;;  %2085 = vmatpush.bf16.msrb.mxu3 %v8787_v55  ;;  %v10926_v6 = vld [vmem:[#allocation4 + $0x69c] sm:$0xf] }
 0x172   : > { %v8752_v55 = vld [vmem:[#allocation4 + $0x6b8] sm:$0xf0] }
 0x173   : > { %v1610_v47 = vpop.f32.mrf.mxu1 }
 0x174   : > { %v1656_v39 = vpop.f32.mrf.mxu2 }
 0x175   : > { %v12030_v46 = vadd.f32 %v1705_v17, %v1656_v39  ;;  %v8782_v17 = vld [vmem:[#allocation4 + $0x6d8] sm:$0xf] }
 0x176   : > { %v1561_v29 = vpop.f32.mrf.mxu0  ;;  %1805 = vmatmul.bf16.gmra.mxu1 %v11786_v15  ;;  %1903 = vmatmul.bf16.gmra.mxu3 %v11786_v15 }
 0x177   : > { %14570 = vst [vmem:[#allocation43_spill] sm:$0xff] %v12030_v46  ;;  %v12032_v54 = vadd.f32 %v1610_v47, %v1561_v29  ;;  %v10938_v47 = vld [vmem:[#allocation4 + $0x6f4] sm:$0xf0] }
 0x178   : > { %v8783_v46 = vor.u32 %v10938_v47, %v8782_v17 }
 0x179   : > { %14571 = vst [vmem:[#allocation44_spill] sm:$0xff] %v12032_v54  ;;  %1756 = vmatmul.bf16.gmra.mxu0 %v11783_v14  ;;  %1854 = vmatmul.bf16.gmra.mxu2 %v11783_v14  ;;  %v1708_v29 = vpop.f32.mrf.mxu3 }
 0x17a   : > { %1987 = vmatpush.bf16.msrb.mxu1 %v8783_v46  ;;  %v8499_v46 = vor.u32 %v10862_v58, %v8496_v1 }
 0x17b   : > { %v1612_v39 = vpop.f32.mrf.mxu1 }
 0x17c   : > { %v1659_v20 = vpop.f32.mrf.mxu2  ;;  %2037 = vmatpush.bf16.msrb.mxu2 %v8499_v46  ;;  %v10854_v46 = vld [vmem:[#allocation4 + $0x45c] sm:$0xf] }
 0x17d   : > { %v12038_v38 = vadd.f32 %v1708_v29, %v1659_v20  ;;  %v10866_v20 = vld [vmem:[#allocation4 + $0x4b4] sm:$0xf0] }
 0x17e   : > { %v1563_v2 = vpop.f32.mrf.mxu0 }
 0x17f   : > { %14572 = vst [vmem:[#allocation45_spill] sm:$0xff] %v12038_v38  ;;  %v12040_v54 = vadd.f32 %v1612_v39, %v1563_v2  ;;  %v8495_v2 = vor.u32 %v10866_v20, %v8494_v63  ;;  %v8755_v39 = vor.u32 %v10926_v6, %v8752_v55  ;;  %v8464_v6 = vld [vmem:[#allocation4 + $0x478] sm:$0xf0]  ;;  %v8462_v55 = vld [vmem:[#allocation4 + $0x458] sm:$0xf] }
 0x181   : > { %14573 = vst [vmem:[#allocation46_spill] sm:$0xff] %v12040_v54  ;;  %v1710_v27 = vpop.f32.mrf.mxu3  ;;  %1939 = vmatpush.bf16.msrb.mxu0 %v8495_v2  ;;  %2086 = vmatpush.bf16.msrb.mxu3 %v8755_v39  ;;  %v10918_v2 = vld [vmem:[#allocation4 + $0x65c] sm:$0xf] }
 0x182   : > { %v8720_v39 = vld [vmem:[#allocation4 + $0x678] sm:$0xf0] }
 0x183   : > { %v1615_v34 = vpop.f32.mrf.mxu1 }
 0x184   : > { %v1661_v37 = vpop.f32.mrf.mxu2 }
 0x185   : > { %v12042_v9 = vadd.f32 %v1710_v27, %v1661_v37  ;;  %v8750_v27 = vld [vmem:[#allocation4 + $0x698] sm:$0xf] }
 0x186   : > { %v1566_v62 = vpop.f32.mrf.mxu0  ;;  %1810 = vmatmul.bf16.gmra.mxu1 %v11812_v57  ;;  %1908 = vmatmul.bf16.gmra.mxu3 %v11812_v57 }
 0x187   : > { %14574 = vst [vmem:[#allocation47_spill] sm:$0xff] %v12042_v9  ;;  %v12044_v30 = vadd.f32 %v1615_v34, %v1566_v62  ;;  %v10930_v34 = vld [vmem:[#allocation4 + $0x6b4] sm:$0xf0] }
 0x188   : > { %v8751_v9 = vor.u32 %v10930_v34, %v8750_v27 }
 0x189   : > { %14575 = vst [vmem:[#allocation48_spill] sm:$0xff] %v12044_v30  ;;  %1761 = vmatmul.bf16.gmra.mxu0 %v11809_v56  ;;  %1859 = vmatmul.bf16.gmra.mxu2 %v11809_v56  ;;  %v1713_v62 = vpop.f32.mrf.mxu3 }
 0x18a   : > { %1988 = vmatpush.bf16.msrb.mxu1 %v8751_v9  ;;  %v8467_v9 = vor.u32 %v10854_v46, %v8464_v6 }
 0x18b   : > { %v1617_v37 = vpop.f32.mrf.mxu1 }
 0x18c   : > { %v1664_v29 = vpop.f32.mrf.mxu2  ;;  %2038 = vmatpush.bf16.msrb.mxu2 %v8467_v9  ;;  %v10846_v9 = vld [vmem:[#allocation4 + $0x41c] sm:$0xf] }
 0x18d   : > { %v12050_v47 = vadd.f32 %v1713_v62, %v1664_v29  ;;  %v10858_v29 = vld [vmem:[#allocation4 + $0x474] sm:$0xf0] }
 0x18e   : > { %v1568_v17 = vpop.f32.mrf.mxu0 }
 0x18f   : > { %14576 = vst [vmem:[#allocation49_spill] sm:$0xff] %v12050_v47  ;;  %v12052_v30 = vadd.f32 %v1617_v37, %v1568_v17  ;;  %v8463_v17 = vor.u32 %v10858_v29, %v8462_v55  ;;  %v8723_v37 = vor.u32 %v10918_v2, %v8720_v39  ;;  %v8432_v2 = vld [vmem:[#allocation4 + $0x438] sm:$0xf0]  ;;  %v8430_v39 = vld [vmem:[#allocation4 + $0x418] sm:$0xf] }
 0x191   : > { %14577 = vst [vmem:[#allocation50_spill] sm:$0xff] %v12052_v30  ;;  %v1715_v1 = vpop.f32.mrf.mxu3  ;;  %1940 = vmatpush.bf16.msrb.mxu0 %v8463_v17  ;;  %2087 = vmatpush.bf16.msrb.mxu3 %v8723_v37  ;;  %v10910_v17 = vld [vmem:[#allocation4 + $0x61c] sm:$0xf] }
 0x192   : > { %v8688_v37 = vld [vmem:[#allocation4 + $0x638] sm:$0xf0] }
 0x193   : > { %v1620_v63 = vpop.f32.mrf.mxu1 }
 0x194   : > { %v1666_v58 = vpop.f32.mrf.mxu2 }
 0x195   : > { %v12054_v38 = vadd.f32 %v1715_v1, %v1666_v58  ;;  %v8718_v1 = vld [vmem:[#allocation4 + $0x658] sm:$0xf] }
 0x196   : > { %v1571_v54 = vpop.f32.mrf.mxu0  ;;  %1815 = vmatmul.bf16.gmra.mxu1 %v11838_v36  ;;  %1913 = vmatmul.bf16.gmra.mxu3 %v11838_v36 }
 0x197   : > { %14578 = vst [vmem:[#allocation51_spill] sm:$0xff] %v12054_v38  ;;  %v12056_v20 = vadd.f32 %v1620_v63, %v1571_v54  ;;  %v10922_v63 = vld [vmem:[#allocation4 + $0x674] sm:$0xf0] }
 0x198   : > { %v8719_v38 = vor.u32 %v10922_v63, %v8718_v1 }
 0x199   : > { %14579 = vst [vmem:[#allocation52_spill] sm:$0xff] %v12056_v20  ;;  %1766 = vmatmul.bf16.gmra.mxu0 %v11835_v35  ;;  %1864 = vmatmul.bf16.gmra.mxu2 %v11835_v35  ;;  %v1718_v54 = vpop.f32.mrf.mxu3 }
 0x19a   : > { %1989 = vmatpush.bf16.msrb.mxu1 %v8719_v38  ;;  %v8435_v38 = vor.u32 %v10846_v9, %v8432_v2 }
 0x19b   : > { %v1622_v58 = vpop.f32.mrf.mxu1 }
 0x19c   : > { %v1669_v62 = vpop.f32.mrf.mxu2  ;;  %2039 = vmatpush.bf16.msrb.mxu2 %v8435_v38  ;;  %v10771_v38 = vld [vmem:[#allocation4 + $0x1c4] sm:$0xf] }
 0x19d   : > { %v12062_v34 = vadd.f32 %v1718_v54, %v1669_v62  ;;  %v10850_v62 = vld [vmem:[#allocation4 + $0x434] sm:$0xf0] }
 0x19e   : > { %v1573_v27 = vpop.f32.mrf.mxu0 }
 0x19f   : > { %14580 = vst [vmem:[#allocation53_spill] sm:$0xff] %v12062_v34  ;;  %v12064_v20 = vadd.f32 %v1622_v58, %v1573_v27  ;;  %v8431_v27 = vor.u32 %v10850_v62, %v8430_v39  ;;  %v8691_v58 = vor.u32 %v10910_v17, %v8688_v37  ;;  %v9144_v17 = vld [vmem:[#allocation4 + $0x1e0] sm:$0xf0]  ;;  %v9142_v37 = vld [vmem:[#allocation4 + $0x1c0] sm:$0xf] }
 0x1a1   : > { %14581 = vst [vmem:[#allocation54_spill] sm:$0xff] %v12064_v20  ;;  %v1720_v6 = vpop.f32.mrf.mxu3  ;;  %1941 = vmatpush.bf16.msrb.mxu0 %v8431_v27  ;;  %2088 = vmatpush.bf16.msrb.mxu3 %v8691_v58  ;;  %v10835_v27 = vld [vmem:[#allocation4 + $0x3c4] sm:$0xf] }
 0x1a2   : > { %v9400_v58 = vld [vmem:[#allocation4 + $0x3e0] sm:$0xf0] }
 0x1a3   : > { %v1625_v55 = vpop.f32.mrf.mxu1 }
 0x1a4   : > { %v1671_v46 = vpop.f32.mrf.mxu2 }
 0x1a5   : > { %v12066_v47 = vadd.f32 %v1720_v6, %v1671_v46  ;;  %v8686_v6 = vld [vmem:[#allocation4 + $0x618] sm:$0xf] }
 0x1a6   : > { %v1576_v30 = vpop.f32.mrf.mxu0  ;;  %1820 = vmatmul.bf16.gmra.mxu1 %v11864_v52  ;;  %1918 = vmatmul.bf16.gmra.mxu3 %v11864_v52 }
 0x1a7   : > { %14582 = vst [vmem:[#allocation55_spill] sm:$0xff] %v12066_v47  ;;  %v12068_v29 = vadd.f32 %v1625_v55, %v1576_v30  ;;  %v10914_v55 = vld [vmem:[#allocation4 + $0x634] sm:$0xf0] }
 0x1a8   : > { %v8687_v47 = vor.u32 %v10914_v55, %v8686_v6 }
 0x1a9   : > { %14583 = vst [vmem:[#allocation56_spill] sm:$0xff] %v12068_v29  ;;  %1771 = vmatmul.bf16.gmra.mxu0 %v11861_v50  ;;  %1869 = vmatmul.bf16.gmra.mxu2 %v11861_v50  ;;  %v1723_v30 = vpop.f32.mrf.mxu3 }
 0x1aa   : > { %1990 = vmatpush.bf16.msrb.mxu1 %v8687_v47  ;;  %v9147_v47 = vor.u32 %v10771_v38, %v9144_v17 }
 0x1ab   : > { %v1627_v46 = vpop.f32.mrf.mxu1 }
 0x1ac   : > { %v1674_v54 = vpop.f32.mrf.mxu2  ;;  %2868 = vmatpush.bf16.msra.mxu2 %v9147_v47  ;;  %v10763_v47 = vld [vmem:[#allocation4 + $0x184] sm:$0xf] }
 0x1ad   : > { %v12074_v63 = vadd.f32 %v1723_v30, %v1674_v54  ;;  %v10775_v54 = vld [vmem:[#allocation4 + $0x1dc] sm:$0xf0] }
 0x1ae   : > { %v1578_v1 = vpop.f32.mrf.mxu0 }
 0x1af   : > { %14584 = vst [vmem:[#allocation57_spill] sm:$0xff] %v12074_v63  ;;  %v12076_v29 = vadd.f32 %v1627_v46, %v1578_v1  ;;  %v9143_v1 = vor.u32 %v10775_v54, %v9142_v37  ;;  %v9403_v46 = vor.u32 %v10835_v27, %v9400_v58  ;;  %v9112_v27 = vld [vmem:[#allocation4 + $0x1a0] sm:$0xf0]  ;;  %v9110_v58 = vld [vmem:[#allocation4 + $0x180] sm:$0xf] }
 0x1b1   : > { %14585 = vst [vmem:[#allocation58_spill] sm:$0xff] %v12076_v29  ;;  %v1725_v2 = vpop.f32.mrf.mxu3  ;;  %2770 = vmatpush.bf16.msra.mxu0 %v9143_v1  ;;  %2917 = vmatpush.bf16.msra.mxu3 %v9403_v46  ;;  %v10827_v1 = vld [vmem:[#allocation4 + $0x384] sm:$0xf] }
 0x1b2   : > { %v9368_v46 = vld [vmem:[#allocation4 + $0x3a0] sm:$0xf0] }
 0x1b3   : > { %v1630_v39 = vpop.f32.mrf.mxu1 }
 0x1b4   : > { %v1676_v9 = vpop.f32.mrf.mxu2 }
 0x1b5   : > { %v12078_v34 = vadd.f32 %v1725_v2, %v1676_v9  ;;  %v9398_v2 = vld [vmem:[#allocation4 + $0x3c0] sm:$0xf] }
 0x1b6   : > { %v1581_v20 = vpop.f32.mrf.mxu0  ;;  %1825 = vmatmul.bf16.gmra.mxu1 %v11890_v10  ;;  %1923 = vmatmul.bf16.gmra.mxu3 %v11890_v10 }
 0x1b7   : > { %14586 = vst [vmem:[#allocation59_spill] sm:$0xff] %v12078_v34  ;;  %v12080_v62 = vadd.f32 %v1630_v39, %v1581_v20  ;;  %v10839_v39 = vld [vmem:[#allocation4 + $0x3dc] sm:$0xf0] }
 0x1b8   : > { %v9399_v34 = vor.u32 %v10839_v39, %v9398_v2 }
 0x1b9   : > { %14587 = vst [vmem:[#allocation60_spill] sm:$0xff] %v12080_v62  ;;  %1776 = vmatmul.bf16.gmra.mxu0 %v11887_v25  ;;  %1874 = vmatmul.bf16.gmra.mxu2 %v11887_v25  ;;  %v1728_v20 = vpop.f32.mrf.mxu3 }
 0x1ba   : > { %2819 = vmatpush.bf16.msra.mxu1 %v9399_v34  ;;  %v9115_v34 = vor.u32 %v10763_v47, %v9112_v27 }
 0x1bb   : > { %v1632_v9 = vpop.f32.mrf.mxu1 }
 0x1bc   : > { %v1679_v30 = vpop.f32.mrf.mxu2  ;;  %2869 = vmatpush.bf16.msra.mxu2 %v9115_v34  ;;  %v10755_v34 = vld [vmem:[#allocation4 + $0x144] sm:$0xf] }
 0x1bd   : > { %v12086_v55 = vadd.f32 %v1728_v20, %v1679_v30  ;;  %v10767_v30 = vld [vmem:[#allocation4 + $0x19c] sm:$0xf0] }
 0x1be   : > { %v1583_v6 = vpop.f32.mrf.mxu0 }
 0x1bf   : > { %14588 = vst [vmem:[#allocation61_spill] sm:$0xff] %v12086_v55  ;;  %v12088_v62 = vadd.f32 %v1632_v9, %v1583_v6  ;;  %v9111_v6 = vor.u32 %v10767_v30, %v9110_v58  ;;  %v9371_v9 = vor.u32 %v10827_v1, %v9368_v46  ;;  %v9080_v1 = vld [vmem:[#allocation4 + $0x160] sm:$0xf0]  ;;  %v9078_v46 = vld [vmem:[#allocation4 + $0x140] sm:$0xf] }
 0x1c1   : > { %14589 = vst [vmem:[#allocation62_spill] sm:$0xff] %v12088_v62  ;;  %v1730_v17 = vpop.f32.mrf.mxu3  ;;  %2771 = vmatpush.bf16.msra.mxu0 %v9111_v6  ;;  %2918 = vmatpush.bf16.msra.mxu3 %v9371_v9  ;;  %v10819_v6 = vld [vmem:[#allocation4 + $0x344] sm:$0xf] }
 0x1c2   : > { %v9336_v9 = vld [vmem:[#allocation4 + $0x360] sm:$0xf0] }
 0x1c3   : > { %v1635_v37 = vpop.f32.mrf.mxu1 }
 0x1c4   : > { %v1681_v38 = vpop.f32.mrf.mxu2 }
 0x1c5   : > { %v12090_v63 = vadd.f32 %v1730_v17, %v1681_v38  ;;  %v9366_v17 = vld [vmem:[#allocation4 + $0x380] sm:$0xf] }
 0x1c6   : > { %v1586_v29 = vpop.f32.mrf.mxu0  ;;  %1830 = vmatmul.bf16.gmra.mxu1 %v11906_v59  ;;  %1928 = vmatmul.bf16.gmra.mxu3 %v11906_v59 }
 0x1c7   : > { %14590 = vst [vmem:[#allocation63_spill] sm:$0xff] %v12090_v63  ;;  %v12092_v54 = vadd.f32 %v1635_v37, %v1586_v29  ;;  %v10831_v37 = vld [vmem:[#allocation4 + $0x39c] sm:$0xf0] }
 0x1c8   : > { %v9367_v63 = vor.u32 %v10831_v37, %v9366_v17 }
 0x1c9   : > { %14591 = vst [vmem:[#allocation64_spill] sm:$0xff] %v12092_v54  ;;  %1781 = vmatmul.bf16.gmra.mxu0 %v11903_v31  ;;  %1879 = vmatmul.bf16.gmra.mxu2 %v11903_v31  ;;  %v1733_v29 = vpop.f32.mrf.mxu3 }
 0x1ca   : > { %2820 = vmatpush.bf16.msra.mxu1 %v9367_v63  ;;  %v9083_v63 = vor.u32 %v10755_v34, %v9080_v1 }
 0x1cb   : > { %v1637_v38 = vpop.f32.mrf.mxu1 }
 0x1cc   : > { %v1684_v20 = vpop.f32.mrf.mxu2  ;;  %2870 = vmatpush.bf16.msra.mxu2 %v9083_v63  ;;  %v10747_v63 = vld [vmem:[#allocation4 + $0x104] sm:$0xf] }
 0x1cd   : > { %v12098_v39 = vadd.f32 %v1733_v29, %v1684_v20  ;;  %v10759_v20 = vld [vmem:[#allocation4 + $0x15c] sm:$0xf0] }
 0x1ce   : > { %v1588_v2 = vpop.f32.mrf.mxu0 }
 0x1cf   : > { %14592 = vst [vmem:[#allocation65_spill] sm:$0xff] %v12098_v39  ;;  %v12100_v54 = vadd.f32 %v1637_v38, %v1588_v2  ;;  %v9079_v2 = vor.u32 %v10759_v20, %v9078_v46  ;;  %v9339_v38 = vor.u32 %v10819_v6, %v9336_v9  ;;  %v9048_v6 = vld [vmem:[#allocation4 + $0x120] sm:$0xf0]  ;;  %v9046_v9 = vld [vmem:[#allocation4 + $0x100] sm:$0xf] }
 0x1d1   : > { %14593 = vst [vmem:[#allocation66_spill] sm:$0xff] %v12100_v54  ;;  %v1735_v27 = vpop.f32.mrf.mxu3  ;;  %2772 = vmatpush.bf16.msra.mxu0 %v9079_v2  ;;  %2919 = vmatpush.bf16.msra.mxu3 %v9339_v38  ;;  %v10751_v2 = vld [vmem:[#allocation4 + $0x11c] sm:$0xf0]  ;;  %v10811_v38 = vld [vmem:[#allocation4 + $0x304] sm:$0xf] }
 0x1d3   : > { %v1796_v58 = vpop.f32.mrf.mxu1 }
 0x1d4   : > { %v1686_v47 = vpop.f32.mrf.mxu2 }
 0x1d5   : > { %v12102_v55 = vadd.f32 %v1735_v27, %v1686_v47 }
 0x1d6   : > { %v1747_v62 = vpop.f32.mrf.mxu0  ;;  %1991 = vmatmul.bf16.vlgmr.msrb.gmra.mxu1 %v11732_v7  ;;  %2089 = vmatmul.bf16.vlgmr.msrb.gmra.mxu3 %v11732_v7  ;;  %v10823_v7 = vld [vmem:[#allocation4 + $0x35c] sm:$0xf0] }
 0x1d7   : > { %14594 = vst [vmem:[#allocation67_spill] sm:$0xff] %v12102_v55  ;;  %v12104_v30 = vadd.f32 %v1796_v58, %v1747_v62 }
 0x1d9   : > { %14595 = vst [vmem:[#allocation68_spill] sm:$0xff] %v12104_v30  ;;  %1942 = vmatmul.bf16.vlgmr.msrb.gmra.mxu0 %v11728_v4  ;;  %2040 = vmatmul.bf16.vlgmr.msrb.gmra.mxu2 %v11728_v4  ;;  %v1894_v62 = vpop.f32.mrf.mxu3  ;;  %v9334_v4 = vld [vmem:[#allocation4 + $0x340] sm:$0xf] }
 0x1da   : > { %v9335_v58 = vor.u32 %v10823_v7, %v9334_v4 }
 0x1db   : > { %v1798_v47 = vpop.f32.mrf.mxu1 }
 0x1dc   : > { %v1845_v29 = vpop.f32.mrf.mxu2  ;;  %2821 = vmatpush.bf16.msra.mxu1 %v9335_v58 }
 0x1dd   : > { %v12110_v37 = vadd.f32 %v1894_v62, %v1845_v29  ;;  %v9051_v29 = vor.u32 %v10747_v63, %v9048_v6  ;;  %v9304_v62 = vld [vmem:[#allocation4 + $0x320] sm:$0xf0] }
 0x1de   : > { %v1749_v17 = vpop.f32.mrf.mxu0  ;;  %v9307_v4 = vor.u32 %v10811_v38, %v9304_v62  ;;  %v9016_v38 = vld [vmem:[#allocation4 + $0xe0] sm:$0xf0]  ;;  %v9014_v62 = vld [vmem:[#allocation4 + $0xc0] sm:$0xf] }
 0x1df   : > { %14596 = vst [vmem:[#allocation69_spill] sm:$0xff] %v12110_v37  ;;  %v12112_v27 = vadd.f32 %v1798_v47, %v1749_v17  ;;  %v9047_v47 = vor.u32 %v10751_v2, %v9046_v9  ;;  %2871 = vmatpush.bf16.msra.mxu2 %v9051_v29  ;;  %v10739_v29 = vld [vmem:[#allocation4 + $0xc4] sm:$0xf]  ;;  %v228_v37 = vld [vmem:[#allocation2 + $0xf8] sm:$0xff] }
 0x1e0   : > { %2920 = vmatpush.bf16.msra.mxu3 %v9307_v4  ;;  %v10803_v4 = vld [vmem:[#allocation4 + $0x2c4] sm:$0xf] }
 0x1e1   : > { %14597 = vst [vmem:[#allocation70_spill] sm:$0xff] %v12112_v27  ;;  %v1896_v1 = vpop.f32.mrf.mxu3  ;;  %2773 = vmatpush.bf16.msra.mxu0 %v9047_v47  ;;  %v10743_v47 = vld [vmem:[#allocation4 + $0xdc] sm:$0xf0]  ;;  %v226_v27 = vld [vmem:[#allocation2 + $0xe8] sm:$0xff] }
 0x1e3   : > { %v1801_v46 = vpop.f32.mrf.mxu1 }
 0x1e4   : > { %v1847_v34 = vpop.f32.mrf.mxu2 }
 0x1e5   : > { %v12114_v55 = vadd.f32 %v1896_v1, %v1847_v34 }
 0x1e6   : > { %v1752_v30 = vpop.f32.mrf.mxu0  ;;  %1996 = vmatmul.bf16.gmra.mxu1 %v11760_v49  ;;  %2094 = vmatmul.bf16.gmra.mxu3 %v11760_v49  ;;  %v10815_v49 = vld [vmem:[#allocation4 + $0x31c] sm:$0xf0] }
 0x1e7   : > { %14598 = vst [vmem:[#allocation71_spill] sm:$0xff] %v12114_v55  ;;  %v12116_v20 = vadd.f32 %v1801_v46, %v1752_v30 }
 0x1e9   : > { %14599 = vst [vmem:[#allocation72_spill] sm:$0xff] %v12116_v20  ;;  %1947 = vmatmul.bf16.gmra.mxu0 %v11757_v48  ;;  %2045 = vmatmul.bf16.gmra.mxu2 %v11757_v48  ;;  %v1899_v30 = vpop.f32.mrf.mxu3  ;;  %v9302_v48 = vld [vmem:[#allocation4 + $0x300] sm:$0xf] }
 0x1ea   : > { %v9303_v46 = vor.u32 %v10815_v49, %v9302_v48 }
 0x1eb   : > { %v1803_v34 = vpop.f32.mrf.mxu1 }
 0x1ec   : > { %v1850_v17 = vpop.f32.mrf.mxu2  ;;  %2822 = vmatpush.bf16.msra.mxu1 %v9303_v46 }
 0x1ed   : > { %v12122_v58 = vadd.f32 %v1899_v30, %v1850_v17  ;;  %v9019_v17 = vor.u32 %v10739_v29, %v9016_v38  ;;  %v9272_v30 = vld [vmem:[#allocation4 + $0x2e0] sm:$0xf0] }
 0x1ee   : > { %v1754_v7 = vpop.f32.mrf.mxu0  ;;  %v9275_v48 = vor.u32 %v10803_v4, %v9272_v30  ;;  %v8984_v4 = vld [vmem:[#allocation4 + $0xa0] sm:$0xf0]  ;;  %v8982_v30 = vld [vmem:[#allocation4 + $0x80] sm:$0xf] }
 0x1ef   : > { %14600 = vst [vmem:[#allocation73_spill] sm:$0xff] %v12122_v58  ;;  %v12124_v1 = vadd.f32 %v1803_v34, %v1754_v7  ;;  %v9015_v34 = vor.u32 %v10743_v47, %v9014_v62  ;;  %2872 = vmatpush.bf16.msra.mxu2 %v9019_v17  ;;  %v10731_v17 = vld [vmem:[#allocation4 + $0x84] sm:$0xf]  ;;  %v224_v58 = vld [vmem:[#allocation2 + $0xd8] sm:$0xff] }
 0x1f0   : > { %2921 = vmatpush.bf16.msra.mxu3 %v9275_v48  ;;  %v10795_v48 = vld [vmem:[#allocation4 + $0x284] sm:$0xf] }
 0x1f1   : > { %14601 = vst [vmem:[#allocation74_spill] sm:$0xff] %v12124_v1  ;;  %v1901_v6 = vpop.f32.mrf.mxu3  ;;  %2774 = vmatpush.bf16.msra.mxu0 %v9015_v34  ;;  %v10735_v34 = vld [vmem:[#allocation4 + $0x9c] sm:$0xf0]  ;;  %v222_v1 = vld [vmem:[#allocation2 + $0xc8] sm:$0xff] }
 0x1f3   : > { %v1806_v9 = vpop.f32.mrf.mxu1 }
 0x1f4   : > { %v1852_v63 = vpop.f32.mrf.mxu2 }
 0x1f5   : > { %v12126_v55 = vadd.f32 %v1901_v6, %v1852_v63 }
 0x1f6   : > { %v1757_v20 = vpop.f32.mrf.mxu0  ;;  %2001 = vmatmul.bf16.gmra.mxu1 %v11786_v15  ;;  %2099 = vmatmul.bf16.gmra.mxu3 %v11786_v15  ;;  %v10807_v15 = vld [vmem:[#allocation4 + $0x2dc] sm:$0xf0] }
 0x1f7   : > { %14602 = vst [vmem:[#allocation75_spill] sm:$0xff] %v12126_v55  ;;  %v12128_v2 = vadd.f32 %v1806_v9, %v1757_v20 }
 0x1f9   : > { %14603 = vst [vmem:[#allocation76_spill] sm:$0xff] %v12128_v2  ;;  %1952 = vmatmul.bf16.gmra.mxu0 %v11783_v14  ;;  %2050 = vmatmul.bf16.gmra.mxu2 %v11783_v14  ;;  %v1904_v20 = vpop.f32.mrf.mxu3  ;;  %v9270_v14 = vld [vmem:[#allocation4 + $0x2c0] sm:$0xf] }
 0x1fa   : > { %v9271_v9 = vor.u32 %v10807_v15, %v9270_v14 }
 0x1fb   : > { %v1808_v63 = vpop.f32.mrf.mxu1 }
 0x1fc   : > { %v1855_v7 = vpop.f32.mrf.mxu2  ;;  %2823 = vmatpush.bf16.msra.mxu1 %v9271_v9 }
 0x1fd   : > { %v12134_v46 = vadd.f32 %v1904_v20, %v1855_v7  ;;  %v8987_v7 = vor.u32 %v10731_v17, %v8984_v4  ;;  %v9240_v20 = vld [vmem:[#allocation4 + $0x2a0] sm:$0xf0] }
 0x1fe   : > { %v1759_v49 = vpop.f32.mrf.mxu0  ;;  %v9243_v14 = vor.u32 %v10795_v48, %v9240_v20  ;;  %v8952_v48 = vld [vmem:[#allocation4 + $0x60] sm:$0xf0]  ;;  %v8950_v20 = vld [vmem:[#allocation4 + $0x40] sm:$0xf] }
 0x1ff   : > { %14604 = vst [vmem:[#allocation77_spill] sm:$0xff] %v12134_v46  ;;  %v12136_v6 = vadd.f32 %v1808_v63, %v1759_v49  ;;  %v8983_v63 = vor.u32 %v10735_v34, %v8982_v30  ;;  %2873 = vmatpush.bf16.msra.mxu2 %v8987_v7  ;;  %v10723_v7 = vld [vmem:[#allocation4 + $0x44] sm:$0xf]  ;;  %v220_v46 = vld [vmem:[#allocation2 + $0xb8] sm:$0xff] }
 0x200   : > { %2922 = vmatpush.bf16.msra.mxu3 %v9243_v14  ;;  %v10787_v14 = vld [vmem:[#allocation4 + $0x244] sm:$0xf] }
 0x201   : > { %14605 = vst [vmem:[#allocation78_spill] sm:$0xff] %v12136_v6  ;;  %v1906_v38 = vpop.f32.mrf.mxu3  ;;  %2775 = vmatpush.bf16.msra.mxu0 %v8983_v63  ;;  %v10727_v63 = vld [vmem:[#allocation4 + $0x5c] sm:$0xf0]  ;;  %v218_v6 = vld [vmem:[#allocation2 + $0xa8] sm:$0xff] }
 0x203   : > { %v1811_v62 = vpop.f32.mrf.mxu1 }
 0x204   : > { %v1857_v29 = vpop.f32.mrf.mxu2 }
 0x205   : > { %v12138_v55 = vadd.f32 %v1906_v38, %v1857_v29 }
 0x206   : > { %v1762_v2 = vpop.f32.mrf.mxu0  ;;  %2006 = vmatmul.bf16.gmra.mxu1 %v11812_v57  ;;  %2104 = vmatmul.bf16.gmra.mxu3 %v11812_v57  ;;  %v10799_v57 = vld [vmem:[#allocation4 + $0x29c] sm:$0xf0] }
 0x207   : > { %14606 = vst [vmem:[#allocation79_spill] sm:$0xff] %v12138_v55  ;;  %v12140_v47 = vadd.f32 %v1811_v62, %v1762_v2 }
 0x209   : > { %14607 = vst [vmem:[#allocation80_spill] sm:$0xff] %v12140_v47  ;;  %1957 = vmatmul.bf16.gmra.mxu0 %v11809_v56  ;;  %2055 = vmatmul.bf16.gmra.mxu2 %v11809_v56  ;;  %v1909_v2 = vpop.f32.mrf.mxu3  ;;  %v9238_v56 = vld [vmem:[#allocation4 + $0x280] sm:$0xf] }
 0x20a   : > { %v9239_v62 = vor.u32 %v10799_v57, %v9238_v56 }
 0x20b   : > { %v1813_v29 = vpop.f32.mrf.mxu1 }
 0x20c   : > { %v1860_v49 = vpop.f32.mrf.mxu2  ;;  %2824 = vmatpush.bf16.msra.mxu1 %v9239_v62 }
 0x20d   : > { %v12146_v9 = vadd.f32 %v1909_v2, %v1860_v49  ;;  %v8955_v49 = vor.u32 %v10723_v7, %v8952_v48  ;;  %v9208_v2 = vld [vmem:[#allocation4 + $0x260] sm:$0xf0] }
 0x20e   : > { %v1764_v15 = vpop.f32.mrf.mxu0  ;;  %v9211_v56 = vor.u32 %v10787_v14, %v9208_v2  ;;  %v8920_v14 = vld [vmem:[#allocation4 + $0x20] sm:$0xf0]  ;;  %v8918_v2 = vld [vmem:[#allocation4] sm:$0xf] }
 0x20f   : > { %14608 = vst [vmem:[#allocation81_spill] sm:$0xff] %v12146_v9  ;;  %v12148_v38 = vadd.f32 %v1813_v29, %v1764_v15  ;;  %v8951_v29 = vor.u32 %v10727_v63, %v8950_v20  ;;  %2874 = vmatpush.bf16.msra.mxu2 %v8955_v49  ;;  %v10715_v49 = vld [vmem:[#allocation4 + $0x4] sm:$0xf]  ;;  %v216_v9 = vld [vmem:[#allocation2 + $0x98] sm:$0xff] }
 0x210   : > { %2923 = vmatpush.bf16.msra.mxu3 %v9211_v56  ;;  %v10779_v56 = vld [vmem:[#allocation4 + $0x204] sm:$0xf] }
 0x211   : > { %14609 = vst [vmem:[#allocation82_spill] sm:$0xff] %v12148_v38  ;;  %v1911_v4 = vpop.f32.mrf.mxu3  ;;  %2776 = vmatpush.bf16.msra.mxu0 %v8951_v29  ;;  %v10719_v29 = vld [vmem:[#allocation4 + $0x1c] sm:$0xf0]  ;;  %v214_v38 = vld [vmem:[#allocation2 + $0x88] sm:$0xff] }
 0x213   : > { %v1816_v30 = vpop.f32.mrf.mxu1 }
 0x214   : > { %v1862_v17 = vpop.f32.mrf.mxu2 }
 0x215   : > { %v12150_v55 = vadd.f32 %v1911_v4, %v1862_v17 }
 0x216   : > { %v1767_v47 = vpop.f32.mrf.mxu0  ;;  %2011 = vmatmul.bf16.gmra.mxu1 %v11838_v36  ;;  %2109 = vmatmul.bf16.gmra.mxu3 %v11838_v36  ;;  %v10791_v36 = vld [vmem:[#allocation4 + $0x25c] sm:$0xf0] }
 0x217   : > { %14610 = vst [vmem:[#allocation83_spill] sm:$0xff] %v12150_v55  ;;  %v12152_v34 = vadd.f32 %v1816_v30, %v1767_v47 }
 0x219   : > { %14611 = vst [vmem:[#allocation84_spill] sm:$0xff] %v12152_v34  ;;  %1962 = vmatmul.bf16.gmra.mxu0 %v11835_v35  ;;  %2060 = vmatmul.bf16.gmra.mxu2 %v11835_v35  ;;  %v1914_v47 = vpop.f32.mrf.mxu3  ;;  %v9206_v35 = vld [vmem:[#allocation4 + $0x240] sm:$0xf] }
 0x21a   : > { %v9207_v30 = vor.u32 %v10791_v36, %v9206_v35 }
 0x21b   : > { %v1818_v17 = vpop.f32.mrf.mxu1 }
 0x21c   : > { %v1865_v15 = vpop.f32.mrf.mxu2  ;;  %2825 = vmatpush.bf16.msra.mxu1 %v9207_v30 }
 0x21d   : > { %v12158_v62 = vadd.f32 %v1914_v47, %v1865_v15  ;;  %v8923_v15 = vor.u32 %v10715_v49, %v8920_v14  ;;  %v9176_v47 = vld [vmem:[#allocation4 + $0x220] sm:$0xf0] }
 0x21e   : > { %v1769_v57 = vpop.f32.mrf.mxu0  ;;  %v9179_v35 = vor.u32 %v10779_v56, %v9176_v47  ;;  %v9152_v56 = vld [vmem:[#allocation4 + $0x1e8] sm:$0xf0]  ;;  %v9150_v47 = vld [vmem:[#allocation4 + $0x1c8] sm:$0xf] }
 0x21f   : > { %14612 = vst [vmem:[#allocation85_spill] sm:$0xff] %v12158_v62  ;;  %v12160_v4 = vadd.f32 %v1818_v17, %v1769_v57  ;;  %v8919_v17 = vor.u32 %v10719_v29, %v8918_v2  ;;  %2875 = vmatpush.bf16.msra.mxu2 %v8923_v15  ;;  %v10772_v15 = vld [vmem:[#allocation4 + $0x1cc] sm:$0xf] }
 0x220   : > { %2924 = vmatpush.bf16.msra.mxu3 %v9179_v35  ;;  %v10836_v35 = vld [vmem:[#allocation4 + $0x3cc] sm:$0xf] }
 0x221   : > { %14613 = vst [vmem:[#allocation86_spill] sm:$0xff] %v12160_v4  ;;  %v1916_v48 = vpop.f32.mrf.mxu3  ;;  %2777 = vmatpush.bf16.msra.mxu0 %v8919_v17  ;;  %v10776_v17 = vld [vmem:[#allocation4 + $0x1e4] sm:$0xf0]  ;;  %v210_v4 = vld [vmem:[#allocation2 + $0x68] sm:$0xff] }
 0x222   : > { %v212_v62 = vld [vmem:[#allocation2 + $0x78] sm:$0xff] }
 0x223   : > { %v1821_v20 = vpop.f32.mrf.mxu1 }
 0x224   : > { %v1867_v7 = vpop.f32.mrf.mxu2 }
 0x225   : > { %v12162_v55 = vadd.f32 %v1916_v48, %v1867_v7 }
 0x226   : > { %v1772_v34 = vpop.f32.mrf.mxu0  ;;  %2016 = vmatmul.bf16.gmra.mxu1 %v11864_v52  ;;  %2114 = vmatmul.bf16.gmra.mxu3 %v11864_v52  ;;  %v10783_v52 = vld [vmem:[#allocation4 + $0x21c] sm:$0xf0] }
 0x227   : > { %14614 = vst [vmem:[#allocation87_spill] sm:$0xff] %v12162_v55  ;;  %v12164_v63 = vadd.f32 %v1821_v20, %v1772_v34 }
 0x229   : > { %14615 = vst [vmem:[#allocation88_spill] sm:$0xff] %v12164_v63  ;;  %1967 = vmatmul.bf16.gmra.mxu0 %v11861_v50  ;;  %2065 = vmatmul.bf16.gmra.mxu2 %v11861_v50  ;;  %v1919_v34 = vpop.f32.mrf.mxu3  ;;  %v9174_v50 = vld [vmem:[#allocation4 + $0x200] sm:$0xf] }
 0x22a   : > { %v9175_v20 = vor.u32 %v10783_v52, %v9174_v50 }
 0x22b   : > { %v1823_v7 = vpop.f32.mrf.mxu1 }
 0x22c   : > { %v1870_v57 = vpop.f32.mrf.mxu2  ;;  %2826 = vmatpush.bf16.msra.mxu1 %v9175_v20 }
 0x22d   : > { %v12170_v30 = vadd.f32 %v1919_v34, %v1870_v57  ;;  %v9155_v57 = vor.u32 %v10772_v15, %v9152_v56  ;;  %v9408_v34 = vld [vmem:[#allocation4 + $0x3e8] sm:$0xf0] }
 0x22e   : > { %v1774_v36 = vpop.f32.mrf.mxu0  ;;  %v9411_v50 = vor.u32 %v10836_v35, %v9408_v34  ;;  %v9120_v35 = vld [vmem:[#allocation4 + $0x1a8] sm:$0xf0]  ;;  %v9118_v34 = vld [vmem:[#allocation4 + $0x188] sm:$0xf] }
 0x22f   : > { %14616 = vst [vmem:[#allocation89_spill] sm:$0xff] %v12170_v30  ;;  %v12172_v48 = vadd.f32 %v1823_v7, %v1774_v36  ;;  %v9151_v7 = vor.u32 %v10776_v17, %v9150_v47  ;;  %3064 = vmatpush.bf16.msrb.mxu2 %v9155_v57  ;;  %v10764_v57 = vld [vmem:[#allocation4 + $0x18c] sm:$0xf] }
 0x230   : > { %3113 = vmatpush.bf16.msrb.mxu3 %v9411_v50  ;;  %v10828_v50 = vld [vmem:[#allocation4 + $0x38c] sm:$0xf] }
 0x231   : > { %14617 = vst [vmem:[#allocation90_spill] sm:$0xff] %v12172_v48  ;;  %v1921_v14 = vpop.f32.mrf.mxu3  ;;  %2966 = vmatpush.bf16.msrb.mxu0 %v9151_v7  ;;  %v10768_v7 = vld [vmem:[#allocation4 + $0x1a4] sm:$0xf0]  ;;  %v206_v48 = vld [vmem:[#allocation2 + $0x48] sm:$0xff] }
 0x232   : > { %v208_v30 = vld [vmem:[#allocation2 + $0x58] sm:$0xff] }
 0x233   : > { %v1826_v2 = vpop.f32.mrf.mxu1 }
 0x234   : > { %v1872_v49 = vpop.f32.mrf.mxu2 }
 0x235   : > { %v12174_v55 = vadd.f32 %v1921_v14, %v1872_v49 }
 0x236   : > { %v1777_v63 = vpop.f32.mrf.mxu0  ;;  %2021 = vmatmul.bf16.gmra.mxu1 %v11890_v10  ;;  %2119 = vmatmul.bf16.gmra.mxu3 %v11890_v10  ;;  %v10840_v10 = vld [vmem:[#allocation4 + $0x3e4] sm:$0xf0] }
 0x237   : > { %14618 = vst [vmem:[#allocation91_spill] sm:$0xff] %v12174_v55  ;;  %v12176_v29 = vadd.f32 %v1826_v2, %v1777_v63 }
 0x239   : > { %14619 = vst [vmem:[#allocation92_spill] sm:$0xff] %v12176_v29  ;;  %1972 = vmatmul.bf16.gmra.mxu0 %v11887_v25  ;;  %2070 = vmatmul.bf16.gmra.mxu2 %v11887_v25  ;;  %v1924_v63 = vpop.f32.mrf.mxu3  ;;  %v9406_v25 = vld [vmem:[#allocation4 + $0x3c8] sm:$0xf] }
 0x23a   : > { %v9407_v2 = vor.u32 %v10840_v10, %v9406_v25 }
 0x23b   : > { %v1828_v49 = vpop.f32.mrf.mxu1 }
 0x23c   : > { %v1875_v36 = vpop.f32.mrf.mxu2  ;;  %3015 = vmatpush.bf16.msrb.mxu1 %v9407_v2 }
 0x23d   : > { %v12182_v20 = vadd.f32 %v1924_v63, %v1875_v36  ;;  %v9123_v36 = vor.u32 %v10764_v57, %v9120_v35  ;;  %v9376_v63 = vld [vmem:[#allocation4 + $0x3a8] sm:$0xf0]  ;;  %v197_v57 = vld [vmem:[#allocation2] sm:$0xff]  ;;  %v199_v35 = vld [vmem:[#allocation2 + $0x10] sm:$0xff] }
 0x23e   : > { %v1779_v52 = vpop.f32.mrf.mxu0  ;;  %v9379_v25 = vor.u32 %v10828_v50, %v9376_v63 }
 0x23f   : > { %14620 = vst [vmem:[#allocation93_spill] sm:$0xff] %v12182_v20  ;;  %v12184_v14 = vadd.f32 %v1828_v49, %v1779_v52  ;;  %v9119_v49 = vor.u32 %v10768_v7, %v9118_v34  ;;  %3065 = vmatpush.bf16.msrb.mxu2 %v9123_v36  ;;  %v12198_v7 = vpack.c.bf16 %v199_v35, %v197_v57  ;;  %v204_v20 = vld [vmem:[#allocation2 + $0x38] sm:$0xff] }
 0x240   : > { %3114 = vmatpush.bf16.msrb.mxu3 %v9379_v25 }
 0x241   : > { %14621 = vst [vmem:[#allocation94_spill] sm:$0xff] %v12184_v14  ;;  %v1926_v56 = vpop.f32.mrf.mxu3  ;;  %2967 = vmatpush.bf16.msrb.mxu0 %v9119_v49  ;;  %v202_v14 = vld [vmem:[#allocation2 + $0x28] sm:$0xff] }
 0x243   : > { %v1831_v47 = vpop.f32.mrf.mxu1 }
 0x244   : > { %v1877_v15 = vpop.f32.mrf.mxu2 }
 0x245   : > { %v12186_v55 = vadd.f32 %v1926_v56, %v1877_v15 }
 0x246   : > { %v1782_v29 = vpop.f32.mrf.mxu0  ;;  %2026 = vmatmul.bf16.gmra.mxu1 %v11906_v59  ;;  %2124 = vmatmul.bf16.gmra.mxu3 %v11906_v59  ;;  %v10832_v59 = vld [vmem:[#allocation4 + $0x3a4] sm:$0xf0] }
 0x247   : > { %14622 = vst [vmem:[#allocation95_spill] sm:$0xff] %v12186_v55  ;;  %v12188_v17 = vadd.f32 %v1831_v47, %v1782_v29  ;;  %v200_v55 = vld [vmem:[#allocation2 + $0x18] sm:$0xff] }
 0x249   : > { %14623 = vst [vmem:[#allocation96_spill] sm:$0xff] %v12188_v17  ;;  %1977 = vmatmul.bf16.gmra.mxu0 %v11903_v31  ;;  %2075 = vmatmul.bf16.gmra.mxu2 %v11903_v31  ;;  %v1929_v29 = vpop.f32.mrf.mxu3  ;;  %v9374_v31 = vld [vmem:[#allocation4 + $0x388] sm:$0xf]  ;;  %v198_v17 = vld [vmem:[#allocation2 + $0x8] sm:$0xff] }
 0x24a   : > { %v9375_v47 = vor.u32 %v10832_v59, %v9374_v31  ;;  %v12200_v63 = vpack.c.bf16 %v200_v55, %v198_v17  ;;  %v10760_v59 = vld [vmem:[#allocation4 + $0x164] sm:$0xf0]  ;;  %v10820_v55 = vld [vmem:[#allocation4 + $0x34c] sm:$0xf] }
 0x24b   : > { %v1833_v15 = vpop.f32.mrf.mxu1  ;;  %v9344_v17 = vld [vmem:[#allocation4 + $0x368] sm:$0xf0] }
 0x24c   : > { %v1880_v52 = vpop.f32.mrf.mxu2  ;;  %3016 = vmatpush.bf16.msrb.mxu1 %v9375_v47  ;;  %v9347_v35 = vor.u32 %v10820_v55, %v9344_v17  ;;  %v12216_v17 = vpack.c.bf16 %v204_v20, %v202_v14  ;;  %v10812_v20 = vld [vmem:[#allocation4 + $0x30c] sm:$0xf] }
 0x24d   : > { %v12194_v2 = vadd.f32 %v1929_v29, %v1880_v52  ;;  %v10756_v29 = vld [vmem:[#allocation4 + $0x14c] sm:$0xf] }
 0x24e   : > { %v1784_v10 = vpop.f32.mrf.mxu0  ;;  %3115 = vmatpush.bf16.msrb.mxu3 %v9347_v35  ;;  %v9312_v14 = vld [vmem:[#allocation4 + $0x328] sm:$0xf0] }
 0x24f   : > { %14624 = vst [vmem:[#allocation97_spill] sm:$0xff] %v12194_v2  ;;  %v12196_v56 = vadd.f32 %v1833_v15, %v1784_v10  ;;  %v9088_v10 = vld [vmem:[#allocation4 + $0x168] sm:$0xf0]  ;;  %v9086_v15 = vld [vmem:[#allocation4 + $0x148] sm:$0xf] }
 0x250   : > { %v9091_v31 = vor.u32 %v10756_v29, %v9088_v10  ;;  %v9087_v57 = vor.u32 %v10760_v59, %v9086_v15  ;;  %v201_v29 = vld [vmem:[#allocation2 + $0x20] sm:$0xff]  ;;  %v203_v10 = vld [vmem:[#allocation2 + $0x30] sm:$0xff] }
 0x251   : > { %14625 = vst [vmem:[#allocation98_spill] sm:$0xff] %v12196_v56  ;;  %v1931_v50 = vpop.f32.mrf.mxu3  ;;  %v12214_v59 = vpack.c.bf16 %v203_v10, %v201_v29  ;;  %v9315_v10 = vor.u32 %v10812_v20, %v9312_v14  ;;  %v12232_v14 = vpack.c.bf16 %v208_v30, %v206_v48  ;;  %v10804_v30 = vld [vmem:[#allocation4 + $0x2cc] sm:$0xf] }
 0x252   : > { %3066 = vmatpush.bf16.msrb.mxu2 %v9091_v31  ;;  %2968 = vmatpush.bf16.msrb.mxu0 %v9087_v57  ;;  %v9280_v48 = vld [vmem:[#allocation4 + $0x2e8] sm:$0xf0] }
 0x253   : > { %v1992_v49 = vpop.f32.mrf.mxu1  ;;  %3116 = vmatpush.bf16.msrb.mxu3 %v9315_v10 }
 0x254   : > { %v1882_v34 = vpop.f32.mrf.mxu2 }
 0x255   : > { %v12202_v52 = vadd.f32 %v1931_v50, %v1882_v34 }
 0x256   : > { %v1943_v36 = vpop.f32.mrf.mxu0  ;;  %2827 = vmatmul.bf16.vlgmr.msra.gmra.mxu1 %v12200_v63  ;;  %2925 = vmatmul.bf16.vlgmr.msra.gmra.mxu3 %v12200_v63 }
 0x257   : > { %14626 = vst [vmem:[#allocation99_spill] sm:$0xff] %v12202_v52  ;;  %v12204_v25 = vadd.f32 %v1992_v49, %v1943_v36  ;;  %v10824_v52 = vld [vmem:[#allocation4 + $0x364] sm:$0xf0] }
 0x259   : > { %14627 = vst [vmem:[#allocation100_spill] sm:$0xff] %v12204_v25  ;;  %2778 = vmatmul.bf16.vlgmr.msra.gmra.mxu0 %v12198_v7  ;;  %2876 = vmatmul.bf16.vlgmr.msra.gmra.mxu2 %v12198_v7  ;;  %v2090_v34 = vpop.f32.mrf.mxu3  ;;  %v9342_v25 = vld [vmem:[#allocation4 + $0x348] sm:$0xf] }
 0x25a   : > { %v9343_v2 = vor.u32 %v10824_v52, %v9342_v25  ;;  %v9056_v52 = vld [vmem:[#allocation4 + $0x128] sm:$0xf0]  ;;  %v9054_v25 = vld [vmem:[#allocation4 + $0x108] sm:$0xf] }
 0x25b   : > { %v1994_v49 = vpop.f32.mrf.mxu1 }
 0x25c   : > { %v2041_v47 = vpop.f32.mrf.mxu2  ;;  %3017 = vmatpush.bf16.msrb.mxu1 %v9343_v2  ;;  %v10748_v2 = vld [vmem:[#allocation4 + $0x10c] sm:$0xf] }
 0x25d   : > { %v12210_v36 = vadd.f32 %v2090_v34, %v2041_v47  ;;  %v9059_v34 = vor.u32 %v10748_v2, %v9056_v52  ;;  %v205_v2 = vld [vmem:[#allocation2 + $0x40] sm:$0xff]  ;;  %v207_v52 = vld [vmem:[#allocation2 + $0x50] sm:$0xff] }
 0x25e   : > { %v1945_v50 = vpop.f32.mrf.mxu0 }
 0x25f   : > { %14628 = vst [vmem:[#allocation101_spill] sm:$0xff] %v12210_v36  ;;  %v12212_v56 = vadd.f32 %v1994_v49, %v1945_v50  ;;  %v10752_v50 = vld [vmem:[#allocation4 + $0x124] sm:$0xf0]  ;;  %3067 = vmatpush.bf16.msrb.mxu2 %v9059_v34 }
 0x260   : > { %v9055_v29 = vor.u32 %v10752_v50, %v9054_v25  ;;  %v12230_v50 = vpack.c.bf16 %v207_v52, %v205_v2  ;;  %v9283_v52 = vor.u32 %v10804_v30, %v9280_v48  ;;  %v12248_v48 = vpack.c.bf16 %v212_v62, %v210_v4  ;;  %v10796_v62 = vld [vmem:[#allocation4 + $0x28c] sm:$0xf] }
 0x261   : > { %14629 = vst [vmem:[#allocation102_spill] sm:$0xff] %v12212_v56  ;;  %v2092_v55 = vpop.f32.mrf.mxu3  ;;  %v9248_v4 = vld [vmem:[#allocation4 + $0x2a8] sm:$0xf0] }
 0x262   : > { %2969 = vmatpush.bf16.msrb.mxu0 %v9055_v29  ;;  %3117 = vmatpush.bf16.msrb.mxu3 %v9283_v52 }
 0x263   : > { %v1997_v57 = vpop.f32.mrf.mxu1 }
 0x264   : > { %v2043_v15 = vpop.f32.mrf.mxu2 }
 0x265   : > { %v12218_v47 = vadd.f32 %v2092_v55, %v2043_v15 }
 0x266   : > { %v1948_v31 = vpop.f32.mrf.mxu0  ;;  %2832 = vmatmul.bf16.gmra.mxu1 %v12216_v17  ;;  %2930 = vmatmul.bf16.gmra.mxu3 %v12216_v17 }
 0x267   : > { %14630 = vst [vmem:[#allocation103_spill] sm:$0xff] %v12218_v47  ;;  %v12220_v35 = vadd.f32 %v1997_v57, %v1948_v31  ;;  %v10816_v47 = vld [vmem:[#allocation4 + $0x324] sm:$0xf0] }
 0x269   : > { %14631 = vst [vmem:[#allocation104_spill] sm:$0xff] %v12220_v35  ;;  %2783 = vmatmul.bf16.gmra.mxu0 %v12214_v59  ;;  %2881 = vmatmul.bf16.gmra.mxu2 %v12214_v59  ;;  %v2095_v15 = vpop.f32.mrf.mxu3  ;;  %v9310_v35 = vld [vmem:[#allocation4 + $0x308] sm:$0xf] }
 0x26a   : > { %v9311_v36 = vor.u32 %v10816_v47, %v9310_v35  ;;  %v9024_v47 = vld [vmem:[#allocation4 + $0xe8] sm:$0xf0]  ;;  %v9022_v35 = vld [vmem:[#allocation4 + $0xc8] sm:$0xf] }
 0x26b   : > { %v1999_v57 = vpop.f32.mrf.mxu1 }
 0x26c   : > { %v2046_v49 = vpop.f32.mrf.mxu2  ;;  %3018 = vmatpush.bf16.msrb.mxu1 %v9311_v36  ;;  %v10740_v36 = vld [vmem:[#allocation4 + $0xcc] sm:$0xf] }
 0x26d   : > { %v12226_v31 = vadd.f32 %v2095_v15, %v2046_v49  ;;  %v9027_v15 = vor.u32 %v10740_v36, %v9024_v47  ;;  %v209_v36 = vld [vmem:[#allocation2 + $0x60] sm:$0xff]  ;;  %v211_v47 = vld [vmem:[#allocation2 + $0x70] sm:$0xff] }
 0x26e   : > { %v1950_v55 = vpop.f32.mrf.mxu0 }
 0x26f   : > { %14632 = vst [vmem:[#allocation105_spill] sm:$0xff] %v12226_v31  ;;  %v12228_v56 = vadd.f32 %v1999_v57, %v1950_v55  ;;  %v10744_v55 = vld [vmem:[#allocation4 + $0xe4] sm:$0xf0]  ;;  %3068 = vmatpush.bf16.msrb.mxu2 %v9027_v15 }
 0x270   : > { %v9023_v2 = vor.u32 %v10744_v55, %v9022_v35  ;;  %v12246_v55 = vpack.c.bf16 %v211_v47, %v209_v36  ;;  %v9251_v47 = vor.u32 %v10796_v62, %v9248_v4  ;;  %v12264_v4 = vpack.c.bf16 %v216_v9, %v214_v38  ;;  %v10788_v9 = vld [vmem:[#allocation4 + $0x24c] sm:$0xf] }
 0x271   : > { %14633 = vst [vmem:[#allocation106_spill] sm:$0xff] %v12228_v56  ;;  %v2097_v20 = vpop.f32.mrf.mxu3  ;;  %v9216_v38 = vld [vmem:[#allocation4 + $0x268] sm:$0xf0] }
 0x272   : > { %2970 = vmatpush.bf16.msrb.mxu0 %v9023_v2  ;;  %3118 = vmatpush.bf16.msrb.mxu3 %v9251_v47 }
 0x273   : > { %v2002_v29 = vpop.f32.mrf.mxu1 }
 0x274   : > { %v2048_v25 = vpop.f32.mrf.mxu2 }
 0x275   : > { %v12234_v49 = vadd.f32 %v2097_v20, %v2048_v25 }
 0x276   : > { %v1953_v34 = vpop.f32.mrf.mxu0  ;;  %2837 = vmatmul.bf16.gmra.mxu1 %v12232_v14  ;;  %2935 = vmatmul.bf16.gmra.mxu3 %v12232_v14 }
 0x277   : > { %14634 = vst [vmem:[#allocation107_spill] sm:$0xff] %v12234_v49  ;;  %v12236_v10 = vadd.f32 %v2002_v29, %v1953_v34  ;;  %v10808_v49 = vld [vmem:[#allocation4 + $0x2e4] sm:$0xf0] }
 0x279   : > { %14635 = vst [vmem:[#allocation108_spill] sm:$0xff] %v12236_v10  ;;  %2788 = vmatmul.bf16.gmra.mxu0 %v12230_v50  ;;  %2886 = vmatmul.bf16.gmra.mxu2 %v12230_v50  ;;  %v2100_v25 = vpop.f32.mrf.mxu3  ;;  %v9278_v10 = vld [vmem:[#allocation4 + $0x2c8] sm:$0xf] }
 0x27a   : > { %v9279_v31 = vor.u32 %v10808_v49, %v9278_v10  ;;  %v8992_v49 = vld [vmem:[#allocation4 + $0xa8] sm:$0xf0]  ;;  %v8990_v10 = vld [vmem:[#allocation4 + $0x88] sm:$0xf] }
 0x27b   : > { %v2004_v29 = vpop.f32.mrf.mxu1 }
 0x27c   : > { %v2051_v57 = vpop.f32.mrf.mxu2  ;;  %3019 = vmatpush.bf16.msrb.mxu1 %v9279_v31  ;;  %v10732_v31 = vld [vmem:[#allocation4 + $0x8c] sm:$0xf] }
 0x27d   : > { %v12242_v34 = vadd.f32 %v2100_v25, %v2051_v57  ;;  %v8995_v25 = vor.u32 %v10732_v31, %v8992_v49  ;;  %v213_v31 = vld [vmem:[#allocation2 + $0x80] sm:$0xff]  ;;  %v215_v49 = vld [vmem:[#allocation2 + $0x90] sm:$0xff] }
 0x27e   : > { %v1955_v20 = vpop.f32.mrf.mxu0 }
 0x27f   : > { %14636 = vst [vmem:[#allocation109_spill] sm:$0xff] %v12242_v34  ;;  %v12244_v56 = vadd.f32 %v2004_v29, %v1955_v20  ;;  %v10736_v20 = vld [vmem:[#allocation4 + $0xa4] sm:$0xf0]  ;;  %3069 = vmatpush.bf16.msrb.mxu2 %v8995_v25 }
 0x280   : > { %v8991_v36 = vor.u32 %v10736_v20, %v8990_v10  ;;  %v12262_v20 = vpack.c.bf16 %v215_v49, %v213_v31  ;;  %v9219_v49 = vor.u32 %v10788_v9, %v9216_v38  ;;  %v12280_v38 = vpack.c.bf16 %v220_v46, %v218_v6  ;;  %v10780_v46 = vld [vmem:[#allocation4 + $0x20c] sm:$0xf] }
 0x281   : > { %14637 = vst [vmem:[#allocation110_spill] sm:$0xff] %v12244_v56  ;;  %v2102_v30 = vpop.f32.mrf.mxu3  ;;  %v9184_v6 = vld [vmem:[#allocation4 + $0x228] sm:$0xf0] }
 0x282   : > { %2971 = vmatpush.bf16.msrb.mxu0 %v8991_v36  ;;  %3119 = vmatpush.bf16.msrb.mxu3 %v9219_v49 }
 0x283   : > { %v2007_v2 = vpop.f32.mrf.mxu1 }
 0x284   : > { %v2053_v35 = vpop.f32.mrf.mxu2 }
 0x285   : > { %v12250_v57 = vadd.f32 %v2102_v30, %v2053_v35 }
 0x286   : > { %v1958_v15 = vpop.f32.mrf.mxu0  ;;  %2842 = vmatmul.bf16.gmra.mxu1 %v12248_v48  ;;  %2940 = vmatmul.bf16.gmra.mxu3 %v12248_v48 }
 0x287   : > { %14638 = vst [vmem:[#allocation111_spill] sm:$0xff] %v12250_v57  ;;  %v12252_v52 = vadd.f32 %v2007_v2, %v1958_v15  ;;  %v10800_v57 = vld [vmem:[#allocation4 + $0x2a4] sm:$0xf0] }
 0x289   : > { %14639 = vst [vmem:[#allocation112_spill] sm:$0xff] %v12252_v52  ;;  %2793 = vmatmul.bf16.gmra.mxu0 %v12246_v55  ;;  %2891 = vmatmul.bf16.gmra.mxu2 %v12246_v55  ;;  %v2105_v35 = vpop.f32.mrf.mxu3  ;;  %v9246_v52 = vld [vmem:[#allocation4 + $0x288] sm:$0xf] }
 0x28a   : > { %v9247_v34 = vor.u32 %v10800_v57, %v9246_v52  ;;  %v8960_v57 = vld [vmem:[#allocation4 + $0x68] sm:$0xf0]  ;;  %v8958_v52 = vld [vmem:[#allocation4 + $0x48] sm:$0xf] }
 0x28b   : > { %v2009_v2 = vpop.f32.mrf.mxu1 }
 0x28c   : > { %v2056_v29 = vpop.f32.mrf.mxu2  ;;  %3020 = vmatpush.bf16.msrb.mxu1 %v9247_v34  ;;  %v10724_v34 = vld [vmem:[#allocation4 + $0x4c] sm:$0xf] }
 0x28d   : > { %v12258_v15 = vadd.f32 %v2105_v35, %v2056_v29  ;;  %v8963_v35 = vor.u32 %v10724_v34, %v8960_v57  ;;  %v217_v34 = vld [vmem:[#allocation2 + $0xa0] sm:$0xff]  ;;  %v219_v57 = vld [vmem:[#allocation2 + $0xb0] sm:$0xff] }
 0x28e   : > { %v1960_v30 = vpop.f32.mrf.mxu0 }
 0x28f   : > { %14640 = vst [vmem:[#allocation113_spill] sm:$0xff] %v12258_v15  ;;  %v12260_v56 = vadd.f32 %v2009_v2, %v1960_v30  ;;  %v10728_v30 = vld [vmem:[#allocation4 + $0x64] sm:$0xf0]  ;;  %3070 = vmatpush.bf16.msrb.mxu2 %v8963_v35 }
 0x290   : > { %v8959_v31 = vor.u32 %v10728_v30, %v8958_v52  ;;  %v12278_v30 = vpack.c.bf16 %v219_v57, %v217_v34  ;;  %v9187_v57 = vor.u32 %v10780_v46, %v9184_v6  ;;  %v12296_v6 = vpack.c.bf16 %v224_v58, %v222_v1  ;;  %v10837_v58 = vld [vmem:[#allocation4 + $0x3d4] sm:$0xf] }
 0x291   : > { %14641 = vst [vmem:[#allocation114_spill] sm:$0xff] %v12260_v56  ;;  %v2107_v62 = vpop.f32.mrf.mxu3  ;;  %v9416_v1 = vld [vmem:[#allocation4 + $0x3f0] sm:$0xf0] }
 0x292   : > { %2972 = vmatpush.bf16.msrb.mxu0 %v8959_v31  ;;  %3120 = vmatpush.bf16.msrb.mxu3 %v9187_v57 }
 0x293   : > { %v2012_v36 = vpop.f32.mrf.mxu1 }
 0x294   : > { %v2058_v10 = vpop.f32.mrf.mxu2 }
 0x295   : > { %v12266_v29 = vadd.f32 %v2107_v62, %v2058_v10 }
 0x296   : > { %v1963_v25 = vpop.f32.mrf.mxu0  ;;  %2847 = vmatmul.bf16.gmra.mxu1 %v12264_v4  ;;  %2945 = vmatmul.bf16.gmra.mxu3 %v12264_v4 }
 0x297   : > { %14642 = vst [vmem:[#allocation115_spill] sm:$0xff] %v12266_v29  ;;  %v12268_v47 = vadd.f32 %v2012_v36, %v1963_v25  ;;  %v10792_v29 = vld [vmem:[#allocation4 + $0x264] sm:$0xf0] }
 0x299   : > { %14643 = vst [vmem:[#allocation116_spill] sm:$0xff] %v12268_v47  ;;  %2798 = vmatmul.bf16.gmra.mxu0 %v12262_v20  ;;  %2896 = vmatmul.bf16.gmra.mxu2 %v12262_v20  ;;  %v2110_v10 = vpop.f32.mrf.mxu3  ;;  %v9214_v47 = vld [vmem:[#allocation4 + $0x248] sm:$0xf] }
 0x29a   : > { %v9215_v15 = vor.u32 %v10792_v29, %v9214_v47  ;;  %v8928_v29 = vld [vmem:[#allocation4 + $0x28] sm:$0xf0]  ;;  %v8926_v47 = vld [vmem:[#allocation4 + $0x8] sm:$0xf] }
 0x29b   : > { %v2014_v36 = vpop.f32.mrf.mxu1 }
 0x29c   : > { %v2061_v2 = vpop.f32.mrf.mxu2  ;;  %3021 = vmatpush.bf16.msrb.mxu1 %v9215_v15  ;;  %v10716_v15 = vld [vmem:[#allocation4 + $0xc] sm:$0xf] }
 0x29d   : > { %v12274_v25 = vadd.f32 %v2110_v10, %v2061_v2  ;;  %v8931_v10 = vor.u32 %v10716_v15, %v8928_v29  ;;  %v221_v15 = vld [vmem:[#allocation2 + $0xc0] sm:$0xff]  ;;  %v223_v29 = vld [vmem:[#allocation2 + $0xd0] sm:$0xff] }
 0x29e   : > { %v1965_v62 = vpop.f32.mrf.mxu0 }
 0x29f   : > { %14644 = vst [vmem:[#allocation117_spill] sm:$0xff] %v12274_v25  ;;  %v12276_v56 = vadd.f32 %v2014_v36, %v1965_v62  ;;  %v10720_v62 = vld [vmem:[#allocation4 + $0x24] sm:$0xf0]  ;;  %3071 = vmatpush.bf16.msrb.mxu2 %v8931_v10 }
 0x2a0   : > { %v8927_v34 = vor.u32 %v10720_v62, %v8926_v47  ;;  %v12294_v62 = vpack.c.bf16 %v223_v29, %v221_v15  ;;  %v9419_v29 = vor.u32 %v10837_v58, %v9416_v1  ;;  %v12312_v1 = vpack.c.bf16 %v228_v37, %v226_v27  ;;  %v10829_v37 = vld [vmem:[#allocation4 + $0x394] sm:$0xf] }
 0x2a1   : > { %14645 = vst [vmem:[#allocation118_spill] sm:$0xff] %v12276_v56  ;;  %v2112_v9 = vpop.f32.mrf.mxu3  ;;  %v9384_v27 = vld [vmem:[#allocation4 + $0x3b0] sm:$0xf0] }
 0x2a2   : > { %2973 = vmatpush.bf16.msrb.mxu0 %v8927_v34  ;;  %3309 = vmatpush.bf16.msra.mxu3 %v9419_v29 }
 0x2a3   : > { %v2017_v31 = vpop.f32.mrf.mxu1 }
 0x2a4   : > { %v2063_v52 = vpop.f32.mrf.mxu2 }
 0x2a5   : > { %v12282_v2 = vadd.f32 %v2112_v9, %v2063_v52 }
 0x2a6   : > { %v1968_v35 = vpop.f32.mrf.mxu0  ;;  %2852 = vmatmul.bf16.gmra.mxu1 %v12280_v38  ;;  %2950 = vmatmul.bf16.gmra.mxu3 %v12280_v38 }
 0x2a7   : > { %14646 = vst [vmem:[#allocation119_spill] sm:$0xff] %v12282_v2  ;;  %v12284_v49 = vadd.f32 %v2017_v31, %v1968_v35  ;;  %v10784_v2 = vld [vmem:[#allocation4 + $0x224] sm:$0xf0] }
 0x2a9   : > { %14647 = vst [vmem:[#allocation120_spill] sm:$0xff] %v12284_v49  ;;  %2803 = vmatmul.bf16.gmra.mxu0 %v12278_v30  ;;  %2901 = vmatmul.bf16.gmra.mxu2 %v12278_v30  ;;  %v2115_v52 = vpop.f32.mrf.mxu3  ;;  %v9182_v49 = vld [vmem:[#allocation4 + $0x208] sm:$0xf] }
 0x2aa   : > { %v9183_v25 = vor.u32 %v10784_v2, %v9182_v49  ;;  %v9160_v2 = vld [vmem:[#allocation4 + $0x1f0] sm:$0xf0]  ;;  %v9158_v49 = vld [vmem:[#allocation4 + $0x1d0] sm:$0xf] }
 0x2ab   : > { %v2019_v31 = vpop.f32.mrf.mxu1 }
 0x2ac   : > { %v2066_v36 = vpop.f32.mrf.mxu2  ;;  %3022 = vmatpush.bf16.msrb.mxu1 %v9183_v25  ;;  %v10773_v25 = vld [vmem:[#allocation4 + $0x1d4] sm:$0xf] }
 0x2ad   : > { %v12290_v35 = vadd.f32 %v2115_v52, %v2066_v36  ;;  %v9163_v52 = vor.u32 %v10773_v25, %v9160_v2  ;;  %v225_v25 = vld [vmem:[#allocation2 + $0xe0] sm:$0xff]  ;;  %v227_v2 = vld [vmem:[#allocation2 + $0xf0] sm:$0xff] }
 0x2ae   : > { %v1970_v9 = vpop.f32.mrf.mxu0 }
 0x2af   : > { %14648 = vst [vmem:[#allocation121_spill] sm:$0xff] %v12290_v35  ;;  %v12292_v56 = vadd.f32 %v2019_v31, %v1970_v9  ;;  %v10777_v9 = vld [vmem:[#allocation4 + $0x1ec] sm:$0xf0]  ;;  %3260 = vmatpush.bf16.msra.mxu2 %v9163_v52 }
 0x2b0   : > { %v9159_v15 = vor.u32 %v10777_v9, %v9158_v49  ;;  %v12310_v9 = vpack.c.bf16 %v227_v2, %v225_v25  ;;  %v9387_v2 = vor.u32 %v10829_v37, %v9384_v27  ;;  %v10761_v27 = vld [vmem:[#allocation4 + $0x16c] sm:$0xf0] }
 0x2b1   : > { %14649 = vst [vmem:[#allocation122_spill] sm:$0xff] %v12292_v56  ;;  %v2117_v46 = vpop.f32.mrf.mxu3  ;;  %v10841_v56 = vld [vmem:[#allocation4 + $0x3ec] sm:$0xf0] }
 0x2b2   : > { %3162 = vmatpush.bf16.msra.mxu0 %v9159_v15  ;;  %3310 = vmatpush.bf16.msra.mxu3 %v9387_v2 }
 0x2b3   : > { %v2022_v34 = vpop.f32.mrf.mxu1 }
 0x2b4   : > { %v2068_v47 = vpop.f32.mrf.mxu2 }
 0x2b5   : > { %v12298_v36 = vadd.f32 %v2117_v46, %v2068_v47 }
 0x2b6   : > { %v1973_v10 = vpop.f32.mrf.mxu0  ;;  %2857 = vmatmul.bf16.gmra.mxu1 %v12296_v6  ;;  %2955 = vmatmul.bf16.gmra.mxu3 %v12296_v6 }
 0x2b7   : > { %14650 = vst [vmem:[#allocation123_spill] sm:$0xff] %v12298_v36  ;;  %v12300_v57 = vadd.f32 %v2022_v34, %v1973_v10  ;;  %v9414_v36 = vld [vmem:[#allocation4 + $0x3d0] sm:$0xf] }
 0x2b8   : > { %v9415_v35 = vor.u32 %v10841_v56, %v9414_v36  ;;  %v10765_v56 = vld [vmem:[#allocation4 + $0x194] sm:$0xf]  ;;  %v9126_v36 = vld [vmem:[#allocation4 + $0x190] sm:$0xf] }
 0x2b9   : > { %14651 = vst [vmem:[#allocation124_spill] sm:$0xff] %v12300_v57  ;;  %2808 = vmatmul.bf16.gmra.mxu0 %v12294_v62  ;;  %2906 = vmatmul.bf16.gmra.mxu2 %v12294_v62  ;;  %v2120_v47 = vpop.f32.mrf.mxu3 }
 0x2ba   : > { %3211 = vmatpush.bf16.msra.mxu1 %v9415_v35  ;;  %v9128_v35 = vld [vmem:[#allocation4 + $0x1b0] sm:$0xf0] }
 0x2bb   : > { %v2024_v34 = vpop.f32.mrf.mxu1 }
 0x2bc   : > { %v2071_v31 = vpop.f32.mrf.mxu2 }
 0x2bd   : > { %v12306_v10 = vadd.f32 %v2120_v47, %v2071_v31  ;;  %v9131_v47 = vor.u32 %v10765_v56, %v9128_v35 }
 0x2be   : > { %v1975_v46 = vpop.f32.mrf.mxu0 }
 0x2bf   : > { %14652 = vst [vmem:[#allocation125_spill] sm:$0xff] %v12306_v10  ;;  %v12308_v57 = vadd.f32 %v2024_v34, %v1975_v46  ;;  %v10769_v46 = vld [vmem:[#allocation4 + $0x1ac] sm:$0xf0]  ;;  %3261 = vmatpush.bf16.msra.mxu2 %v9131_v47 }
 0x2c0   : > { %v9127_v25 = vor.u32 %v10769_v46, %v9126_v36 }
 0x2c1   : > { %14653 = vst [vmem:[#allocation126_spill] sm:$0xff] %v12308_v57  ;;  %v2122_v58 = vpop.f32.mrf.mxu3  ;;  %v10833_v57 = vld [vmem:[#allocation4 + $0x3ac] sm:$0xf0] }
 0x2c2   : > { %3163 = vmatpush.bf16.msra.mxu0 %v9127_v25  ;;  %v9352_v25 = vld [vmem:[#allocation4 + $0x370] sm:$0xf0] }
 0x2c3   : > { %v2027_v15 = vpop.f32.mrf.mxu1 }
 0x2c4   : > { %v2073_v49 = vpop.f32.mrf.mxu2 }
 0x2c5   : > { %v12314_v31 = vadd.f32 %v2122_v58, %v2073_v49 }
 0x2c6   : > { %v1978_v52 = vpop.f32.mrf.mxu0  ;;  %2862 = vmatmul.bf16.gmra.mxu1 %v12312_v1  ;;  %2960 = vmatmul.bf16.gmra.mxu3 %v12312_v1 }
 0x2c7   : > { %14654 = vst [vmem:[#allocation127_spill] sm:$0xff] %v12314_v31  ;;  %v12316_v29 = vadd.f32 %v2027_v15, %v1978_v52  ;;  %v9382_v31 = vld [vmem:[#allocation4 + $0x390] sm:$0xf] }
 0x2c8   : > { %v9383_v10 = vor.u32 %v10833_v57, %v9382_v31  ;;  %v10757_v57 = vld [vmem:[#allocation4 + $0x154] sm:$0xf]  ;;  %v9094_v31 = vld [vmem:[#allocation4 + $0x150] sm:$0xf] }
 0x2c9   : > { %14655 = vst [vmem:[#allocation128_spill] sm:$0xff] %v12316_v29  ;;  %2813 = vmatmul.bf16.gmra.mxu0 %v12310_v9  ;;  %2911 = vmatmul.bf16.gmra.mxu2 %v12310_v9  ;;  %v2125_v49 = vpop.f32.mrf.mxu3 }
 0x2ca   : > { %3212 = vmatpush.bf16.msra.mxu1 %v9383_v10  ;;  %v9096_v10 = vld [vmem:[#allocation4 + $0x170] sm:$0xf0] }
 0x2cb   : > { %v2029_v15 = vpop.f32.mrf.mxu1  ;;  %v9099_v37 = vor.u32 %v10757_v57, %v9096_v10  ;;  %v10825_v57 = vld [vmem:[#allocation4 + $0x36c] sm:$0xf0] }
 0x2cc   : > { %v2076_v34 = vpop.f32.mrf.mxu2 }
 0x2cd   : > { %v12322_v52 = vadd.f32 %v2125_v49, %v2076_v34  ;;  %v10821_v34 = vld [vmem:[#allocation4 + $0x354] sm:$0xf]  ;;  %3262 = vmatpush.bf16.msra.mxu2 %v9099_v37 }
 0x2ce   : > { %v1980_v58 = vpop.f32.mrf.mxu0 }
 0x2cf   : > { %v12324_v29 = vadd.f32 %v2029_v15, %v1980_v58 }
 0x2d1   : > { %v2127_v35 = vpop.f32.mrf.mxu3 }
 0x2d3   : > { %v2828_v46 = vpop.f32.mrf.mxu1 }
 0x2d4   : > { %v2078_v56 = vpop.f32.mrf.mxu2 }
 0x2d5   : > { %v12326_v39 = vadd.f32 %v2127_v35, %v2078_v56 }
 0x2d6   : > { %v2779_v54 = vpop.f32.mrf.mxu0  ;;  %3023 = vmatmul.bf16.vlgmr.msrb.gmra.mxu1 %v12200_v63  ;;  %3121 = vmatmul.bf16.vlgmr.msrb.gmra.mxu3 %v12200_v63 }
 0x2d7   : > { %v2780_v36 = vadd.f32 %v2779_v54, %v11912_v61  ;;  %v9095_v61 = vor.u32 %v10761_v27, %v9094_v31  ;;  %v9355_v54 = vor.u32 %v10821_v34, %v9352_v25 }
 0x2d9   : > { %v12329_v47 = vadd.f32 %v2828_v46, %v2780_v36  ;;  %2974 = vmatmul.bf16.vlgmr.msrb.gmra.mxu0 %v12198_v7  ;;  %3072 = vmatmul.bf16.vlgmr.msrb.gmra.mxu2 %v12198_v7  ;;  %v2926_v58 = vpop.f32.mrf.mxu3  ;;  %v9350_v46 = vld [vmem:[#allocation4 + $0x350] sm:$0xf] }
 0x2da   : > { %3164 = vmatpush.bf16.msra.mxu0 %v9095_v61  ;;  %3311 = vmatpush.bf16.msra.mxu3 %v9355_v54  ;;  %v9064_v61 = vld [vmem:[#allocation4 + $0x130] sm:$0xf0] }
 0x2db   : > { %14656 = vst [vmem:[#allocation129_spill] sm:$0xff] %v12329_v47  ;;  %v2830_v35 = vpop.f32.mrf.mxu1  ;;  %v9351_v47 = vor.u32 %v10825_v57, %v9350_v46 }
 0x2dc   : > { %v2877_v2 = vpop.f32.mrf.mxu2 }
 0x2dd   : > { %v2878_v49 = vadd.f32 %v2877_v2, %v11918_v12  ;;  %3213 = vmatpush.bf16.msra.mxu1 %v9351_v47  ;;  %v10749_v47 = vld [vmem:[#allocation4 + $0x114] sm:$0xf] }
 0x2de   : > { %v2781_v15 = vpop.f32.mrf.mxu0  ;;  %v9067_v54 = vor.u32 %v10749_v47, %v9064_v61 }
 0x2df   : > { %v2782_v56 = vadd.f32 %v2781_v15, %v11920_v16  ;;  %v12337_v36 = vadd.f32 %v2926_v58, %v2878_v49  ;;  %v10753_v49 = vld [vmem:[#allocation4 + $0x12c] sm:$0xf0]  ;;  %v10813_v58 = vld [vmem:[#allocation4 + $0x314] sm:$0xf] }
 0x2e0   : > { %3263 = vmatpush.bf16.msra.mxu2 %v9067_v54 }
 0x2e1   : > { %v12339_v10 = vadd.f32 %v2830_v35, %v2782_v56  ;;  %v2928_v12 = vpop.f32.mrf.mxu3 }
 0x2e3   : > { %v2833_v25 = vpop.f32.mrf.mxu1 }
 0x2e4   : > { %v2879_v31 = vpop.f32.mrf.mxu2 }
 0x2e5   : > { %v2880_v27 = vadd.f32 %v2879_v31, %v11922_v43  ;;  %v9062_v43 = vld [vmem:[#allocation4 + $0x110] sm:$0xf] }
 0x2e6   : > { %v2784_v34 = vpop.f32.mrf.mxu0  ;;  %3028 = vmatmul.bf16.gmra.mxu1 %v12216_v17  ;;  %3126 = vmatmul.bf16.gmra.mxu3 %v12216_v17  ;;  %v9063_v56 = vor.u32 %v10753_v49, %v9062_v43 }
 0x2e7   : > { %v2785_v37 = vadd.f32 %v2784_v34, %v11924_v60  ;;  %v12343_v16 = vadd.f32 %v2928_v12, %v2880_v27  ;;  %v9320_v60 = vld [vmem:[#allocation4 + $0x330] sm:$0xf0] }
 0x2e8   : > { %v9323_v35 = vor.u32 %v10813_v58, %v9320_v60  ;;  %3165 = vmatpush.bf16.msra.mxu0 %v9063_v56  ;;  %v10741_v56 = vld [vmem:[#allocation4 + $0xd4] sm:$0xf] }
 0x2e9   : > { %v12345_v2 = vadd.f32 %v2833_v25, %v2785_v37  ;;  %2979 = vmatmul.bf16.gmra.mxu0 %v12214_v59  ;;  %3077 = vmatmul.bf16.gmra.mxu2 %v12214_v59  ;;  %v2931_v57 = vpop.f32.mrf.mxu3  ;;  %v9318_v37 = vld [vmem:[#allocation4 + $0x310] sm:$0xf] }
 0x2ea   : > { %3312 = vmatpush.bf16.msra.mxu3 %v9323_v35  ;;  %v10817_v25 = vld [vmem:[#allocation4 + $0x32c] sm:$0xf0]  ;;  %v9032_v35 = vld [vmem:[#allocation4 + $0xf0] sm:$0xf0] }
 0x2eb   : > { %v2835_v12 = vpop.f32.mrf.mxu1  ;;  %v9319_v61 = vor.u32 %v10817_v25, %v9318_v37 }
 0x2ec   : > { %v2882_v15 = vpop.f32.mrf.mxu2 }
 0x2ed   : > { %v2883_v46 = vadd.f32 %v2882_v15, %v11930_v28  ;;  %3214 = vmatpush.bf16.msra.mxu1 %v9319_v61 }
 0x2ee   : > { %v2786_v31 = vpop.f32.mrf.mxu0 }
 0x2ef   : > { %v2787_v27 = vadd.f32 %v2786_v31, %v11932_v19  ;;  %v12353_v34 = vadd.f32 %v2931_v57, %v2883_v46  ;;  %v9035_v46 = vor.u32 %v10741_v56, %v9032_v35  ;;  %v10745_v57 = vld [vmem:[#allocation4 + $0xec] sm:$0xf0]  ;;  %v10805_v31 = vld [vmem:[#allocation4 + $0x2d4] sm:$0xf] }
 0x2f1   : > { %v12355_v47 = vadd.f32 %v2835_v12, %v2787_v27  ;;  %v2933_v28 = vpop.f32.mrf.mxu3  ;;  %3264 = vmatpush.bf16.msra.mxu2 %v9035_v46 }
 0x2f3   : > { %v2838_v60 = vpop.f32.mrf.mxu1 }
 0x2f4   : > { %v2884_v43 = vpop.f32.mrf.mxu2 }
 0x2f5   : > { %v2885_v49 = vadd.f32 %v2884_v43, %v11934_v5  ;;  %v9030_v5 = vld [vmem:[#allocation4 + $0xd0] sm:$0xf] }
 0x2f6   : > { %v2789_v58 = vpop.f32.mrf.mxu0  ;;  %3033 = vmatmul.bf16.gmra.mxu1 %v12232_v14  ;;  %3131 = vmatmul.bf16.gmra.mxu3 %v12232_v14  ;;  %v9031_v12 = vor.u32 %v10745_v57, %v9030_v5 }
 0x2f7   : > { %v2790_v54 = vadd.f32 %v2789_v58, %v11936_v24  ;;  %v12359_v19 = vadd.f32 %v2933_v28, %v2885_v49  ;;  %v9288_v24 = vld [vmem:[#allocation4 + $0x2f0] sm:$0xf0] }
 0x2f8   : > { %v9291_v37 = vor.u32 %v10805_v31, %v9288_v24  ;;  %3166 = vmatpush.bf16.msra.mxu0 %v9031_v12  ;;  %v10733_v12 = vld [vmem:[#allocation4 + $0x94] sm:$0xf] }
 0x2f9   : > { %v12361_v15 = vadd.f32 %v2838_v60, %v2790_v54  ;;  %2984 = vmatmul.bf16.gmra.mxu0 %v12230_v50  ;;  %3082 = vmatmul.bf16.gmra.mxu2 %v12230_v50  ;;  %v2936_v61 = vpop.f32.mrf.mxu3  ;;  %v9286_v54 = vld [vmem:[#allocation4 + $0x2d0] sm:$0xf] }
 0x2fa   : > { %3313 = vmatpush.bf16.msra.mxu3 %v9291_v37  ;;  %v10809_v60 = vld [vmem:[#allocation4 + $0x2ec] sm:$0xf0]  ;;  %v9000_v37 = vld [vmem:[#allocation4 + $0xb0] sm:$0xf0] }
 0x2fb   : > { %v2840_v28 = vpop.f32.mrf.mxu1  ;;  %v9287_v35 = vor.u32 %v10809_v60, %v9286_v54 }
 0x2fc   : > { %v2887_v27 = vpop.f32.mrf.mxu2 }
 0x2fd   : > { %v2888_v25 = vadd.f32 %v2887_v27, %v11942_v13  ;;  %3215 = vmatpush.bf16.msra.mxu1 %v9287_v35 }
 0x2fe   : > { %v2791_v43 = vpop.f32.mrf.mxu0 }
 0x2ff   : > { %v2792_v49 = vadd.f32 %v2791_v43, %v11944_v41  ;;  %v12369_v58 = vadd.f32 %v2936_v61, %v2888_v25  ;;  %v9003_v25 = vor.u32 %v10733_v12, %v9000_v37  ;;  %v10737_v61 = vld [vmem:[#allocation4 + $0xac] sm:$0xf0]  ;;  %v10797_v43 = vld [vmem:[#allocation4 + $0x294] sm:$0xf] }
 0x301   : > { %v12371_v56 = vadd.f32 %v2840_v28, %v2792_v49  ;;  %v2938_v13 = vpop.f32.mrf.mxu3  ;;  %3265 = vmatpush.bf16.msra.mxu2 %v9003_v25 }
 0x303   : > { %v2843_v24 = vpop.f32.mrf.mxu1 }
 0x304   : > { %v2889_v5 = vpop.f32.mrf.mxu2 }
 0x305   : > { %v2890_v57 = vadd.f32 %v2889_v5, %v11946_v33  ;;  %v8998_v33 = vld [vmem:[#allocation4 + $0x90] sm:$0xf] }
 0x306   : > { %v2794_v31 = vpop.f32.mrf.mxu0  ;;  %3038 = vmatmul.bf16.gmra.mxu1 %v12248_v48  ;;  %3136 = vmatmul.bf16.gmra.mxu3 %v12248_v48  ;;  %v8999_v28 = vor.u32 %v10737_v61, %v8998_v33 }
 0x307   : > { %v2795_v46 = vadd.f32 %v2794_v31, %v11948_v0  ;;  %v12375_v41 = vadd.f32 %v2938_v13, %v2890_v57  ;;  %v9256_v0 = vld [vmem:[#allocation4 + $0x2b0] sm:$0xf0] }
 0x308   : > { %v9259_v54 = vor.u32 %v10797_v43, %v9256_v0  ;;  %3167 = vmatpush.bf16.msra.mxu0 %v8999_v28  ;;  %v10725_v28 = vld [vmem:[#allocation4 + $0x54] sm:$0xf] }
 0x309   : > { %v12377_v27 = vadd.f32 %v2843_v24, %v2795_v46  ;;  %2989 = vmatmul.bf16.gmra.mxu0 %v12246_v55  ;;  %3087 = vmatmul.bf16.gmra.mxu2 %v12246_v55  ;;  %v2941_v35 = vpop.f32.mrf.mxu3  ;;  %v9254_v46 = vld [vmem:[#allocation4 + $0x290] sm:$0xf] }
 0x30a   : > { %3314 = vmatpush.bf16.msra.mxu3 %v9259_v54  ;;  %v10801_v24 = vld [vmem:[#allocation4 + $0x2ac] sm:$0xf0]  ;;  %v8968_v54 = vld [vmem:[#allocation4 + $0x70] sm:$0xf0] }
 0x30b   : > { %v2845_v13 = vpop.f32.mrf.mxu1  ;;  %v9255_v37 = vor.u32 %v10801_v24, %v9254_v46 }
 0x30c   : > { %v2892_v49 = vpop.f32.mrf.mxu2 }
 0x30d   : > { %v2893_v60 = vadd.f32 %v2892_v49, %v11954_v18  ;;  %3216 = vmatpush.bf16.msra.mxu1 %v9255_v37 }
 0x30e   : > { %v2796_v5 = vpop.f32.mrf.mxu0 }
 0x30f   : > { %v2797_v57 = vadd.f32 %v2796_v5, %v11956_v3  ;;  %v12385_v31 = vadd.f32 %v2941_v35, %v2893_v60  ;;  %v8971_v60 = vor.u32 %v10725_v28, %v8968_v54  ;;  %v10729_v35 = vld [vmem:[#allocation4 + $0x6c] sm:$0xf0]  ;;  %v10789_v5 = vld [vmem:[#allocation4 + $0x254] sm:$0xf] }
 0x311   : > { %v12387_v12 = vadd.f32 %v2845_v13, %v2797_v57  ;;  %v2943_v18 = vpop.f32.mrf.mxu3  ;;  %3266 = vmatpush.bf16.msra.mxu2 %v8971_v60 }
 0x313   : > { %v2848_v0 = vpop.f32.mrf.mxu1 }
 0x314   : > { %v2894_v33 = vpop.f32.mrf.mxu2 }
 0x315   : > { %v2895_v61 = vadd.f32 %v2894_v33, %v11958_v42  ;;  %v8966_v42 = vld [vmem:[#allocation4 + $0x50] sm:$0xf] }
 0x316   : > { %v2799_v43 = vpop.f32.mrf.mxu0  ;;  %3043 = vmatmul.bf16.gmra.mxu1 %v12264_v4  ;;  %3141 = vmatmul.bf16.gmra.mxu3 %v12264_v4  ;;  %v8967_v13 = vor.u32 %v10729_v35, %v8966_v42 }
 0x317   : > { %v2800_v25 = vadd.f32 %v2799_v43, %v11960_v26  ;;  %v12391_v3 = vadd.f32 %v2943_v18, %v2895_v61  ;;  %v9224_v26 = vld [vmem:[#allocation4 + $0x270] sm:$0xf0] }
 0x318   : > { %v9227_v46 = vor.u32 %v10789_v5, %v9224_v26  ;;  %3168 = vmatpush.bf16.msra.mxu0 %v8967_v13  ;;  %v10717_v13 = vld [vmem:[#allocation4 + $0x14] sm:$0xf] }
 0x319   : > { %v12393_v49 = vadd.f32 %v2848_v0, %v2800_v25  ;;  %2994 = vmatmul.bf16.gmra.mxu0 %v12262_v20  ;;  %3092 = vmatmul.bf16.gmra.mxu2 %v12262_v20  ;;  %v2946_v37 = vpop.f32.mrf.mxu3  ;;  %v9222_v25 = vld [vmem:[#allocation4 + $0x250] sm:$0xf] }
 0x31a   : > { %3315 = vmatpush.bf16.msra.mxu3 %v9227_v46  ;;  %v10793_v0 = vld [vmem:[#allocation4 + $0x26c] sm:$0xf0]  ;;  %v8936_v46 = vld [vmem:[#allocation4 + $0x30] sm:$0xf0] }
 0x31b   : > { %v2850_v18 = vpop.f32.mrf.mxu1  ;;  %v9223_v54 = vor.u32 %v10793_v0, %v9222_v25 }
 0x31c   : > { %v2897_v57 = vpop.f32.mrf.mxu2 }
 0x31d   : > { %v2898_v24 = vadd.f32 %v2897_v57, %v11966_v44  ;;  %3217 = vmatpush.bf16.msra.mxu1 %v9223_v54 }
 0x31e   : > { %v2801_v33 = vpop.f32.mrf.mxu0 }
 0x31f   : > { %v2802_v61 = vadd.f32 %v2801_v33, %v11968_v32  ;;  %v12401_v43 = vadd.f32 %v2946_v37, %v2898_v24  ;;  %v8939_v24 = vor.u32 %v10717_v13, %v8936_v46  ;;  %v10721_v37 = vld [vmem:[#allocation4 + $0x2c] sm:$0xf0]  ;;  %v10781_v33 = vld [vmem:[#allocation4 + $0x214] sm:$0xf] }
 0x321   : > { %v12403_v28 = vadd.f32 %v2850_v18, %v2802_v61  ;;  %v2948_v44 = vpop.f32.mrf.mxu3  ;;  %3267 = vmatpush.bf16.msra.mxu2 %v8939_v24 }
 0x323   : > { %v2853_v26 = vpop.f32.mrf.mxu1 }
 0x324   : > { %v2899_v42 = vpop.f32.mrf.mxu2 }
 0x325   : > { %v2900_v35 = vadd.f32 %v2899_v42, %v11970_v53  ;;  %v8934_v53 = vld [vmem:[#allocation4 + $0x10] sm:$0xf] }
 0x326   : > { %v2804_v5 = vpop.f32.mrf.mxu0  ;;  %3048 = vmatmul.bf16.gmra.mxu1 %v12280_v38  ;;  %3146 = vmatmul.bf16.gmra.mxu3 %v12280_v38  ;;  %v8935_v18 = vor.u32 %v10721_v37, %v8934_v53 }
 0x327   : > { %v2805_v60 = vadd.f32 %v2804_v5, %v11972_v45  ;;  %v12407_v32 = vadd.f32 %v2948_v44, %v2900_v35  ;;  %v9192_v45 = vld [vmem:[#allocation4 + $0x230] sm:$0xf0] }
 0x328   : > { %v9195_v25 = vor.u32 %v10781_v33, %v9192_v45  ;;  %3169 = vmatpush.bf16.msra.mxu0 %v8935_v18  ;;  %v10774_v18 = vld [vmem:[#allocation4 + $0x1dc] sm:$0xf] }
 0x329   : > { %v12409_v57 = vadd.f32 %v2853_v26, %v2805_v60  ;;  %2999 = vmatmul.bf16.gmra.mxu0 %v12278_v30  ;;  %3097 = vmatmul.bf16.gmra.mxu2 %v12278_v30  ;;  %v2951_v54 = vpop.f32.mrf.mxu3  ;;  %v9190_v60 = vld [vmem:[#allocation4 + $0x210] sm:$0xf] }
 0x32a   : > { %3316 = vmatpush.bf16.msra.mxu3 %v9195_v25  ;;  %v10785_v26 = vld [vmem:[#allocation4 + $0x22c] sm:$0xf0]  ;;  %v9168_v25 = vld [vmem:[#allocation4 + $0x1f8] sm:$0xf0] }
 0x32b   : > { %v2855_v44 = vpop.f32.mrf.mxu1  ;;  %v9191_v46 = vor.u32 %v10785_v26, %v9190_v60 }
 0x32c   : > { %v2902_v61 = vpop.f32.mrf.mxu2 }
 0x32d   : > { %v2903_v0 = vadd.f32 %v2902_v61, %v11978_v11  ;;  %3218 = vmatpush.bf16.msra.mxu1 %v9191_v46 }
 0x32e   : > { %v2806_v42 = vpop.f32.mrf.mxu0 }
 0x32f   : > { %v2807_v35 = vadd.f32 %v2806_v42, %v11980_v51  ;;  %v12417_v5 = vadd.f32 %v2951_v54, %v2903_v0  ;;  %v9171_v0 = vor.u32 %v10774_v18, %v9168_v25  ;;  %v10778_v54 = vld [vmem:[#allocation4 + $0x1f4] sm:$0xf0]  ;;  %v10838_v42 = vld [vmem:[#allocation4 + $0x3dc] sm:$0xf] }
 0x331   : > { %v12419_v13 = vadd.f32 %v2855_v44, %v2807_v35  ;;  %v2953_v11 = vpop.f32.mrf.mxu3  ;;  %3456 = vmatpush.bf16.msrb.mxu2 %v9171_v0 }
 0x333   : > { %v2858_v45 = vpop.f32.mrf.mxu1 }
 0x334   : > { %v2904_v53 = vpop.f32.mrf.mxu2 }
 0x335   : > { %v2905_v37 = vadd.f32 %v2904_v53, %v11982_v23  ;;  %v9166_v23 = vld [vmem:[#allocation4 + $0x1d8] sm:$0xf] }
 0x336   : > { %v2809_v33 = vpop.f32.mrf.mxu0  ;;  %3053 = vmatmul.bf16.gmra.mxu1 %v12296_v6  ;;  %3151 = vmatmul.bf16.gmra.mxu3 %v12296_v6  ;;  %v9167_v44 = vor.u32 %v10778_v54, %v9166_v23 }
 0x337   : > { %v2810_v24 = vadd.f32 %v2809_v33, %v11984_v8  ;;  %v12423_v51 = vadd.f32 %v2953_v11, %v2905_v37  ;;  %v9424_v8 = vld [vmem:[#allocation4 + $0x3f8] sm:$0xf0] }
 0x338   : > { %v9427_v60 = vor.u32 %v10838_v42, %v9424_v8  ;;  %3358 = vmatpush.bf16.msrb.mxu0 %v9167_v44  ;;  %v14660_v8 = vld [vmem:[#allocation32_spill] sm:$0xff] }
 0x339   : > { %v12425_v61 = vadd.f32 %v2858_v45, %v2810_v24  ;;  %3004 = vmatmul.bf16.gmra.mxu0 %v12294_v62  ;;  %3102 = vmatmul.bf16.gmra.mxu2 %v12294_v62  ;;  %v2956_v46 = vpop.f32.mrf.mxu3  ;;  %v9422_v24 = vld [vmem:[#allocation4 + $0x3d8] sm:$0xf] }
 0x33a   : > { %3505 = vmatpush.bf16.msrb.mxu3 %v9427_v60  ;;  %v10842_v45 = vld [vmem:[#allocation4 + $0x3f4] sm:$0xf0]  ;;  %v10766_v60 = vld [vmem:[#allocation4 + $0x19c] sm:$0xf] }
 0x33b   : > { %14657 = vst [vmem:[#allocation130_spill] sm:$0xff] %v12425_v61  ;;  %v2860_v11 = vpop.f32.mrf.mxu1  ;;  %v9423_v25 = vor.u32 %v10842_v45, %v9422_v24  ;;  %v11097_v61 = vld [vmem:[#allocation4 + $0xbec] sm:$0xf0] }
 0x33c   : > { %v2907_v35 = vpop.f32.mrf.mxu2 }
 0x33d   : > { %v2908_v26 = vadd.f32 %v2907_v35, %v11990_v40  ;;  %3407 = vmatpush.bf16.msrb.mxu1 %v9423_v25 }
 0x33e   : > { %v2811_v53 = vpop.f32.mrf.mxu0 }
 0x33f   : > { %v2812_v37 = vadd.f32 %v2811_v53, %v11992_v22  ;;  %v12433_v33 = vadd.f32 %v2956_v46, %v2908_v26  ;;  %v9136_v26 = vld [vmem:[#allocation4 + $0x1b8] sm:$0xf0]  ;;  %v10770_v53 = vld [vmem:[#allocation4 + $0x1b4] sm:$0xf0] }
 0x340   : > { %v9139_v46 = vor.u32 %v10766_v60, %v9136_v26  ;;  %v10834_v60 = vld [vmem:[#allocation4 + $0x3b4] sm:$0xf0] }
 0x341   : > { %14658 = vst [vmem:[#allocation131_spill] sm:$0xff] %v12433_v33  ;;  %v12435_v18 = vadd.f32 %v2860_v11, %v2812_v37  ;;  %v2958_v40 = vpop.f32.mrf.mxu3  ;;  %v10830_v37 = vld [vmem:[#allocation4 + $0x39c] sm:$0xf] }
 0x342   : > { %v9392_v11 = vld [vmem:[#allocation4 + $0x3b8] sm:$0xf0]  ;;  %3457 = vmatpush.bf16.msrb.mxu2 %v9139_v46 }
 0x343   : > { %14659 = vst [vmem:[#allocation132_spill] sm:$0xff] %v12435_v18  ;;  %v2863_v35 = vpop.f32.mrf.mxu1  ;;  %v9395_v25 = vor.u32 %v10830_v37, %v9392_v11 }
 0x344   : > { %v2909_v23 = vpop.f32.mrf.mxu2 }
 0x345   : > { %v2910_v54 = vadd.f32 %v2909_v23, %v11994_v21  ;;  %v9134_v21 = vld [vmem:[#allocation4 + $0x198] sm:$0xf]  ;;  %3506 = vmatpush.bf16.msrb.mxu3 %v9395_v25 }
 0x346   : > { %v2814_v42 = vpop.f32.mrf.mxu0  ;;  %3058 = vmatmul.bf16.gmra.mxu1 %v12312_v1  ;;  %3156 = vmatmul.bf16.gmra.mxu3 %v12312_v1  ;;  %v9135_v45 = vor.u32 %v10770_v53, %v9134_v21  ;;  %v14663_v23 = vld [vmem:[#allocation33_spill] sm:$0xff]  ;;  %v14667_v53 = vld [vmem:[#allocation35_spill] sm:$0xff] }
 0x347   : > { %v2815_v0 = vadd.f32 %v2814_v42, %v14660_v8  ;;  %v12439_v22 = vadd.f32 %v2958_v40, %v2910_v54  ;;  %v14664_v8 = vld [vmem:[#allocation34_spill] sm:$0xff]  ;;  %v9102_v25 = vld [vmem:[#allocation4 + $0x158] sm:$0xf] }
 0x348   : > { %3359 = vmatpush.bf16.msrb.mxu0 %v9135_v45 }
 0x349   : > { %14661 = vst [vmem:[#allocation32_spill] sm:$0xff] %v12439_v22  ;;  %v12441_v44 = vadd.f32 %v2863_v35, %v2815_v0  ;;  %3009 = vmatmul.bf16.gmra.mxu0 %v12310_v9  ;;  %3107 = vmatmul.bf16.gmra.mxu2 %v12310_v9  ;;  %v2961_v40 = vpop.f32.mrf.mxu3  ;;  %v9390_v22 = vld [vmem:[#allocation4 + $0x398] sm:$0xf] }
 0x34a   : > { %v9391_v18 = vor.u32 %v10834_v60, %v9390_v22  ;;  %v9104_v22 = vld [vmem:[#allocation4 + $0x178] sm:$0xf0] }
 0x34b   : > { %14662 = vst [vmem:[#allocation133_spill] sm:$0xff] %v12441_v44  ;;  %v2865_v35 = vpop.f32.mrf.mxu1 }
 0x34c   : > { %v2912_v24 = vpop.f32.mrf.mxu2  ;;  %3408 = vmatpush.bf16.msrb.mxu1 %v9391_v18  ;;  %v10758_v18 = vld [vmem:[#allocation4 + $0x15c] sm:$0xf] }
 0x34d   : > { %v2913_v54 = vadd.f32 %v2912_v24, %v14663_v23  ;;  %v14668_v23 = vld [vmem:[#allocation36_spill] sm:$0xff] }
 0x34e   : > { %v2816_v42 = vpop.f32.mrf.mxu0 }
 0x34f   : > { %v2817_v0 = vadd.f32 %v2816_v42, %v14664_v8  ;;  %v12449_v44 = vadd.f32 %v2961_v40, %v2913_v54  ;;  %v9107_v54 = vor.u32 %v10758_v18, %v9104_v22  ;;  %v10762_v40 = vld [vmem:[#allocation4 + $0x174] sm:$0xf0]  ;;  %v10822_v8 = vld [vmem:[#allocation4 + $0x35c] sm:$0xf] }
 0x350   : > { %v9103_v60 = vor.u32 %v10762_v40, %v9102_v25  ;;  %v10826_v18 = vld [vmem:[#allocation4 + $0x374] sm:$0xf0]  ;;  %v14675_v40 = vld [vmem:[#allocation39_spill] sm:$0xff] }
 0x351   : > { %14665 = vst [vmem:[#allocation33_spill] sm:$0xff] %v12449_v44  ;;  %v12451_v26 = vadd.f32 %v2865_v35, %v2817_v0  ;;  %v2963_v11 = vpop.f32.mrf.mxu3  ;;  %v9360_v0 = vld [vmem:[#allocation4 + $0x378] sm:$0xf0]  ;;  %3458 = vmatpush.bf16.msrb.mxu2 %v9107_v54 }
 0x352   : > { %3360 = vmatpush.bf16.msrb.mxu0 %v9103_v60 }
 0x353   : > { %14666 = vst [vmem:[#allocation34_spill] sm:$0xff] %v12451_v26  ;;  %v3024_v33 = vpop.f32.mrf.mxu1 }
 0x354   : > { %v2914_v21 = vpop.f32.mrf.mxu2 }
 0x355   : > { %v2915_v37 = vadd.f32 %v2914_v21, %v14667_v53  ;;  %v9363_v21 = vor.u32 %v10822_v8, %v9360_v0 }
 0x356   : > { %v2975_v24 = vpop.f32.mrf.mxu0  ;;  %3219 = vmatmul.bf16.vlgmr.msra.gmra.mxu1 %v12200_v63  ;;  %3317 = vmatmul.bf16.vlgmr.msra.gmra.mxu3 %v12200_v63 }
 0x357   : > { %v2976_v46 = vadd.f32 %v2975_v24, %v14668_v23  ;;  %v12455_v42 = vadd.f32 %v2963_v11, %v2915_v37  ;;  %v14672_v24 = vld [vmem:[#allocation38_spill] sm:$0xff]  ;;  %3507 = vmatpush.bf16.msrb.mxu3 %v9363_v21  ;;  %v9070_v21 = vld [vmem:[#allocation4 + $0x118] sm:$0xf] }
 0x359   : > { %14669 = vst [vmem:[#allocation35_spill] sm:$0xff] %v12455_v42  ;;  %v12457_v45 = vadd.f32 %v3024_v33, %v2976_v46  ;;  %3170 = vmatmul.bf16.vlgmr.msra.gmra.mxu0 %v12198_v7  ;;  %3268 = vmatmul.bf16.vlgmr.msra.gmra.mxu2 %v12198_v7  ;;  %v14671_v33 = vld [vmem:[#allocation37_spill] sm:$0xff]  ;;  %v3122_v37 = vpop.f32.mrf.mxu3 }
 0x35a   : > { %v9358_v42 = vld [vmem:[#allocation4 + $0x358] sm:$0xf] }
 0x35b   : > { %14670 = vst [vmem:[#allocation36_spill] sm:$0xff] %v12457_v45  ;;  %v3026_v46 = vpop.f32.mrf.mxu1  ;;  %v9359_v26 = vor.u32 %v10826_v18, %v9358_v42  ;;  %v9072_v42 = vld [vmem:[#allocation4 + $0x138] sm:$0xf0] }
 0x35c   : > { %v3073_v35 = vpop.f32.mrf.mxu2 }
 0x35d   : > { %v3074_v53 = vadd.f32 %v3073_v35, %v14671_v33  ;;  %3409 = vmatpush.bf16.msrb.mxu1 %v9359_v26  ;;  %v14676_v33 = vld [vmem:[#allocation40_spill] sm:$0xff]  ;;  %v10750_v26 = vld [vmem:[#allocation4 + $0x11c] sm:$0xf] }
 0x35e   : > { %v2977_v11 = vpop.f32.mrf.mxu0 }
 0x35f   : > { %v2978_v23 = vadd.f32 %v2977_v11, %v14672_v24  ;;  %v12465_v45 = vadd.f32 %v3122_v37, %v3074_v53  ;;  %v9075_v53 = vor.u32 %v10750_v26, %v9072_v42  ;;  %v10754_v37 = vld [vmem:[#allocation4 + $0x134] sm:$0xf0]  ;;  %v10814_v24 = vld [vmem:[#allocation4 + $0x31c] sm:$0xf] }
 0x360   : > { %v9071_v18 = vor.u32 %v10754_v37, %v9070_v21  ;;  %v10818_v26 = vld [vmem:[#allocation4 + $0x334] sm:$0xf0]  ;;  %v14683_v37 = vld [vmem:[#allocation43_spill] sm:$0xff] }
 0x361   : > { %14673 = vst [vmem:[#allocation37_spill] sm:$0xff] %v12465_v45  ;;  %v12467_v22 = vadd.f32 %v3026_v46, %v2978_v23  ;;  %v3124_v0 = vpop.f32.mrf.mxu3  ;;  %v9328_v23 = vld [vmem:[#allocation4 + $0x338] sm:$0xf0]  ;;  %3459 = vmatpush.bf16.msrb.mxu2 %v9075_v53 }
 0x362   : > { %3361 = vmatpush.bf16.msrb.mxu0 %v9071_v18 }
 0x363   : > { %14674 = vst [vmem:[#allocation38_spill] sm:$0xff] %v12467_v22  ;;  %v3029_v44 = vpop.f32.mrf.mxu1 }
 0x364   : > { %v3075_v25 = vpop.f32.mrf.mxu2 }
 0x365   : > { %v3076_v8 = vadd.f32 %v3075_v25, %v14675_v40  ;;  %v9331_v25 = vor.u32 %v10814_v24, %v9328_v23 }
 0x366   : > { %v2980_v35 = vpop.f32.mrf.mxu0  ;;  %3224 = vmatmul.bf16.gmra.mxu1 %v12216_v17  ;;  %3322 = vmatmul.bf16.gmra.mxu3 %v12216_v17 }
 0x367   : > { %v2981_v54 = vadd.f32 %v2980_v35, %v14676_v33  ;;  %v12471_v11 = vadd.f32 %v3124_v0, %v3076_v8  ;;  %v14680_v35 = vld [vmem:[#allocation42_spill] sm:$0xff]  ;;  %3508 = vmatpush.bf16.msrb.mxu3 %v9331_v25  ;;  %v9038_v25 = vld [vmem:[#allocation4 + $0xd8] sm:$0xf] }
 0x369   : > { %14677 = vst [vmem:[#allocation39_spill] sm:$0xff] %v12471_v11  ;;  %v12473_v60 = vadd.f32 %v3029_v44, %v2981_v54  ;;  %3175 = vmatmul.bf16.gmra.mxu0 %v12214_v59  ;;  %3273 = vmatmul.bf16.gmra.mxu2 %v12214_v59  ;;  %v14679_v44 = vld [vmem:[#allocation41_spill] sm:$0xff]  ;;  %v3127_v8 = vpop.f32.mrf.mxu3 }
 0x36a   : > { %v9326_v11 = vld [vmem:[#allocation4 + $0x318] sm:$0xf] }
 0x36b   : > { %14678 = vst [vmem:[#allocation40_spill] sm:$0xff] %v12473_v60  ;;  %v3031_v54 = vpop.f32.mrf.mxu1  ;;  %v9327_v22 = vor.u32 %v10818_v26, %v9326_v11  ;;  %v9040_v11 = vld [vmem:[#allocation4 + $0xf8] sm:$0xf0] }
 0x36c   : > { %v3078_v46 = vpop.f32.mrf.mxu2 }
 0x36d   : > { %v3079_v40 = vadd.f32 %v3078_v46, %v14679_v44  ;;  %3410 = vmatpush.bf16.msrb.mxu1 %v9327_v22  ;;  %v14684_v44 = vld [vmem:[#allocation44_spill] sm:$0xff]  ;;  %v10742_v22 = vld [vmem:[#allocation4 + $0xdc] sm:$0xf] }
 0x36e   : > { %v2982_v0 = vpop.f32.mrf.mxu0 }
 0x36f   : > { %v2983_v33 = vadd.f32 %v2982_v0, %v14680_v35  ;;  %v12481_v60 = vadd.f32 %v3127_v8, %v3079_v40  ;;  %v9043_v40 = vor.u32 %v10742_v22, %v9040_v11  ;;  %v10746_v8 = vld [vmem:[#allocation4 + $0xf4] sm:$0xf0]  ;;  %v10806_v35 = vld [vmem:[#allocation4 + $0x2dc] sm:$0xf] }
 0x370   : > { %v9039_v26 = vor.u32 %v10746_v8, %v9038_v25  ;;  %v10810_v22 = vld [vmem:[#allocation4 + $0x2f4] sm:$0xf0]  ;;  %v14691_v8 = vld [vmem:[#allocation47_spill] sm:$0xff] }
 0x371   : > { %14681 = vst [vmem:[#allocation41_spill] sm:$0xff] %v12481_v60  ;;  %v12483_v42 = vadd.f32 %v3031_v54, %v2983_v33  ;;  %v3129_v23 = vpop.f32.mrf.mxu3  ;;  %v9296_v33 = vld [vmem:[#allocation4 + $0x2f8] sm:$0xf0]  ;;  %3460 = vmatpush.bf16.msrb.mxu2 %v9043_v40 }
 0x372   : > { %3362 = vmatpush.bf16.msrb.mxu0 %v9039_v26 }
 0x373   : > { %14682 = vst [vmem:[#allocation42_spill] sm:$0xff] %v12483_v42  ;;  %v3034_v45 = vpop.f32.mrf.mxu1 }
 0x374   : > { %v3080_v21 = vpop.f32.mrf.mxu2 }
 0x375   : > { %v3081_v24 = vadd.f32 %v3080_v21, %v14683_v37  ;;  %v9299_v21 = vor.u32 %v10806_v35, %v9296_v33 }
 0x376   : > { %v2985_v46 = vpop.f32.mrf.mxu0  ;;  %3229 = vmatmul.bf16.gmra.mxu1 %v12232_v14  ;;  %3327 = vmatmul.bf16.gmra.mxu3 %v12232_v14 }
 0x377   : > { %v2986_v53 = vadd.f32 %v2985_v46, %v14684_v44  ;;  %v12487_v0 = vadd.f32 %v3129_v23, %v3081_v24  ;;  %v14688_v46 = vld [vmem:[#allocation46_spill] sm:$0xff]  ;;  %3509 = vmatpush.bf16.msrb.mxu3 %v9299_v21  ;;  %v9006_v21 = vld [vmem:[#allocation4 + $0x98] sm:$0xf] }
 0x379   : > { %14685 = vst [vmem:[#allocation43_spill] sm:$0xff] %v12487_v0  ;;  %v12489_v18 = vadd.f32 %v3034_v45, %v2986_v53  ;;  %3180 = vmatmul.bf16.gmra.mxu0 %v12230_v50  ;;  %3278 = vmatmul.bf16.gmra.mxu2 %v12230_v50  ;;  %v14687_v45 = vld [vmem:[#allocation45_spill] sm:$0xff]  ;;  %v3132_v24 = vpop.f32.mrf.mxu3 }
 0x37a   : > { %v9294_v0 = vld [vmem:[#allocation4 + $0x2d8] sm:$0xf] }
 0x37b   : > { %14686 = vst [vmem:[#allocation44_spill] sm:$0xff] %v12489_v18  ;;  %v3036_v53 = vpop.f32.mrf.mxu1  ;;  %v9295_v42 = vor.u32 %v10810_v22, %v9294_v0  ;;  %v9008_v0 = vld [vmem:[#allocation4 + $0xb8] sm:$0xf0] }
 0x37c   : > { %v3083_v54 = vpop.f32.mrf.mxu2 }
 0x37d   : > { %v3084_v37 = vadd.f32 %v3083_v54, %v14687_v45  ;;  %3411 = vmatpush.bf16.msrb.mxu1 %v9295_v42  ;;  %v14692_v45 = vld [vmem:[#allocation48_spill] sm:$0xff]  ;;  %v10734_v42 = vld [vmem:[#allocation4 + $0x9c] sm:$0xf] }
 0x37e   : > { %v2987_v23 = vpop.f32.mrf.mxu0 }
 0x37f   : > { %v2988_v44 = vadd.f32 %v2987_v23, %v14688_v46  ;;  %v12497_v18 = vadd.f32 %v3132_v24, %v3084_v37  ;;  %v9011_v37 = vor.u32 %v10734_v42, %v9008_v0  ;;  %v10738_v24 = vld [vmem:[#allocation4 + $0xb4] sm:$0xf0]  ;;  %v10798_v46 = vld [vmem:[#allocation4 + $0x29c] sm:$0xf] }
 0x380   : > { %v9007_v22 = vor.u32 %v10738_v24, %v9006_v21  ;;  %v10802_v42 = vld [vmem:[#allocation4 + $0x2b4] sm:$0xf0]  ;;  %v14699_v24 = vld [vmem:[#allocation51_spill] sm:$0xff] }
 0x381   : > { %14689 = vst [vmem:[#allocation45_spill] sm:$0xff] %v12497_v18  ;;  %v12499_v11 = vadd.f32 %v3036_v53, %v2988_v44  ;;  %v3134_v33 = vpop.f32.mrf.mxu3  ;;  %v9264_v44 = vld [vmem:[#allocation4 + $0x2b8] sm:$0xf0]  ;;  %3461 = vmatpush.bf16.msrb.mxu2 %v9011_v37 }
 0x382   : > { %3363 = vmatpush.bf16.msrb.mxu0 %v9007_v22 }
 0x383   : > { %14690 = vst [vmem:[#allocation46_spill] sm:$0xff] %v12499_v11  ;;  %v3039_v60 = vpop.f32.mrf.mxu1 }
 0x384   : > { %v3085_v25 = vpop.f32.mrf.mxu2 }
 0x385   : > { %v3086_v35 = vadd.f32 %v3085_v25, %v14691_v8  ;;  %v9267_v25 = vor.u32 %v10798_v46, %v9264_v44 }
 0x386   : > { %v2990_v54 = vpop.f32.mrf.mxu0  ;;  %3234 = vmatmul.bf16.gmra.mxu1 %v12248_v48  ;;  %3332 = vmatmul.bf16.gmra.mxu3 %v12248_v48 }
 0x387   : > { %v2991_v40 = vadd.f32 %v2990_v54, %v14692_v45  ;;  %v12503_v23 = vadd.f32 %v3134_v33, %v3086_v35  ;;  %v14696_v54 = vld [vmem:[#allocation50_spill] sm:$0xff]  ;;  %3510 = vmatpush.bf16.msrb.mxu3 %v9267_v25  ;;  %v8974_v25 = vld [vmem:[#allocation4 + $0x58] sm:$0xf] }
 0x389   : > { %14693 = vst [vmem:[#allocation47_spill] sm:$0xff] %v12503_v23  ;;  %v12505_v26 = vadd.f32 %v3039_v60, %v2991_v40  ;;  %3185 = vmatmul.bf16.gmra.mxu0 %v12246_v55  ;;  %3283 = vmatmul.bf16.gmra.mxu2 %v12246_v55  ;;  %v14695_v60 = vld [vmem:[#allocation49_spill] sm:$0xff]  ;;  %v3137_v35 = vpop.f32.mrf.mxu3 }
 0x38a   : > { %v9262_v23 = vld [vmem:[#allocation4 + $0x298] sm:$0xf] }
 0x38b   : > { %14694 = vst [vmem:[#allocation48_spill] sm:$0xff] %v12505_v26  ;;  %v3041_v40 = vpop.f32.mrf.mxu1  ;;  %v9263_v11 = vor.u32 %v10802_v42, %v9262_v23  ;;  %v8976_v23 = vld [vmem:[#allocation4 + $0x78] sm:$0xf0] }
 0x38c   : > { %v3088_v53 = vpop.f32.mrf.mxu2 }
 0x38d   : > { %v3089_v8 = vadd.f32 %v3088_v53, %v14695_v60  ;;  %3412 = vmatpush.bf16.msrb.mxu1 %v9263_v11  ;;  %v14700_v60 = vld [vmem:[#allocation52_spill] sm:$0xff]  ;;  %v10726_v11 = vld [vmem:[#allocation4 + $0x5c] sm:$0xf] }
 0x38e   : > { %v2992_v33 = vpop.f32.mrf.mxu0 }
 0x38f   : > { %v2993_v45 = vadd.f32 %v2992_v33, %v14696_v54  ;;  %v12513_v26 = vadd.f32 %v3137_v35, %v3089_v8  ;;  %v8979_v8 = vor.u32 %v10726_v11, %v8976_v23  ;;  %v10730_v35 = vld [vmem:[#allocation4 + $0x74] sm:$0xf0]  ;;  %v10790_v54 = vld [vmem:[#allocation4 + $0x25c] sm:$0xf] }
 0x390   : > { %v8975_v42 = vor.u32 %v10730_v35, %v8974_v25  ;;  %v10794_v11 = vld [vmem:[#allocation4 + $0x274] sm:$0xf0]  ;;  %v14707_v35 = vld [vmem:[#allocation55_spill] sm:$0xff] }
 0x391   : > { %14697 = vst [vmem:[#allocation49_spill] sm:$0xff] %v12513_v26  ;;  %v12515_v0 = vadd.f32 %v3041_v40, %v2993_v45  ;;  %v3139_v44 = vpop.f32.mrf.mxu3  ;;  %v9232_v45 = vld [vmem:[#allocation4 + $0x278] sm:$0xf0]  ;;  %3462 = vmatpush.bf16.msrb.mxu2 %v8979_v8 }
 0x392   : > { %3364 = vmatpush.bf16.msrb.mxu0 %v8975_v42 }
 0x393   : > { %14698 = vst [vmem:[#allocation50_spill] sm:$0xff] %v12515_v0  ;;  %v3044_v18 = vpop.f32.mrf.mxu1 }
 0x394   : > { %v3090_v21 = vpop.f32.mrf.mxu2 }
 0x395   : > { %v3091_v46 = vadd.f32 %v3090_v21, %v14699_v24  ;;  %v9235_v21 = vor.u32 %v10790_v54, %v9232_v45 }
 0x396   : > { %v2995_v53 = vpop.f32.mrf.mxu0  ;;  %3239 = vmatmul.bf16.gmra.mxu1 %v12264_v4  ;;  %3337 = vmatmul.bf16.gmra.mxu3 %v12264_v4 }
 0x397   : > { %v2996_v37 = vadd.f32 %v2995_v53, %v14700_v60  ;;  %v12519_v33 = vadd.f32 %v3139_v44, %v3091_v46  ;;  %v14704_v53 = vld [vmem:[#allocation54_spill] sm:$0xff]  ;;  %3511 = vmatpush.bf16.msrb.mxu3 %v9235_v21  ;;  %v8942_v21 = vld [vmem:[#allocation4 + $0x18] sm:$0xf] }
 0x399   : > { %14701 = vst [vmem:[#allocation51_spill] sm:$0xff] %v12519_v33  ;;  %v12521_v22 = vadd.f32 %v3044_v18, %v2996_v37  ;;  %3190 = vmatmul.bf16.gmra.mxu0 %v12262_v20  ;;  %3288 = vmatmul.bf16.gmra.mxu2 %v12262_v20  ;;  %v14703_v18 = vld [vmem:[#allocation53_spill] sm:$0xff]  ;;  %v3142_v46 = vpop.f32.mrf.mxu3 }
 0x39a   : > { %v9230_v33 = vld [vmem:[#allocation4 + $0x258] sm:$0xf] }
 0x39b   : > { %14702 = vst [vmem:[#allocation52_spill] sm:$0xff] %v12521_v22  ;;  %v3046_v37 = vpop.f32.mrf.mxu1  ;;  %v9231_v0 = vor.u32 %v10794_v11, %v9230_v33  ;;  %v8944_v33 = vld [vmem:[#allocation4 + $0x38] sm:$0xf0] }
 0x39c   : > { %v3093_v40 = vpop.f32.mrf.mxu2 }
 0x39d   : > { %v3094_v24 = vadd.f32 %v3093_v40, %v14703_v18  ;;  %3413 = vmatpush.bf16.msrb.mxu1 %v9231_v0  ;;  %v14708_v18 = vld [vmem:[#allocation56_spill] sm:$0xff]  ;;  %v10718_v0 = vld [vmem:[#allocation4 + $0x1c] sm:$0xf] }
 0x39e   : > { %v2997_v44 = vpop.f32.mrf.mxu0 }
 0x39f   : > { %v2998_v60 = vadd.f32 %v2997_v44, %v14704_v53  ;;  %v12529_v22 = vadd.f32 %v3142_v46, %v3094_v24  ;;  %v8947_v24 = vor.u32 %v10718_v0, %v8944_v33  ;;  %v10722_v46 = vld [vmem:[#allocation4 + $0x34] sm:$0xf0]  ;;  %v10782_v53 = vld [vmem:[#allocation4 + $0x21c] sm:$0xf] }
 0x3a0   : > { %v8943_v11 = vor.u32 %v10722_v46, %v8942_v21  ;;  %v10786_v0 = vld [vmem:[#allocation4 + $0x234] sm:$0xf0]  ;;  %v14715_v46 = vld [vmem:[#allocation59_spill] sm:$0xff] }
 0x3a1   : > { %14705 = vst [vmem:[#allocation53_spill] sm:$0xff] %v12529_v22  ;;  %v12531_v23 = vadd.f32 %v3046_v37, %v2998_v60  ;;  %v3144_v45 = vpop.f32.mrf.mxu3  ;;  %v9200_v60 = vld [vmem:[#allocation4 + $0x238] sm:$0xf0]  ;;  %3463 = vmatpush.bf16.msrb.mxu2 %v8947_v24 }
 0x3a2   : > { %3365 = vmatpush.bf16.msrb.mxu0 %v8943_v11 }
 0x3a3   : > { %14706 = vst [vmem:[#allocation54_spill] sm:$0xff] %v12531_v23  ;;  %v3049_v26 = vpop.f32.mrf.mxu1 }
 0x3a4   : > { %v3095_v25 = vpop.f32.mrf.mxu2 }
 0x3a5   : > { %v3096_v54 = vadd.f32 %v3095_v25, %v14707_v35  ;;  %v9203_v25 = vor.u32 %v10782_v53, %v9200_v60 }
 0x3a6   : > { %v3000_v40 = vpop.f32.mrf.mxu0  ;;  %3244 = vmatmul.bf16.gmra.mxu1 %v12280_v38  ;;  %3342 = vmatmul.bf16.gmra.mxu3 %v12280_v38 }
 0x3a7   : > { %v3001_v8 = vadd.f32 %v3000_v40, %v14708_v18  ;;  %v12535_v44 = vadd.f32 %v3144_v45, %v3096_v54  ;;  %v14712_v40 = vld [vmem:[#allocation58_spill] sm:$0xff]  ;;  %3512 = vmatpush.bf16.msrb.mxu3 %v9203_v25 }
 0x3a8   : > { %v9654_v25 = vld [vmem:[#allocation4 + $0x9c0] sm:$0xf] }
 0x3a9   : > { %14709 = vst [vmem:[#allocation55_spill] sm:$0xff] %v12535_v44  ;;  %v12537_v42 = vadd.f32 %v3049_v26, %v3001_v8  ;;  %3195 = vmatmul.bf16.gmra.mxu0 %v12278_v30  ;;  %3293 = vmatmul.bf16.gmra.mxu2 %v12278_v30  ;;  %v14711_v26 = vld [vmem:[#allocation57_spill] sm:$0xff]  ;;  %v3147_v54 = vpop.f32.mrf.mxu3 }
 0x3aa   : > { %v9198_v44 = vld [vmem:[#allocation4 + $0x218] sm:$0xf] }
 0x3ab   : > { %14710 = vst [vmem:[#allocation56_spill] sm:$0xff] %v12537_v42  ;;  %v3051_v8 = vpop.f32.mrf.mxu1  ;;  %v9199_v23 = vor.u32 %v10786_v0, %v9198_v44  ;;  %v9656_v44 = vld [vmem:[#allocation4 + $0x9e0] sm:$0xf0] }
 0x3ac   : > { %v3098_v37 = vpop.f32.mrf.mxu2 }
 0x3ad   : > { %v3099_v35 = vadd.f32 %v3098_v37, %v14711_v26  ;;  %3414 = vmatpush.bf16.msrb.mxu1 %v9199_v23  ;;  %v14716_v26 = vld [vmem:[#allocation60_spill] sm:$0xff]  ;;  %v11027_v23 = vld [vmem:[#allocation4 + $0x9c4] sm:$0xf] }
 0x3ae   : > { %v3002_v45 = vpop.f32.mrf.mxu0 }
 0x3af   : > { %v3003_v18 = vadd.f32 %v3002_v45, %v14712_v40  ;;  %v12545_v42 = vadd.f32 %v3147_v54, %v3099_v35  ;;  %v9659_v35 = vor.u32 %v11027_v23, %v9656_v44  ;;  %v11031_v54 = vld [vmem:[#allocation4 + $0x9dc] sm:$0xf0]  ;;  %v11091_v40 = vld [vmem:[#allocation4 + $0xbc4] sm:$0xf] }
 0x3b0   : > { %v9655_v0 = vor.u32 %v11031_v54, %v9654_v25  ;;  %v11095_v23 = vld [vmem:[#allocation4 + $0xbdc] sm:$0xf0]  ;;  %v14723_v54 = vld [vmem:[#allocation63_spill] sm:$0xff] }
 0x3b1   : > { %14713 = vst [vmem:[#allocation57_spill] sm:$0xff] %v12545_v42  ;;  %v12547_v33 = vadd.f32 %v3051_v8, %v3003_v18  ;;  %v3149_v60 = vpop.f32.mrf.mxu3  ;;  %v9912_v18 = vld [vmem:[#allocation4 + $0xbe0] sm:$0xf0]  ;;  %4497 = vmatpush.bf16.msra.mxu2 %v9659_v35 }
 0x3b2   : > { %4399 = vmatpush.bf16.msra.mxu0 %v9655_v0 }
 0x3b3   : > { %14714 = vst [vmem:[#allocation58_spill] sm:$0xff] %v12547_v33  ;;  %v3054_v22 = vpop.f32.mrf.mxu1 }
 0x3b4   : > { %v3100_v21 = vpop.f32.mrf.mxu2 }
 0x3b5   : > { %v3101_v53 = vadd.f32 %v3100_v21, %v14715_v46  ;;  %v9915_v21 = vor.u32 %v11091_v40, %v9912_v18 }
 0x3b6   : > { %v3005_v37 = vpop.f32.mrf.mxu0  ;;  %3249 = vmatmul.bf16.gmra.mxu1 %v12296_v6  ;;  %3347 = vmatmul.bf16.gmra.mxu3 %v12296_v6 }
 0x3b7   : > { %v3006_v24 = vadd.f32 %v3005_v37, %v14716_v26  ;;  %v12551_v45 = vadd.f32 %v3149_v60, %v3101_v53  ;;  %v14720_v37 = vld [vmem:[#allocation62_spill] sm:$0xff]  ;;  %4546 = vmatpush.bf16.msra.mxu3 %v9915_v21 }
 0x3b8   : > { %v9622_v21 = vld [vmem:[#allocation4 + $0x980] sm:$0xf] }
 0x3b9   : > { %14717 = vst [vmem:[#allocation59_spill] sm:$0xff] %v12551_v45  ;;  %v12553_v11 = vadd.f32 %v3054_v22, %v3006_v24  ;;  %3200 = vmatmul.bf16.gmra.mxu0 %v12294_v62  ;;  %3298 = vmatmul.bf16.gmra.mxu2 %v12294_v62  ;;  %v14719_v22 = vld [vmem:[#allocation61_spill] sm:$0xff]  ;;  %v3152_v53 = vpop.f32.mrf.mxu3  ;;  %v9910_v45 = vld [vmem:[#allocation4 + $0xbc0] sm:$0xf] }
 0x3ba   : > { %v9911_v33 = vor.u32 %v11095_v23, %v9910_v45  ;;  %v9624_v45 = vld [vmem:[#allocation4 + $0x9a0] sm:$0xf0] }
 0x3bb   : > { %14718 = vst [vmem:[#allocation60_spill] sm:$0xff] %v12553_v11  ;;  %v3056_v24 = vpop.f32.mrf.mxu1 }
 0x3bc   : > { %v3103_v8 = vpop.f32.mrf.mxu2  ;;  %4448 = vmatpush.bf16.msra.mxu1 %v9911_v33  ;;  %v11019_v33 = vld [vmem:[#allocation4 + $0x984] sm:$0xf] }
 0x3bd   : > { %v3104_v46 = vadd.f32 %v3103_v8, %v14719_v22  ;;  %v14724_v22 = vld [vmem:[#allocation64_spill] sm:$0xff] }
 0x3be   : > { %v3007_v60 = vpop.f32.mrf.mxu0 }
 0x3bf   : > { %v3008_v26 = vadd.f32 %v3007_v60, %v14720_v37  ;;  %v12561_v11 = vadd.f32 %v3152_v53, %v3104_v46  ;;  %v9627_v46 = vor.u32 %v11019_v33, %v9624_v45  ;;  %v11023_v53 = vld [vmem:[#allocation4 + $0x99c] sm:$0xf0]  ;;  %v11083_v37 = vld [vmem:[#allocation4 + $0xb84] sm:$0xf] }
 0x3c0   : > { %v9623_v23 = vor.u32 %v11023_v53, %v9622_v21  ;;  %v11087_v33 = vld [vmem:[#allocation4 + $0xb9c] sm:$0xf0]  ;;  %v14731_v53 = vld [vmem:[#allocation67_spill] sm:$0xff] }
 0x3c1   : > { %14721 = vst [vmem:[#allocation61_spill] sm:$0xff] %v12561_v11  ;;  %v12563_v44 = vadd.f32 %v3056_v24, %v3008_v26  ;;  %v3154_v18 = vpop.f32.mrf.mxu3  ;;  %v9880_v26 = vld [vmem:[#allocation4 + $0xba0] sm:$0xf0]  ;;  %4498 = vmatpush.bf16.msra.mxu2 %v9627_v46 }
 0x3c2   : > { %4400 = vmatpush.bf16.msra.mxu0 %v9623_v23 }
 0x3c3   : > { %14722 = vst [vmem:[#allocation62_spill] sm:$0xff] %v12563_v44  ;;  %v3059_v42 = vpop.f32.mrf.mxu1 }
 0x3c4   : > { %v3105_v25 = vpop.f32.mrf.mxu2 }
 0x3c5   : > { %v3106_v40 = vadd.f32 %v3105_v25, %v14723_v54  ;;  %v9883_v25 = vor.u32 %v11083_v37, %v9880_v26 }
 0x3c6   : > { %v3010_v8 = vpop.f32.mrf.mxu0  ;;  %3254 = vmatmul.bf16.gmra.mxu1 %v12312_v1  ;;  %3352 = vmatmul.bf16.gmra.mxu3 %v12312_v1 }
 0x3c7   : > { %v3011_v35 = vadd.f32 %v3010_v8, %v14724_v22  ;;  %v12567_v60 = vadd.f32 %v3154_v18, %v3106_v40  ;;  %v14728_v8 = vld [vmem:[#allocation66_spill] sm:$0xff]  ;;  %4547 = vmatpush.bf16.msra.mxu3 %v9883_v25 }
 0x3c8   : > { %v9590_v25 = vld [vmem:[#allocation4 + $0x940] sm:$0xf] }
 0x3c9   : > { %14725 = vst [vmem:[#allocation63_spill] sm:$0xff] %v12567_v60  ;;  %v12569_v0 = vadd.f32 %v3059_v42, %v3011_v35  ;;  %3205 = vmatmul.bf16.gmra.mxu0 %v12310_v9  ;;  %3303 = vmatmul.bf16.gmra.mxu2 %v12310_v9  ;;  %v14727_v42 = vld [vmem:[#allocation65_spill] sm:$0xff]  ;;  %v3157_v40 = vpop.f32.mrf.mxu3  ;;  %v9878_v60 = vld [vmem:[#allocation4 + $0xb80] sm:$0xf] }
 0x3ca   : > { %v9879_v44 = vor.u32 %v11087_v33, %v9878_v60  ;;  %v9592_v60 = vld [vmem:[#allocation4 + $0x960] sm:$0xf0] }
 0x3cb   : > { %14726 = vst [vmem:[#allocation64_spill] sm:$0xff] %v12569_v0  ;;  %v3061_v35 = vpop.f32.mrf.mxu1 }
 0x3cc   : > { %v3108_v24 = vpop.f32.mrf.mxu2  ;;  %4449 = vmatpush.bf16.msra.mxu1 %v9879_v44  ;;  %v11011_v44 = vld [vmem:[#allocation4 + $0x944] sm:$0xf] }
 0x3cd   : > { %v3109_v54 = vadd.f32 %v3108_v24, %v14727_v42  ;;  %v14732_v42 = vld [vmem:[#allocation68_spill] sm:$0xff] }
 0x3ce   : > { %v3012_v18 = vpop.f32.mrf.mxu0 }
 0x3cf   : > { %v3013_v22 = vadd.f32 %v3012_v18, %v14728_v8  ;;  %v12577_v0 = vadd.f32 %v3157_v40, %v3109_v54  ;;  %v9595_v54 = vor.u32 %v11011_v44, %v9592_v60  ;;  %v11015_v40 = vld [vmem:[#allocation4 + $0x95c] sm:$0xf0]  ;;  %v11075_v8 = vld [vmem:[#allocation4 + $0xb44] sm:$0xf] }
 0x3d0   : > { %v9591_v33 = vor.u32 %v11015_v40, %v9590_v25  ;;  %v11079_v44 = vld [vmem:[#allocation4 + $0xb5c] sm:$0xf0]  ;;  %v14739_v40 = vld [vmem:[#allocation71_spill] sm:$0xff] }
 0x3d1   : > { %14729 = vst [vmem:[#allocation65_spill] sm:$0xff] %v12577_v0  ;;  %v12579_v45 = vadd.f32 %v3061_v35, %v3013_v22  ;;  %v3159_v26 = vpop.f32.mrf.mxu3  ;;  %v9848_v22 = vld [vmem:[#allocation4 + $0xb60] sm:$0xf0]  ;;  %4499 = vmatpush.bf16.msra.mxu2 %v9595_v54 }
 0x3d2   : > { %4401 = vmatpush.bf16.msra.mxu0 %v9591_v33 }
 0x3d3   : > { %14730 = vst [vmem:[#allocation66_spill] sm:$0xff] %v12579_v45  ;;  %v3220_v11 = vpop.f32.mrf.mxu1 }
 0x3d4   : > { %v3110_v21 = vpop.f32.mrf.mxu2 }
 0x3d5   : > { %v3111_v37 = vadd.f32 %v3110_v21, %v14731_v53  ;;  %v9851_v21 = vor.u32 %v11075_v8, %v9848_v22 }
 0x3d6   : > { %v3171_v24 = vpop.f32.mrf.mxu0  ;;  %3415 = vmatmul.bf16.vlgmr.msrb.gmra.mxu1 %v12200_v63  ;;  %3513 = vmatmul.bf16.vlgmr.msrb.gmra.mxu3 %v12200_v63 }
 0x3d7   : > { %v3172_v46 = vadd.f32 %v3171_v24, %v14732_v42  ;;  %v12583_v18 = vadd.f32 %v3159_v26, %v3111_v37  ;;  %v14736_v24 = vld [vmem:[#allocation70_spill] sm:$0xff]  ;;  %4548 = vmatpush.bf16.msra.mxu3 %v9851_v21 }
 0x3d8   : > { %v9560_v21 = vld [vmem:[#allocation4 + $0x920] sm:$0xf0] }
 0x3d9   : > { %14733 = vst [vmem:[#allocation67_spill] sm:$0xff] %v12583_v18  ;;  %v12585_v23 = vadd.f32 %v3220_v11, %v3172_v46  ;;  %3366 = vmatmul.bf16.vlgmr.msrb.gmra.mxu0 %v12198_v7  ;;  %3464 = vmatmul.bf16.vlgmr.msrb.gmra.mxu2 %v12198_v7  ;;  %v14735_v11 = vld [vmem:[#allocation69_spill] sm:$0xff]  ;;  %v3318_v37 = vpop.f32.mrf.mxu3  ;;  %v9846_v46 = vld [vmem:[#allocation4 + $0xb40] sm:$0xf] }
 0x3db   : > { %14734 = vst [vmem:[#allocation68_spill] sm:$0xff] %v12585_v23  ;;  %v3222_v7 = vpop.f32.mrf.mxu1  ;;  %v9847_v23 = vor.u32 %v11079_v44, %v9846_v46 }
 0x3dc   : > { %v3269_v35 = vpop.f32.mrf.mxu2 }
 0x3dd   : > { %v3270_v53 = vadd.f32 %v3269_v35, %v14735_v11  ;;  %4450 = vmatpush.bf16.msra.mxu1 %v9847_v23  ;;  %v14740_v11 = vld [vmem:[#allocation72_spill] sm:$0xff]  ;;  %v11003_v23 = vld [vmem:[#allocation4 + $0x904] sm:$0xf] }
 0x3de   : > { %v3173_v26 = vpop.f32.mrf.mxu0 }
 0x3df   : > { %v3174_v42 = vadd.f32 %v3173_v26, %v14736_v24  ;;  %v12593_v63 = vadd.f32 %v3318_v37, %v3270_v53  ;;  %v9558_v53 = vld [vmem:[#allocation4 + $0x900] sm:$0xf]  ;;  %v9563_v37 = vor.u32 %v11003_v23, %v9560_v21 }
 0x3e0   : > { %v11007_v24 = vld [vmem:[#allocation4 + $0x91c] sm:$0xf0] }
 0x3e1   : > { %14737 = vst [vmem:[#allocation69_spill] sm:$0xff] %v12593_v63  ;;  %v12595_v60 = vadd.f32 %v3222_v7, %v3174_v42  ;;  %v3320_v22 = vpop.f32.mrf.mxu3  ;;  %v11067_v42 = vld [vmem:[#allocation4 + $0xb04] sm:$0xf]  ;;  %v9559_v44 = vor.u32 %v11007_v24, %v9558_v53  ;;  %4500 = vmatpush.bf16.msra.mxu2 %v9563_v37  ;;  %v11071_v23 = vld [vmem:[#allocation4 + $0xb1c] sm:$0xf0]  ;;  %v14747_v24 = vld [vmem:[#allocation75_spill] sm:$0xff] }
 0x3e2   : > { %v9816_v7 = vld [vmem:[#allocation4 + $0xb20] sm:$0xf0] }
 0x3e3   : > { %14738 = vst [vmem:[#allocation70_spill] sm:$0xff] %v12595_v60  ;;  %v3225_v18 = vpop.f32.mrf.mxu1  ;;  %4402 = vmatpush.bf16.msra.mxu0 %v9559_v44  ;;  %v14855_v63 = vld [vmem:[#allocation30_spill] sm:$0xff] }
 0x3e4   : > { %v3271_v25 = vpop.f32.mrf.mxu2 }
 0x3e5   : > { %v3272_v8 = vadd.f32 %v3271_v25, %v14739_v40  ;;  %v9819_v25 = vor.u32 %v11067_v42, %v9816_v7 }
 0x3e6   : > { %v3176_v35 = vpop.f32.mrf.mxu0  ;;  %3420 = vmatmul.bf16.gmra.mxu1 %v12216_v17  ;;  %3518 = vmatmul.bf16.gmra.mxu3 %v12216_v17 }
 0x3e7   : > { %v3177_v54 = vadd.f32 %v3176_v35, %v14740_v11  ;;  %v12599_v26 = vadd.f32 %v3320_v22, %v3272_v8  ;;  %v14744_v35 = vld [vmem:[#allocation74_spill] sm:$0xff]  ;;  %4549 = vmatpush.bf16.msra.mxu3 %v9819_v25 }
 0x3e8   : > { %v9528_v25 = vld [vmem:[#allocation4 + $0x8e0] sm:$0xf0] }
 0x3e9   : > { %14741 = vst [vmem:[#allocation71_spill] sm:$0xff] %v12599_v26  ;;  %v12601_v33 = vadd.f32 %v3225_v18, %v3177_v54  ;;  %3371 = vmatmul.bf16.gmra.mxu0 %v12214_v59  ;;  %3469 = vmatmul.bf16.gmra.mxu2 %v12214_v59  ;;  %v14743_v18 = vld [vmem:[#allocation73_spill] sm:$0xff]  ;;  %v3323_v8 = vpop.f32.mrf.mxu3  ;;  %v9814_v54 = vld [vmem:[#allocation4 + $0xb00] sm:$0xf] }
 0x3eb   : > { %14742 = vst [vmem:[#allocation72_spill] sm:$0xff] %v12601_v33  ;;  %v3227_v59 = vpop.f32.mrf.mxu1  ;;  %v9815_v33 = vor.u32 %v11071_v23, %v9814_v54 }
 0x3ec   : > { %v3274_v46 = vpop.f32.mrf.mxu2 }
 0x3ed   : > { %v3275_v40 = vadd.f32 %v3274_v46, %v14743_v18  ;;  %4451 = vmatpush.bf16.msra.mxu1 %v9815_v33  ;;  %v14748_v18 = vld [vmem:[#allocation76_spill] sm:$0xff]  ;;  %v10995_v33 = vld [vmem:[#allocation4 + $0x8c4] sm:$0xf] }
 0x3ee   : > { %v3178_v22 = vpop.f32.mrf.mxu0 }
 0x3ef   : > { %v3179_v11 = vadd.f32 %v3178_v22, %v14744_v35  ;;  %v12609_v17 = vadd.f32 %v3323_v8, %v3275_v40  ;;  %v9526_v40 = vld [vmem:[#allocation4 + $0x8c0] sm:$0xf]  ;;  %v9531_v8 = vor.u32 %v10995_v33, %v9528_v25 }
 0x3f0   : > { %v10999_v35 = vld [vmem:[#allocation4 + $0x8dc] sm:$0xf0] }
 0x3f1   : > { %14745 = vst [vmem:[#allocation73_spill] sm:$0xff] %v12609_v17  ;;  %v12611_v21 = vadd.f32 %v3227_v59, %v3179_v11  ;;  %v3325_v7 = vpop.f32.mrf.mxu3  ;;  %v11059_v11 = vld [vmem:[#allocation4 + $0xac4] sm:$0xf]  ;;  %v9527_v23 = vor.u32 %v10999_v35, %v9526_v40  ;;  %4501 = vmatpush.bf16.msra.mxu2 %v9531_v8  ;;  %v11063_v33 = vld [vmem:[#allocation4 + $0xadc] sm:$0xf0]  ;;  %v14755_v35 = vld [vmem:[#allocation79_spill] sm:$0xff] }
 0x3f2   : > { %v9784_v59 = vld [vmem:[#allocation4 + $0xae0] sm:$0xf0]  ;;  %v14845_v17 = vld [vmem:[#allocation28_spill] sm:$0xff] }
 0x3f3   : > { %14746 = vst [vmem:[#allocation74_spill] sm:$0xff] %v12611_v21  ;;  %v3230_v26 = vpop.f32.mrf.mxu1  ;;  %4403 = vmatpush.bf16.msra.mxu0 %v9527_v23 }
 0x3f4   : > { %v3276_v53 = vpop.f32.mrf.mxu2 }
 0x3f5   : > { %v3277_v42 = vadd.f32 %v3276_v53, %v14747_v24  ;;  %v9787_v53 = vor.u32 %v11059_v11, %v9784_v59 }
 0x3f6   : > { %v3181_v46 = vpop.f32.mrf.mxu0  ;;  %3425 = vmatmul.bf16.gmra.mxu1 %v12232_v14  ;;  %3523 = vmatmul.bf16.gmra.mxu3 %v12232_v14 }
 0x3f7   : > { %v3182_v37 = vadd.f32 %v3181_v46, %v14748_v18  ;;  %v12615_v22 = vadd.f32 %v3325_v7, %v3277_v42  ;;  %v14752_v46 = vld [vmem:[#allocation78_spill] sm:$0xff]  ;;  %4550 = vmatpush.bf16.msra.mxu3 %v9787_v53 }
 0x3f8   : > { %v9496_v53 = vld [vmem:[#allocation4 + $0x8a0] sm:$0xf0] }
 0x3f9   : > { %14749 = vst [vmem:[#allocation75_spill] sm:$0xff] %v12615_v22  ;;  %v12617_v44 = vadd.f32 %v3230_v26, %v3182_v37  ;;  %3376 = vmatmul.bf16.gmra.mxu0 %v12230_v50  ;;  %3474 = vmatmul.bf16.gmra.mxu2 %v12230_v50  ;;  %v14751_v26 = vld [vmem:[#allocation77_spill] sm:$0xff]  ;;  %v3328_v42 = vpop.f32.mrf.mxu3  ;;  %v9782_v37 = vld [vmem:[#allocation4 + $0xac0] sm:$0xf] }
 0x3fb   : > { %14750 = vst [vmem:[#allocation76_spill] sm:$0xff] %v12617_v44  ;;  %v3232_v50 = vpop.f32.mrf.mxu1  ;;  %v9783_v44 = vor.u32 %v11063_v33, %v9782_v37 }
 0x3fc   : > { %v3279_v54 = vpop.f32.mrf.mxu2 }
 0x3fd   : > { %v3280_v24 = vadd.f32 %v3279_v54, %v14751_v26  ;;  %4452 = vmatpush.bf16.msra.mxu1 %v9783_v44  ;;  %v14756_v26 = vld [vmem:[#allocation80_spill] sm:$0xff]  ;;  %v10987_v44 = vld [vmem:[#allocation4 + $0x884] sm:$0xf] }
 0x3fe   : > { %v3183_v7 = vpop.f32.mrf.mxu0 }
 0x3ff   : > { %v3184_v18 = vadd.f32 %v3183_v7, %v14752_v46  ;;  %v12625_v14 = vadd.f32 %v3328_v42, %v3280_v24  ;;  %v9494_v24 = vld [vmem:[#allocation4 + $0x880] sm:$0xf]  ;;  %v9499_v42 = vor.u32 %v10987_v44, %v9496_v53 }
 0x400   : > { %v10991_v46 = vld [vmem:[#allocation4 + $0x89c] sm:$0xf0] }
 0x401   : > { %14753 = vst [vmem:[#allocation77_spill] sm:$0xff] %v12625_v14  ;;  %v12627_v25 = vadd.f32 %v3232_v50, %v3184_v18  ;;  %v3330_v59 = vpop.f32.mrf.mxu3  ;;  %v11051_v18 = vld [vmem:[#allocation4 + $0xa84] sm:$0xf]  ;;  %v9495_v33 = vor.u32 %v10991_v46, %v9494_v24  ;;  %4502 = vmatpush.bf16.msra.mxu2 %v9499_v42  ;;  %v11055_v44 = vld [vmem:[#allocation4 + $0xa9c] sm:$0xf0]  ;;  %v14763_v46 = vld [vmem:[#allocation83_spill] sm:$0xff] }
 0x402   : > { %v9752_v50 = vld [vmem:[#allocation4 + $0xaa0] sm:$0xf0] }
 0x403   : > { %14754 = vst [vmem:[#allocation78_spill] sm:$0xff] %v12627_v25  ;;  %v3235_v22 = vpop.f32.mrf.mxu1  ;;  %4404 = vmatpush.bf16.msra.mxu0 %v9495_v33  ;;  %v14835_v14 = vld [vmem:[#allocation26_spill] sm:$0xff] }
 0x404   : > { %v3281_v40 = vpop.f32.mrf.mxu2 }
 0x405   : > { %v3282_v11 = vadd.f32 %v3281_v40, %v14755_v35  ;;  %v9755_v40 = vor.u32 %v11051_v18, %v9752_v50 }
 0x406   : > { %v3186_v54 = vpop.f32.mrf.mxu0  ;;  %3430 = vmatmul.bf16.gmra.mxu1 %v12248_v48  ;;  %3528 = vmatmul.bf16.gmra.mxu3 %v12248_v48 }
 0x407   : > { %v3187_v8 = vadd.f32 %v3186_v54, %v14756_v26  ;;  %v12631_v7 = vadd.f32 %v3330_v59, %v3282_v11  ;;  %v14760_v54 = vld [vmem:[#allocation82_spill] sm:$0xff]  ;;  %4551 = vmatpush.bf16.msra.mxu3 %v9755_v40 }
 0x408   : > { %v9464_v40 = vld [vmem:[#allocation4 + $0x860] sm:$0xf0] }
 0x409   : > { %14757 = vst [vmem:[#allocation79_spill] sm:$0xff] %v12631_v7  ;;  %v12633_v23 = vadd.f32 %v3235_v22, %v3187_v8  ;;  %3381 = vmatmul.bf16.gmra.mxu0 %v12246_v55  ;;  %3479 = vmatmul.bf16.gmra.mxu2 %v12246_v55  ;;  %v14759_v22 = vld [vmem:[#allocation81_spill] sm:$0xff]  ;;  %v3333_v11 = vpop.f32.mrf.mxu3  ;;  %v9750_v8 = vld [vmem:[#allocation4 + $0xa80] sm:$0xf] }
 0x40b   : > { %14758 = vst [vmem:[#allocation80_spill] sm:$0xff] %v12633_v23  ;;  %v3237_v55 = vpop.f32.mrf.mxu1  ;;  %v9751_v23 = vor.u32 %v11055_v44, %v9750_v8 }
 0x40c   : > { %v3284_v37 = vpop.f32.mrf.mxu2 }
 0x40d   : > { %v3285_v35 = vadd.f32 %v3284_v37, %v14759_v22  ;;  %4453 = vmatpush.bf16.msra.mxu1 %v9751_v23  ;;  %v14764_v22 = vld [vmem:[#allocation84_spill] sm:$0xff]  ;;  %v10979_v23 = vld [vmem:[#allocation4 + $0x844] sm:$0xf] }
 0x40e   : > { %v3188_v59 = vpop.f32.mrf.mxu0 }
 0x40f   : > { %v3189_v26 = vadd.f32 %v3188_v59, %v14760_v54  ;;  %v12641_v48 = vadd.f32 %v3333_v11, %v3285_v35  ;;  %v9462_v35 = vld [vmem:[#allocation4 + $0x840] sm:$0xf]  ;;  %v9467_v11 = vor.u32 %v10979_v23, %v9464_v40 }
 0x410   : > { %v10983_v54 = vld [vmem:[#allocation4 + $0x85c] sm:$0xf0] }
 0x411   : > { %14761 = vst [vmem:[#allocation81_spill] sm:$0xff] %v12641_v48  ;;  %v12643_v53 = vadd.f32 %v3237_v55, %v3189_v26  ;;  %v3335_v50 = vpop.f32.mrf.mxu3  ;;  %v11043_v26 = vld [vmem:[#allocation4 + $0xa44] sm:$0xf]  ;;  %v9463_v44 = vor.u32 %v10983_v54, %v9462_v35  ;;  %4503 = vmatpush.bf16.msra.mxu2 %v9467_v11  ;;  %v11047_v23 = vld [vmem:[#allocation4 + $0xa5c] sm:$0xf0]  ;;  %v14771_v54 = vld [vmem:[#allocation87_spill] sm:$0xff] }
 0x412   : > { %v9720_v55 = vld [vmem:[#allocation4 + $0xa60] sm:$0xf0]  ;;  %v14825_v48 = vld [vmem:[#allocation24_spill] sm:$0xff] }
 0x413   : > { %14762 = vst [vmem:[#allocation82_spill] sm:$0xff] %v12643_v53  ;;  %v3240_v7 = vpop.f32.mrf.mxu1  ;;  %4405 = vmatpush.bf16.msra.mxu0 %v9463_v44 }
 0x414   : > { %v3286_v24 = vpop.f32.mrf.mxu2 }
 0x415   : > { %v3287_v18 = vadd.f32 %v3286_v24, %v14763_v46  ;;  %v9723_v24 = vor.u32 %v11043_v26, %v9720_v55 }
 0x416   : > { %v3191_v37 = vpop.f32.mrf.mxu0  ;;  %3435 = vmatmul.bf16.gmra.mxu1 %v12264_v4  ;;  %3533 = vmatmul.bf16.gmra.mxu3 %v12264_v4 }
 0x417   : > { %v3192_v42 = vadd.f32 %v3191_v37, %v14764_v22  ;;  %v12647_v59 = vadd.f32 %v3335_v50, %v3287_v18  ;;  %v14768_v37 = vld [vmem:[#allocation86_spill] sm:$0xff]  ;;  %4552 = vmatpush.bf16.msra.mxu3 %v9723_v24 }
 0x418   : > { %v9432_v24 = vld [vmem:[#allocation4 + $0x820] sm:$0xf0] }
 0x419   : > { %14765 = vst [vmem:[#allocation83_spill] sm:$0xff] %v12647_v59  ;;  %v12649_v33 = vadd.f32 %v3240_v7, %v3192_v42  ;;  %3386 = vmatmul.bf16.gmra.mxu0 %v12262_v20  ;;  %3484 = vmatmul.bf16.gmra.mxu2 %v12262_v20  ;;  %v14767_v7 = vld [vmem:[#allocation85_spill] sm:$0xff]  ;;  %v3338_v18 = vpop.f32.mrf.mxu3  ;;  %v9718_v42 = vld [vmem:[#allocation4 + $0xa40] sm:$0xf] }
 0x41b   : > { %14766 = vst [vmem:[#allocation84_spill] sm:$0xff] %v12649_v33  ;;  %v3242_v20 = vpop.f32.mrf.mxu1  ;;  %v9719_v33 = vor.u32 %v11047_v23, %v9718_v42 }
 0x41c   : > { %v3289_v8 = vpop.f32.mrf.mxu2 }
 0x41d   : > { %v3290_v46 = vadd.f32 %v3289_v8, %v14767_v7  ;;  %4454 = vmatpush.bf16.msra.mxu1 %v9719_v33  ;;  %v14772_v7 = vld [vmem:[#allocation88_spill] sm:$0xff]  ;;  %v10971_v33 = vld [vmem:[#allocation4 + $0x804] sm:$0xf] }
 0x41e   : > { %v3193_v50 = vpop.f32.mrf.mxu0 }
 0x41f   : > { %v3194_v22 = vadd.f32 %v3193_v50, %v14768_v37  ;;  %v12657_v4 = vadd.f32 %v3338_v18, %v3290_v46  ;;  %v9430_v46 = vld [vmem:[#allocation4 + $0x800] sm:$0xf]  ;;  %v9435_v18 = vor.u32 %v10971_v33, %v9432_v24 }
 0x420   : > { %v10975_v37 = vld [vmem:[#allocation4 + $0x81c] sm:$0xf0] }
 0x421   : > { %14769 = vst [vmem:[#allocation85_spill] sm:$0xff] %v12657_v4  ;;  %v12659_v40 = vadd.f32 %v3242_v20, %v3194_v22  ;;  %v3340_v55 = vpop.f32.mrf.mxu3  ;;  %v11035_v22 = vld [vmem:[#allocation4 + $0xa04] sm:$0xf]  ;;  %v9431_v23 = vor.u32 %v10975_v37, %v9430_v46  ;;  %4504 = vmatpush.bf16.msra.mxu2 %v9435_v18  ;;  %v11039_v33 = vld [vmem:[#allocation4 + $0xa1c] sm:$0xf0]  ;;  %v14779_v37 = vld [vmem:[#allocation91_spill] sm:$0xff] }
 0x422   : > { %v9688_v20 = vld [vmem:[#allocation4 + $0xa20] sm:$0xf0] }
 0x423   : > { %14770 = vst [vmem:[#allocation86_spill] sm:$0xff] %v12659_v40  ;;  %v3245_v59 = vpop.f32.mrf.mxu1  ;;  %4406 = vmatpush.bf16.msra.mxu0 %v9431_v23  ;;  %v14815_v4 = vld [vmem:[#allocation22_spill] sm:$0xff] }
 0x424   : > { %v3291_v35 = vpop.f32.mrf.mxu2 }
 0x425   : > { %v3292_v26 = vadd.f32 %v3291_v35, %v14771_v54  ;;  %v9691_v35 = vor.u32 %v11035_v22, %v9688_v20 }
 0x426   : > { %v3196_v8 = vpop.f32.mrf.mxu0  ;;  %3440 = vmatmul.bf16.gmra.mxu1 %v12280_v38  ;;  %3538 = vmatmul.bf16.gmra.mxu3 %v12280_v38 }
 0x427   : > { %v3197_v11 = vadd.f32 %v3196_v8, %v14772_v7  ;;  %v12663_v50 = vadd.f32 %v3340_v55, %v3292_v26  ;;  %v14776_v8 = vld [vmem:[#allocation90_spill] sm:$0xff]  ;;  %4553 = vmatpush.bf16.msra.mxu3 %v9691_v35  ;;  %v9664_v35 = vld [vmem:[#allocation4 + $0x9e8] sm:$0xf0] }
 0x429   : > { %14773 = vst [vmem:[#allocation87_spill] sm:$0xff] %v12663_v50  ;;  %v12665_v44 = vadd.f32 %v3245_v59, %v3197_v11  ;;  %3391 = vmatmul.bf16.gmra.mxu0 %v12278_v30  ;;  %3489 = vmatmul.bf16.gmra.mxu2 %v12278_v30  ;;  %v14775_v59 = vld [vmem:[#allocation89_spill] sm:$0xff]  ;;  %v3343_v26 = vpop.f32.mrf.mxu3  ;;  %v9686_v11 = vld [vmem:[#allocation4 + $0xa00] sm:$0xf] }
 0x42b   : > { %14774 = vst [vmem:[#allocation88_spill] sm:$0xff] %v12665_v44  ;;  %v3247_v30 = vpop.f32.mrf.mxu1  ;;  %v9687_v44 = vor.u32 %v11039_v33, %v9686_v11 }
 0x42c   : > { %v3294_v42 = vpop.f32.mrf.mxu2 }
 0x42d   : > { %v3295_v54 = vadd.f32 %v3294_v42, %v14775_v59  ;;  %4455 = vmatpush.bf16.msra.mxu1 %v9687_v44  ;;  %v14780_v59 = vld [vmem:[#allocation92_spill] sm:$0xff]  ;;  %v11028_v44 = vld [vmem:[#allocation4 + $0x9cc] sm:$0xf] }
 0x42e   : > { %v3198_v55 = vpop.f32.mrf.mxu0 }
 0x42f   : > { %v3199_v7 = vadd.f32 %v3198_v55, %v14776_v8  ;;  %v12673_v38 = vadd.f32 %v3343_v26, %v3295_v54  ;;  %v9662_v54 = vld [vmem:[#allocation4 + $0x9c8] sm:$0xf]  ;;  %v9667_v26 = vor.u32 %v11028_v44, %v9664_v35 }
 0x430   : > { %v11032_v8 = vld [vmem:[#allocation4 + $0x9e4] sm:$0xf0] }
 0x431   : > { %14777 = vst [vmem:[#allocation89_spill] sm:$0xff] %v12673_v38  ;;  %v12675_v24 = vadd.f32 %v3247_v30, %v3199_v7  ;;  %v3345_v20 = vpop.f32.mrf.mxu3  ;;  %v11092_v7 = vld [vmem:[#allocation4 + $0xbcc] sm:$0xf]  ;;  %v9663_v33 = vor.u32 %v11032_v8, %v9662_v54  ;;  %4693 = vmatpush.bf16.msrb.mxu2 %v9667_v26  ;;  %v11096_v44 = vld [vmem:[#allocation4 + $0xbe4] sm:$0xf0]  ;;  %v14805_v38 = vld [vmem:[#allocation20_spill] sm:$0xff] }
 0x432   : > { %v9920_v30 = vld [vmem:[#allocation4 + $0xbe8] sm:$0xf0] }
 0x433   : > { %14778 = vst [vmem:[#allocation90_spill] sm:$0xff] %v12675_v24  ;;  %v3250_v50 = vpop.f32.mrf.mxu1  ;;  %4595 = vmatpush.bf16.msrb.mxu0 %v9663_v33  ;;  %v14787_v8 = vld [vmem:[#allocation95_spill] sm:$0xff] }
 0x434   : > { %v3296_v46 = vpop.f32.mrf.mxu2  ;;  %v11088_v24 = vld [vmem:[#allocation4 + $0xba4] sm:$0xf0] }
 0x435   : > { %v3297_v22 = vadd.f32 %v3296_v46, %v14779_v37  ;;  %v9923_v46 = vor.u32 %v11092_v7, %v9920_v30 }
 0x436   : > { %v3201_v42 = vpop.f32.mrf.mxu0  ;;  %3445 = vmatmul.bf16.gmra.mxu1 %v12296_v6  ;;  %3543 = vmatmul.bf16.gmra.mxu3 %v12296_v6 }
 0x437   : > { %v3202_v18 = vadd.f32 %v3201_v42, %v14780_v59  ;;  %v12679_v55 = vadd.f32 %v3345_v20, %v3297_v22  ;;  %v14784_v42 = vld [vmem:[#allocation94_spill] sm:$0xff]  ;;  %4742 = vmatpush.bf16.msrb.mxu3 %v9923_v46  ;;  %v3554_v46 = vld [vmem:[#allocation2] sm:$0xfc] }
 0x439   : > { %14781 = vst [vmem:[#allocation91_spill] sm:$0xff] %v12679_v55  ;;  %v12681_v23 = vadd.f32 %v3250_v50, %v3202_v18  ;;  %3396 = vmatmul.bf16.gmra.mxu0 %v12294_v62  ;;  %3494 = vmatmul.bf16.gmra.mxu2 %v12294_v62  ;;  %v14783_v50 = vld [vmem:[#allocation93_spill] sm:$0xff]  ;;  %v3348_v22 = vpop.f32.mrf.mxu3  ;;  %v9918_v18 = vld [vmem:[#allocation4 + $0xbc8] sm:$0xf] }
 0x43b   : > { %14782 = vst [vmem:[#allocation92_spill] sm:$0xff] %v12681_v23  ;;  %v3252_v62 = vpop.f32.mrf.mxu1  ;;  %v9919_v23 = vor.u32 %v11096_v44, %v9918_v18  ;;  %v11084_v18 = vld [vmem:[#allocation4 + $0xb8c] sm:$0xf] }
 0x43c   : > { %v3299_v11 = vpop.f32.mrf.mxu2  ;;  %v9888_v44 = vld [vmem:[#allocation4 + $0xba8] sm:$0xf0] }
 0x43d   : > { %v3300_v37 = vadd.f32 %v3299_v11, %v14783_v50  ;;  %4644 = vmatpush.bf16.msrb.mxu1 %v9919_v23  ;;  %v14788_v50 = vld [vmem:[#allocation96_spill] sm:$0xff]  ;;  %v3555_v23 = vld [vmem:[#allocation2 + $0x8] sm:$0xfc] }
 0x43e   : > { %v3203_v20 = vpop.f32.mrf.mxu0 }
 0x43f   : > { %v3204_v59 = vadd.f32 %v3203_v20, %v14784_v42  ;;  %v12689_v6 = vadd.f32 %v3348_v22, %v3300_v37  ;;  %v11020_v37 = vld [vmem:[#allocation4 + $0x98c] sm:$0xf]  ;;  %v9630_v42 = vld [vmem:[#allocation4 + $0x988] sm:$0xf] }
 0x440   : > { %v9632_v22 = vld [vmem:[#allocation4 + $0x9a8] sm:$0xf0] }
 0x441   : > { %14785 = vst [vmem:[#allocation93_spill] sm:$0xff] %v12689_v6  ;;  %v12691_v35 = vadd.f32 %v3252_v62, %v3204_v59  ;;  %v3350_v30 = vpop.f32.mrf.mxu3  ;;  %v9635_v59 = vor.u32 %v11020_v37, %v9632_v22  ;;  %v11024_v62 = vld [vmem:[#allocation4 + $0x9a4] sm:$0xf0] }
 0x442   : > { %v9886_v22 = vld [vmem:[#allocation4 + $0xb88] sm:$0xf] }
 0x443   : > { %14786 = vst [vmem:[#allocation94_spill] sm:$0xff] %v12691_v35  ;;  %v3255_v55 = vpop.f32.mrf.mxu1  ;;  %4694 = vmatpush.bf16.msrb.mxu2 %v9635_v59  ;;  %v11408_v35 = vld [vmem:[#allocation2 + $0x18] sm:$0xff] }
 0x444   : > { %v3301_v54 = vpop.f32.mrf.mxu2  ;;  %v3559_v6 = vpack.c.bf16 %v11408_v35, %v3555_v23  ;;  %v14796_v59 = vld [vmem:[#allocation19_spill] sm:$0xff] }
 0x445   : > { %v3302_v7 = vadd.f32 %v3301_v54, %v14787_v8  ;;  %v9891_v8 = vor.u32 %v11084_v18, %v9888_v44  ;;  %v14795_v44 = vld [vmem:[#allocation18_spill] sm:$0xff] }
 0x446   : > { %v3206_v11 = vpop.f32.mrf.mxu0  ;;  %3450 = vmatmul.bf16.gmra.mxu1 %v12312_v1  ;;  %3548 = vmatmul.bf16.gmra.mxu3 %v12312_v1 }
 0x447   : > { %v3207_v26 = vadd.f32 %v3206_v11, %v14788_v50  ;;  %v12695_v20 = vadd.f32 %v3350_v30, %v3302_v7  ;;  %v14791_v7 = vld [vmem:[#allocation97_spill] sm:$0xff]  ;;  %4743 = vmatpush.bf16.msrb.mxu3 %v9891_v8 }
 0x449   : > { %14789 = vst [vmem:[#allocation95_spill] sm:$0xff] %v12695_v20  ;;  %v12697_v33 = vadd.f32 %v3255_v55, %v3207_v26  ;;  %3401 = vmatmul.bf16.gmra.mxu0 %v12310_v9  ;;  %3499 = vmatmul.bf16.gmra.mxu2 %v12310_v9  ;;  %v9631_v55 = vor.u32 %v11024_v62, %v9630_v42  ;;  %v3353_v11 = vpop.f32.mrf.mxu3  ;;  %v11407_v26 = vld [vmem:[#allocation2 + $0x10] sm:$0xff] }
 0x44a   : > { %v3558_v9 = vpack.c.bf16 %v11407_v26, %v3554_v46  ;;  %v9887_v62 = vor.u32 %v11088_v24, %v9886_v22  ;;  %v3712_v46 = vrot.slane %v3559_v6, 1  ;;  %v9598_v22 = vld [vmem:[#allocation4 + $0x948] sm:$0xf] }
 0x44b   : > { %14790 = vst [vmem:[#allocation96_spill] sm:$0xff] %v12697_v33  ;;  %v14792_v33 = vld [vmem:[#allocation98_spill] sm:$0xff]  ;;  %v3257_v1 = vpop.f32.mrf.mxu1  ;;  %4596 = vmatpush.bf16.msrb.mxu0 %v9631_v55 }
 0x44c   : > { %v3304_v54 = vpop.f32.mrf.mxu2  ;;  %v3709_v18 = vrot.slane %v3558_v9, 1  ;;  %4645 = vmatpush.bf16.msrb.mxu1 %v9887_v62  ;;  %v11012_v9 = vld [vmem:[#allocation4 + $0x94c] sm:$0xf] }
 0x44d   : > { %v3305_v30 = vadd.f32 %v3304_v54, %v14791_v7  ;;  %v3710_v54 = vrot.slane %v14795_v44, 1  ;;  %v3713_v7 = vrot.slane %v14796_v59, 1  ;;  %v9854_v59 = vld [vmem:[#allocation4 + $0xb48] sm:$0xf] }
 0x44e   : > { %v3208_v50 = vpop.f32.mrf.mxu0 }
 0x44f   : > { %v3209_v20 = vadd.f32 %v3208_v50, %v14792_v33  ;;  %v12705_v37 = vadd.f32 %v3353_v11, %v3305_v30  ;;  %v14797_v50 = vld [vmem:[#allocation99_spill] sm:$0xff]  ;;  %v12713_v8 = vsel %vm3708_vm1, %v3709_v18, %v3710_v54  ;;  %v14798_v30 = vld [vmem:[#allocation100_spill] sm:$0xff]  ;;  %v12717_v24 = vsel %vm3708_vm1, %v3712_v46, %v3713_v7 }
 0x450   : > { %v11016_v18 = vld [vmem:[#allocation4 + $0x964] sm:$0xf0]  ;;  %v9856_v46 = vld [vmem:[#allocation4 + $0xb68] sm:$0xf0] }
 0x451   : > { %14793 = vst [vmem:[#allocation97_spill] sm:$0xff] %v12705_v37  ;;  %v12707_v42 = vadd.f32 %v3257_v1, %v3209_v20  ;;  %v3355_v23 = vpop.f32.mrf.mxu3  ;;  %v9600_v1 = vld [vmem:[#allocation4 + $0x968] sm:$0xf0] }
 0x452   : > { %v9603_v62 = vor.u32 %v11012_v9, %v9600_v1  ;;  %v11080_v9 = vld [vmem:[#allocation4 + $0xb64] sm:$0xf0] }
 0x453   : > { %14794 = vst [vmem:[#allocation98_spill] sm:$0xff] %v12707_v42  ;;  %v3416_v11 = vpop.f32.mrf.mxu1  ;;  %v9855_v44 = vor.u32 %v11080_v9, %v9854_v59 }
 0x454   : > { %v3306_v33 = vpop.f32.mrf.mxu2  ;;  %4695 = vmatpush.bf16.msrb.mxu2 %v9603_v62 }
 0x455   : > { %v3307_v35 = vadd.f32 %v3306_v33, %v14797_v50  ;;  %v11076_v33 = vld [vmem:[#allocation4 + $0xb4c] sm:$0xf]  ;;  %4646 = vmatpush.bf16.msrb.mxu1 %v9855_v44 }
 0x456   : > { %v3367_v55 = vpop.f32.mrf.mxu0  ;;  %4456 = vmatmul.bf16.vlgmr.msra.gmra.mxu1 %v12717_v24  ;;  %4554 = vmatmul.bf16.vlgmr.msra.gmra.mxu3 %v12717_v24  ;;  %v11004_v44 = vld [vmem:[#allocation4 + $0x90c] sm:$0xf] }
 0x457   : > { %v3368_v20 = vadd.f32 %v3367_v55, %v14798_v30  ;;  %v12719_v26 = vadd.f32 %v3355_v23, %v3307_v35  ;;  %v9599_v35 = vor.u32 %v11016_v18, %v9598_v22  ;;  %v9859_v23 = vor.u32 %v11076_v33, %v9856_v46  ;;  %v14801_v55 = vld [vmem:[#allocation101_spill] sm:$0xff] }
 0x458   : > { %v3715_v22 = vrot.slane %v14805_v38, 1  ;;  %v14806_v18 = vld [vmem:[#allocation21_spill] sm:$0xff]  ;;  %v9822_v38 = vld [vmem:[#allocation4 + $0xb08] sm:$0xf] }
 0x459   : > { %14799 = vst [vmem:[#allocation99_spill] sm:$0xff] %v12719_v26  ;;  %v12721_v6 = vadd.f32 %v3416_v11, %v3368_v20  ;;  %4407 = vmatmul.bf16.vlgmr.msra.gmra.mxu0 %v12713_v8  ;;  %4505 = vmatmul.bf16.vlgmr.msra.gmra.mxu2 %v12713_v8  ;;  %v3514_v20 = vpop.f32.mrf.mxu3  ;;  %v3717_v33 = vrot.slane %v14806_v18, 1 }
 0x45a   : > { %4597 = vmatpush.bf16.msrb.mxu0 %v9599_v35  ;;  %4744 = vmatpush.bf16.msrb.mxu3 %v9859_v23  ;;  %v12737_v35 = vsel %vm3708_vm1, %v3710_v54, %v3715_v22  ;;  %v14808_v23 = vld [vmem:[#allocation104_spill] sm:$0xff]  ;;  %v9568_v54 = vld [vmem:[#allocation4 + $0x928] sm:$0xf0] }
 0x45b   : > { %14800 = vst [vmem:[#allocation100_spill] sm:$0xff] %v12721_v6  ;;  %v14802_v6 = vld [vmem:[#allocation102_spill] sm:$0xff]  ;;  %v3418_v42 = vpop.f32.mrf.mxu1  ;;  %v9571_v9 = vor.u32 %v11004_v44, %v9568_v54  ;;  %v11072_v44 = vld [vmem:[#allocation4 + $0xb24] sm:$0xf0] }
 0x45c   : > { %v3465_v50 = vpop.f32.mrf.mxu2  ;;  %v9823_v40 = vor.u32 %v11072_v44, %v9822_v38 }
 0x45d   : > { %v3466_v30 = vadd.f32 %v3465_v50, %v14801_v55  ;;  %v14807_v50 = vld [vmem:[#allocation103_spill] sm:$0xff]  ;;  %4696 = vmatpush.bf16.msrb.mxu2 %v9571_v9 }
 0x45e   : > { %v3369_v11 = vpop.f32.mrf.mxu0  ;;  %4647 = vmatpush.bf16.msrb.mxu1 %v9823_v40  ;;  %v10996_v40 = vld [vmem:[#allocation4 + $0x8cc] sm:$0xf] }
 0x45f   : > { %v3370_v26 = vadd.f32 %v3369_v11, %v14802_v6  ;;  %v12729_v37 = vadd.f32 %v3514_v20, %v3466_v30  ;;  %v9566_v11 = vld [vmem:[#allocation4 + $0x908] sm:$0xf] }
 0x461   : > { %14803 = vst [vmem:[#allocation101_spill] sm:$0xff] %v12729_v37  ;;  %v12731_v1 = vadd.f32 %v3418_v42, %v3370_v26  ;;  %v3516_v55 = vpop.f32.mrf.mxu3  ;;  %v12741_v42 = vsel %vm3708_vm1, %v3713_v7, %v3717_v33  ;;  %v9824_v7 = vld [vmem:[#allocation4 + $0xb28] sm:$0xf0] }
 0x463   : > { %14804 = vst [vmem:[#allocation102_spill] sm:$0xff] %v12731_v1  ;;  %v3421_v20 = vpop.f32.mrf.mxu1 }
 0x464   : > { %v3467_v46 = vpop.f32.mrf.mxu2 }
 0x465   : > { %v3468_v62 = vadd.f32 %v3467_v46, %v14807_v50  ;;  %v11008_v46 = vld [vmem:[#allocation4 + $0x924] sm:$0xf0]  ;;  %v11068_v50 = vld [vmem:[#allocation4 + $0xb0c] sm:$0xf] }
 0x466   : > { %v3372_v6 = vpop.f32.mrf.mxu0  ;;  %4461 = vmatmul.bf16.gmra.mxu1 %v12741_v42  ;;  %4559 = vmatmul.bf16.gmra.mxu3 %v12741_v42 }
 0x467   : > { %v3373_v30 = vadd.f32 %v3372_v6, %v14808_v23  ;;  %v12743_v59 = vadd.f32 %v3516_v55, %v3468_v62  ;;  %v9567_v62 = vor.u32 %v11008_v46, %v9566_v11  ;;  %v9827_v55 = vor.u32 %v11068_v50, %v9824_v7  ;;  %v14811_v23 = vld [vmem:[#allocation105_spill] sm:$0xff]  ;;  %v14816_v46 = vld [vmem:[#allocation23_spill] sm:$0xff] }
 0x468   : > { %v3719_v11 = vrot.slane %v14815_v4, 1  ;;  %v3721_v50 = vrot.slane %v14816_v46, 1  ;;  %v9790_v4 = vld [vmem:[#allocation4 + $0xac8] sm:$0xf] }
 0x469   : > { %14809 = vst [vmem:[#allocation103_spill] sm:$0xff] %v12743_v59  ;;  %v12745_v26 = vadd.f32 %v3421_v20, %v3373_v30  ;;  %4412 = vmatmul.bf16.gmra.mxu0 %v12737_v35  ;;  %4510 = vmatmul.bf16.gmra.mxu2 %v12737_v35  ;;  %v3519_v20 = vpop.f32.mrf.mxu3  ;;  %v14812_v59 = vld [vmem:[#allocation106_spill] sm:$0xff] }
 0x46a   : > { %4598 = vmatpush.bf16.msrb.mxu0 %v9567_v62  ;;  %4745 = vmatpush.bf16.msrb.mxu3 %v9827_v55  ;;  %v14818_v62 = vld [vmem:[#allocation108_spill] sm:$0xff] }
 0x46b   : > { %14810 = vst [vmem:[#allocation104_spill] sm:$0xff] %v12745_v26  ;;  %v3423_v37 = vpop.f32.mrf.mxu1 }
 0x46c   : > { %v3470_v6 = vpop.f32.mrf.mxu2 }
 0x46d   : > { %v3471_v30 = vadd.f32 %v3470_v6, %v14811_v23  ;;  %v14817_v6 = vld [vmem:[#allocation107_spill] sm:$0xff] }
 0x46e   : > { %v3374_v26 = vpop.f32.mrf.mxu0 }
 0x46f   : > { %v3375_v1 = vadd.f32 %v3374_v26, %v14812_v59  ;;  %v12753_v18 = vadd.f32 %v3519_v20, %v3471_v30  ;;  %v12761_v26 = vsel %vm3708_vm1, %v3715_v22, %v3719_v11  ;;  %v9536_v22 = vld [vmem:[#allocation4 + $0x8e8] sm:$0xf0]  ;;  %v9534_v20 = vld [vmem:[#allocation4 + $0x8c8] sm:$0xf] }
 0x470   : > { %v9539_v44 = vor.u32 %v10996_v40, %v9536_v22  ;;  %v11064_v40 = vld [vmem:[#allocation4 + $0xae4] sm:$0xf0] }
 0x471   : > { %14813 = vst [vmem:[#allocation105_spill] sm:$0xff] %v12753_v18  ;;  %v12755_v54 = vadd.f32 %v3423_v37, %v3375_v1  ;;  %v3521_v23 = vpop.f32.mrf.mxu3  ;;  %v12765_v37 = vsel %vm3708_vm1, %v3717_v33, %v3721_v50  ;;  %v9792_v33 = vld [vmem:[#allocation4 + $0xae8] sm:$0xf0]  ;;  %v9791_v53 = vor.u32 %v11064_v40, %v9790_v4 }
 0x472   : > { %4697 = vmatpush.bf16.msrb.mxu2 %v9539_v44 }
 0x473   : > { %14814 = vst [vmem:[#allocation106_spill] sm:$0xff] %v12755_v54  ;;  %v3426_v30 = vpop.f32.mrf.mxu1  ;;  %4648 = vmatpush.bf16.msrb.mxu1 %v9791_v53  ;;  %v10988_v53 = vld [vmem:[#allocation4 + $0x88c] sm:$0xf] }
 0x474   : > { %v3472_v7 = vpop.f32.mrf.mxu2 }
 0x475   : > { %v3473_v9 = vadd.f32 %v3472_v7, %v14817_v6  ;;  %v11000_v7 = vld [vmem:[#allocation4 + $0x8e4] sm:$0xf0]  ;;  %v11060_v6 = vld [vmem:[#allocation4 + $0xacc] sm:$0xf] }
 0x476   : > { %v3377_v59 = vpop.f32.mrf.mxu0  ;;  %4466 = vmatmul.bf16.gmra.mxu1 %v12765_v37  ;;  %4564 = vmatmul.bf16.gmra.mxu3 %v12765_v37 }
 0x477   : > { %v3378_v55 = vadd.f32 %v3377_v59, %v14818_v62  ;;  %v12767_v38 = vadd.f32 %v3521_v23, %v3473_v9  ;;  %v9535_v9 = vor.u32 %v11000_v7, %v9534_v20  ;;  %v9795_v23 = vor.u32 %v11060_v6, %v9792_v33  ;;  %v14821_v62 = vld [vmem:[#allocation109_spill] sm:$0xff] }
 0x478   : > { %v3723_v20 = vrot.slane %v14825_v48, 1  ;;  %v14826_v7 = vld [vmem:[#allocation25_spill] sm:$0xff]  ;;  %v9758_v48 = vld [vmem:[#allocation4 + $0xa88] sm:$0xf] }
 0x479   : > { %14819 = vst [vmem:[#allocation107_spill] sm:$0xff] %v12767_v38  ;;  %v12769_v1 = vadd.f32 %v3426_v30, %v3378_v55  ;;  %4417 = vmatmul.bf16.gmra.mxu0 %v12761_v26  ;;  %4515 = vmatmul.bf16.gmra.mxu2 %v12761_v26  ;;  %v3524_v30 = vpop.f32.mrf.mxu3  ;;  %v14822_v38 = vld [vmem:[#allocation110_spill] sm:$0xff]  ;;  %v3725_v6 = vrot.slane %v14826_v7, 1 }
 0x47a   : > { %4599 = vmatpush.bf16.msrb.mxu0 %v9535_v9  ;;  %4746 = vmatpush.bf16.msrb.mxu3 %v9795_v23  ;;  %v14828_v9 = vld [vmem:[#allocation112_spill] sm:$0xff] }
 0x47b   : > { %14820 = vst [vmem:[#allocation108_spill] sm:$0xff] %v12769_v1  ;;  %v3428_v18 = vpop.f32.mrf.mxu1 }
 0x47c   : > { %v3475_v59 = vpop.f32.mrf.mxu2 }
 0x47d   : > { %v3476_v55 = vadd.f32 %v3475_v59, %v14821_v62  ;;  %v14827_v59 = vld [vmem:[#allocation111_spill] sm:$0xff] }
 0x47e   : > { %v3379_v1 = vpop.f32.mrf.mxu0 }
 0x47f   : > { %v3380_v54 = vadd.f32 %v3379_v1, %v14822_v38  ;;  %v12777_v46 = vadd.f32 %v3524_v30, %v3476_v55  ;;  %v12785_v1 = vsel %vm3708_vm1, %v3719_v11, %v3723_v20  ;;  %v9504_v11 = vld [vmem:[#allocation4 + $0x8a8] sm:$0xf0]  ;;  %v9502_v30 = vld [vmem:[#allocation4 + $0x888] sm:$0xf] }
 0x480   : > { %v9507_v40 = vor.u32 %v10988_v53, %v9504_v11  ;;  %v11056_v53 = vld [vmem:[#allocation4 + $0xaa4] sm:$0xf0] }
 0x481   : > { %14823 = vst [vmem:[#allocation109_spill] sm:$0xff] %v12777_v46  ;;  %v12779_v22 = vadd.f32 %v3428_v18, %v3380_v54  ;;  %v3526_v62 = vpop.f32.mrf.mxu3  ;;  %v12789_v18 = vsel %vm3708_vm1, %v3721_v50, %v3725_v6  ;;  %v9760_v50 = vld [vmem:[#allocation4 + $0xaa8] sm:$0xf0]  ;;  %v9759_v25 = vor.u32 %v11056_v53, %v9758_v48 }
 0x482   : > { %4698 = vmatpush.bf16.msrb.mxu2 %v9507_v40 }
 0x483   : > { %14824 = vst [vmem:[#allocation110_spill] sm:$0xff] %v12779_v22  ;;  %v3431_v55 = vpop.f32.mrf.mxu1  ;;  %4649 = vmatpush.bf16.msrb.mxu1 %v9759_v25  ;;  %v10980_v25 = vld [vmem:[#allocation4 + $0x84c] sm:$0xf] }
 0x484   : > { %v3477_v33 = vpop.f32.mrf.mxu2 }
 0x485   : > { %v3478_v44 = vadd.f32 %v3477_v33, %v14827_v59  ;;  %v10992_v33 = vld [vmem:[#allocation4 + $0x8a4] sm:$0xf0]  ;;  %v11052_v59 = vld [vmem:[#allocation4 + $0xa8c] sm:$0xf] }
 0x486   : > { %v3382_v38 = vpop.f32.mrf.mxu0  ;;  %4471 = vmatmul.bf16.gmra.mxu1 %v12789_v18  ;;  %4569 = vmatmul.bf16.gmra.mxu3 %v12789_v18 }
 0x487   : > { %v3383_v23 = vadd.f32 %v3382_v38, %v14828_v9  ;;  %v12791_v4 = vadd.f32 %v3526_v62, %v3478_v44  ;;  %v9503_v44 = vor.u32 %v10992_v33, %v9502_v30  ;;  %v9763_v62 = vor.u32 %v11052_v59, %v9760_v50  ;;  %v14831_v9 = vld [vmem:[#allocation113_spill] sm:$0xff]  ;;  %v14836_v33 = vld [vmem:[#allocation27_spill] sm:$0xff] }
 0x488   : > { %v3727_v30 = vrot.slane %v14835_v14, 1  ;;  %v3729_v59 = vrot.slane %v14836_v33, 1  ;;  %v9726_v14 = vld [vmem:[#allocation4 + $0xa48] sm:$0xf] }
 0x489   : > { %14829 = vst [vmem:[#allocation111_spill] sm:$0xff] %v12791_v4  ;;  %v12793_v54 = vadd.f32 %v3431_v55, %v3383_v23  ;;  %4422 = vmatmul.bf16.gmra.mxu0 %v12785_v1  ;;  %4520 = vmatmul.bf16.gmra.mxu2 %v12785_v1  ;;  %v3529_v55 = vpop.f32.mrf.mxu3  ;;  %v14832_v4 = vld [vmem:[#allocation114_spill] sm:$0xff] }
 0x48a   : > { %4600 = vmatpush.bf16.msrb.mxu0 %v9503_v44  ;;  %4747 = vmatpush.bf16.msrb.mxu3 %v9763_v62  ;;  %v14838_v44 = vld [vmem:[#allocation116_spill] sm:$0xff] }
 0x48b   : > { %14830 = vst [vmem:[#allocation112_spill] sm:$0xff] %v12793_v54  ;;  %v3433_v46 = vpop.f32.mrf.mxu1 }
 0x48c   : > { %v3480_v38 = vpop.f32.mrf.mxu2 }
 0x48d   : > { %v3481_v23 = vadd.f32 %v3480_v38, %v14831_v9  ;;  %v14837_v38 = vld [vmem:[#allocation115_spill] sm:$0xff] }
 0x48e   : > { %v3384_v54 = vpop.f32.mrf.mxu0 }
 0x48f   : > { %v3385_v22 = vadd.f32 %v3384_v54, %v14832_v4  ;;  %v12801_v7 = vadd.f32 %v3529_v55, %v3481_v23  ;;  %v12809_v54 = vsel %vm3708_vm1, %v3723_v20, %v3727_v30  ;;  %v9472_v20 = vld [vmem:[#allocation4 + $0x868] sm:$0xf0]  ;;  %v9470_v55 = vld [vmem:[#allocation4 + $0x848] sm:$0xf] }
 0x490   : > { %v9475_v53 = vor.u32 %v10980_v25, %v9472_v20  ;;  %v11048_v25 = vld [vmem:[#allocation4 + $0xa64] sm:$0xf0] }
 0x491   : > { %14833 = vst [vmem:[#allocation113_spill] sm:$0xff] %v12801_v7  ;;  %v12803_v11 = vadd.f32 %v3433_v46, %v3385_v22  ;;  %v3531_v9 = vpop.f32.mrf.mxu3  ;;  %v12813_v46 = vsel %vm3708_vm1, %v3725_v6, %v3729_v59  ;;  %v9728_v6 = vld [vmem:[#allocation4 + $0xa68] sm:$0xf0]  ;;  %v9727_v21 = vor.u32 %v11048_v25, %v9726_v14 }
 0x492   : > { %4699 = vmatpush.bf16.msrb.mxu2 %v9475_v53 }
 0x493   : > { %14834 = vst [vmem:[#allocation114_spill] sm:$0xff] %v12803_v11  ;;  %v3436_v23 = vpop.f32.mrf.mxu1  ;;  %4650 = vmatpush.bf16.msrb.mxu1 %v9727_v21  ;;  %v10972_v21 = vld [vmem:[#allocation4 + $0x80c] sm:$0xf] }
 0x494   : > { %v3482_v50 = vpop.f32.mrf.mxu2 }
 0x495   : > { %v3483_v40 = vadd.f32 %v3482_v50, %v14837_v38  ;;  %v10984_v50 = vld [vmem:[#allocation4 + $0x864] sm:$0xf0]  ;;  %v11044_v38 = vld [vmem:[#allocation4 + $0xa4c] sm:$0xf] }
 0x496   : > { %v3387_v4 = vpop.f32.mrf.mxu0  ;;  %4476 = vmatmul.bf16.gmra.mxu1 %v12813_v46  ;;  %4574 = vmatmul.bf16.gmra.mxu3 %v12813_v46 }
 0x497   : > { %v3388_v62 = vadd.f32 %v3387_v4, %v14838_v44  ;;  %v12815_v48 = vadd.f32 %v3531_v9, %v3483_v40  ;;  %v9471_v40 = vor.u32 %v10984_v50, %v9470_v55  ;;  %v9731_v9 = vor.u32 %v11044_v38, %v9728_v6  ;;  %v14841_v44 = vld [vmem:[#allocation117_spill] sm:$0xff] }
 0x498   : > { %v3731_v55 = vrot.slane %v14845_v17, 1  ;;  %v14846_v50 = vld [vmem:[#allocation29_spill] sm:$0xff]  ;;  %v9694_v17 = vld [vmem:[#allocation4 + $0xa08] sm:$0xf] }
 0x499   : > { %14839 = vst [vmem:[#allocation115_spill] sm:$0xff] %v12815_v48  ;;  %v12817_v22 = vadd.f32 %v3436_v23, %v3388_v62  ;;  %4427 = vmatmul.bf16.gmra.mxu0 %v12809_v54  ;;  %4525 = vmatmul.bf16.gmra.mxu2 %v12809_v54  ;;  %v3534_v23 = vpop.f32.mrf.mxu3  ;;  %v14842_v48 = vld [vmem:[#allocation118_spill] sm:$0xff]  ;;  %v3733_v38 = vrot.slane %v14846_v50, 1 }
 0x49a   : > { %4601 = vmatpush.bf16.msrb.mxu0 %v9471_v40  ;;  %4748 = vmatpush.bf16.msrb.mxu3 %v9731_v9  ;;  %v14848_v40 = vld [vmem:[#allocation120_spill] sm:$0xff] }
 0x49b   : > { %14840 = vst [vmem:[#allocation116_spill] sm:$0xff] %v12817_v22  ;;  %v3438_v7 = vpop.f32.mrf.mxu1 }
 0x49c   : > { %v3485_v4 = vpop.f32.mrf.mxu2 }
 0x49d   : > { %v3486_v62 = vadd.f32 %v3485_v4, %v14841_v44  ;;  %v14847_v4 = vld [vmem:[#allocation119_spill] sm:$0xff] }
 0x49e   : > { %v3389_v22 = vpop.f32.mrf.mxu0 }
 0x49f   : > { %v3390_v11 = vadd.f32 %v3389_v22, %v14842_v48  ;;  %v12825_v33 = vadd.f32 %v3534_v23, %v3486_v62  ;;  %v12833_v22 = vsel %vm3708_vm1, %v3727_v30, %v3731_v55  ;;  %v9440_v30 = vld [vmem:[#allocation4 + $0x828] sm:$0xf0]  ;;  %v9438_v23 = vld [vmem:[#allocation4 + $0x808] sm:$0xf] }
 0x4a0   : > { %v9443_v25 = vor.u32 %v10972_v21, %v9440_v30  ;;  %v11040_v21 = vld [vmem:[#allocation4 + $0xa24] sm:$0xf0] }
 0x4a1   : > { %14843 = vst [vmem:[#allocation117_spill] sm:$0xff] %v12825_v33  ;;  %v12827_v20 = vadd.f32 %v3438_v7, %v3390_v11  ;;  %v3536_v44 = vpop.f32.mrf.mxu3  ;;  %v12837_v7 = vsel %vm3708_vm1, %v3729_v59, %v3733_v38  ;;  %v9696_v59 = vld [vmem:[#allocation4 + $0xa28] sm:$0xf0]  ;;  %v9695_v60 = vor.u32 %v11040_v21, %v9694_v17  ;;  %v9672_v21 = vld [vmem:[#allocation4 + $0x9f0] sm:$0xf0] }
 0x4a2   : > { %4700 = vmatpush.bf16.msrb.mxu2 %v9443_v25 }
 0x4a3   : > { %14844 = vst [vmem:[#allocation118_spill] sm:$0xff] %v12827_v20  ;;  %v3441_v62 = vpop.f32.mrf.mxu1  ;;  %4651 = vmatpush.bf16.msrb.mxu1 %v9695_v60  ;;  %v3556_v60 = vld [vmem:[#allocation2 + $0x100] sm:$0x3] }
 0x4a4   : > { %v3487_v6 = vpop.f32.mrf.mxu2 }
 0x4a5   : > { %v3488_v53 = vadd.f32 %v3487_v6, %v14847_v4  ;;  %v10976_v6 = vld [vmem:[#allocation4 + $0x824] sm:$0xf0]  ;;  %v11036_v4 = vld [vmem:[#allocation4 + $0xa0c] sm:$0xf] }
 0x4a6   : > { %v3392_v48 = vpop.f32.mrf.mxu0  ;;  %4481 = vmatmul.bf16.gmra.mxu1 %v12837_v7  ;;  %4579 = vmatmul.bf16.gmra.mxu3 %v12837_v7 }
 0x4a7   : > { %v3393_v9 = vadd.f32 %v3392_v48, %v14848_v40  ;;  %v12839_v14 = vadd.f32 %v3536_v44, %v3488_v53  ;;  %v9439_v53 = vor.u32 %v10976_v6, %v9438_v23  ;;  %v9699_v44 = vor.u32 %v11036_v4, %v9696_v59  ;;  %v14851_v40 = vld [vmem:[#allocation121_spill] sm:$0xff]  ;;  %v14856_v6 = vld [vmem:[#allocation31_spill] sm:$0xff] }
 0x4a8   : > { %v3735_v23 = vrot.slane %v14855_v63, 1  ;;  %v3737_v4 = vrot.slane %v14856_v6, 1  ;;  %v14863_v6 = vld [vmem:[#allocation126_spill] sm:$0xff] }
 0x4a9   : > { %14849 = vst [vmem:[#allocation119_spill] sm:$0xff] %v12839_v14  ;;  %v12841_v11 = vadd.f32 %v3441_v62, %v3393_v9  ;;  %4432 = vmatmul.bf16.gmra.mxu0 %v12833_v22  ;;  %4530 = vmatmul.bf16.gmra.mxu2 %v12833_v22  ;;  %v3539_v62 = vpop.f32.mrf.mxu3  ;;  %v14852_v14 = vld [vmem:[#allocation122_spill] sm:$0xff] }
 0x4aa   : > { %4602 = vmatpush.bf16.msrb.mxu0 %v9439_v53  ;;  %4749 = vmatpush.bf16.msrb.mxu3 %v9699_v44  ;;  %v14858_v53 = vld [vmem:[#allocation124_spill] sm:$0xff] }
 0x4ab   : > { %14850 = vst [vmem:[#allocation120_spill] sm:$0xff] %v12841_v11  ;;  %v3443_v33 = vpop.f32.mrf.mxu1 }
 0x4ac   : > { %v3490_v48 = vpop.f32.mrf.mxu2 }
 0x4ad   : > { %v3491_v9 = vadd.f32 %v3490_v48, %v14851_v40  ;;  %v14857_v48 = vld [vmem:[#allocation123_spill] sm:$0xff] }
 0x4ae   : > { %v3394_v11 = vpop.f32.mrf.mxu0 }
 0x4af   : > { %v3395_v20 = vadd.f32 %v3394_v11, %v14852_v14  ;;  %v12849_v50 = vadd.f32 %v3539_v62, %v3491_v9  ;;  %v12857_v11 = vsel %vm3708_vm1, %v3731_v55, %v3735_v23  ;;  %v3557_v62 = vld [vmem:[#allocation2 + $0x108] sm:$0x3]  ;;  %v11029_v55 = vld [vmem:[#allocation4 + $0x9d4] sm:$0xf] }
 0x4b0   : > { %v3561_v0 = vpack.c.bf16 %v3557_v62, %v3557_v62 }
 0x4b1   : > { %14853 = vst [vmem:[#allocation121_spill] sm:$0xff] %v12849_v50  ;;  %v12851_v30 = vadd.f32 %v3443_v33, %v3395_v20  ;;  %v3541_v40 = vpop.f32.mrf.mxu3  ;;  %v12861_v33 = vsel %vm3708_vm1, %v3733_v38, %v3737_v4  ;;  %v11033_v38 = vld [vmem:[#allocation4 + $0x9ec] sm:$0xf0]  ;;  %v3560_v50 = vpack.c.bf16 %v3556_v60, %v3556_v60 }
 0x4b2   : > { %14859 = vst [vmem:[#allocation123_spill] sm:$0xff] %v12861_v33 }
 0x4b3   : > { %14854 = vst [vmem:[#allocation122_spill] sm:$0xff] %v12851_v30  ;;  %v3446_v9 = vpop.f32.mrf.mxu1 }
 0x4b4   : > { %v3492_v59 = vpop.f32.mrf.mxu2 }
 0x4b5   : > { %v3493_v25 = vadd.f32 %v3492_v59, %v14857_v48  ;;  %v9670_v59 = vld [vmem:[#allocation4 + $0x9d0] sm:$0xf]  ;;  %v9675_v48 = vor.u32 %v11029_v55, %v9672_v21 }
 0x4b6   : > { %v3397_v14 = vpop.f32.mrf.mxu0  ;;  %4486 = vmatmul.bf16.gmra.mxu1 %v12861_v33  ;;  %4584 = vmatmul.bf16.gmra.mxu3 %v12861_v33  ;;  %v9926_v21 = vld [vmem:[#allocation4 + $0xbd0] sm:$0xf] }
 0x4b7   : > { %v3398_v44 = vadd.f32 %v3397_v14, %v14858_v53  ;;  %v12863_v17 = vadd.f32 %v3541_v40, %v3493_v25  ;;  %v11093_v14 = vld [vmem:[#allocation4 + $0xbd4] sm:$0xf]  ;;  %v9671_v53 = vor.u32 %v11033_v38, %v9670_v59  ;;  %4889 = vmatpush.bf16.msra.mxu2 %v9675_v48  ;;  %v3739_v59 = vrot.slane %v3560_v50, 1 }
 0x4b8   : > { %v9928_v25 = vld [vmem:[#allocation4 + $0xbf0] sm:$0xf0]  ;;  %v9927_v38 = vor.u32 %v11097_v61, %v9926_v21 }
 0x4b9   : > { %14860 = vst [vmem:[#allocation124_spill] sm:$0xff] %v12863_v17  ;;  %v12865_v20 = vadd.f32 %v3446_v9, %v3398_v44  ;;  %4437 = vmatmul.bf16.gmra.mxu0 %v12857_v11  ;;  %4535 = vmatmul.bf16.gmra.mxu2 %v12857_v11  ;;  %v9931_v44 = vor.u32 %v11093_v14, %v9928_v25  ;;  %v14862_v9 = vld [vmem:[#allocation125_spill] sm:$0xff]  ;;  %v3544_v17 = vpop.f32.mrf.mxu3  ;;  %v3741_v14 = vrot.slane %v3561_v0, 1  ;;  %v11021_v61 = vld [vmem:[#allocation4 + $0x994] sm:$0xf] }
 0x4ba   : > { %4791 = vmatpush.bf16.msra.mxu0 %v9671_v53  ;;  %4840 = vmatpush.bf16.msra.mxu1 %v9927_v38  ;;  %v9640_v0 = vld [vmem:[#allocation4 + $0x9b0] sm:$0xf0]  ;;  %v11025_v53 = vld [vmem:[#allocation4 + $0x9ac] sm:$0xf0] }
 0x4bb   : > { %14861 = vst [vmem:[#allocation134_spill] sm:$0xff] %v12865_v20  ;;  %v3448_v45 = vpop.f32.mrf.mxu1  ;;  %4938 = vmatpush.bf16.msra.mxu3 %v9931_v44  ;;  %v11085_v44 = vld [vmem:[#allocation4 + $0xb94] sm:$0xf] }
 0x4bc   : > { %v3495_v40 = vpop.f32.mrf.mxu2 }
 0x4bd   : > { %v3496_v20 = vadd.f32 %v3495_v40, %v14862_v9  ;;  %v14864_v40 = vld [vmem:[#allocation127_spill] sm:$0xff] }
 0x4be   : > { %v3399_v30 = vpop.f32.mrf.mxu0 }
 0x4bf   : > { %v3400_v63 = vadd.f32 %v3399_v30, %v14863_v6  ;;  %v12873_v33 = vadd.f32 %v3544_v17, %v3496_v20  ;;  %v12879_v30 = vsel %vm3708_vm1, %v3735_v23, %v3739_v59  ;;  %v14865_v6 = vld [vmem:[#allocation128_spill] sm:$0xff]  ;;  %v9643_v20 = vor.u32 %v11021_v61, %v9640_v0 }
 0x4c0   : > { %v9638_v23 = vld [vmem:[#allocation4 + $0x990] sm:$0xf] }
 0x4c1   : > { %v12875_v55 = vadd.f32 %v3448_v45, %v3400_v63  ;;  %v3546_v48 = vpop.f32.mrf.mxu3  ;;  %v12883_v45 = vsel %vm3708_vm1, %v3737_v4, %v3741_v14  ;;  %v9896_v4 = vld [vmem:[#allocation4 + $0xbb0] sm:$0xf0]  ;;  %v9639_v59 = vor.u32 %v11025_v53, %v9638_v23  ;;  %4890 = vmatpush.bf16.msra.mxu2 %v9643_v20 }
 0x4c2   : > { %v9899_v38 = vor.u32 %v11085_v44, %v9896_v4  ;;  %v14866_v4 = vld [vmem:[#allocation129_spill] sm:$0xff] }
 0x4c3   : > { %v3451_v17 = vpop.f32.mrf.mxu1  ;;  %4792 = vmatpush.bf16.msra.mxu0 %v9639_v59  ;;  %v11013_v59 = vld [vmem:[#allocation4 + $0x954] sm:$0xf] }
 0x4c4   : > { %v3497_v25 = vpop.f32.mrf.mxu2  ;;  %4939 = vmatpush.bf16.msra.mxu3 %v9899_v38  ;;  %v9608_v38 = vld [vmem:[#allocation4 + $0x970] sm:$0xf0] }
 0x4c5   : > { %v3498_v60 = vadd.f32 %v3497_v25, %v14864_v40 }
 0x4c6   : > { %v3402_v9 = vpop.f32.mrf.mxu0  ;;  %4491 = vmatmul.bf16.gmra.mxu1 %v12883_v45  ;;  %4589 = vmatmul.bf16.gmra.mxu3 %v12883_v45 }
 0x4c7   : > { %v3403_v62 = vadd.f32 %v3402_v9, %v14865_v6  ;;  %v12885_v63 = vadd.f32 %v3546_v48, %v3498_v60 }
 0x4c9   : > { %v12887_v50 = vadd.f32 %v3451_v17, %v3403_v62  ;;  %4442 = vmatmul.bf16.gmra.mxu0 %v12879_v30  ;;  %4540 = vmatmul.bf16.gmra.mxu2 %v12879_v30  ;;  %v3549_v25 = vpop.f32.mrf.mxu3  ;;  %v9894_v62 = vld [vmem:[#allocation4 + $0xb90] sm:$0xf] }
 0x4ca   : > { %v11089_v17 = vld [vmem:[#allocation4 + $0xbac] sm:$0xf0] }
 0x4cb   : > { %v3453_v48 = vpop.f32.mrf.mxu1  ;;  %v9895_v61 = vor.u32 %v11089_v17, %v9894_v62 }
 0x4cc   : > { %v3500_v21 = vpop.f32.mrf.mxu2 }
 0x4cd   : > { %v3501_v14 = vadd.f32 %v3500_v21, %v12322_v52  ;;  %4841 = vmatpush.bf16.msra.mxu1 %v9895_v61 }
 0x4ce   : > { %v3404_v40 = vpop.f32.mrf.mxu0 }
 0x4cf   : > { %v3405_v60 = vadd.f32 %v3404_v40, %v12324_v29  ;;  %v12895_v9 = vadd.f32 %v3549_v25, %v3501_v14  ;;  %v9611_v14 = vor.u32 %v11013_v59, %v9608_v38  ;;  %v11017_v25 = vld [vmem:[#allocation4 + $0x96c] sm:$0xf0]  ;;  %v11077_v40 = vld [vmem:[#allocation4 + $0xb54] sm:$0xf] }
 0x4d1   : > { %v12897_v6 = vadd.f32 %v3453_v48, %v3405_v60  ;;  %v3551_v52 = vpop.f32.mrf.mxu3  ;;  %v9864_v60 = vld [vmem:[#allocation4 + $0xb70] sm:$0xf0]  ;;  %4891 = vmatpush.bf16.msra.mxu2 %v9611_v14 }
 0x4d2   : > { %v9867_v17 = vor.u32 %v11077_v40, %v9864_v60 }
 0x4d3   : > { %v4457_v44 = vpop.f32.mrf.mxu1 }
 0x4d4   : > { %v3502_v0 = vpop.f32.mrf.mxu2  ;;  %4940 = vmatpush.bf16.msra.mxu3 %v9867_v17  ;;  %v9576_v17 = vld [vmem:[#allocation4 + $0x930] sm:$0xf0] }
 0x4d5   : > { %v3503_v23 = vadd.f32 %v3502_v0, %v12326_v39  ;;  %v9606_v39 = vld [vmem:[#allocation4 + $0x950] sm:$0xf] }
 0x4d6   : > { %v4408_v53 = vpop.f32.mrf.mxu0  ;;  %4652 = vmatmul.bf16.vlgmr.msrb.gmra.mxu1 %v12717_v24  ;;  %4750 = vmatmul.bf16.vlgmr.msrb.gmra.mxu3 %v12717_v24  ;;  %v9607_v62 = vor.u32 %v11017_v25, %v9606_v39 }
 0x4d7   : > { %v12900_v20 = vadd.f32 %v3551_v52, %v3503_v23  ;;  %v4458_v29 = vadd.f32 %v4457_v44, %v4408_v53 }
 0x4d8   : > { %4793 = vmatpush.bf16.msra.mxu0 %v9607_v62 }
 0x4d9   : > { %4603 = vmatmul.bf16.vlgmr.msrb.gmra.mxu0 %v12713_v8  ;;  %v12904_v21 = vadd.f32 %v4458_v29, %v14866_v4  ;;  %4701 = vmatmul.bf16.vlgmr.msrb.gmra.mxu2 %v12713_v8  ;;  %v4555_v61 = vpop.f32.mrf.mxu3  ;;  %v9862_v29 = vld [vmem:[#allocation4 + $0xb50] sm:$0xf] }
 0x4da   : > { %v11081_v4 = vld [vmem:[#allocation4 + $0xb6c] sm:$0xf0] }
 0x4db   : > { %v4459_v52 = vpop.f32.mrf.mxu1  ;;  %v9863_v38 = vor.u32 %v11081_v4, %v9862_v29 }
 0x4dc   : > { %v4506_v48 = vpop.f32.mrf.mxu2 }
 0x4dd   : > { %v4556_v23 = vadd.f32 %v4555_v61, %v4506_v48  ;;  %4842 = vmatpush.bf16.msra.mxu1 %v9863_v38  ;;  %v9574_v61 = vld [vmem:[#allocation4 + $0x910] sm:$0xf] }
 0x4de   : > { %v4410_v0 = vpop.f32.mrf.mxu0 }
 0x4df   : > { %v4460_v53 = vadd.f32 %v4459_v52, %v4410_v0  ;;  %v12910_v44 = vadd.f32 %v4556_v23, %v12337_v36  ;;  %v11009_v23 = vld [vmem:[#allocation4 + $0x92c] sm:$0xf0]  ;;  %v11069_v52 = vld [vmem:[#allocation4 + $0xb14] sm:$0xf] }
 0x4e0   : > { %v9575_v29 = vor.u32 %v11009_v23, %v9574_v61 }
 0x4e1   : > { %v12913_v59 = vadd.f32 %v4460_v53, %v12339_v10  ;;  %v4557_v25 = vpop.f32.mrf.mxu3  ;;  %v11005_v10 = vld [vmem:[#allocation4 + $0x914] sm:$0xf] }
 0x4e2   : > { %v9579_v0 = vor.u32 %v11005_v10, %v9576_v17  ;;  %v9832_v53 = vld [vmem:[#allocation4 + $0xb30] sm:$0xf0]  ;;  %4794 = vmatpush.bf16.msra.mxu0 %v9575_v29 }
 0x4e3   : > { %v4462_v14 = vpop.f32.mrf.mxu1  ;;  %v9835_v4 = vor.u32 %v11069_v52, %v9832_v53 }
 0x4e4   : > { %v4508_v39 = vpop.f32.mrf.mxu2  ;;  %4892 = vmatpush.bf16.msra.mxu2 %v9579_v0 }
 0x4e5   : > { %v4558_v60 = vadd.f32 %v4557_v25, %v4508_v39  ;;  %4941 = vmatpush.bf16.msra.mxu3 %v9835_v4  ;;  %v9544_v4 = vld [vmem:[#allocation4 + $0x8f0] sm:$0xf0] }
 0x4e6   : > { %v4413_v40 = vpop.f32.mrf.mxu0  ;;  %4657 = vmatmul.bf16.gmra.mxu1 %v12741_v42  ;;  %4755 = vmatmul.bf16.gmra.mxu3 %v12741_v42 }
 0x4e7   : > { %v4463_v48 = vadd.f32 %v4462_v14, %v4413_v40  ;;  %v12916_v62 = vadd.f32 %v4558_v60, %v12343_v16  ;;  %v9830_v14 = vld [vmem:[#allocation4 + $0xb10] sm:$0xf] }
 0x4e9   : > { %4608 = vmatmul.bf16.gmra.mxu0 %v12737_v35  ;;  %v12920_v36 = vadd.f32 %v4463_v48, %v12345_v2  ;;  %4706 = vmatmul.bf16.gmra.mxu2 %v12737_v35  ;;  %v4560_v38 = vpop.f32.mrf.mxu3  ;;  %v11073_v48 = vld [vmem:[#allocation4 + $0xb2c] sm:$0xf0] }
 0x4ea   : > { %v9831_v17 = vor.u32 %v11073_v48, %v9830_v14 }
 0x4eb   : > { %v4464_v25 = vpop.f32.mrf.mxu1 }
 0x4ec   : > { %v4511_v16 = vpop.f32.mrf.mxu2  ;;  %4843 = vmatpush.bf16.msra.mxu1 %v9831_v17 }
 0x4ed   : > { %v4561_v2 = vadd.f32 %v4560_v38, %v4511_v16  ;;  %v9542_v38 = vld [vmem:[#allocation4 + $0x8d0] sm:$0xf] }
 0x4ee   : > { %v4415_v39 = vpop.f32.mrf.mxu0 }
 0x4ef   : > { %v4465_v40 = vadd.f32 %v4464_v25, %v4415_v39  ;;  %v12926_v60 = vadd.f32 %v4561_v2, %v12353_v34  ;;  %v11001_v2 = vld [vmem:[#allocation4 + $0x8ec] sm:$0xf0]  ;;  %v11061_v25 = vld [vmem:[#allocation4 + $0xad4] sm:$0xf] }
 0x4f0   : > { %v9543_v14 = vor.u32 %v11001_v2, %v9542_v38 }
 0x4f1   : > { %v12929_v10 = vadd.f32 %v4465_v40, %v12355_v47  ;;  %v4562_v23 = vpop.f32.mrf.mxu3  ;;  %v10997_v47 = vld [vmem:[#allocation4 + $0x8d4] sm:$0xf] }
 0x4f2   : > { %v9547_v39 = vor.u32 %v10997_v47, %v9544_v4  ;;  %v9800_v40 = vld [vmem:[#allocation4 + $0xaf0] sm:$0xf0]  ;;  %4795 = vmatpush.bf16.msra.mxu0 %v9543_v14 }
 0x4f3   : > { %v4467_v0 = vpop.f32.mrf.mxu1  ;;  %v9803_v48 = vor.u32 %v11061_v25, %v9800_v40 }
 0x4f4   : > { %v4513_v61 = vpop.f32.mrf.mxu2  ;;  %4893 = vmatpush.bf16.msra.mxu2 %v9547_v39 }
 0x4f5   : > { %v4563_v53 = vadd.f32 %v4562_v23, %v4513_v61  ;;  %4942 = vmatpush.bf16.msra.mxu3 %v9803_v48  ;;  %v9512_v48 = vld [vmem:[#allocation4 + $0x8b0] sm:$0xf0] }
 0x4f6   : > { %v4418_v52 = vpop.f32.mrf.mxu0  ;;  %4662 = vmatmul.bf16.gmra.mxu1 %v12765_v37  ;;  %4760 = vmatmul.bf16.gmra.mxu3 %v12765_v37 }
 0x4f7   : > { %v4468_v16 = vadd.f32 %v4467_v0, %v4418_v52  ;;  %v12932_v29 = vadd.f32 %v4563_v53, %v12359_v19  ;;  %v9798_v0 = vld [vmem:[#allocation4 + $0xad0] sm:$0xf] }
 0x4f9   : > { %4613 = vmatmul.bf16.gmra.mxu0 %v12761_v26  ;;  %v12936_v34 = vadd.f32 %v4468_v16, %v12361_v15  ;;  %4711 = vmatmul.bf16.gmra.mxu2 %v12761_v26  ;;  %v4565_v17 = vpop.f32.mrf.mxu3  ;;  %v11065_v16 = vld [vmem:[#allocation4 + $0xaec] sm:$0xf0] }
 0x4fa   : > { %v9799_v4 = vor.u32 %v11065_v16, %v9798_v0 }
 0x4fb   : > { %v4469_v23 = vpop.f32.mrf.mxu1 }
 0x4fc   : > { %v4516_v19 = vpop.f32.mrf.mxu2  ;;  %4844 = vmatpush.bf16.msra.mxu1 %v9799_v4 }
 0x4fd   : > { %v4566_v15 = vadd.f32 %v4565_v17, %v4516_v19  ;;  %v9510_v17 = vld [vmem:[#allocation4 + $0x890] sm:$0xf] }
 0x4fe   : > { %v4420_v61 = vpop.f32.mrf.mxu0 }
 0x4ff   : > { %v4470_v52 = vadd.f32 %v4469_v23, %v4420_v61  ;;  %v12942_v53 = vadd.f32 %v4566_v15, %v12369_v58  ;;  %v10993_v15 = vld [vmem:[#allocation4 + $0x8ac] sm:$0xf0]  ;;  %v11053_v23 = vld [vmem:[#allocation4 + $0xa94] sm:$0xf] }
 0x500   : > { %v9511_v0 = vor.u32 %v10993_v15, %v9510_v17 }
 0x501   : > { %v12945_v47 = vadd.f32 %v4470_v52, %v12371_v56  ;;  %v4567_v2 = vpop.f32.mrf.mxu3  ;;  %v10989_v56 = vld [vmem:[#allocation4 + $0x894] sm:$0xf] }
 0x502   : > { %v9515_v61 = vor.u32 %v10989_v56, %v9512_v48  ;;  %v9768_v52 = vld [vmem:[#allocation4 + $0xab0] sm:$0xf0]  ;;  %4796 = vmatpush.bf16.msra.mxu0 %v9511_v0 }
 0x503   : > { %v4472_v39 = vpop.f32.mrf.mxu1  ;;  %v9771_v16 = vor.u32 %v11053_v23, %v9768_v52 }
 0x504   : > { %v4518_v38 = vpop.f32.mrf.mxu2  ;;  %4894 = vmatpush.bf16.msra.mxu2 %v9515_v61 }
 0x505   : > { %v4568_v40 = vadd.f32 %v4567_v2, %v4518_v38  ;;  %4943 = vmatpush.bf16.msra.mxu3 %v9771_v16  ;;  %v9480_v16 = vld [vmem:[#allocation4 + $0x870] sm:$0xf0] }
 0x506   : > { %v4423_v25 = vpop.f32.mrf.mxu0  ;;  %4667 = vmatmul.bf16.gmra.mxu1 %v12789_v18  ;;  %4765 = vmatmul.bf16.gmra.mxu3 %v12789_v18 }
 0x507   : > { %v4473_v19 = vadd.f32 %v4472_v39, %v4423_v25  ;;  %v12948_v14 = vadd.f32 %v4568_v40, %v12375_v41  ;;  %v9766_v39 = vld [vmem:[#allocation4 + $0xa90] sm:$0xf] }
 0x509   : > { %4618 = vmatmul.bf16.gmra.mxu0 %v12785_v1  ;;  %v12952_v58 = vadd.f32 %v4473_v19, %v12377_v27  ;;  %4716 = vmatmul.bf16.gmra.mxu2 %v12785_v1  ;;  %v4570_v4 = vpop.f32.mrf.mxu3  ;;  %v11057_v19 = vld [vmem:[#allocation4 + $0xaac] sm:$0xf0] }
 0x50a   : > { %v9767_v48 = vor.u32 %v11057_v19, %v9766_v39 }
 0x50b   : > { %v4474_v2 = vpop.f32.mrf.mxu1 }
 0x50c   : > { %v4521_v41 = vpop.f32.mrf.mxu2  ;;  %4845 = vmatpush.bf16.msra.mxu1 %v9767_v48 }
 0x50d   : > { %v4571_v27 = vadd.f32 %v4570_v4, %v4521_v41  ;;  %v9478_v4 = vld [vmem:[#allocation4 + $0x850] sm:$0xf] }
 0x50e   : > { %v4425_v38 = vpop.f32.mrf.mxu0 }
 0x50f   : > { %v4475_v25 = vadd.f32 %v4474_v2, %v4425_v38  ;;  %v12958_v40 = vadd.f32 %v4571_v27, %v12385_v31  ;;  %v10985_v27 = vld [vmem:[#allocation4 + $0x86c] sm:$0xf0]  ;;  %v11045_v2 = vld [vmem:[#allocation4 + $0xa54] sm:$0xf] }
 0x510   : > { %v9479_v39 = vor.u32 %v10985_v27, %v9478_v4 }
 0x511   : > { %v12961_v56 = vadd.f32 %v4475_v25, %v12387_v12  ;;  %v4572_v15 = vpop.f32.mrf.mxu3  ;;  %v10981_v12 = vld [vmem:[#allocation4 + $0x854] sm:$0xf] }
 0x512   : > { %v9483_v38 = vor.u32 %v10981_v12, %v9480_v16  ;;  %v9736_v25 = vld [vmem:[#allocation4 + $0xa70] sm:$0xf0]  ;;  %4797 = vmatpush.bf16.msra.mxu0 %v9479_v39 }
 0x513   : > { %v4477_v61 = vpop.f32.mrf.mxu1  ;;  %v9739_v19 = vor.u32 %v11045_v2, %v9736_v25 }
 0x514   : > { %v4523_v17 = vpop.f32.mrf.mxu2  ;;  %4895 = vmatpush.bf16.msra.mxu2 %v9483_v38 }
 0x515   : > { %v4573_v52 = vadd.f32 %v4572_v15, %v4523_v17  ;;  %4944 = vmatpush.bf16.msra.mxu3 %v9739_v19  ;;  %v9448_v19 = vld [vmem:[#allocation4 + $0x830] sm:$0xf0] }
 0x516   : > { %v4428_v23 = vpop.f32.mrf.mxu0  ;;  %4672 = vmatmul.bf16.gmra.mxu1 %v12813_v46  ;;  %4770 = vmatmul.bf16.gmra.mxu3 %v12813_v46 }
 0x517   : > { %v4478_v41 = vadd.f32 %v4477_v61, %v4428_v23  ;;  %v12964_v0 = vadd.f32 %v4573_v52, %v12391_v3  ;;  %v9734_v61 = vld [vmem:[#allocation4 + $0xa50] sm:$0xf] }
 0x519   : > { %4623 = vmatmul.bf16.gmra.mxu0 %v12809_v54  ;;  %v12968_v31 = vadd.f32 %v4478_v41, %v12393_v49  ;;  %4721 = vmatmul.bf16.gmra.mxu2 %v12809_v54  ;;  %v4575_v48 = vpop.f32.mrf.mxu3  ;;  %v11049_v41 = vld [vmem:[#allocation4 + $0xa6c] sm:$0xf0] }
 0x51a   : > { %v9735_v16 = vor.u32 %v11049_v41, %v9734_v61 }
 0x51b   : > { %v4479_v15 = vpop.f32.mrf.mxu1 }
 0x51c   : > { %v4526_v3 = vpop.f32.mrf.mxu2  ;;  %4846 = vmatpush.bf16.msra.mxu1 %v9735_v16 }
 0x51d   : > { %v4576_v49 = vadd.f32 %v4575_v48, %v4526_v3  ;;  %v9446_v48 = vld [vmem:[#allocation4 + $0x810] sm:$0xf] }
 0x51e   : > { %v4430_v17 = vpop.f32.mrf.mxu0 }
 0x51f   : > { %v4480_v23 = vadd.f32 %v4479_v15, %v4430_v17  ;;  %v12974_v52 = vadd.f32 %v4576_v49, %v12401_v43  ;;  %v10977_v49 = vld [vmem:[#allocation4 + $0x82c] sm:$0xf0]  ;;  %v11037_v15 = vld [vmem:[#allocation4 + $0xa14] sm:$0xf] }
 0x520   : > { %v9447_v61 = vor.u32 %v10977_v49, %v9446_v48 }
 0x521   : > { %v12977_v12 = vadd.f32 %v4480_v23, %v12403_v28  ;;  %v4577_v27 = vpop.f32.mrf.mxu3  ;;  %v10973_v28 = vld [vmem:[#allocation4 + $0x814] sm:$0xf] }
 0x522   : > { %v9451_v17 = vor.u32 %v10973_v28, %v9448_v19  ;;  %v9704_v23 = vld [vmem:[#allocation4 + $0xa30] sm:$0xf0]  ;;  %4798 = vmatpush.bf16.msra.mxu0 %v9447_v61 }
 0x523   : > { %v4482_v38 = vpop.f32.mrf.mxu1  ;;  %v9707_v41 = vor.u32 %v11037_v15, %v9704_v23 }
 0x524   : > { %v4528_v4 = vpop.f32.mrf.mxu2  ;;  %4896 = vmatpush.bf16.msra.mxu2 %v9451_v17 }
 0x525   : > { %v4578_v25 = vadd.f32 %v4577_v27, %v4528_v4  ;;  %4945 = vmatpush.bf16.msra.mxu3 %v9707_v41 }
 0x526   : > { %v4433_v2 = vpop.f32.mrf.mxu0  ;;  %4677 = vmatmul.bf16.gmra.mxu1 %v12837_v7  ;;  %4775 = vmatmul.bf16.gmra.mxu3 %v12837_v7 }
 0x527   : > { %v4483_v3 = vadd.f32 %v4482_v38, %v4433_v2  ;;  %v12980_v39 = vadd.f32 %v4578_v25, %v12407_v32  ;;  %v9702_v38 = vld [vmem:[#allocation4 + $0xa10] sm:$0xf] }
 0x529   : > { %4628 = vmatmul.bf16.gmra.mxu0 %v12833_v22  ;;  %v12984_v43 = vadd.f32 %v4483_v3, %v12409_v57  ;;  %4726 = vmatmul.bf16.gmra.mxu2 %v12833_v22  ;;  %v4580_v16 = vpop.f32.mrf.mxu3  ;;  %v11041_v3 = vld [vmem:[#allocation4 + $0xa2c] sm:$0xf0] }
 0x52a   : > { %v9703_v19 = vor.u32 %v11041_v3, %v9702_v38  ;;  %v11094_v38 = vld [vmem:[#allocation4 + $0xbdc] sm:$0xf] }
 0x52b   : > { %14867 = vst [vmem:[#allocation125_spill] sm:$0xff] %v12984_v43  ;;  %v4484_v27 = vpop.f32.mrf.mxu1  ;;  %v9936_v3 = vld [vmem:[#allocation4 + $0xbf8] sm:$0xf0]  ;;  %v5314_v43 = vld [vmem:[#allocation2 + $0x108] sm:$0x7] }
 0x52c   : > { %v4531_v32 = vpop.f32.mrf.mxu2  ;;  %4847 = vmatpush.bf16.msra.mxu1 %v9703_v19 }
 0x52d   : > { %v4581_v57 = vadd.f32 %v4580_v16, %v4531_v32  ;;  %v14873_v16 = vld [vmem:[#allocation123_spill] sm:$0xff] }
 0x52e   : > { %v4435_v4 = vpop.f32.mrf.mxu0 }
 0x52f   : > { %v4485_v2 = vadd.f32 %v4484_v27, %v4435_v4  ;;  %v12990_v25 = vadd.f32 %v4581_v57, %v12417_v5  ;;  %v14871_v5 = vld [vmem:[#allocation130_spill] sm:$0xff]  ;;  %v9680_v4 = vld [vmem:[#allocation4 + $0x9f8] sm:$0xf0]  ;;  %v9678_v57 = vld [vmem:[#allocation4 + $0x9d8] sm:$0xf] }
 0x531   : > { %14868 = vst [vmem:[#allocation126_spill] sm:$0xff] %v12990_v25  ;;  %v12993_v28 = vadd.f32 %v4485_v2, %v12419_v13  ;;  %v4582_v49 = vpop.f32.mrf.mxu3  ;;  %v11030_v13 = vld [vmem:[#allocation4 + $0x9dc] sm:$0xf]  ;;  %v11034_v2 = vld [vmem:[#allocation4 + $0x9f4] sm:$0xf0] }
 0x532   : > { %v9683_v27 = vor.u32 %v11030_v13, %v9680_v4  ;;  %v9679_v19 = vor.u32 %v11034_v2, %v9678_v57  ;;  %v14876_v13 = vld [vmem:[#allocation132_spill] sm:$0xff] }
 0x533   : > { %14869 = vst [vmem:[#allocation127_spill] sm:$0xff] %v12993_v28  ;;  %v4487_v17 = vpop.f32.mrf.mxu1  ;;  %v11098_v28 = vld [vmem:[#allocation4 + $0xbf4] sm:$0xf0] }
 0x534   : > { %v4533_v48 = vpop.f32.mrf.mxu2  ;;  %5085 = vmatpush.bf16.msrb.mxu2 %v9683_v27  ;;  %4987 = vmatpush.bf16.msrb.mxu0 %v9679_v19 }
 0x535   : > { %v4583_v23 = vadd.f32 %v4582_v49, %v4533_v48  ;;  %v9939_v48 = vor.u32 %v11094_v38, %v9936_v3 }
 0x536   : > { %v4438_v15 = vpop.f32.mrf.mxu0  ;;  %4682 = vmatmul.bf16.gmra.mxu1 %v14873_v16  ;;  %4780 = vmatmul.bf16.gmra.mxu3 %v14873_v16 }
 0x537   : > { %v4488_v32 = vadd.f32 %v4487_v17, %v4438_v15  ;;  %v12996_v61 = vadd.f32 %v4583_v23, %v12423_v51  ;;  %5134 = vmatpush.bf16.msrb.mxu3 %v9939_v48  ;;  %v14880_v48 = vld [vmem:[#allocation133_spill] sm:$0xff] }
 0x539   : > { %14870 = vst [vmem:[#allocation128_spill] sm:$0xff] %v12996_v61  ;;  %4633 = vmatmul.bf16.gmra.mxu0 %v12857_v11  ;;  %v13000_v41 = vadd.f32 %v4488_v32, %v14871_v5  ;;  %4731 = vmatmul.bf16.gmra.mxu2 %v12857_v11  ;;  %v4585_v49 = vpop.f32.mrf.mxu3  ;;  %v14874_v5 = vld [vmem:[#allocation131_spill] sm:$0xff]  ;;  %v9934_v61 = vld [vmem:[#allocation4 + $0xbd8] sm:$0xf] }
 0x53a   : > { %v9935_v25 = vor.u32 %v11098_v28, %v9934_v61  ;;  %v9648_v28 = vld [vmem:[#allocation4 + $0x9b8] sm:$0xf0]  ;;  %v9646_v61 = vld [vmem:[#allocation4 + $0x998] sm:$0xf] }
 0x53b   : > { %14872 = vst [vmem:[#allocation129_spill] sm:$0xff] %v13000_v41  ;;  %v4489_v17 = vpop.f32.mrf.mxu1 }
 0x53c   : > { %v4536_v51 = vpop.f32.mrf.mxu2  ;;  %5036 = vmatpush.bf16.msrb.mxu1 %v9935_v25  ;;  %v11022_v25 = vld [vmem:[#allocation4 + $0x99c] sm:$0xf] }
 0x53d   : > { %v4586_v23 = vadd.f32 %v4585_v49, %v4536_v51  ;;  %v14878_v49 = vld [vmem:[#allocation32_spill] sm:$0xff] }
 0x53e   : > { %v4440_v15 = vpop.f32.mrf.mxu0 }
 0x53f   : > { %v4490_v32 = vadd.f32 %v4489_v17, %v4440_v15  ;;  %v13006_v41 = vadd.f32 %v4586_v23, %v14874_v5  ;;  %v9651_v23 = vor.u32 %v11022_v25, %v9648_v28  ;;  %v11026_v17 = vld [vmem:[#allocation4 + $0x9b4] sm:$0xf0]  ;;  %v9904_v5 = vld [vmem:[#allocation4 + $0xbb8] sm:$0xf0]  ;;  %v14884_v25 = vld [vmem:[#allocation34_spill] sm:$0xff] }
 0x541   : > { %14875 = vst [vmem:[#allocation130_spill] sm:$0xff] %v13006_v41  ;;  %v13009_v4 = vadd.f32 %v4490_v32, %v14876_v13  ;;  %v4587_v2 = vpop.f32.mrf.mxu3  ;;  %v11086_v32 = vld [vmem:[#allocation4 + $0xb9c] sm:$0xf]  ;;  %5086 = vmatpush.bf16.msrb.mxu2 %v9651_v23 }
 0x543   : > { %14877 = vst [vmem:[#allocation123_spill] sm:$0xff] %v13009_v4  ;;  %v4492_v27 = vpop.f32.mrf.mxu1  ;;  %v11090_v4 = vld [vmem:[#allocation4 + $0xbb4] sm:$0xf0] }
 0x544   : > { %v4538_v57 = vpop.f32.mrf.mxu2 }
 0x545   : > { %v4588_v3 = vadd.f32 %v4587_v2, %v4538_v57  ;;  %v9647_v57 = vor.u32 %v11026_v17, %v9646_v61  ;;  %v9907_v2 = vor.u32 %v11086_v32, %v9904_v5 }
 0x546   : > { %v4443_v38 = vpop.f32.mrf.mxu0  ;;  %4687 = vmatmul.bf16.gmra.mxu1 %v12883_v45  ;;  %4785 = vmatmul.bf16.gmra.mxu3 %v12883_v45 }
 0x547   : > { %v4493_v51 = vadd.f32 %v4492_v27, %v4443_v38  ;;  %v13012_v19 = vadd.f32 %v4588_v3, %v14878_v49  ;;  %4988 = vmatpush.bf16.msrb.mxu0 %v9647_v57  ;;  %5135 = vmatpush.bf16.msrb.mxu3 %v9907_v2  ;;  %v14888_v2 = vld [vmem:[#allocation36_spill] sm:$0xff] }
 0x549   : > { %14879 = vst [vmem:[#allocation131_spill] sm:$0xff] %v13012_v19  ;;  %4638 = vmatmul.bf16.gmra.mxu0 %v12879_v30  ;;  %v13016_v15 = vadd.f32 %v4493_v51, %v14880_v48  ;;  %4736 = vmatmul.bf16.gmra.mxu2 %v12879_v30  ;;  %v4590_v38 = vpop.f32.mrf.mxu3  ;;  %v14882_v48 = vld [vmem:[#allocation33_spill] sm:$0xff] }
 0x54a   : > { %v9902_v19 = vld [vmem:[#allocation4 + $0xb98] sm:$0xf] }
 0x54b   : > { %14881 = vst [vmem:[#allocation132_spill] sm:$0xff] %v13016_v15  ;;  %v4494_v51 = vpop.f32.mrf.mxu1  ;;  %v9903_v41 = vor.u32 %v11090_v4, %v9902_v19  ;;  %v9616_v4 = vld [vmem:[#allocation4 + $0x978] sm:$0xf0]  ;;  %v9614_v19 = vld [vmem:[#allocation4 + $0x958] sm:$0xf] }
 0x54c   : > { %v4541_v13 = vpop.f32.mrf.mxu2 }
 0x54d   : > { %v4591_v27 = vadd.f32 %v4590_v38, %v4541_v13  ;;  %5037 = vmatpush.bf16.msrb.mxu1 %v9903_v41  ;;  %v14886_v38 = vld [vmem:[#allocation35_spill] sm:$0xff]  ;;  %v11014_v41 = vld [vmem:[#allocation4 + $0x95c] sm:$0xf] }
 0x54e   : > { %v4445_v3 = vpop.f32.mrf.mxu0 }
 0x54f   : > { %v4495_v49 = vadd.f32 %v4494_v51, %v4445_v3  ;;  %v13022_v15 = vadd.f32 %v4591_v27, %v14882_v48  ;;  %v9619_v27 = vor.u32 %v11014_v41, %v9616_v4  ;;  %v11018_v51 = vld [vmem:[#allocation4 + $0x974] sm:$0xf0]  ;;  %v9872_v48 = vld [vmem:[#allocation4 + $0xb78] sm:$0xf0]  ;;  %v14892_v41 = vld [vmem:[#allocation38_spill] sm:$0xff] }
 0x551   : > { %14883 = vst [vmem:[#allocation32_spill] sm:$0xff] %v13022_v15  ;;  %v13025_v28 = vadd.f32 %v4495_v49, %v14884_v25  ;;  %v4592_v17 = vpop.f32.mrf.mxu3  ;;  %v11078_v49 = vld [vmem:[#allocation4 + $0xb5c] sm:$0xf]  ;;  %5087 = vmatpush.bf16.msrb.mxu2 %v9619_v27 }
 0x553   : > { %14885 = vst [vmem:[#allocation133_spill] sm:$0xff] %v13025_v28  ;;  %v4653_v23 = vpop.f32.mrf.mxu1  ;;  %v11082_v28 = vld [vmem:[#allocation4 + $0xb74] sm:$0xf0] }
 0x554   : > { %v4543_v61 = vpop.f32.mrf.mxu2 }
 0x555   : > { %v4593_v5 = vadd.f32 %v4592_v17, %v4543_v61  ;;  %v9615_v61 = vor.u32 %v11018_v51, %v9614_v19  ;;  %v9875_v17 = vor.u32 %v11078_v49, %v9872_v48 }
 0x556   : > { %v4604_v32 = vpop.f32.mrf.mxu0  ;;  %4848 = vmatmul.bf16.vlgmr.msra.gmra.mxu1 %v12717_v24  ;;  %4946 = vmatmul.bf16.vlgmr.msra.gmra.mxu3 %v12717_v24 }
 0x557   : > { %v4654_v13 = vadd.f32 %v4653_v23, %v4604_v32  ;;  %v13028_v57 = vadd.f32 %v4593_v5, %v14886_v38  ;;  %4989 = vmatpush.bf16.msrb.mxu0 %v9615_v61  ;;  %5136 = vmatpush.bf16.msrb.mxu3 %v9875_v17  ;;  %v14896_v17 = vld [vmem:[#allocation40_spill] sm:$0xff] }
 0x559   : > { %14887 = vst [vmem:[#allocation33_spill] sm:$0xff] %v13028_v57  ;;  %4799 = vmatmul.bf16.vlgmr.msra.gmra.mxu0 %v12713_v8  ;;  %v13032_v3 = vadd.f32 %v4654_v13, %v14888_v2  ;;  %4897 = vmatmul.bf16.vlgmr.msra.gmra.mxu2 %v12713_v8  ;;  %v4751_v32 = vpop.f32.mrf.mxu3  ;;  %v14890_v2 = vld [vmem:[#allocation37_spill] sm:$0xff] }
 0x55a   : > { %v9870_v57 = vld [vmem:[#allocation4 + $0xb58] sm:$0xf] }
 0x55b   : > { %14889 = vst [vmem:[#allocation34_spill] sm:$0xff] %v13032_v3  ;;  %v4655_v13 = vpop.f32.mrf.mxu1  ;;  %v9871_v15 = vor.u32 %v11082_v28, %v9870_v57  ;;  %v9584_v28 = vld [vmem:[#allocation4 + $0x938] sm:$0xf0]  ;;  %v9582_v57 = vld [vmem:[#allocation4 + $0x918] sm:$0xf] }
 0x55c   : > { %v4702_v25 = vpop.f32.mrf.mxu2 }
 0x55d   : > { %v4752_v23 = vadd.f32 %v4751_v32, %v4702_v25  ;;  %5038 = vmatpush.bf16.msrb.mxu1 %v9871_v15  ;;  %v14894_v32 = vld [vmem:[#allocation39_spill] sm:$0xff]  ;;  %v11006_v15 = vld [vmem:[#allocation4 + $0x91c] sm:$0xf] }
 0x55e   : > { %v4606_v5 = vpop.f32.mrf.mxu0 }
 0x55f   : > { %v4656_v38 = vadd.f32 %v4655_v13, %v4606_v5  ;;  %v13038_v3 = vadd.f32 %v4752_v23, %v14890_v2  ;;  %v9587_v23 = vor.u32 %v11006_v15, %v9584_v28  ;;  %v11010_v13 = vld [vmem:[#allocation4 + $0x934] sm:$0xf0]  ;;  %v9840_v2 = vld [vmem:[#allocation4 + $0xb38] sm:$0xf0]  ;;  %v14900_v15 = vld [vmem:[#allocation42_spill] sm:$0xff] }
 0x561   : > { %14891 = vst [vmem:[#allocation35_spill] sm:$0xff] %v13038_v3  ;;  %v13041_v4 = vadd.f32 %v4656_v38, %v14892_v41  ;;  %v4753_v51 = vpop.f32.mrf.mxu3  ;;  %v11070_v38 = vld [vmem:[#allocation4 + $0xb1c] sm:$0xf]  ;;  %5088 = vmatpush.bf16.msrb.mxu2 %v9587_v23 }
 0x563   : > { %14893 = vst [vmem:[#allocation36_spill] sm:$0xff] %v13041_v4  ;;  %v4658_v27 = vpop.f32.mrf.mxu1  ;;  %v11074_v4 = vld [vmem:[#allocation4 + $0xb34] sm:$0xf0] }
 0x564   : > { %v4704_v19 = vpop.f32.mrf.mxu2 }
 0x565   : > { %v4754_v48 = vadd.f32 %v4753_v51, %v4704_v19  ;;  %v9583_v19 = vor.u32 %v11010_v13, %v9582_v57  ;;  %v9843_v51 = vor.u32 %v11070_v38, %v9840_v2 }
 0x566   : > { %v4609_v49 = vpop.f32.mrf.mxu0  ;;  %4853 = vmatmul.bf16.gmra.mxu1 %v12741_v42  ;;  %4951 = vmatmul.bf16.gmra.mxu3 %v12741_v42 }
 0x567   : > { %v4659_v25 = vadd.f32 %v4658_v27, %v4609_v49  ;;  %v13044_v61 = vadd.f32 %v4754_v48, %v14894_v32  ;;  %4990 = vmatpush.bf16.msrb.mxu0 %v9583_v19  ;;  %5137 = vmatpush.bf16.msrb.mxu3 %v9843_v51  ;;  %v14904_v51 = vld [vmem:[#allocation44_spill] sm:$0xff] }
 0x569   : > { %14895 = vst [vmem:[#allocation37_spill] sm:$0xff] %v13044_v61  ;;  %4804 = vmatmul.bf16.gmra.mxu0 %v12737_v35  ;;  %v13048_v5 = vadd.f32 %v4659_v25, %v14896_v17  ;;  %4902 = vmatmul.bf16.gmra.mxu2 %v12737_v35  ;;  %v4756_v49 = vpop.f32.mrf.mxu3  ;;  %v14898_v17 = vld [vmem:[#allocation41_spill] sm:$0xff] }
 0x56a   : > { %v9838_v61 = vld [vmem:[#allocation4 + $0xb18] sm:$0xf] }
 0x56b   : > { %14897 = vst [vmem:[#allocation38_spill] sm:$0xff] %v13048_v5  ;;  %v4660_v25 = vpop.f32.mrf.mxu1  ;;  %v9839_v3 = vor.u32 %v11074_v4, %v9838_v61  ;;  %v9552_v4 = vld [vmem:[#allocation4 + $0x8f8] sm:$0xf0]  ;;  %v9550_v61 = vld [vmem:[#allocation4 + $0x8d8] sm:$0xf] }
 0x56c   : > { %v4707_v41 = vpop.f32.mrf.mxu2 }
 0x56d   : > { %v4757_v27 = vadd.f32 %v4756_v49, %v4707_v41  ;;  %5039 = vmatpush.bf16.msrb.mxu1 %v9839_v3  ;;  %v14902_v49 = vld [vmem:[#allocation43_spill] sm:$0xff]  ;;  %v10998_v3 = vld [vmem:[#allocation4 + $0x8dc] sm:$0xf] }
 0x56e   : > { %v4611_v48 = vpop.f32.mrf.mxu0 }
 0x56f   : > { %v4661_v32 = vadd.f32 %v4660_v25, %v4611_v48  ;;  %v13054_v5 = vadd.f32 %v4757_v27, %v14898_v17  ;;  %v9555_v27 = vor.u32 %v10998_v3, %v9552_v4  ;;  %v11002_v25 = vld [vmem:[#allocation4 + $0x8f4] sm:$0xf0]  ;;  %v9808_v17 = vld [vmem:[#allocation4 + $0xaf8] sm:$0xf0]  ;;  %v14908_v3 = vld [vmem:[#allocation46_spill] sm:$0xff] }
 0x571   : > { %14899 = vst [vmem:[#allocation39_spill] sm:$0xff] %v13054_v5  ;;  %v13057_v28 = vadd.f32 %v4661_v32, %v14900_v15  ;;  %v4758_v13 = vpop.f32.mrf.mxu3  ;;  %v11062_v32 = vld [vmem:[#allocation4 + $0xadc] sm:$0xf]  ;;  %5089 = vmatpush.bf16.msrb.mxu2 %v9555_v27 }
 0x573   : > { %14901 = vst [vmem:[#allocation40_spill] sm:$0xff] %v13057_v28  ;;  %v4663_v23 = vpop.f32.mrf.mxu1  ;;  %v11066_v28 = vld [vmem:[#allocation4 + $0xaf4] sm:$0xf0] }
 0x574   : > { %v4709_v57 = vpop.f32.mrf.mxu2 }
 0x575   : > { %v4759_v2 = vadd.f32 %v4758_v13, %v4709_v57  ;;  %v9551_v57 = vor.u32 %v11002_v25, %v9550_v61  ;;  %v9811_v13 = vor.u32 %v11062_v32, %v9808_v17 }
 0x576   : > { %v4614_v38 = vpop.f32.mrf.mxu0  ;;  %4858 = vmatmul.bf16.gmra.mxu1 %v12765_v37  ;;  %4956 = vmatmul.bf16.gmra.mxu3 %v12765_v37 }
 0x577   : > { %v4664_v41 = vadd.f32 %v4663_v23, %v4614_v38  ;;  %v13060_v19 = vadd.f32 %v4759_v2, %v14902_v49  ;;  %4991 = vmatpush.bf16.msrb.mxu0 %v9551_v57  ;;  %5138 = vmatpush.bf16.msrb.mxu3 %v9811_v13  ;;  %v14912_v13 = vld [vmem:[#allocation48_spill] sm:$0xff] }
 0x579   : > { %14903 = vst [vmem:[#allocation41_spill] sm:$0xff] %v13060_v19  ;;  %4809 = vmatmul.bf16.gmra.mxu0 %v12761_v26  ;;  %v13064_v48 = vadd.f32 %v4664_v41, %v14904_v51  ;;  %4907 = vmatmul.bf16.gmra.mxu2 %v12761_v26  ;;  %v4761_v38 = vpop.f32.mrf.mxu3  ;;  %v14906_v51 = vld [vmem:[#allocation45_spill] sm:$0xff] }
 0x57a   : > { %v9806_v19 = vld [vmem:[#allocation4 + $0xad8] sm:$0xf] }
 0x57b   : > { %14905 = vst [vmem:[#allocation42_spill] sm:$0xff] %v13064_v48  ;;  %v4665_v41 = vpop.f32.mrf.mxu1  ;;  %v9807_v5 = vor.u32 %v11066_v28, %v9806_v19  ;;  %v9520_v28 = vld [vmem:[#allocation4 + $0x8b8] sm:$0xf0]  ;;  %v9518_v19 = vld [vmem:[#allocation4 + $0x898] sm:$0xf] }
 0x57c   : > { %v4712_v15 = vpop.f32.mrf.mxu2 }
 0x57d   : > { %v4762_v23 = vadd.f32 %v4761_v38, %v4712_v15  ;;  %5040 = vmatpush.bf16.msrb.mxu1 %v9807_v5  ;;  %v14910_v38 = vld [vmem:[#allocation47_spill] sm:$0xff]  ;;  %v10990_v5 = vld [vmem:[#allocation4 + $0x89c] sm:$0xf] }
 0x57e   : > { %v4616_v2 = vpop.f32.mrf.mxu0 }
 0x57f   : > { %v4666_v49 = vadd.f32 %v4665_v41, %v4616_v2  ;;  %v13070_v48 = vadd.f32 %v4762_v23, %v14906_v51  ;;  %v9523_v23 = vor.u32 %v10990_v5, %v9520_v28  ;;  %v10994_v41 = vld [vmem:[#allocation4 + $0x8b4] sm:$0xf0]  ;;  %v9776_v51 = vld [vmem:[#allocation4 + $0xab8] sm:$0xf0]  ;;  %v14916_v5 = vld [vmem:[#allocation50_spill] sm:$0xff] }
 0x581   : > { %14907 = vst [vmem:[#allocation43_spill] sm:$0xff] %v13070_v48  ;;  %v13073_v4 = vadd.f32 %v4666_v49, %v14908_v3  ;;  %v4763_v25 = vpop.f32.mrf.mxu3  ;;  %v11054_v49 = vld [vmem:[#allocation4 + $0xa9c] sm:$0xf]  ;;  %5090 = vmatpush.bf16.msrb.mxu2 %v9523_v23 }
 0x583   : > { %14909 = vst [vmem:[#allocation44_spill] sm:$0xff] %v13073_v4  ;;  %v4668_v27 = vpop.f32.mrf.mxu1  ;;  %v11058_v4 = vld [vmem:[#allocation4 + $0xab4] sm:$0xf0] }
 0x584   : > { %v4714_v61 = vpop.f32.mrf.mxu2 }
 0x585   : > { %v4764_v17 = vadd.f32 %v4763_v25, %v4714_v61  ;;  %v9519_v61 = vor.u32 %v10994_v41, %v9518_v19  ;;  %v9779_v25 = vor.u32 %v11054_v49, %v9776_v51 }
 0x586   : > { %v4619_v32 = vpop.f32.mrf.mxu0  ;;  %4863 = vmatmul.bf16.gmra.mxu1 %v12789_v18  ;;  %4961 = vmatmul.bf16.gmra.mxu3 %v12789_v18 }
 0x587   : > { %v4669_v15 = vadd.f32 %v4668_v27, %v4619_v32  ;;  %v13076_v57 = vadd.f32 %v4764_v17, %v14910_v38  ;;  %4992 = vmatpush.bf16.msrb.mxu0 %v9519_v61  ;;  %5139 = vmatpush.bf16.msrb.mxu3 %v9779_v25  ;;  %v14920_v25 = vld [vmem:[#allocation52_spill] sm:$0xff] }
 0x589   : > { %14911 = vst [vmem:[#allocation45_spill] sm:$0xff] %v13076_v57  ;;  %4814 = vmatmul.bf16.gmra.mxu0 %v12785_v1  ;;  %v13080_v2 = vadd.f32 %v4669_v15, %v14912_v13  ;;  %4912 = vmatmul.bf16.gmra.mxu2 %v12785_v1  ;;  %v4766_v32 = vpop.f32.mrf.mxu3  ;;  %v14914_v13 = vld [vmem:[#allocation49_spill] sm:$0xff] }
 0x58a   : > { %v9774_v57 = vld [vmem:[#allocation4 + $0xa98] sm:$0xf] }
 0x58b   : > { %14913 = vst [vmem:[#allocation46_spill] sm:$0xff] %v13080_v2  ;;  %v4670_v15 = vpop.f32.mrf.mxu1  ;;  %v9775_v48 = vor.u32 %v11058_v4, %v9774_v57  ;;  %v9488_v4 = vld [vmem:[#allocation4 + $0x878] sm:$0xf0]  ;;  %v9486_v57 = vld [vmem:[#allocation4 + $0x858] sm:$0xf] }
 0x58c   : > { %v4717_v3 = vpop.f32.mrf.mxu2 }
 0x58d   : > { %v4767_v27 = vadd.f32 %v4766_v32, %v4717_v3  ;;  %5041 = vmatpush.bf16.msrb.mxu1 %v9775_v48  ;;  %v14918_v32 = vld [vmem:[#allocation51_spill] sm:$0xff]  ;;  %v10982_v48 = vld [vmem:[#allocation4 + $0x85c] sm:$0xf] }
 0x58e   : > { %v4621_v17 = vpop.f32.mrf.mxu0 }
 0x58f   : > { %v4671_v38 = vadd.f32 %v4670_v15, %v4621_v17  ;;  %v13086_v2 = vadd.f32 %v4767_v27, %v14914_v13  ;;  %v9491_v27 = vor.u32 %v10982_v48, %v9488_v4  ;;  %v10986_v15 = vld [vmem:[#allocation4 + $0x874] sm:$0xf0]  ;;  %v9744_v13 = vld [vmem:[#allocation4 + $0xa78] sm:$0xf0]  ;;  %v14924_v48 = vld [vmem:[#allocation54_spill] sm:$0xff] }
 0x591   : > { %14915 = vst [vmem:[#allocation47_spill] sm:$0xff] %v13086_v2  ;;  %v13089_v28 = vadd.f32 %v4671_v38, %v14916_v5  ;;  %v4768_v41 = vpop.f32.mrf.mxu3  ;;  %v11046_v38 = vld [vmem:[#allocation4 + $0xa5c] sm:$0xf]  ;;  %5091 = vmatpush.bf16.msrb.mxu2 %v9491_v27 }
 0x593   : > { %14917 = vst [vmem:[#allocation48_spill] sm:$0xff] %v13089_v28  ;;  %v4673_v23 = vpop.f32.mrf.mxu1  ;;  %v11050_v28 = vld [vmem:[#allocation4 + $0xa74] sm:$0xf0] }
 0x594   : > { %v4719_v19 = vpop.f32.mrf.mxu2 }
 0x595   : > { %v4769_v51 = vadd.f32 %v4768_v41, %v4719_v19  ;;  %v9487_v19 = vor.u32 %v10986_v15, %v9486_v57  ;;  %v9747_v41 = vor.u32 %v11046_v38, %v9744_v13 }
 0x596   : > { %v4624_v49 = vpop.f32.mrf.mxu0  ;;  %4868 = vmatmul.bf16.gmra.mxu1 %v12813_v46  ;;  %4966 = vmatmul.bf16.gmra.mxu3 %v12813_v46 }
 0x597   : > { %v4674_v3 = vadd.f32 %v4673_v23, %v4624_v49  ;;  %v13092_v61 = vadd.f32 %v4769_v51, %v14918_v32  ;;  %4993 = vmatpush.bf16.msrb.mxu0 %v9487_v19  ;;  %5140 = vmatpush.bf16.msrb.mxu3 %v9747_v41  ;;  %v14928_v41 = vld [vmem:[#allocation56_spill] sm:$0xff] }
 0x599   : > { %14919 = vst [vmem:[#allocation49_spill] sm:$0xff] %v13092_v61  ;;  %4819 = vmatmul.bf16.gmra.mxu0 %v12809_v54  ;;  %v13096_v17 = vadd.f32 %v4674_v3, %v14920_v25  ;;  %4917 = vmatmul.bf16.gmra.mxu2 %v12809_v54  ;;  %v4771_v49 = vpop.f32.mrf.mxu3  ;;  %v14922_v25 = vld [vmem:[#allocation53_spill] sm:$0xff] }
 0x59a   : > { %v9742_v61 = vld [vmem:[#allocation4 + $0xa58] sm:$0xf] }
 0x59b   : > { %14921 = vst [vmem:[#allocation50_spill] sm:$0xff] %v13096_v17  ;;  %v4675_v3 = vpop.f32.mrf.mxu1  ;;  %v9743_v2 = vor.u32 %v11050_v28, %v9742_v61  ;;  %v9456_v28 = vld [vmem:[#allocation4 + $0x838] sm:$0xf0]  ;;  %v9454_v61 = vld [vmem:[#allocation4 + $0x818] sm:$0xf] }
 0x59c   : > { %v4722_v5 = vpop.f32.mrf.mxu2 }
 0x59d   : > { %v4772_v23 = vadd.f32 %v4771_v49, %v4722_v5  ;;  %5042 = vmatpush.bf16.msrb.mxu1 %v9743_v2  ;;  %v14926_v49 = vld [vmem:[#allocation55_spill] sm:$0xff]  ;;  %v10974_v2 = vld [vmem:[#allocation4 + $0x81c] sm:$0xf] }
 0x59e   : > { %v4626_v51 = vpop.f32.mrf.mxu0 }
 0x59f   : > { %v4676_v32 = vadd.f32 %v4675_v3, %v4626_v51  ;;  %v13102_v17 = vadd.f32 %v4772_v23, %v14922_v25  ;;  %v9459_v23 = vor.u32 %v10974_v2, %v9456_v28  ;;  %v10978_v3 = vld [vmem:[#allocation4 + $0x834] sm:$0xf0]  ;;  %v9712_v25 = vld [vmem:[#allocation4 + $0xa38] sm:$0xf0]  ;;  %v14932_v2 = vld [vmem:[#allocation58_spill] sm:$0xff] }
 0x5a1   : > { %14923 = vst [vmem:[#allocation51_spill] sm:$0xff] %v13102_v17  ;;  %v13105_v4 = vadd.f32 %v4676_v32, %v14924_v48  ;;  %v4773_v15 = vpop.f32.mrf.mxu3  ;;  %v11038_v32 = vld [vmem:[#allocation4 + $0xa1c] sm:$0xf]  ;;  %5092 = vmatpush.bf16.msrb.mxu2 %v9459_v23 }
 0x5a3   : > { %14925 = vst [vmem:[#allocation52_spill] sm:$0xff] %v13105_v4  ;;  %v4678_v27 = vpop.f32.mrf.mxu1  ;;  %v11042_v4 = vld [vmem:[#allocation4 + $0xa34] sm:$0xf0] }
 0x5a4   : > { %v4724_v57 = vpop.f32.mrf.mxu2 }
 0x5a5   : > { %v4774_v13 = vadd.f32 %v4773_v15, %v4724_v57  ;;  %v9455_v57 = vor.u32 %v10978_v3, %v9454_v61  ;;  %v9715_v15 = vor.u32 %v11038_v32, %v9712_v25 }
 0x5a6   : > { %v4629_v38 = vpop.f32.mrf.mxu0  ;;  %4873 = vmatmul.bf16.gmra.mxu1 %v12837_v7  ;;  %4971 = vmatmul.bf16.gmra.mxu3 %v12837_v7 }
 0x5a7   : > { %v4679_v5 = vadd.f32 %v4678_v27, %v4629_v38  ;;  %v13108_v19 = vadd.f32 %v4774_v13, %v14926_v49  ;;  %4994 = vmatpush.bf16.msrb.mxu0 %v9455_v57  ;;  %5141 = vmatpush.bf16.msrb.mxu3 %v9715_v15  ;;  %v14936_v15 = vld [vmem:[#allocation60_spill] sm:$0xff] }
 0x5a9   : > { %14927 = vst [vmem:[#allocation53_spill] sm:$0xff] %v13108_v19  ;;  %4824 = vmatmul.bf16.gmra.mxu0 %v12833_v22  ;;  %v13112_v51 = vadd.f32 %v4679_v5, %v14928_v41  ;;  %4922 = vmatmul.bf16.gmra.mxu2 %v12833_v22  ;;  %v4776_v38 = vpop.f32.mrf.mxu3  ;;  %v14930_v41 = vld [vmem:[#allocation57_spill] sm:$0xff] }
 0x5aa   : > { %v9710_v19 = vld [vmem:[#allocation4 + $0xa18] sm:$0xf] }
 0x5ab   : > { %14929 = vst [vmem:[#allocation54_spill] sm:$0xff] %v13112_v51  ;;  %v4680_v5 = vpop.f32.mrf.mxu1  ;;  %v9711_v17 = vor.u32 %v11042_v4, %v9710_v19  ;;  %v10168_v4 = vld [vmem:[#allocation4 + $0xde0] sm:$0xf0]  ;;  %v10166_v19 = vld [vmem:[#allocation4 + $0xdc0] sm:$0xf] }
 0x5ac   : > { %v4727_v48 = vpop.f32.mrf.mxu2 }
 0x5ad   : > { %v4777_v27 = vadd.f32 %v4776_v38, %v4727_v48  ;;  %5043 = vmatpush.bf16.msrb.mxu1 %v9711_v17  ;;  %v14934_v38 = vld [vmem:[#allocation59_spill] sm:$0xff]  ;;  %v11155_v17 = vld [vmem:[#allocation4 + $0xdc4] sm:$0xf] }
 0x5ae   : > { %v4631_v13 = vpop.f32.mrf.mxu0 }
 0x5af   : > { %v4681_v49 = vadd.f32 %v4680_v5, %v4631_v13  ;;  %v13118_v51 = vadd.f32 %v4777_v27, %v14930_v41  ;;  %v10171_v27 = vor.u32 %v11155_v17, %v10168_v4  ;;  %v11159_v5 = vld [vmem:[#allocation4 + $0xddc] sm:$0xf0]  ;;  %v10424_v41 = vld [vmem:[#allocation4 + $0xfe0] sm:$0xf0] }
 0x5b0   : > { %v14940_v17 = vld [vmem:[#allocation62_spill] sm:$0xff] }
 0x5b1   : > { %14931 = vst [vmem:[#allocation55_spill] sm:$0xff] %v13118_v51  ;;  %v13121_v28 = vadd.f32 %v4681_v49, %v14932_v2  ;;  %v4778_v3 = vpop.f32.mrf.mxu3  ;;  %v11219_v49 = vld [vmem:[#allocation4 + $0xfc4] sm:$0xf]  ;;  %6292 = vmatpush.bf16.msra.mxu2 %v10171_v27 }
 0x5b3   : > { %14933 = vst [vmem:[#allocation56_spill] sm:$0xff] %v13121_v28  ;;  %v4683_v23 = vpop.f32.mrf.mxu1  ;;  %v11223_v28 = vld [vmem:[#allocation4 + $0xfdc] sm:$0xf0] }
 0x5b4   : > { %v4729_v61 = vpop.f32.mrf.mxu2 }
 0x5b5   : > { %v4779_v25 = vadd.f32 %v4778_v3, %v4729_v61  ;;  %v10167_v61 = vor.u32 %v11159_v5, %v10166_v19  ;;  %v10427_v3 = vor.u32 %v11219_v49, %v10424_v41 }
 0x5b6   : > { %v4634_v32 = vpop.f32.mrf.mxu0  ;;  %4878 = vmatmul.bf16.gmra.mxu1 %v14873_v16  ;;  %4976 = vmatmul.bf16.gmra.mxu3 %v14873_v16 }
 0x5b7   : > { %v4684_v48 = vadd.f32 %v4683_v23, %v4634_v32  ;;  %v13124_v57 = vadd.f32 %v4779_v25, %v14934_v38  ;;  %6194 = vmatpush.bf16.msra.mxu0 %v10167_v61  ;;  %6341 = vmatpush.bf16.msra.mxu3 %v10427_v3  ;;  %v14944_v3 = vld [vmem:[#allocation64_spill] sm:$0xff] }
 0x5b9   : > { %14935 = vst [vmem:[#allocation57_spill] sm:$0xff] %v13124_v57  ;;  %4829 = vmatmul.bf16.gmra.mxu0 %v12857_v11  ;;  %v13128_v13 = vadd.f32 %v4684_v48, %v14936_v15  ;;  %4927 = vmatmul.bf16.gmra.mxu2 %v12857_v11  ;;  %v4781_v32 = vpop.f32.mrf.mxu3  ;;  %v14938_v15 = vld [vmem:[#allocation61_spill] sm:$0xff]  ;;  %v10422_v57 = vld [vmem:[#allocation4 + $0xfc0] sm:$0xf] }
 0x5ba   : > { %v10423_v51 = vor.u32 %v11223_v28, %v10422_v57  ;;  %v10136_v28 = vld [vmem:[#allocation4 + $0xda0] sm:$0xf0]  ;;  %v10134_v57 = vld [vmem:[#allocation4 + $0xd80] sm:$0xf] }
 0x5bb   : > { %14937 = vst [vmem:[#allocation58_spill] sm:$0xff] %v13128_v13  ;;  %v4685_v48 = vpop.f32.mrf.mxu1 }
 0x5bc   : > { %v4732_v2 = vpop.f32.mrf.mxu2  ;;  %6243 = vmatpush.bf16.msra.mxu1 %v10423_v51  ;;  %v11147_v51 = vld [vmem:[#allocation4 + $0xd84] sm:$0xf] }
 0x5bd   : > { %v4782_v23 = vadd.f32 %v4781_v32, %v4732_v2  ;;  %v14942_v32 = vld [vmem:[#allocation63_spill] sm:$0xff] }
 0x5be   : > { %v4636_v25 = vpop.f32.mrf.mxu0 }
 0x5bf   : > { %v4686_v38 = vadd.f32 %v4685_v48, %v4636_v25  ;;  %v13134_v13 = vadd.f32 %v4782_v23, %v14938_v15  ;;  %v10139_v23 = vor.u32 %v11147_v51, %v10136_v28  ;;  %v11151_v48 = vld [vmem:[#allocation4 + $0xd9c] sm:$0xf0]  ;;  %v10392_v15 = vld [vmem:[#allocation4 + $0xfa0] sm:$0xf0] }
 0x5c0   : > { %v14948_v51 = vld [vmem:[#allocation66_spill] sm:$0xff] }
 0x5c1   : > { %14939 = vst [vmem:[#allocation59_spill] sm:$0xff] %v13134_v13  ;;  %v13137_v4 = vadd.f32 %v4686_v38, %v14940_v17  ;;  %v4783_v5 = vpop.f32.mrf.mxu3  ;;  %v11211_v38 = vld [vmem:[#allocation4 + $0xf84] sm:$0xf]  ;;  %6293 = vmatpush.bf16.msra.mxu2 %v10139_v23 }
 0x5c3   : > { %14941 = vst [vmem:[#allocation60_spill] sm:$0xff] %v13137_v4  ;;  %v4688_v27 = vpop.f32.mrf.mxu1  ;;  %v11215_v4 = vld [vmem:[#allocation4 + $0xf9c] sm:$0xf0] }
 0x5c4   : > { %v4734_v19 = vpop.f32.mrf.mxu2 }
 0x5c5   : > { %v4784_v41 = vadd.f32 %v4783_v5, %v4734_v19  ;;  %v10135_v19 = vor.u32 %v11151_v48, %v10134_v57  ;;  %v10395_v5 = vor.u32 %v11211_v38, %v10392_v15 }
 0x5c6   : > { %v4639_v49 = vpop.f32.mrf.mxu0  ;;  %4883 = vmatmul.bf16.gmra.mxu1 %v12883_v45  ;;  %4981 = vmatmul.bf16.gmra.mxu3 %v12883_v45 }
 0x5c7   : > { %v4689_v2 = vadd.f32 %v4688_v27, %v4639_v49  ;;  %v13140_v61 = vadd.f32 %v4784_v41, %v14942_v32  ;;  %6195 = vmatpush.bf16.msra.mxu0 %v10135_v19  ;;  %6342 = vmatpush.bf16.msra.mxu3 %v10395_v5  ;;  %v14952_v5 = vld [vmem:[#allocation68_spill] sm:$0xff] }
 0x5c9   : > { %14943 = vst [vmem:[#allocation61_spill] sm:$0xff] %v13140_v61  ;;  %4834 = vmatmul.bf16.gmra.mxu0 %v12879_v30  ;;  %v13144_v25 = vadd.f32 %v4689_v2, %v14944_v3  ;;  %4932 = vmatmul.bf16.gmra.mxu2 %v12879_v30  ;;  %v4786_v49 = vpop.f32.mrf.mxu3  ;;  %v14946_v3 = vld [vmem:[#allocation65_spill] sm:$0xff]  ;;  %v10390_v61 = vld [vmem:[#allocation4 + $0xf80] sm:$0xf] }
 0x5ca   : > { %v10391_v13 = vor.u32 %v11215_v4, %v10390_v61  ;;  %v10104_v4 = vld [vmem:[#allocation4 + $0xd60] sm:$0xf0]  ;;  %v10102_v61 = vld [vmem:[#allocation4 + $0xd40] sm:$0xf] }
 0x5cb   : > { %14945 = vst [vmem:[#allocation62_spill] sm:$0xff] %v13144_v25  ;;  %v4690_v2 = vpop.f32.mrf.mxu1 }
 0x5cc   : > { %v4737_v17 = vpop.f32.mrf.mxu2  ;;  %6244 = vmatpush.bf16.msra.mxu1 %v10391_v13  ;;  %v11139_v13 = vld [vmem:[#allocation4 + $0xd44] sm:$0xf] }
 0x5cd   : > { %v4787_v27 = vadd.f32 %v4786_v49, %v4737_v17  ;;  %v14950_v49 = vld [vmem:[#allocation67_spill] sm:$0xff] }
 0x5ce   : > { %v4641_v41 = vpop.f32.mrf.mxu0 }
 0x5cf   : > { %v4691_v32 = vadd.f32 %v4690_v2, %v4641_v41  ;;  %v13150_v25 = vadd.f32 %v4787_v27, %v14946_v3  ;;  %v10107_v27 = vor.u32 %v11139_v13, %v10104_v4  ;;  %v11143_v2 = vld [vmem:[#allocation4 + $0xd5c] sm:$0xf0]  ;;  %v10360_v3 = vld [vmem:[#allocation4 + $0xf60] sm:$0xf0] }
 0x5d0   : > { %v14956_v13 = vld [vmem:[#allocation70_spill] sm:$0xff] }
 0x5d1   : > { %14947 = vst [vmem:[#allocation63_spill] sm:$0xff] %v13150_v25  ;;  %v13153_v28 = vadd.f32 %v4691_v32, %v14948_v51  ;;  %v4788_v48 = vpop.f32.mrf.mxu3  ;;  %v11203_v32 = vld [vmem:[#allocation4 + $0xf44] sm:$0xf]  ;;  %6294 = vmatpush.bf16.msra.mxu2 %v10107_v27 }
 0x5d3   : > { %14949 = vst [vmem:[#allocation64_spill] sm:$0xff] %v13153_v28  ;;  %v4849_v23 = vpop.f32.mrf.mxu1  ;;  %v15088_v28 = vld [vmem:[#allocation118_spill] sm:$0xff] }
 0x5d4   : > { %v4739_v57 = vpop.f32.mrf.mxu2 }
 0x5d5   : > { %v4789_v15 = vadd.f32 %v4788_v48, %v4739_v57  ;;  %v10103_v57 = vor.u32 %v11143_v2, %v10102_v61  ;;  %v10363_v48 = vor.u32 %v11203_v32, %v10360_v3 }
 0x5d6   : > { %v4800_v38 = vpop.f32.mrf.mxu0  ;;  %5044 = vmatmul.bf16.vlgmr.msrb.gmra.mxu1 %v12717_v24  ;;  %5142 = vmatmul.bf16.vlgmr.msrb.gmra.mxu3 %v12717_v24 }
 0x5d7   : > { %v4850_v17 = vadd.f32 %v4849_v23, %v4800_v38  ;;  %v13156_v19 = vadd.f32 %v4789_v15, %v14950_v49  ;;  %6196 = vmatpush.bf16.msra.mxu0 %v10103_v57  ;;  %6343 = vmatpush.bf16.msra.mxu3 %v10363_v48  ;;  %v14954_v49 = vld [vmem:[#allocation69_spill] sm:$0xff]  ;;  %v14960_v48 = vld [vmem:[#allocation72_spill] sm:$0xff] }
 0x5d9   : > { %14951 = vst [vmem:[#allocation65_spill] sm:$0xff] %v13156_v19  ;;  %4995 = vmatmul.bf16.vlgmr.msrb.gmra.mxu0 %v12713_v8  ;;  %v13160_v41 = vadd.f32 %v4850_v17, %v14952_v5  ;;  %5093 = vmatmul.bf16.vlgmr.msrb.gmra.mxu2 %v12713_v8  ;;  %v4947_v38 = vpop.f32.mrf.mxu3  ;;  %v10358_v5 = vld [vmem:[#allocation4 + $0xf40] sm:$0xf] }
 0x5db   : > { %14953 = vst [vmem:[#allocation66_spill] sm:$0xff] %v13160_v41  ;;  %v4851_v17 = vpop.f32.mrf.mxu1  ;;  %v11207_v41 = vld [vmem:[#allocation4 + $0xf5c] sm:$0xf0] }
 0x5dc   : > { %v4898_v51 = vpop.f32.mrf.mxu2  ;;  %v10359_v19 = vor.u32 %v11207_v41, %v10358_v5  ;;  %v10072_v41 = vld [vmem:[#allocation4 + $0xd20] sm:$0xf0] }
 0x5dd   : > { %v4948_v23 = vadd.f32 %v4947_v38, %v4898_v51  ;;  %v14958_v38 = vld [vmem:[#allocation71_spill] sm:$0xff]  ;;  %v10328_v5 = vld [vmem:[#allocation4 + $0xf20] sm:$0xf0] }
 0x5de   : > { %v4802_v15 = vpop.f32.mrf.mxu0  ;;  %6245 = vmatpush.bf16.msra.mxu1 %v10359_v19  ;;  %v11131_v19 = vld [vmem:[#allocation4 + $0xd04] sm:$0xf] }
 0x5df   : > { %v4852_v8 = vadd.f32 %v4851_v17, %v4802_v15  ;;  %v13166_v24 = vadd.f32 %v4948_v23, %v14954_v49  ;;  %v10070_v23 = vld [vmem:[#allocation4 + $0xd00] sm:$0xf]  ;;  %v10075_v17 = vor.u32 %v11131_v19, %v10072_v41  ;;  %v11195_v49 = vld [vmem:[#allocation4 + $0xf04] sm:$0xf] }
 0x5e0   : > { %v14964_v19 = vld [vmem:[#allocation74_spill] sm:$0xff] }
 0x5e1   : > { %14955 = vst [vmem:[#allocation67_spill] sm:$0xff] %v13166_v24  ;;  %v13169_v4 = vadd.f32 %v4852_v8, %v14956_v13  ;;  %v4949_v2 = vpop.f32.mrf.mxu3  ;;  %v11135_v8 = vld [vmem:[#allocation4 + $0xd1c] sm:$0xf0]  ;;  %6295 = vmatpush.bf16.msra.mxu2 %v10075_v17 }
 0x5e3   : > { %14957 = vst [vmem:[#allocation68_spill] sm:$0xff] %v13169_v4  ;;  %v4854_v27 = vpop.f32.mrf.mxu1  ;;  %v15074_v4 = vld [vmem:[#allocation114_spill] sm:$0xff] }
 0x5e4   : > { %v4900_v61 = vpop.f32.mrf.mxu2 }
 0x5e5   : > { %v4950_v3 = vadd.f32 %v4949_v2, %v4900_v61  ;;  %v10071_v61 = vor.u32 %v11135_v8, %v10070_v23  ;;  %v10331_v2 = vor.u32 %v11195_v49, %v10328_v5 }
 0x5e6   : > { %v4805_v32 = vpop.f32.mrf.mxu0  ;;  %5049 = vmatmul.bf16.gmra.mxu1 %v12741_v42  ;;  %5147 = vmatmul.bf16.gmra.mxu3 %v12741_v42 }
 0x5e7   : > { %v4855_v51 = vadd.f32 %v4854_v27, %v4805_v32  ;;  %v13172_v57 = vadd.f32 %v4950_v3, %v14958_v38  ;;  %6197 = vmatpush.bf16.msra.mxu0 %v10071_v61  ;;  %6344 = vmatpush.bf16.msra.mxu3 %v10331_v2  ;;  %v14962_v38 = vld [vmem:[#allocation73_spill] sm:$0xff]  ;;  %v14968_v2 = vld [vmem:[#allocation76_spill] sm:$0xff] }
 0x5e9   : > { %14959 = vst [vmem:[#allocation69_spill] sm:$0xff] %v13172_v57  ;;  %5000 = vmatmul.bf16.gmra.mxu0 %v12737_v35  ;;  %v13176_v15 = vadd.f32 %v4855_v51, %v14960_v48  ;;  %5098 = vmatmul.bf16.gmra.mxu2 %v12737_v35  ;;  %v4952_v32 = vpop.f32.mrf.mxu3  ;;  %v10326_v48 = vld [vmem:[#allocation4 + $0xf00] sm:$0xf] }
 0x5eb   : > { %14961 = vst [vmem:[#allocation70_spill] sm:$0xff] %v13176_v15  ;;  %v4856_v51 = vpop.f32.mrf.mxu1  ;;  %v11199_v15 = vld [vmem:[#allocation4 + $0xf1c] sm:$0xf0] }
 0x5ec   : > { %v4903_v13 = vpop.f32.mrf.mxu2  ;;  %v10327_v57 = vor.u32 %v11199_v15, %v10326_v48  ;;  %v10040_v15 = vld [vmem:[#allocation4 + $0xce0] sm:$0xf0] }
 0x5ed   : > { %v4953_v27 = vadd.f32 %v4952_v32, %v4903_v13  ;;  %v14966_v32 = vld [vmem:[#allocation75_spill] sm:$0xff]  ;;  %v10296_v48 = vld [vmem:[#allocation4 + $0xee0] sm:$0xf0] }
 0x5ee   : > { %v4807_v3 = vpop.f32.mrf.mxu0  ;;  %6246 = vmatpush.bf16.msra.mxu1 %v10327_v57  ;;  %v11123_v57 = vld [vmem:[#allocation4 + $0xcc4] sm:$0xf] }
 0x5ef   : > { %v4857_v35 = vadd.f32 %v4856_v51, %v4807_v3  ;;  %v13182_v42 = vadd.f32 %v4953_v27, %v14962_v38  ;;  %v10038_v27 = vld [vmem:[#allocation4 + $0xcc0] sm:$0xf]  ;;  %v10043_v51 = vor.u32 %v11123_v57, %v10040_v15  ;;  %v11187_v38 = vld [vmem:[#allocation4 + $0xec4] sm:$0xf] }
 0x5f0   : > { %v14972_v57 = vld [vmem:[#allocation78_spill] sm:$0xff] }
 0x5f1   : > { %14963 = vst [vmem:[#allocation71_spill] sm:$0xff] %v13182_v42  ;;  %v13185_v41 = vadd.f32 %v4857_v35, %v14964_v19  ;;  %v4954_v8 = vpop.f32.mrf.mxu3  ;;  %v11127_v35 = vld [vmem:[#allocation4 + $0xcdc] sm:$0xf0]  ;;  %6296 = vmatpush.bf16.msra.mxu2 %v10043_v51 }
 0x5f3   : > { %14965 = vst [vmem:[#allocation72_spill] sm:$0xff] %v13185_v41  ;;  %v4859_v17 = vpop.f32.mrf.mxu1  ;;  %v15060_v41 = vld [vmem:[#allocation110_spill] sm:$0xff] }
 0x5f4   : > { %v4905_v23 = vpop.f32.mrf.mxu2 }
 0x5f5   : > { %v4955_v5 = vadd.f32 %v4954_v8, %v4905_v23  ;;  %v10039_v23 = vor.u32 %v11127_v35, %v10038_v27  ;;  %v10299_v8 = vor.u32 %v11187_v38, %v10296_v48 }
 0x5f6   : > { %v4810_v49 = vpop.f32.mrf.mxu0  ;;  %5054 = vmatmul.bf16.gmra.mxu1 %v12765_v37  ;;  %5152 = vmatmul.bf16.gmra.mxu3 %v12765_v37 }
 0x5f7   : > { %v4860_v13 = vadd.f32 %v4859_v17, %v4810_v49  ;;  %v13188_v61 = vadd.f32 %v4955_v5, %v14966_v32  ;;  %6198 = vmatpush.bf16.msra.mxu0 %v10039_v23  ;;  %6345 = vmatpush.bf16.msra.mxu3 %v10299_v8  ;;  %v14970_v32 = vld [vmem:[#allocation77_spill] sm:$0xff]  ;;  %v14976_v8 = vld [vmem:[#allocation80_spill] sm:$0xff] }
 0x5f9   : > { %14967 = vst [vmem:[#allocation73_spill] sm:$0xff] %v13188_v61  ;;  %5005 = vmatmul.bf16.gmra.mxu0 %v12761_v26  ;;  %v13192_v3 = vadd.f32 %v4860_v13, %v14968_v2  ;;  %5103 = vmatmul.bf16.gmra.mxu2 %v12761_v26  ;;  %v4957_v49 = vpop.f32.mrf.mxu3  ;;  %v10294_v2 = vld [vmem:[#allocation4 + $0xec0] sm:$0xf] }
 0x5fb   : > { %14969 = vst [vmem:[#allocation74_spill] sm:$0xff] %v13192_v3  ;;  %v4861_v13 = vpop.f32.mrf.mxu1  ;;  %v11191_v3 = vld [vmem:[#allocation4 + $0xedc] sm:$0xf0] }
 0x5fc   : > { %v4908_v19 = vpop.f32.mrf.mxu2  ;;  %v10295_v61 = vor.u32 %v11191_v3, %v10294_v2  ;;  %v10008_v3 = vld [vmem:[#allocation4 + $0xca0] sm:$0xf0] }
 0x5fd   : > { %v4958_v17 = vadd.f32 %v4957_v49, %v4908_v19  ;;  %v14974_v49 = vld [vmem:[#allocation79_spill] sm:$0xff]  ;;  %v10264_v2 = vld [vmem:[#allocation4 + $0xea0] sm:$0xf0] }
 0x5fe   : > { %v4812_v5 = vpop.f32.mrf.mxu0  ;;  %6247 = vmatpush.bf16.msra.mxu1 %v10295_v61  ;;  %v11115_v61 = vld [vmem:[#allocation4 + $0xc84] sm:$0xf] }
 0x5ff   : > { %v4862_v26 = vadd.f32 %v4861_v13, %v4812_v5  ;;  %v13198_v37 = vadd.f32 %v4958_v17, %v14970_v32  ;;  %v10006_v17 = vld [vmem:[#allocation4 + $0xc80] sm:$0xf]  ;;  %v10011_v13 = vor.u32 %v11115_v61, %v10008_v3  ;;  %v11179_v32 = vld [vmem:[#allocation4 + $0xe84] sm:$0xf] }
 0x600   : > { %v14980_v61 = vld [vmem:[#allocation82_spill] sm:$0xff] }
 0x601   : > { %14971 = vst [vmem:[#allocation75_spill] sm:$0xff] %v13198_v37  ;;  %v13201_v15 = vadd.f32 %v4862_v26, %v14972_v57  ;;  %v4959_v35 = vpop.f32.mrf.mxu3  ;;  %v11119_v26 = vld [vmem:[#allocation4 + $0xc9c] sm:$0xf0]  ;;  %6297 = vmatpush.bf16.msra.mxu2 %v10011_v13 }
 0x603   : > { %14973 = vst [vmem:[#allocation76_spill] sm:$0xff] %v13201_v15  ;;  %v4864_v51 = vpop.f32.mrf.mxu1  ;;  %v15046_v15 = vld [vmem:[#allocation106_spill] sm:$0xff] }
 0x604   : > { %v4910_v27 = vpop.f32.mrf.mxu2 }
 0x605   : > { %v4960_v48 = vadd.f32 %v4959_v35, %v4910_v27  ;;  %v10007_v27 = vor.u32 %v11119_v26, %v10006_v17  ;;  %v10267_v35 = vor.u32 %v11179_v32, %v10264_v2 }
 0x606   : > { %v4815_v38 = vpop.f32.mrf.mxu0  ;;  %5059 = vmatmul.bf16.gmra.mxu1 %v12789_v18  ;;  %5157 = vmatmul.bf16.gmra.mxu3 %v12789_v18 }
 0x607   : > { %v4865_v19 = vadd.f32 %v4864_v51, %v4815_v38  ;;  %v13204_v23 = vadd.f32 %v4960_v48, %v14974_v49  ;;  %6199 = vmatpush.bf16.msra.mxu0 %v10007_v27  ;;  %6346 = vmatpush.bf16.msra.mxu3 %v10267_v35  ;;  %v14978_v49 = vld [vmem:[#allocation81_spill] sm:$0xff]  ;;  %v14984_v35 = vld [vmem:[#allocation84_spill] sm:$0xff] }
 0x609   : > { %14975 = vst [vmem:[#allocation77_spill] sm:$0xff] %v13204_v23  ;;  %5010 = vmatmul.bf16.gmra.mxu0 %v12785_v1  ;;  %v13208_v5 = vadd.f32 %v4865_v19, %v14976_v8  ;;  %5108 = vmatmul.bf16.gmra.mxu2 %v12785_v1  ;;  %v4962_v38 = vpop.f32.mrf.mxu3  ;;  %v10262_v8 = vld [vmem:[#allocation4 + $0xe80] sm:$0xf] }
 0x60b   : > { %14977 = vst [vmem:[#allocation78_spill] sm:$0xff] %v13208_v5  ;;  %v4866_v19 = vpop.f32.mrf.mxu1  ;;  %v11183_v5 = vld [vmem:[#allocation4 + $0xe9c] sm:$0xf0] }
 0x60c   : > { %v4913_v57 = vpop.f32.mrf.mxu2  ;;  %v10263_v23 = vor.u32 %v11183_v5, %v10262_v8  ;;  %v9976_v5 = vld [vmem:[#allocation4 + $0xc60] sm:$0xf0] }
 0x60d   : > { %v4963_v51 = vadd.f32 %v4962_v38, %v4913_v57  ;;  %v14982_v38 = vld [vmem:[#allocation83_spill] sm:$0xff]  ;;  %v10232_v8 = vld [vmem:[#allocation4 + $0xe60] sm:$0xf0] }
 0x60e   : > { %v4817_v48 = vpop.f32.mrf.mxu0  ;;  %6248 = vmatpush.bf16.msra.mxu1 %v10263_v23  ;;  %v11107_v23 = vld [vmem:[#allocation4 + $0xc44] sm:$0xf] }
 0x60f   : > { %v4867_v1 = vadd.f32 %v4866_v19, %v4817_v48  ;;  %v13214_v18 = vadd.f32 %v4963_v51, %v14978_v49  ;;  %v9974_v51 = vld [vmem:[#allocation4 + $0xc40] sm:$0xf]  ;;  %v9979_v19 = vor.u32 %v11107_v23, %v9976_v5  ;;  %v11171_v49 = vld [vmem:[#allocation4 + $0xe44] sm:$0xf] }
 0x610   : > { %v14988_v23 = vld [vmem:[#allocation86_spill] sm:$0xff] }
 0x611   : > { %14979 = vst [vmem:[#allocation79_spill] sm:$0xff] %v13214_v18  ;;  %v13217_v3 = vadd.f32 %v4867_v1, %v14980_v61  ;;  %v4964_v26 = vpop.f32.mrf.mxu3  ;;  %v11111_v1 = vld [vmem:[#allocation4 + $0xc5c] sm:$0xf0]  ;;  %6298 = vmatpush.bf16.msra.mxu2 %v9979_v19 }
 0x613   : > { %14981 = vst [vmem:[#allocation80_spill] sm:$0xff] %v13217_v3  ;;  %v4869_v13 = vpop.f32.mrf.mxu1 }
 0x614   : > { %v4915_v17 = vpop.f32.mrf.mxu2 }
 0x615   : > { %v4965_v2 = vadd.f32 %v4964_v26, %v4915_v17  ;;  %v9975_v17 = vor.u32 %v11111_v1, %v9974_v51  ;;  %v10235_v26 = vor.u32 %v11171_v49, %v10232_v8 }
 0x616   : > { %v4820_v32 = vpop.f32.mrf.mxu0  ;;  %5064 = vmatmul.bf16.gmra.mxu1 %v12813_v46  ;;  %5162 = vmatmul.bf16.gmra.mxu3 %v12813_v46 }
 0x617   : > { %v4870_v57 = vadd.f32 %v4869_v13, %v4820_v32  ;;  %v13220_v27 = vadd.f32 %v4965_v2, %v14982_v38  ;;  %6200 = vmatpush.bf16.msra.mxu0 %v9975_v17  ;;  %6347 = vmatpush.bf16.msra.mxu3 %v10235_v26  ;;  %v14986_v38 = vld [vmem:[#allocation85_spill] sm:$0xff]  ;;  %v14992_v26 = vld [vmem:[#allocation88_spill] sm:$0xff] }
 0x619   : > { %14983 = vst [vmem:[#allocation81_spill] sm:$0xff] %v13220_v27  ;;  %5015 = vmatmul.bf16.gmra.mxu0 %v12809_v54  ;;  %v13224_v48 = vadd.f32 %v4870_v57, %v14984_v35  ;;  %5113 = vmatmul.bf16.gmra.mxu2 %v12809_v54  ;;  %v4967_v32 = vpop.f32.mrf.mxu3  ;;  %v10230_v35 = vld [vmem:[#allocation4 + $0xe40] sm:$0xf] }
 0x61b   : > { %14985 = vst [vmem:[#allocation82_spill] sm:$0xff] %v13224_v48  ;;  %v4871_v57 = vpop.f32.mrf.mxu1  ;;  %v11175_v48 = vld [vmem:[#allocation4 + $0xe5c] sm:$0xf0] }
 0x61c   : > { %v4918_v61 = vpop.f32.mrf.mxu2  ;;  %v10231_v27 = vor.u32 %v11175_v48, %v10230_v35  ;;  %v9944_v48 = vld [vmem:[#allocation4 + $0xc20] sm:$0xf0] }
 0x61d   : > { %v4968_v13 = vadd.f32 %v4967_v32, %v4918_v61  ;;  %v14990_v32 = vld [vmem:[#allocation87_spill] sm:$0xff]  ;;  %v10200_v35 = vld [vmem:[#allocation4 + $0xe20] sm:$0xf0] }
 0x61e   : > { %v4822_v2 = vpop.f32.mrf.mxu0  ;;  %6249 = vmatpush.bf16.msra.mxu1 %v10231_v27  ;;  %v11099_v27 = vld [vmem:[#allocation4 + $0xc04] sm:$0xf] }
 0x61f   : > { %v4872_v54 = vadd.f32 %v4871_v57, %v4822_v2  ;;  %v13230_v46 = vadd.f32 %v4968_v13, %v14986_v38  ;;  %v9942_v13 = vld [vmem:[#allocation4 + $0xc00] sm:$0xf]  ;;  %v9947_v57 = vor.u32 %v11099_v27, %v9944_v48  ;;  %v11163_v38 = vld [vmem:[#allocation4 + $0xe04] sm:$0xf] }
 0x620   : > { %v14996_v27 = vld [vmem:[#allocation90_spill] sm:$0xff] }
 0x621   : > { %14987 = vst [vmem:[#allocation83_spill] sm:$0xff] %v13230_v46  ;;  %v13233_v5 = vadd.f32 %v4872_v54, %v14988_v23  ;;  %v4969_v1 = vpop.f32.mrf.mxu3  ;;  %v11103_v54 = vld [vmem:[#allocation4 + $0xc1c] sm:$0xf0]  ;;  %6299 = vmatpush.bf16.msra.mxu2 %v9947_v57  ;;  %v15013_v46 = vld [vmem:[#allocation19_spill] sm:$0xff] }
 0x622   : > { %v15014_v3 = vshrl.u32 %v15013_v46, 16 }
 0x623   : > { %14989 = vst [vmem:[#allocation84_spill] sm:$0xff] %v13233_v5  ;;  %v4874_v19 = vpop.f32.mrf.mxu1 }
 0x624   : > { %v4920_v51 = vpop.f32.mrf.mxu2  ;;  %v5468_v18 = vrot.slane %v15014_v3, 1 }
 0x625   : > { %v4970_v8 = vadd.f32 %v4969_v1, %v4920_v51  ;;  %v9943_v51 = vor.u32 %v11103_v54, %v9942_v13  ;;  %v10203_v1 = vor.u32 %v11163_v38, %v10200_v35 }
 0x626   : > { %v4825_v49 = vpop.f32.mrf.mxu0  ;;  %5069 = vmatmul.bf16.gmra.mxu1 %v12837_v7  ;;  %5167 = vmatmul.bf16.gmra.mxu3 %v12837_v7 }
 0x627   : > { %v4875_v61 = vadd.f32 %v4874_v19, %v4825_v49  ;;  %v13236_v17 = vadd.f32 %v4970_v8, %v14990_v32  ;;  %6201 = vmatpush.bf16.msra.mxu0 %v9943_v51  ;;  %6348 = vmatpush.bf16.msra.mxu3 %v10203_v1  ;;  %v14994_v32 = vld [vmem:[#allocation89_spill] sm:$0xff]  ;;  %v15000_v1 = vld [vmem:[#allocation92_spill] sm:$0xff] }
 0x629   : > { %14991 = vst [vmem:[#allocation85_spill] sm:$0xff] %v13236_v17  ;;  %5020 = vmatmul.bf16.gmra.mxu0 %v12833_v22  ;;  %v13240_v2 = vadd.f32 %v4875_v61, %v14992_v26  ;;  %5118 = vmatmul.bf16.gmra.mxu2 %v12833_v22  ;;  %v4972_v49 = vpop.f32.mrf.mxu3  ;;  %v10198_v26 = vld [vmem:[#allocation4 + $0xe00] sm:$0xf] }
 0x62b   : > { %14993 = vst [vmem:[#allocation86_spill] sm:$0xff] %v13240_v2  ;;  %v4876_v61 = vpop.f32.mrf.mxu1  ;;  %v11167_v2 = vld [vmem:[#allocation4 + $0xe1c] sm:$0xf0] }
 0x62c   : > { %v4923_v23 = vpop.f32.mrf.mxu2  ;;  %v10199_v17 = vor.u32 %v11167_v2, %v10198_v26  ;;  %v10176_v2 = vld [vmem:[#allocation4 + $0xde8] sm:$0xf0] }
 0x62d   : > { %v4973_v19 = vadd.f32 %v4972_v49, %v4923_v23  ;;  %v14998_v49 = vld [vmem:[#allocation91_spill] sm:$0xff] }
 0x62e   : > { %v4827_v8 = vpop.f32.mrf.mxu0  ;;  %6250 = vmatpush.bf16.msra.mxu1 %v10199_v17  ;;  %v11156_v17 = vld [vmem:[#allocation4 + $0xdcc] sm:$0xf] }
 0x62f   : > { %v4877_v22 = vadd.f32 %v4876_v61, %v4827_v8  ;;  %v13246_v7 = vadd.f32 %v4973_v19, %v14994_v32  ;;  %v10174_v19 = vld [vmem:[#allocation4 + $0xdc8] sm:$0xf]  ;;  %v10179_v61 = vor.u32 %v11156_v17, %v10176_v2  ;;  %v11220_v32 = vld [vmem:[#allocation4 + $0xfcc] sm:$0xf]  ;;  %v15004_v17 = vld [vmem:[#allocation94_spill] sm:$0xff] }
 0x630   : > { %v10432_v26 = vld [vmem:[#allocation4 + $0xfe8] sm:$0xf0] }
 0x631   : > { %14995 = vst [vmem:[#allocation87_spill] sm:$0xff] %v13246_v7  ;;  %v13249_v48 = vadd.f32 %v4877_v22, %v14996_v27  ;;  %v4974_v54 = vpop.f32.mrf.mxu3  ;;  %v11160_v22 = vld [vmem:[#allocation4 + $0xde4] sm:$0xf0]  ;;  %6488 = vmatpush.bf16.msrb.mxu2 %v10179_v61 }
 0x633   : > { %14997 = vst [vmem:[#allocation88_spill] sm:$0xff] %v13249_v48  ;;  %v4879_v57 = vpop.f32.mrf.mxu1 }
 0x634   : > { %v4925_v13 = vpop.f32.mrf.mxu2 }
 0x635   : > { %v4975_v35 = vadd.f32 %v4974_v54, %v4925_v13  ;;  %v10175_v13 = vor.u32 %v11160_v22, %v10174_v19  ;;  %v10435_v54 = vor.u32 %v11220_v32, %v10432_v26  ;;  %v5312_v19 = vld [vmem:[#allocation2 + $0x8] sm:$0xf8]  ;;  %v11409_v32 = vld [vmem:[#allocation2 + $0x10] sm:$0xff] }
 0x636   : > { %v4830_v38 = vpop.f32.mrf.mxu0  ;;  %5074 = vmatmul.bf16.gmra.mxu1 %v14873_v16  ;;  %5172 = vmatmul.bf16.gmra.mxu3 %v14873_v16 }
 0x637   : > { %v4880_v23 = vadd.f32 %v4879_v57, %v4830_v38  ;;  %v13252_v51 = vadd.f32 %v4975_v35, %v14998_v49  ;;  %6390 = vmatpush.bf16.msrb.mxu0 %v10175_v13  ;;  %6537 = vmatpush.bf16.msrb.mxu3 %v10435_v54  ;;  %v15002_v49 = vld [vmem:[#allocation93_spill] sm:$0xff]  ;;  %v11410_v13 = vld [vmem:[#allocation2 + $0x18] sm:$0xff] }
 0x638   : > { %v5316_v54 = vpack.c.bf16 %v11410_v13, %v5312_v19  ;;  %v11148_v19 = vld [vmem:[#allocation4 + $0xd8c] sm:$0xf] }
 0x639   : > { %14999 = vst [vmem:[#allocation89_spill] sm:$0xff] %v13252_v51  ;;  %5025 = vmatmul.bf16.gmra.mxu0 %v12857_v11  ;;  %v13256_v8 = vadd.f32 %v4880_v23, %v15000_v1  ;;  %5123 = vmatmul.bf16.gmra.mxu2 %v12857_v11  ;;  %v4977_v38 = vpop.f32.mrf.mxu3  ;;  %v10430_v1 = vld [vmem:[#allocation4 + $0xfc8] sm:$0xf]  ;;  %v5311_v51 = vld [vmem:[#allocation2] sm:$0xf8] }
 0x63a   : > { %v5315_v61 = vpack.c.bf16 %v11409_v32, %v5311_v51  ;;  %v5461_v51 = vshrl.u32 %v5316_v54, 16  ;;  %v10142_v32 = vld [vmem:[#allocation4 + $0xd88] sm:$0xf]  ;;  %v11212_v13 = vld [vmem:[#allocation4 + $0xf8c] sm:$0xf] }
 0x63b   : > { %15001 = vst [vmem:[#allocation90_spill] sm:$0xff] %v13256_v8  ;;  %v4881_v23 = vpop.f32.mrf.mxu1  ;;  %v11224_v8 = vld [vmem:[#allocation4 + $0xfe4] sm:$0xf0] }
 0x63c   : > { %v4928_v27 = vpop.f32.mrf.mxu2  ;;  %v10431_v48 = vor.u32 %v11224_v8, %v10430_v1  ;;  %v5464_v1 = vshll.u32 %v5316_v54, 16  ;;  %v5463_v7 = vrot.slane %v5461_v51, 1 }
 0x63d   : > { %v4978_v57 = vadd.f32 %v4977_v38, %v4928_v27 }
 0x63e   : > { %v4832_v35 = vpop.f32.mrf.mxu0  ;;  %6439 = vmatpush.bf16.msrb.mxu1 %v10431_v48  ;;  %v5452_v48 = vshll.u32 %v5315_v61, 16 }
 0x63f   : > { %v4882_v11 = vadd.f32 %v4881_v23, %v4832_v35  ;;  %v13262_v16 = vadd.f32 %v4978_v57, %v15002_v49  ;;  %v15006_v23 = vld [vmem:[#allocation95_spill] sm:$0xff] }
 0x641   : > { %15003 = vst [vmem:[#allocation91_spill] sm:$0xff] %v13262_v16  ;;  %v13265_v2 = vadd.f32 %v4882_v11, %v15004_v17  ;;  %v4979_v26 = vpop.f32.mrf.mxu3  ;;  %v5449_v11 = vshrl.u32 %v5315_v61, 16  ;;  %v15008_v17 = vld [vmem:[#allocation96_spill] sm:$0xff] }
 0x643   : > { %15005 = vst [vmem:[#allocation92_spill] sm:$0xff] %v13265_v2  ;;  %v4884_v35 = vpop.f32.mrf.mxu1  ;;  %v5454_v2 = vrot.slane %v5452_v48, 2 }
 0x644   : > { %v4930_v22 = vpop.f32.mrf.mxu2 }
 0x645   : > { %v4980_v38 = vadd.f32 %v4979_v26, %v4930_v22  ;;  %v10144_v22 = vld [vmem:[#allocation4 + $0xda8] sm:$0xf0] }
 0x646   : > { %v4835_v27 = vpop.f32.mrf.mxu0  ;;  %5079 = vmatmul.bf16.gmra.mxu1 %v12883_v45  ;;  %5177 = vmatmul.bf16.gmra.mxu3 %v12883_v45  ;;  %v10147_v26 = vor.u32 %v11148_v19, %v10144_v22  ;;  %v5466_v22 = vrot.slane %v5464_v1, 2 }
 0x647   : > { %v4885_v57 = vadd.f32 %v4884_v35, %v4835_v27  ;;  %v13268_v49 = vadd.f32 %v4980_v38, %v15006_v23  ;;  %v11152_v27 = vld [vmem:[#allocation4 + $0xda4] sm:$0xf0]  ;;  %v10400_v38 = vld [vmem:[#allocation4 + $0xfa8] sm:$0xf0]  ;;  %v5451_v23 = vrot.slane %v5449_v11, 1  ;;  %v15015_v11 = vshll.u32 %v15013_v46, 16 }
 0x648   : > { %6489 = vmatpush.bf16.msrb.mxu2 %v10147_v26 }
 0x649   : > { %15007 = vst [vmem:[#allocation93_spill] sm:$0xff] %v13268_v49  ;;  %5030 = vmatmul.bf16.gmra.mxu0 %v12879_v30  ;;  %v13272_v8 = vadd.f32 %v4885_v57, %v15008_v17  ;;  %5128 = vmatmul.bf16.gmra.mxu2 %v12879_v30  ;;  %v10143_v57 = vor.u32 %v11152_v27, %v10142_v32  ;;  %v15010_v30 = vld [vmem:[#allocation18_spill] sm:$0xff]  ;;  %v5469_v32 = vrot.slane %v15015_v11, 2  ;;  %v15016_v27 = vld [vmem:[#allocation97_spill] sm:$0xff] }
 0x64a   : > { %v10403_v17 = vor.u32 %v11212_v13, %v10400_v38  ;;  %v15011_v61 = vshrl.u32 %v15010_v30, 16  ;;  %v15012_v54 = vshll.u32 %v15010_v30, 16  ;;  %v10398_v38 = vld [vmem:[#allocation4 + $0xf88] sm:$0xf] }
 0x64b   : > { %15009 = vst [vmem:[#allocation94_spill] sm:$0xff] %v13272_v8  ;;  %v4982_v8 = vpop.f32.mrf.mxu3  ;;  %v4886_v19 = vpop.f32.mrf.mxu1  ;;  %6391 = vmatpush.bf16.msrb.mxu0 %v10143_v57  ;;  %v11216_v30 = vld [vmem:[#allocation4 + $0xfa4] sm:$0xf0]  ;;  %v5470_v3 = vor.u32 %v5469_v32, %v5468_v18 }
 0x64c   : > { %v4933_v35 = vpop.f32.mrf.mxu2  ;;  %v5456_v16 = vrot.slane %v15011_v61, 1  ;;  %v5457_v45 = vrot.slane %v15012_v54, 2  ;;  %6538 = vmatpush.bf16.msrb.mxu3 %v10403_v17  ;;  %v15018_v61 = vld [vmem:[#allocation98_spill] sm:$0xff]  ;;  %v10399_v1 = vor.u32 %v11216_v30, %v10398_v38  ;;  %v11144_v32 = vld [vmem:[#allocation4 + $0xd64] sm:$0xf0] }
 0x64d   : > { %v4983_v5 = vadd.f32 %v4982_v8, %v4933_v35  ;;  %v5455_v8 = vor.u32 %v5454_v2, %v5451_v23  ;;  %v5467_v35 = vor.u32 %v5466_v22, %v5463_v7  ;;  %v15022_v7 = vld [vmem:[#allocation100_spill] sm:$0xff]  ;;  %v10112_v23 = vld [vmem:[#allocation4 + $0xd68] sm:$0xf0] }
 0x64e   : > { %v4837_v49 = vpop.f32.mrf.mxu0  ;;  %v5458_v26 = vor.u32 %v5457_v45, %v5456_v16  ;;  %6440 = vmatpush.bf16.msrb.mxu1 %v10399_v1  ;;  %v11140_v16 = vld [vmem:[#allocation4 + $0xd4c] sm:$0xf]  ;;  %v10110_v45 = vld [vmem:[#allocation4 + $0xd48] sm:$0xf] }
 0x64f   : > { %v4887_v48 = vadd.f32 %v4886_v19, %v4837_v49  ;;  %v13286_v13 = vadd.f32 %v4983_v5, %v15016_v27  ;;  %v13295_v19 = vsel %vm5447_vm2, %v5467_v35, %v5470_v3  ;;  %v10115_v22 = vor.u32 %v11140_v16, %v10112_v23  ;;  %v11204_v27 = vld [vmem:[#allocation4 + $0xf4c] sm:$0xf] }
 0x650   : > { %v13292_v49 = vsel %vm5447_vm2, %v5455_v8, %v5458_v26  ;;  %v10368_v38 = vld [vmem:[#allocation4 + $0xf68] sm:$0xf0] }
 0x651   : > { %15017 = vst [vmem:[#allocation95_spill] sm:$0xff] %v13286_v13  ;;  %v13289_v51 = vadd.f32 %v4887_v48, %v15018_v61  ;;  %v15020_v48 = vld [vmem:[#allocation99_spill] sm:$0xff]  ;;  %v10111_v61 = vor.u32 %v11144_v32, %v10110_v45  ;;  %v10371_v8 = vor.u32 %v11204_v27, %v10368_v38  ;;  %6490 = vmatpush.bf16.msrb.mxu2 %v10115_v22  ;;  %v15030_v32 = vld [vmem:[#allocation101_spill] sm:$0xff] }
 0x652   : > { %v10366_v38 = vld [vmem:[#allocation4 + $0xf48] sm:$0xf] }
 0x653   : > { %15019 = vst [vmem:[#allocation96_spill] sm:$0xff] %v13289_v51  ;;  %v4984_v54 = vpop.f32.mrf.mxu3  ;;  %v5045_v17 = vpop.f32.mrf.mxu1  ;;  %6392 = vmatpush.bf16.msrb.mxu0 %v10111_v61  ;;  %6539 = vmatpush.bf16.msrb.mxu3 %v10371_v8  ;;  %v15032_v51 = vld [vmem:[#allocation102_spill] sm:$0xff] }
 0x654   : > { %v4935_v46 = vpop.f32.mrf.mxu2 }
 0x655   : > { %v4985_v5 = vadd.f32 %v4984_v54, %v4935_v46  ;;  %v15024_v46 = vld [vmem:[#allocation20_spill] sm:$0xff] }
 0x656   : > { %v4996_v57 = vpop.f32.mrf.mxu0  ;;  %6251 = vmatmul.bf16.vlgmr.msra.gmra.mxu1 %v13295_v19  ;;  %6349 = vmatmul.bf16.vlgmr.msra.gmra.mxu3 %v13295_v19  ;;  %v15025_v54 = vshrl.u32 %v15024_v46, 16 }
 0x657   : > { %v5046_v11 = vadd.f32 %v5045_v17, %v4996_v57  ;;  %v13298_v2 = vadd.f32 %v4985_v5, %v15020_v48  ;;  %v15026_v5 = vshll.u32 %v15024_v46, 16 }
 0x658   : > { %v5472_v57 = vrot.slane %v15025_v54, 1  ;;  %v11208_v54 = vld [vmem:[#allocation4 + $0xf64] sm:$0xf0] }
 0x659   : > { %15021 = vst [vmem:[#allocation18_spill] sm:$0xff] %v13298_v2  ;;  %6202 = vmatmul.bf16.vlgmr.msra.gmra.mxu0 %v13292_v49  ;;  %v13302_v18 = vadd.f32 %v5046_v11, %v15022_v7  ;;  %6300 = vmatmul.bf16.vlgmr.msra.gmra.mxu2 %v13292_v49  ;;  %v5473_v17 = vrot.slane %v15026_v5, 2  ;;  %v15027_v7 = vld [vmem:[#allocation21_spill] sm:$0xff] }
 0x65a   : > { %v15029_v23 = vshll.u32 %v15027_v7, 16 }
 0x65b   : > { %15023 = vst [vmem:[#allocation19_spill] sm:$0xff] %v13302_v18  ;;  %v5143_v1 = vpop.f32.mrf.mxu3  ;;  %v5047_v48 = vpop.f32.mrf.mxu1  ;;  %v15028_v18 = vshrl.u32 %v15027_v7, 16  ;;  %v5474_v22 = vor.u32 %v5473_v17, %v5472_v57  ;;  %v10080_v57 = vld [vmem:[#allocation4 + $0xd28] sm:$0xf0]  ;;  %v10078_v17 = vld [vmem:[#allocation4 + $0xd08] sm:$0xf] }
 0x65c   : > { %v5094_v30 = vpop.f32.mrf.mxu2  ;;  %v5477_v2 = vrot.slane %v15029_v23, 2 }
 0x65d   : > { %v5144_v11 = vadd.f32 %v5143_v1, %v5094_v30  ;;  %v5476_v16 = vrot.slane %v15028_v18, 1  ;;  %v10367_v30 = vor.u32 %v11208_v54, %v10366_v38  ;;  %v13322_v7 = vsel %vm5447_vm2, %v5458_v26, %v5474_v22  ;;  %v11132_v26 = vld [vmem:[#allocation4 + $0xd0c] sm:$0xf] }
 0x65e   : > { %v4998_v35 = vpop.f32.mrf.mxu0 }
 0x65f   : > { %v5048_v45 = vadd.f32 %v5047_v48, %v4998_v35  ;;  %v13316_v27 = vadd.f32 %v5144_v11, %v15030_v32  ;;  %v5478_v1 = vor.u32 %v5477_v2, %v5476_v16  ;;  %6441 = vmatpush.bf16.msrb.mxu1 %v10367_v30  ;;  %v15034_v48 = vld [vmem:[#allocation103_spill] sm:$0xff] }
 0x660   : > { %v11136_v16 = vld [vmem:[#allocation4 + $0xd24] sm:$0xf0] }
 0x661   : > { %15031 = vst [vmem:[#allocation97_spill] sm:$0xff] %v13316_v27  ;;  %v13319_v46 = vadd.f32 %v5048_v45, %v15032_v51  ;;  %v13325_v35 = vsel %vm5447_vm2, %v5470_v3, %v5478_v1  ;;  %v15036_v51 = vld [vmem:[#allocation104_spill] sm:$0xff]  ;;  %v10083_v3 = vor.u32 %v11132_v26, %v10080_v57  ;;  %v10336_v45 = vld [vmem:[#allocation4 + $0xf28] sm:$0xf0]  ;;  %v10079_v38 = vor.u32 %v11136_v16, %v10078_v17  ;;  %v15044_v16 = vld [vmem:[#allocation105_spill] sm:$0xff] }
 0x663   : > { %15033 = vst [vmem:[#allocation98_spill] sm:$0xff] %v13319_v46  ;;  %v5145_v18 = vpop.f32.mrf.mxu3  ;;  %v5050_v8 = vpop.f32.mrf.mxu1  ;;  %6491 = vmatpush.bf16.msrb.mxu2 %v10083_v3  ;;  %6393 = vmatpush.bf16.msrb.mxu0 %v10079_v38 }
 0x664   : > { %v5096_v5 = vpop.f32.mrf.mxu2 }
 0x665   : > { %v5146_v61 = vadd.f32 %v5145_v18, %v5096_v5  ;;  %v15038_v18 = vld [vmem:[#allocation22_spill] sm:$0xff] }
 0x666   : > { %v5001_v13 = vpop.f32.mrf.mxu0  ;;  %6256 = vmatmul.bf16.gmra.mxu1 %v13325_v35  ;;  %6354 = vmatmul.bf16.gmra.mxu3 %v13325_v35 }
 0x667   : > { %v5051_v11 = vadd.f32 %v5050_v8, %v5001_v13  ;;  %v13328_v23 = vadd.f32 %v5146_v61, %v15034_v48  ;;  %v11196_v13 = vld [vmem:[#allocation4 + $0xf0c] sm:$0xf]  ;;  %v15039_v61 = vshrl.u32 %v15038_v18, 16 }
 0x668   : > { %v10339_v54 = vor.u32 %v11196_v13, %v10336_v45  ;;  %v10334_v45 = vld [vmem:[#allocation4 + $0xf08] sm:$0xf] }
 0x669   : > { %15035 = vst [vmem:[#allocation99_spill] sm:$0xff] %v13328_v23  ;;  %6207 = vmatmul.bf16.gmra.mxu0 %v13322_v7  ;;  %v13332_v2 = vadd.f32 %v5051_v11, %v15036_v51  ;;  %6305 = vmatmul.bf16.gmra.mxu2 %v13322_v7  ;;  %v5480_v8 = vrot.slane %v15039_v61, 1  ;;  %v15040_v11 = vshll.u32 %v15038_v18, 16  ;;  %v15041_v23 = vld [vmem:[#allocation23_spill] sm:$0xff] }
 0x66a   : > { %v15042_v46 = vshrl.u32 %v15041_v23, 16  ;;  %v15043_v57 = vshll.u32 %v15041_v23, 16  ;;  %6540 = vmatpush.bf16.msrb.mxu3 %v10339_v54  ;;  %v11200_v61 = vld [vmem:[#allocation4 + $0xf24] sm:$0xf0] }
 0x66b   : > { %15037 = vst [vmem:[#allocation100_spill] sm:$0xff] %v13332_v2  ;;  %v5148_v30 = vpop.f32.mrf.mxu3  ;;  %v5481_v48 = vrot.slane %v15040_v11, 2  ;;  %v5052_v2 = vpop.f32.mrf.mxu1 }
 0x66c   : > { %v5099_v32 = vpop.f32.mrf.mxu2  ;;  %v5484_v26 = vrot.slane %v15042_v46, 1  ;;  %v5485_v27 = vrot.slane %v15043_v57, 2 }
 0x66d   : > { %v5149_v51 = vadd.f32 %v5148_v30, %v5099_v32  ;;  %v5482_v3 = vor.u32 %v5481_v48, %v5480_v8  ;;  %v10335_v32 = vor.u32 %v11200_v61, %v10334_v45  ;;  %v10048_v8 = vld [vmem:[#allocation4 + $0xce8] sm:$0xf0]  ;;  %v10046_v48 = vld [vmem:[#allocation4 + $0xcc8] sm:$0xf] }
 0x66e   : > { %v5003_v5 = vpop.f32.mrf.mxu0  ;;  %v5486_v30 = vor.u32 %v5485_v27, %v5484_v26  ;;  %v11128_v26 = vld [vmem:[#allocation4 + $0xce4] sm:$0xf0] }
 0x66f   : > { %v5053_v17 = vadd.f32 %v5052_v2, %v5003_v5  ;;  %v13346_v13 = vadd.f32 %v5149_v51, %v15044_v16  ;;  %6442 = vmatpush.bf16.msrb.mxu1 %v10335_v32  ;;  %v13352_v23 = vsel %vm5447_vm2, %v5474_v22, %v5482_v3  ;;  %v15048_v51 = vld [vmem:[#allocation107_spill] sm:$0xff]  ;;  %v10047_v45 = vor.u32 %v11128_v26, %v10046_v48  ;;  %v15058_v26 = vld [vmem:[#allocation109_spill] sm:$0xff] }
 0x670   : > { %v13355_v54 = vsel %vm5447_vm2, %v5478_v1, %v5486_v30  ;;  %v11124_v22 = vld [vmem:[#allocation4 + $0xccc] sm:$0xf] }
 0x671   : > { %15045 = vst [vmem:[#allocation20_spill] sm:$0xff] %v13346_v13  ;;  %v13349_v18 = vadd.f32 %v5053_v17, %v15046_v15  ;;  %v15050_v15 = vld [vmem:[#allocation108_spill] sm:$0xff]  ;;  %v10051_v1 = vor.u32 %v11124_v22, %v10048_v8  ;;  %v10304_v17 = vld [vmem:[#allocation4 + $0xee8] sm:$0xf0]  ;;  %6394 = vmatpush.bf16.msrb.mxu0 %v10047_v45 }
 0x673   : > { %15047 = vst [vmem:[#allocation21_spill] sm:$0xff] %v13349_v18  ;;  %v5150_v46 = vpop.f32.mrf.mxu3  ;;  %v5055_v2 = vpop.f32.mrf.mxu1  ;;  %6492 = vmatpush.bf16.msrb.mxu2 %v10051_v1 }
 0x674   : > { %v5101_v11 = vpop.f32.mrf.mxu2 }
 0x675   : > { %v5151_v38 = vadd.f32 %v5150_v46, %v5101_v11  ;;  %v15052_v46 = vld [vmem:[#allocation24_spill] sm:$0xff] }
 0x676   : > { %v5006_v37 = vpop.f32.mrf.mxu0  ;;  %6261 = vmatmul.bf16.gmra.mxu1 %v13355_v54  ;;  %6359 = vmatmul.bf16.gmra.mxu3 %v13355_v54 }
 0x677   : > { %v5056_v5 = vadd.f32 %v5055_v2, %v5006_v37  ;;  %v13358_v57 = vadd.f32 %v5151_v38, %v15048_v51  ;;  %v11188_v37 = vld [vmem:[#allocation4 + $0xecc] sm:$0xf]  ;;  %v15053_v38 = vshrl.u32 %v15052_v46, 16 }
 0x678   : > { %v10307_v61 = vor.u32 %v11188_v37, %v10304_v17  ;;  %v10302_v17 = vld [vmem:[#allocation4 + $0xec8] sm:$0xf] }
 0x679   : > { %15049 = vst [vmem:[#allocation101_spill] sm:$0xff] %v13358_v57  ;;  %6212 = vmatmul.bf16.gmra.mxu0 %v13352_v23  ;;  %v13362_v27 = vadd.f32 %v5056_v5, %v15050_v15  ;;  %6310 = vmatmul.bf16.gmra.mxu2 %v13352_v23  ;;  %v5488_v2 = vrot.slane %v15053_v38, 1  ;;  %v15054_v5 = vshll.u32 %v15052_v46, 16  ;;  %v15055_v57 = vld [vmem:[#allocation25_spill] sm:$0xff]  ;;  %v11192_v38 = vld [vmem:[#allocation4 + $0xee4] sm:$0xf0] }
 0x67a   : > { %v15056_v18 = vshrl.u32 %v15055_v57, 16  ;;  %v15057_v8 = vshll.u32 %v15055_v57, 16  ;;  %6541 = vmatpush.bf16.msrb.mxu3 %v10307_v61 }
 0x67b   : > { %15051 = vst [vmem:[#allocation102_spill] sm:$0xff] %v13362_v27  ;;  %v5153_v32 = vpop.f32.mrf.mxu3  ;;  %v5489_v51 = vrot.slane %v15054_v5, 2  ;;  %v5057_v27 = vpop.f32.mrf.mxu1 }
 0x67c   : > { %v5104_v16 = vpop.f32.mrf.mxu2  ;;  %v5492_v22 = vrot.slane %v15056_v18, 1  ;;  %v5493_v13 = vrot.slane %v15057_v8, 2 }
 0x67d   : > { %v5154_v15 = vadd.f32 %v5153_v32, %v5104_v16  ;;  %v5490_v1 = vor.u32 %v5489_v51, %v5488_v2  ;;  %v10303_v16 = vor.u32 %v11192_v38, %v10302_v17  ;;  %v10016_v2 = vld [vmem:[#allocation4 + $0xca8] sm:$0xf0]  ;;  %v10014_v51 = vld [vmem:[#allocation4 + $0xc88] sm:$0xf] }
 0x67e   : > { %v5008_v11 = vpop.f32.mrf.mxu0  ;;  %v5494_v32 = vor.u32 %v5493_v13, %v5492_v22  ;;  %v11120_v22 = vld [vmem:[#allocation4 + $0xca4] sm:$0xf0] }
 0x67f   : > { %v5058_v48 = vadd.f32 %v5057_v27, %v5008_v11  ;;  %v13376_v37 = vadd.f32 %v5154_v15, %v15058_v26  ;;  %6443 = vmatpush.bf16.msrb.mxu1 %v10303_v16  ;;  %v13382_v57 = vsel %vm5447_vm2, %v5482_v3, %v5490_v1  ;;  %v15062_v15 = vld [vmem:[#allocation111_spill] sm:$0xff]  ;;  %v10015_v17 = vor.u32 %v11120_v22, %v10014_v51  ;;  %v15072_v22 = vld [vmem:[#allocation113_spill] sm:$0xff] }
 0x680   : > { %v13385_v61 = vsel %vm5447_vm2, %v5486_v30, %v5494_v32  ;;  %v11116_v3 = vld [vmem:[#allocation4 + $0xc8c] sm:$0xf] }
 0x681   : > { %15059 = vst [vmem:[#allocation103_spill] sm:$0xff] %v13376_v37  ;;  %v13379_v46 = vadd.f32 %v5058_v48, %v15060_v41  ;;  %v15064_v41 = vld [vmem:[#allocation112_spill] sm:$0xff]  ;;  %v10019_v30 = vor.u32 %v11116_v3, %v10016_v2  ;;  %v10272_v48 = vld [vmem:[#allocation4 + $0xea8] sm:$0xf0]  ;;  %6395 = vmatpush.bf16.msrb.mxu0 %v10015_v17 }
 0x683   : > { %15061 = vst [vmem:[#allocation104_spill] sm:$0xff] %v13379_v46  ;;  %v5155_v18 = vpop.f32.mrf.mxu3  ;;  %v5060_v27 = vpop.f32.mrf.mxu1  ;;  %6493 = vmatpush.bf16.msrb.mxu2 %v10019_v30 }
 0x684   : > { %v5106_v5 = vpop.f32.mrf.mxu2 }
 0x685   : > { %v5156_v45 = vadd.f32 %v5155_v18, %v5106_v5  ;;  %v15066_v18 = vld [vmem:[#allocation26_spill] sm:$0xff] }
 0x686   : > { %v5011_v42 = vpop.f32.mrf.mxu0  ;;  %6266 = vmatmul.bf16.gmra.mxu1 %v13385_v61  ;;  %6364 = vmatmul.bf16.gmra.mxu3 %v13385_v61 }
 0x687   : > { %v5061_v11 = vadd.f32 %v5060_v27, %v5011_v42  ;;  %v13388_v8 = vadd.f32 %v5156_v45, %v15062_v15  ;;  %v11180_v42 = vld [vmem:[#allocation4 + $0xe8c] sm:$0xf]  ;;  %v15067_v45 = vshrl.u32 %v15066_v18, 16 }
 0x688   : > { %v10275_v38 = vor.u32 %v11180_v42, %v10272_v48  ;;  %v10270_v48 = vld [vmem:[#allocation4 + $0xe88] sm:$0xf] }
 0x689   : > { %15063 = vst [vmem:[#allocation22_spill] sm:$0xff] %v13388_v8  ;;  %6217 = vmatmul.bf16.gmra.mxu0 %v13382_v57  ;;  %v13392_v13 = vadd.f32 %v5061_v11, %v15064_v41  ;;  %6315 = vmatmul.bf16.gmra.mxu2 %v13382_v57  ;;  %v5496_v27 = vrot.slane %v15067_v45, 1  ;;  %v15068_v11 = vshll.u32 %v15066_v18, 16  ;;  %v15069_v8 = vld [vmem:[#allocation27_spill] sm:$0xff] }
 0x68a   : > { %v15070_v46 = vshrl.u32 %v15069_v8, 16  ;;  %v15071_v2 = vshll.u32 %v15069_v8, 16  ;;  %6542 = vmatpush.bf16.msrb.mxu3 %v10275_v38  ;;  %v11184_v45 = vld [vmem:[#allocation4 + $0xea4] sm:$0xf0] }
 0x68b   : > { %15065 = vst [vmem:[#allocation23_spill] sm:$0xff] %v13392_v13  ;;  %v5158_v16 = vpop.f32.mrf.mxu3  ;;  %v5497_v15 = vrot.slane %v15068_v11, 2  ;;  %v5062_v13 = vpop.f32.mrf.mxu1 }
 0x68c   : > { %v5109_v26 = vpop.f32.mrf.mxu2  ;;  %v5500_v3 = vrot.slane %v15070_v46, 1  ;;  %v5501_v37 = vrot.slane %v15071_v2, 2 }
 0x68d   : > { %v5159_v41 = vadd.f32 %v5158_v16, %v5109_v26  ;;  %v5498_v30 = vor.u32 %v5497_v15, %v5496_v27  ;;  %v10271_v26 = vor.u32 %v11184_v45, %v10270_v48  ;;  %v9984_v27 = vld [vmem:[#allocation4 + $0xc68] sm:$0xf0]  ;;  %v9982_v15 = vld [vmem:[#allocation4 + $0xc48] sm:$0xf] }
 0x68e   : > { %v5013_v5 = vpop.f32.mrf.mxu0  ;;  %v5502_v16 = vor.u32 %v5501_v37, %v5500_v3  ;;  %v11112_v3 = vld [vmem:[#allocation4 + $0xc64] sm:$0xf0] }
 0x68f   : > { %v5063_v51 = vadd.f32 %v5062_v13, %v5013_v5  ;;  %v13406_v42 = vadd.f32 %v5159_v41, %v15072_v22  ;;  %6444 = vmatpush.bf16.msrb.mxu1 %v10271_v26  ;;  %v13412_v8 = vsel %vm5447_vm2, %v5490_v1, %v5498_v30  ;;  %v15076_v41 = vld [vmem:[#allocation115_spill] sm:$0xff]  ;;  %v9983_v48 = vor.u32 %v11112_v3, %v9982_v15  ;;  %v15086_v3 = vld [vmem:[#allocation117_spill] sm:$0xff] }
 0x690   : > { %v13415_v38 = vsel %vm5447_vm2, %v5494_v32, %v5502_v16  ;;  %v11108_v1 = vld [vmem:[#allocation4 + $0xc4c] sm:$0xf] }
 0x691   : > { %15073 = vst [vmem:[#allocation105_spill] sm:$0xff] %v13406_v42  ;;  %v13409_v18 = vadd.f32 %v5063_v51, %v15074_v4  ;;  %v15078_v4 = vld [vmem:[#allocation116_spill] sm:$0xff]  ;;  %v9987_v32 = vor.u32 %v11108_v1, %v9984_v27  ;;  %v10240_v51 = vld [vmem:[#allocation4 + $0xe68] sm:$0xf0]  ;;  %6396 = vmatpush.bf16.msrb.mxu0 %v9983_v48 }
 0x693   : > { %15075 = vst [vmem:[#allocation106_spill] sm:$0xff] %v13409_v18  ;;  %v5160_v46 = vpop.f32.mrf.mxu3  ;;  %v5065_v13 = vpop.f32.mrf.mxu1  ;;  %6494 = vmatpush.bf16.msrb.mxu2 %v9987_v32 }
 0x694   : > { %v5111_v11 = vpop.f32.mrf.mxu2 }
 0x695   : > { %v5161_v17 = vadd.f32 %v5160_v46, %v5111_v11  ;;  %v15080_v46 = vld [vmem:[#allocation28_spill] sm:$0xff] }
 0x696   : > { %v5016_v24 = vpop.f32.mrf.mxu0  ;;  %6271 = vmatmul.bf16.gmra.mxu1 %v13415_v38  ;;  %6369 = vmatmul.bf16.gmra.mxu3 %v13415_v38 }
 0x697   : > { %v5066_v5 = vadd.f32 %v5065_v13, %v5016_v24  ;;  %v13418_v2 = vadd.f32 %v5161_v17, %v15076_v41  ;;  %v11172_v24 = vld [vmem:[#allocation4 + $0xe4c] sm:$0xf]  ;;  %v15081_v17 = vshrl.u32 %v15080_v46, 16 }
 0x698   : > { %v10243_v45 = vor.u32 %v11172_v24, %v10240_v51  ;;  %v10238_v51 = vld [vmem:[#allocation4 + $0xe48] sm:$0xf] }
 0x699   : > { %15077 = vst [vmem:[#allocation107_spill] sm:$0xff] %v13418_v2  ;;  %6222 = vmatmul.bf16.gmra.mxu0 %v13412_v8  ;;  %v13422_v37 = vadd.f32 %v5066_v5, %v15078_v4  ;;  %6320 = vmatmul.bf16.gmra.mxu2 %v13412_v8  ;;  %v5504_v13 = vrot.slane %v15081_v17, 1  ;;  %v15082_v5 = vshll.u32 %v15080_v46, 16  ;;  %v15083_v2 = vld [vmem:[#allocation29_spill] sm:$0xff]  ;;  %v11176_v17 = vld [vmem:[#allocation4 + $0xe64] sm:$0xf0] }
 0x69a   : > { %v15084_v18 = vshrl.u32 %v15083_v2, 16  ;;  %v15085_v27 = vshll.u32 %v15083_v2, 16  ;;  %6543 = vmatpush.bf16.msrb.mxu3 %v10243_v45 }
 0x69b   : > { %15079 = vst [vmem:[#allocation108_spill] sm:$0xff] %v13422_v37  ;;  %v5163_v26 = vpop.f32.mrf.mxu3  ;;  %v5505_v41 = vrot.slane %v15082_v5, 2  ;;  %v5067_v37 = vpop.f32.mrf.mxu1 }
 0x69c   : > { %v5114_v22 = vpop.f32.mrf.mxu2  ;;  %v5508_v1 = vrot.slane %v15084_v18, 1  ;;  %v5509_v42 = vrot.slane %v15085_v27, 2 }
 0x69d   : > { %v5164_v4 = vadd.f32 %v5163_v26, %v5114_v22  ;;  %v5506_v32 = vor.u32 %v5505_v41, %v5504_v13  ;;  %v10239_v22 = vor.u32 %v11176_v17, %v10238_v51  ;;  %v9952_v13 = vld [vmem:[#allocation4 + $0xc28] sm:$0xf0]  ;;  %v9950_v41 = vld [vmem:[#allocation4 + $0xc08] sm:$0xf] }
 0x69e   : > { %v5018_v11 = vpop.f32.mrf.mxu0  ;;  %v5510_v26 = vor.u32 %v5509_v42, %v5508_v1  ;;  %v11104_v1 = vld [vmem:[#allocation4 + $0xc24] sm:$0xf0] }
 0x69f   : > { %v5068_v15 = vadd.f32 %v5067_v37, %v5018_v11  ;;  %v13436_v24 = vadd.f32 %v5164_v4, %v15086_v3  ;;  %6445 = vmatpush.bf16.msrb.mxu1 %v10239_v22  ;;  %v13442_v2 = vsel %vm5447_vm2, %v5498_v30, %v5506_v32  ;;  %v15092_v4 = vld [vmem:[#allocation119_spill] sm:$0xff]  ;;  %v9951_v51 = vor.u32 %v11104_v1, %v9950_v41  ;;  %v15102_v1 = vld [vmem:[#allocation121_spill] sm:$0xff] }
 0x6a0   : > { %15090 = vst [vmem:[#allocation109_spill] sm:$0xff] %v13442_v2  ;;  %v13445_v45 = vsel %vm5447_vm2, %v5502_v16, %v5510_v26  ;;  %v11100_v30 = vld [vmem:[#allocation4 + $0xc0c] sm:$0xf] }
 0x6a1   : > { %15087 = vst [vmem:[#allocation24_spill] sm:$0xff] %v13436_v24  ;;  %v13439_v46 = vadd.f32 %v5068_v15, %v15088_v28  ;;  %v15094_v28 = vld [vmem:[#allocation120_spill] sm:$0xff]  ;;  %v9955_v16 = vor.u32 %v11100_v30, %v9952_v13  ;;  %v10208_v15 = vld [vmem:[#allocation4 + $0xe28] sm:$0xf0]  ;;  %6397 = vmatpush.bf16.msrb.mxu0 %v9951_v51 }
 0x6a2   : > { %15091 = vst [vmem:[#allocation110_spill] sm:$0xff] %v13445_v45 }
 0x6a3   : > { %15089 = vst [vmem:[#allocation25_spill] sm:$0xff] %v13439_v46  ;;  %v5165_v18 = vpop.f32.mrf.mxu3  ;;  %v5070_v37 = vpop.f32.mrf.mxu1  ;;  %6495 = vmatpush.bf16.msrb.mxu2 %v9955_v16 }
 0x6a4   : > { %v5116_v5 = vpop.f32.mrf.mxu2 }
 0x6a5   : > { %v5166_v48 = vadd.f32 %v5165_v18, %v5116_v5  ;;  %v15096_v18 = vld [vmem:[#allocation30_spill] sm:$0xff] }
 0x6a6   : > { %v5021_v25 = vpop.f32.mrf.mxu0  ;;  %6276 = vmatmul.bf16.gmra.mxu1 %v13445_v45  ;;  %6374 = vmatmul.bf16.gmra.mxu3 %v13445_v45  ;;  %v15104_v45 = vld [vmem:[#allocation122_spill] sm:$0xff] }
 0x6a7   : > { %v5071_v11 = vadd.f32 %v5070_v37, %v5021_v25  ;;  %v13448_v27 = vadd.f32 %v5166_v48, %v15092_v4  ;;  %v11164_v25 = vld [vmem:[#allocation4 + $0xe0c] sm:$0xf]  ;;  %v15097_v48 = vshrl.u32 %v15096_v18, 16 }
 0x6a8   : > { %v10211_v17 = vor.u32 %v11164_v25, %v10208_v15  ;;  %v10206_v15 = vld [vmem:[#allocation4 + $0xe08] sm:$0xf] }
 0x6a9   : > { %15093 = vst [vmem:[#allocation111_spill] sm:$0xff] %v13448_v27  ;;  %6227 = vmatmul.bf16.gmra.mxu0 %v13442_v2  ;;  %v13452_v42 = vadd.f32 %v5071_v11, %v15094_v28  ;;  %6325 = vmatmul.bf16.gmra.mxu2 %v13442_v2  ;;  %v5512_v37 = vrot.slane %v15097_v48, 1  ;;  %v15098_v11 = vshll.u32 %v15096_v18, 16  ;;  %v15099_v27 = vld [vmem:[#allocation31_spill] sm:$0xff] }
 0x6aa   : > { %v15100_v46 = vshrl.u32 %v15099_v27, 16  ;;  %v15101_v13 = vshll.u32 %v15099_v27, 16  ;;  %6544 = vmatpush.bf16.msrb.mxu3 %v10211_v17  ;;  %v11168_v48 = vld [vmem:[#allocation4 + $0xe24] sm:$0xf0] }
 0x6ab   : > { %15095 = vst [vmem:[#allocation112_spill] sm:$0xff] %v13452_v42  ;;  %v5168_v22 = vpop.f32.mrf.mxu3  ;;  %v5513_v4 = vrot.slane %v15098_v11, 2  ;;  %v5072_v42 = vpop.f32.mrf.mxu1  ;;  %v5313_v11 = vld [vmem:[#allocation2 + $0x100] sm:$0x7] }
 0x6ac   : > { %v5119_v3 = vpop.f32.mrf.mxu2  ;;  %v5516_v30 = vrot.slane %v15100_v46, 1  ;;  %v5517_v24 = vrot.slane %v15101_v13, 2 }
 0x6ad   : > { %v5169_v28 = vadd.f32 %v5168_v22, %v5119_v3  ;;  %v5514_v16 = vor.u32 %v5513_v4, %v5512_v37  ;;  %v10207_v3 = vor.u32 %v11168_v48, %v10206_v15  ;;  %v15108_v37 = vld [vmem:[#allocation124_spill] sm:$0xff] }
 0x6ae   : > { %v5023_v5 = vpop.f32.mrf.mxu0  ;;  %v5518_v22 = vor.u32 %v5517_v24, %v5516_v30  ;;  %v15110_v24 = vld [vmem:[#allocation134_spill] sm:$0xff]  ;;  %v10184_v48 = vld [vmem:[#allocation4 + $0xdf0] sm:$0xf0] }
 0x6af   : > { %v5073_v41 = vadd.f32 %v5072_v42, %v5023_v5  ;;  %v13466_v25 = vadd.f32 %v5169_v28, %v15102_v1  ;;  %6446 = vmatpush.bf16.msrb.mxu1 %v10207_v3  ;;  %v13472_v51 = vsel %vm5447_vm2, %v5506_v32, %v5514_v16  ;;  %v5317_v42 = vpack.c.bf16 %v5313_v11, %v5313_v11  ;;  %v10182_v3 = vld [vmem:[#allocation4 + $0xdd0] sm:$0xf] }
 0x6b0   : > { %15106 = vst [vmem:[#allocation113_spill] sm:$0xff] %v13472_v51  ;;  %v13475_v28 = vsel %vm5447_vm2, %v5510_v26, %v5518_v22 }
 0x6b1   : > { %15103 = vst [vmem:[#allocation26_spill] sm:$0xff] %v13466_v25  ;;  %v13469_v18 = vadd.f32 %v5073_v41, %v15104_v45  ;;  %v5318_v45 = vpack.c.bf16 %v5314_v43, %v5314_v43  ;;  %v5521_v32 = vshrl.u32 %v5317_v42, 16  ;;  %v5524_v1 = vshll.u32 %v5317_v42, 16  ;;  %v11157_v43 = vld [vmem:[#allocation4 + $0xdd4] sm:$0xf] }
 0x6b2   : > { %15107 = vst [vmem:[#allocation114_spill] sm:$0xff] %v13475_v28 }
 0x6b3   : > { %15105 = vst [vmem:[#allocation27_spill] sm:$0xff] %v13469_v18  ;;  %v5170_v27 = vpop.f32.mrf.mxu3  ;;  %v5075_v5 = vpop.f32.mrf.mxu1  ;;  %v5530_v26 = vshrl.u32 %v5318_v45, 16  ;;  %v5533_v15 = vshll.u32 %v5318_v45, 16 }
 0x6b4   : > { %v5121_v46 = vpop.f32.mrf.mxu2 }
 0x6b5   : > { %v5171_v17 = vadd.f32 %v5170_v27, %v5121_v46  ;;  %v10187_v46 = vor.u32 %v11157_v43, %v10184_v48  ;;  %v11161_v27 = vld [vmem:[#allocation4 + $0xdec] sm:$0xf0]  ;;  %v5532_v25 = vrot.slane %v5530_v26, 1 }
 0x6b6   : > { %v5026_v13 = vpop.f32.mrf.mxu0  ;;  %6281 = vmatmul.bf16.gmra.mxu1 %v13475_v28  ;;  %6379 = vmatmul.bf16.gmra.mxu3 %v13475_v28  ;;  %v5535_v28 = vrot.slane %v5533_v15, 2  ;;  %v10152_v15 = vld [vmem:[#allocation4 + $0xdb0] sm:$0xf0] }
 0x6b7   : > { %v5076_v41 = vadd.f32 %v5075_v5, %v5026_v13  ;;  %v13478_v4 = vadd.f32 %v5171_v17, %v15108_v37  ;;  %v11221_v13 = vld [vmem:[#allocation4 + $0xfd4] sm:$0xf]  ;;  %v5523_v37 = vrot.slane %v5521_v32, 1  ;;  %6684 = vmatpush.bf16.msra.mxu2 %v10187_v46  ;;  %v10438_v32 = vld [vmem:[#allocation4 + $0xfd0] sm:$0xf] }
 0x6b8   : > { %v10440_v17 = vld [vmem:[#allocation4 + $0xff0] sm:$0xf0]  ;;  %v5536_v2 = vor.u32 %v5535_v28, %v5532_v25 }
 0x6b9   : > { %15109 = vst [vmem:[#allocation115_spill] sm:$0xff] %v13478_v4  ;;  %6232 = vmatmul.bf16.gmra.mxu0 %v13472_v51  ;;  %v13482_v30 = vadd.f32 %v5076_v41, %v15110_v24  ;;  %6330 = vmatmul.bf16.gmra.mxu2 %v13472_v51  ;;  %v5526_v24 = vrot.slane %v5524_v1, 2  ;;  %v10443_v4 = vor.u32 %v11221_v13, %v10440_v17  ;;  %v11225_v1 = vld [vmem:[#allocation4 + $0xfec] sm:$0xf0]  ;;  %v11149_v28 = vld [vmem:[#allocation4 + $0xd94] sm:$0xf] }
 0x6ba   : > { %v10155_v17 = vor.u32 %v11149_v28, %v10152_v15  ;;  %v10120_v15 = vld [vmem:[#allocation4 + $0xd70] sm:$0xf0] }
 0x6bb   : > { %15111 = vst [vmem:[#allocation116_spill] sm:$0xff] %v13482_v30  ;;  %v5173_v5 = vpop.f32.mrf.mxu3  ;;  %v10183_v30 = vor.u32 %v11161_v27, %v10182_v3  ;;  %v5077_v42 = vpop.f32.mrf.mxu1  ;;  %6733 = vmatpush.bf16.msra.mxu3 %v10443_v4  ;;  %v5527_v48 = vor.u32 %v5526_v24, %v5523_v37  ;;  %v10439_v3 = vor.u32 %v11225_v1, %v10438_v32  ;;  %v10406_v1 = vld [vmem:[#allocation4 + $0xf90] sm:$0xf] }
 0x6bc   : > { %v5124_v11 = vpop.f32.mrf.mxu2  ;;  %6685 = vmatpush.bf16.msra.mxu2 %v10155_v17  ;;  %v11145_v17 = vld [vmem:[#allocation4 + $0xd6c] sm:$0xf0] }
 0x6bd   : > { %v5174_v18 = vadd.f32 %v5173_v5, %v5124_v11  ;;  %6586 = vmatpush.bf16.msra.mxu0 %v10183_v30  ;;  %v13494_v26 = vsel %vm5447_vm2, %v5514_v16, %v5527_v48  ;;  %6635 = vmatpush.bf16.msra.mxu1 %v10439_v3  ;;  %v11213_v5 = vld [vmem:[#allocation4 + $0xf94] sm:$0xf]  ;;  %v11217_v3 = vld [vmem:[#allocation4 + $0xfac] sm:$0xf0] }
 0x6be   : > { %v5028_v41 = vpop.f32.mrf.mxu0 }
 0x6bf   : > { %v5078_v45 = vadd.f32 %v5077_v42, %v5028_v41  ;;  %v13488_v51 = vadd.f32 %v5174_v18, %v12873_v33  ;;  %v13497_v33 = vsel %vm5447_vm2, %v5518_v22, %v5536_v2  ;;  %v10150_v2 = vld [vmem:[#allocation4 + $0xd90] sm:$0xf]  ;;  %v10408_v41 = vld [vmem:[#allocation4 + $0xfb0] sm:$0xf0] }
 0x6c0   : > { %v10411_v42 = vor.u32 %v11213_v5, %v10408_v41  ;;  %v10376_v5 = vld [vmem:[#allocation4 + $0xf70] sm:$0xf0] }
 0x6c1   : > { %15112 = vst [vmem:[#allocation28_spill] sm:$0xff] %v13488_v51  ;;  %v13491_v43 = vadd.f32 %v5078_v45, %v12875_v55 }
 0x6c2   : > { %6734 = vmatpush.bf16.msra.mxu3 %v10411_v42 }
 0x6c3   : > { %15113 = vst [vmem:[#allocation29_spill] sm:$0xff] %v13491_v43  ;;  %v5175_v11 = vpop.f32.mrf.mxu3  ;;  %v5080_v4 = vpop.f32.mrf.mxu1 }
 0x6c4   : > { %v5126_v27 = vpop.f32.mrf.mxu2 }
 0x6c5   : > { %v5176_v30 = vadd.f32 %v5175_v11, %v5126_v27  ;;  %v10407_v27 = vor.u32 %v11217_v3, %v10406_v1  ;;  %v10374_v3 = vld [vmem:[#allocation4 + $0xf50] sm:$0xf] }
 0x6c6   : > { %v5031_v13 = vpop.f32.mrf.mxu0  ;;  %6286 = vmatmul.bf16.gmra.mxu1 %v13497_v33  ;;  %6384 = vmatmul.bf16.gmra.mxu3 %v13497_v33 }
 0x6c7   : > { %v5081_v18 = vadd.f32 %v5080_v4, %v5031_v13  ;;  %v13500_v55 = vadd.f32 %v5176_v30, %v12885_v63  ;;  %v11153_v63 = vld [vmem:[#allocation4 + $0xdac] sm:$0xf0]  ;;  %6636 = vmatpush.bf16.msra.mxu1 %v10407_v27 }
 0x6c8   : > { %v11209_v27 = vld [vmem:[#allocation4 + $0xf6c] sm:$0xf0] }
 0x6c9   : > { %15114 = vst [vmem:[#allocation117_spill] sm:$0xff] %v13500_v55  ;;  %6237 = vmatmul.bf16.gmra.mxu0 %v13494_v26  ;;  %v13504_v25 = vadd.f32 %v5081_v18, %v12887_v50  ;;  %6335 = vmatmul.bf16.gmra.mxu2 %v13494_v26  ;;  %v10151_v50 = vor.u32 %v11153_v63, %v10150_v2  ;;  %v10118_v2 = vld [vmem:[#allocation4 + $0xd50] sm:$0xf]  ;;  %v11205_v63 = vld [vmem:[#allocation4 + $0xf54] sm:$0xf] }
 0x6cb   : > { %15115 = vst [vmem:[#allocation118_spill] sm:$0xff] %v13504_v25  ;;  %v5178_v22 = vpop.f32.mrf.mxu3  ;;  %v5082_v24 = vpop.f32.mrf.mxu1  ;;  %6587 = vmatpush.bf16.msra.mxu0 %v10151_v50  ;;  %v11226_v25 = vld [vmem:[#allocation4 + $0xff4] sm:$0xf0] }
 0x6cc   : > { %v5129_v16 = vpop.f32.mrf.mxu2 }
 0x6cd   : > { %v5179_v37 = vadd.f32 %v5178_v22, %v5129_v16 }
 0x6ce   : > { %v5033_v46 = vpop.f32.mrf.mxu0 }
 0x6cf   : > { %v5083_v45 = vadd.f32 %v5082_v24, %v5033_v46  ;;  %v13510_v48 = vadd.f32 %v5179_v37, %v12895_v9  ;;  %v10119_v37 = vor.u32 %v11145_v17, %v10118_v2  ;;  %v10379_v24 = vor.u32 %v11205_v63, %v10376_v5  ;;  %v11133_v17 = vld [vmem:[#allocation4 + $0xd14] sm:$0xf]  ;;  %v10086_v5 = vld [vmem:[#allocation4 + $0xd10] sm:$0xf] }
 0x6d0   : > { %v10088_v63 = vld [vmem:[#allocation4 + $0xd30] sm:$0xf0] }
 0x6d1   : > { %15116 = vst [vmem:[#allocation119_spill] sm:$0xff] %v13510_v48  ;;  %v13513_v32 = vadd.f32 %v5083_v45, %v12897_v6  ;;  %v11141_v6 = vld [vmem:[#allocation4 + $0xd54] sm:$0xf]  ;;  %6588 = vmatpush.bf16.msra.mxu0 %v10119_v37  ;;  %6735 = vmatpush.bf16.msra.mxu3 %v10379_v24  ;;  %v11137_v37 = vld [vmem:[#allocation4 + $0xd2c] sm:$0xf0]  ;;  %v15141_v48 = vld [vmem:[#allocation123_spill] sm:$0xff] }
 0x6d2   : > { %v10123_v46 = vor.u32 %v11141_v6, %v10120_v15  ;;  %v10344_v24 = vld [vmem:[#allocation4 + $0xf30] sm:$0xf0] }
 0x6d3   : > { %15117 = vst [vmem:[#allocation120_spill] sm:$0xff] %v13513_v32  ;;  %v5180_v13 = vpop.f32.mrf.mxu3  ;;  %v6252_v18 = vpop.f32.mrf.mxu1 }
 0x6d4   : > { %v5131_v11 = vpop.f32.mrf.mxu2  ;;  %6686 = vmatpush.bf16.msra.mxu2 %v10123_v46 }
 0x6d5   : > { %v5181_v4 = vadd.f32 %v5180_v13, %v5131_v11 }
 0x6d6   : > { %v6203_v30 = vpop.f32.mrf.mxu0  ;;  %6447 = vmatmul.bf16.vlgmr.msrb.gmra.mxu1 %v13295_v19  ;;  %6545 = vmatmul.bf16.vlgmr.msrb.gmra.mxu3 %v13295_v19 }
 0x6d7   : > { %v6253_v16 = vadd.f32 %v6252_v18, %v6203_v30  ;;  %v13516_v28 = vadd.f32 %v5181_v4, %v12900_v20  ;;  %v10375_v30 = vor.u32 %v11209_v27, %v10374_v3 }
 0x6d9   : > { %15118 = vst [vmem:[#allocation30_spill] sm:$0xff] %v13516_v28  ;;  %6398 = vmatmul.bf16.vlgmr.msrb.gmra.mxu0 %v13292_v49  ;;  %v6978_v9 = vadd.f32 %v6253_v16, %v12904_v21  ;;  %6496 = vmatmul.bf16.vlgmr.msrb.gmra.mxu2 %v13292_v49 }
 0x6da   : > { %6637 = vmatpush.bf16.msra.mxu1 %v10375_v30 }
 0x6db   : > { %v6350_v20 = vpop.f32.mrf.mxu3  ;;  %v6254_v21 = vpop.f32.mrf.mxu1  ;;  %v13525_v11 = vmul.f32 %v6978_v9, %v6978_v9 }
 0x6dc   : > { %v6301_v22 = vpop.f32.mrf.mxu2 }
 0x6dd   : > { %v6351_v50 = vadd.f32 %v6350_v20, %v6301_v22 }
 0x6de   : > { %v6205_v41 = vpop.f32.mrf.mxu0 }
 0x6df   : > { %v6255_v42 = vadd.f32 %v6254_v21, %v6205_v41  ;;  %v6979_v45 = vadd.f32 %v6351_v50, %v12910_v44  ;;  %v10091_v41 = vor.u32 %v11133_v17, %v10088_v63 }
 0x6e1   : > { %v6986_v1 = vadd.f32 %v6255_v42, %v12913_v59  ;;  %v13536_v9 = vmul.f32 %v6979_v45, %v6979_v45  ;;  %v10087_v42 = vor.u32 %v11137_v37, %v10086_v5  ;;  %6687 = vmatpush.bf16.msra.mxu2 %v10091_v41  ;;  %v11169_v5 = vld [vmem:[#allocation4 + $0xe2c] sm:$0xf0] }
 0x6e3   : > { %v13527_v13 = vmul.f32 %v6986_v1, %v6986_v1  ;;  %v6352_v16 = vpop.f32.mrf.mxu3  ;;  %v6257_v2 = vpop.f32.mrf.mxu1  ;;  %6589 = vmatpush.bf16.msra.mxu0 %v10087_v42 }
 0x6e4   : > { %v6303_v4 = vpop.f32.mrf.mxu2 }
 0x6e5   : > { %v6353_v15 = vadd.f32 %v6352_v16, %v6303_v4  ;;  %v10342_v16 = vld [vmem:[#allocation4 + $0xf10] sm:$0xf] }
 0x6e6   : > { %v6208_v6 = vpop.f32.mrf.mxu0  ;;  %6452 = vmatmul.bf16.gmra.mxu1 %v13325_v35  ;;  %6550 = vmatmul.bf16.gmra.mxu3 %v13325_v35 }
 0x6e7   : > { %v6258_v22 = vadd.f32 %v6257_v2, %v6208_v6  ;;  %v6987_v44 = vadd.f32 %v6353_v15, %v12916_v62  ;;  %v11201_v6 = vld [vmem:[#allocation4 + $0xf2c] sm:$0xf0] }
 0x6e9   : > { %6403 = vmatmul.bf16.gmra.mxu0 %v13322_v7  ;;  %v6994_v59 = vadd.f32 %v6258_v22, %v12920_v36  ;;  %6501 = vmatmul.bf16.gmra.mxu2 %v13322_v7  ;;  %v13538_v46 = vmul.f32 %v6987_v44, %v6987_v44  ;;  %v11197_v36 = vld [vmem:[#allocation4 + $0xf14] sm:$0xf]  ;;  %v10343_v22 = vor.u32 %v11201_v6, %v10342_v16 }
 0x6ea   : > { %v10347_v45 = vor.u32 %v11197_v36, %v10344_v24  ;;  %v11125_v24 = vld [vmem:[#allocation4 + $0xcd4] sm:$0xf] }
 0x6eb   : > { %v6355_v50 = vpop.f32.mrf.mxu3  ;;  %v6259_v3 = vpop.f32.mrf.mxu1  ;;  %v13545_v15 = vmul.f32 %v6994_v59, %v6994_v59  ;;  %6638 = vmatpush.bf16.msra.mxu1 %v10343_v22 }
 0x6ec   : > { %v6306_v20 = vpop.f32.mrf.mxu2  ;;  %6736 = vmatpush.bf16.msra.mxu3 %v10347_v45 }
 0x6ed   : > { %v6356_v1 = vadd.f32 %v6355_v50, %v6306_v20  ;;  %v10056_v50 = vld [vmem:[#allocation4 + $0xcf0] sm:$0xf0] }
 0x6ee   : > { %v6210_v21 = vpop.f32.mrf.mxu0  ;;  %v10059_v45 = vor.u32 %v11125_v24, %v10056_v50 }
 0x6ef   : > { %v6260_v27 = vadd.f32 %v6259_v3, %v6210_v21  ;;  %v6995_v30 = vadd.f32 %v6356_v1, %v12926_v60  ;;  %v10054_v21 = vld [vmem:[#allocation4 + $0xcd0] sm:$0xf]  ;;  %v11189_v1 = vld [vmem:[#allocation4 + $0xed4] sm:$0xf] }
 0x6f0   : > { %v10312_v3 = vld [vmem:[#allocation4 + $0xef0] sm:$0xf0]  ;;  %6688 = vmatpush.bf16.msra.mxu2 %v10059_v45 }
 0x6f1   : > { %v7002_v4 = vadd.f32 %v6260_v27, %v12929_v10  ;;  %v13556_v59 = vmul.f32 %v6995_v30, %v6995_v30  ;;  %v10315_v30 = vor.u32 %v11189_v1, %v10312_v3 }
 0x6f3   : > { %v13547_v2 = vmul.f32 %v7002_v4, %v7002_v4  ;;  %v6357_v17 = vpop.f32.mrf.mxu3  ;;  %v6262_v41 = vpop.f32.mrf.mxu1  ;;  %6737 = vmatpush.bf16.msra.mxu3 %v10315_v30  ;;  %v10022_v30 = vld [vmem:[#allocation4 + $0xc90] sm:$0xf] }
 0x6f4   : > { %v6308_v44 = vpop.f32.mrf.mxu2 }
 0x6f5   : > { %v6358_v20 = vadd.f32 %v6357_v17, %v6308_v44 }
 0x6f6   : > { %v6213_v63 = vpop.f32.mrf.mxu0  ;;  %6457 = vmatmul.bf16.gmra.mxu1 %v13355_v54  ;;  %6555 = vmatmul.bf16.gmra.mxu3 %v13355_v54 }
 0x6f7   : > { %v6263_v37 = vadd.f32 %v6262_v41, %v6213_v63  ;;  %v7003_v60 = vadd.f32 %v6358_v20, %v12932_v29  ;;  %v11129_v29 = vld [vmem:[#allocation4 + $0xcec] sm:$0xf0] }
 0x6f8   : > { %v10055_v16 = vor.u32 %v11129_v29, %v10054_v21  ;;  %v10310_v20 = vld [vmem:[#allocation4 + $0xed0] sm:$0xf] }
 0x6f9   : > { %6408 = vmatmul.bf16.gmra.mxu0 %v13352_v23  ;;  %v7010_v10 = vadd.f32 %v6263_v37, %v12936_v34  ;;  %6506 = vmatmul.bf16.gmra.mxu2 %v13352_v23  ;;  %v13558_v36 = vmul.f32 %v7003_v60, %v7003_v60  ;;  %v11193_v41 = vld [vmem:[#allocation4 + $0xeec] sm:$0xf0]  ;;  %v15131_v34 = vld [vmem:[#allocation127_spill] sm:$0xff] }
 0x6fa   : > { %6590 = vmatpush.bf16.msra.mxu0 %v10055_v16  ;;  %v10311_v24 = vor.u32 %v11193_v41, %v10310_v20  ;;  %v10024_v16 = vld [vmem:[#allocation4 + $0xcb0] sm:$0xf0] }
 0x6fb   : > { %v6360_v27 = vpop.f32.mrf.mxu3  ;;  %v6264_v22 = vpop.f32.mrf.mxu1  ;;  %v13565_v37 = vmul.f32 %v7010_v10, %v7010_v10 }
 0x6fc   : > { %v6311_v42 = vpop.f32.mrf.mxu2  ;;  %6639 = vmatpush.bf16.msra.mxu1 %v10311_v24 }
 0x6fd   : > { %v6361_v6 = vadd.f32 %v6360_v27, %v6311_v42 }
 0x6fe   : > { %v6215_v4 = vpop.f32.mrf.mxu0 }
 0x6ff   : > { %v6265_v44 = vadd.f32 %v6264_v22, %v6215_v4  ;;  %v7011_v17 = vadd.f32 %v6361_v6, %v12942_v53  ;;  %v11117_v4 = vld [vmem:[#allocation4 + $0xc94] sm:$0xf] }
 0x700   : > { %v10027_v22 = vor.u32 %v11117_v4, %v10024_v16 }
 0x701   : > { %v7018_v63 = vadd.f32 %v6265_v44, %v12945_v47  ;;  %v13576_v10 = vmul.f32 %v7011_v17, %v7011_v17  ;;  %v11181_v44 = vld [vmem:[#allocation4 + $0xe94] sm:$0xf] }
 0x702   : > { %6689 = vmatpush.bf16.msra.mxu2 %v10027_v22 }
 0x703   : > { %v13567_v60 = vmul.f32 %v7018_v63, %v7018_v63  ;;  %v6362_v21 = vpop.f32.mrf.mxu3  ;;  %v6267_v1 = vpop.f32.mrf.mxu1  ;;  %v10280_v63 = vld [vmem:[#allocation4 + $0xeb0] sm:$0xf0] }
 0x704   : > { %v6313_v50 = vpop.f32.mrf.mxu2  ;;  %v10283_v17 = vor.u32 %v11181_v44, %v10280_v63 }
 0x705   : > { %v6363_v45 = vadd.f32 %v6362_v21, %v6313_v50 }
 0x706   : > { %v6218_v29 = vpop.f32.mrf.mxu0  ;;  %6462 = vmatmul.bf16.gmra.mxu1 %v13385_v61  ;;  %6560 = vmatmul.bf16.gmra.mxu3 %v13385_v61 }
 0x707   : > { %v6268_v3 = vadd.f32 %v6267_v1, %v6218_v29  ;;  %v7019_v53 = vadd.f32 %v6363_v45, %v12948_v14  ;;  %v11121_v14 = vld [vmem:[#allocation4 + $0xcac] sm:$0xf0]  ;;  %6738 = vmatpush.bf16.msra.mxu3 %v10283_v17 }
 0x708   : > { %v10023_v24 = vor.u32 %v11121_v14, %v10022_v30 }
 0x709   : > { %6413 = vmatmul.bf16.gmra.mxu0 %v13382_v57  ;;  %v7026_v47 = vadd.f32 %v6268_v3, %v12952_v58  ;;  %6511 = vmatmul.bf16.gmra.mxu2 %v13382_v57  ;;  %v13578_v27 = vmul.f32 %v7019_v53, %v7019_v53  ;;  %v10278_v3 = vld [vmem:[#allocation4 + $0xe90] sm:$0xf] }
 0x70a   : > { %6591 = vmatpush.bf16.msra.mxu0 %v10023_v24  ;;  %v11185_v53 = vld [vmem:[#allocation4 + $0xeac] sm:$0xf0] }
 0x70b   : > { %v6365_v20 = vpop.f32.mrf.mxu3  ;;  %v6269_v21 = vpop.f32.mrf.mxu1  ;;  %v13585_v4 = vmul.f32 %v7026_v47, %v7026_v47  ;;  %v10279_v58 = vor.u32 %v11185_v53, %v10278_v3 }
 0x70c   : > { %v6316_v6 = vpop.f32.mrf.mxu2 }
 0x70d   : > { %v6366_v50 = vadd.f32 %v6365_v20, %v6316_v6  ;;  %15119 = vst [vmem:[#allocation31_spill] sm:$0xff] %v13585_v4  ;;  %6640 = vmatpush.bf16.msra.mxu1 %v10279_v58  ;;  %v11109_v58 = vld [vmem:[#allocation4 + $0xc54] sm:$0xf] }
 0x70e   : > { %v6220_v41 = vpop.f32.mrf.mxu0 }
 0x70f   : > { %v6270_v29 = vadd.f32 %v6269_v21, %v6220_v41  ;;  %v7027_v45 = vadd.f32 %v6366_v50, %v12958_v40  ;;  %v9990_v41 = vld [vmem:[#allocation4 + $0xc50] sm:$0xf]  ;;  %v11173_v50 = vld [vmem:[#allocation4 + $0xe54] sm:$0xf] }
 0x710   : > { %v10248_v21 = vld [vmem:[#allocation4 + $0xe70] sm:$0xf0] }
 0x711   : > { %v7034_v1 = vadd.f32 %v6270_v29, %v12961_v56  ;;  %v13596_v47 = vmul.f32 %v7027_v45, %v7027_v45  ;;  %v10251_v45 = vor.u32 %v11173_v50, %v10248_v21 }
 0x713   : > { %v13587_v16 = vmul.f32 %v7034_v1, %v7034_v1  ;;  %v6367_v30 = vpop.f32.mrf.mxu3  ;;  %v6272_v44 = vpop.f32.mrf.mxu1  ;;  %15121 = vst [vmem:[#allocation122_spill] sm:$0xff] %v13596_v47  ;;  %6739 = vmatpush.bf16.msra.mxu3 %v10251_v45  ;;  %v11186_v47 = vld [vmem:[#allocation4 + $0xeb4] sm:$0xf0] }
 0x714   : > { %v6318_v42 = vpop.f32.mrf.mxu2 }
 0x715   : > { %15120 = vst [vmem:[#allocation121_spill] sm:$0xff] %v13587_v16  ;;  %v6368_v22 = vadd.f32 %v6367_v30, %v6318_v42  ;;  %v9992_v42 = vld [vmem:[#allocation4 + $0xc70] sm:$0xf0] }
 0x716   : > { %v6223_v14 = vpop.f32.mrf.mxu0  ;;  %6467 = vmatmul.bf16.gmra.mxu1 %v13415_v38  ;;  %6565 = vmatmul.bf16.gmra.mxu3 %v13415_v38  ;;  %v9995_v17 = vor.u32 %v11109_v58, %v9992_v42 }
 0x717   : > { %v6273_v63 = vadd.f32 %v6272_v44, %v6223_v14  ;;  %v7035_v40 = vadd.f32 %v6368_v22, %v12964_v0  ;;  %v11113_v0 = vld [vmem:[#allocation4 + $0xc6c] sm:$0xf0] }
 0x718   : > { %v9991_v3 = vor.u32 %v11113_v0, %v9990_v41  ;;  %6690 = vmatpush.bf16.msra.mxu2 %v9995_v17 }
 0x719   : > { %6418 = vmatmul.bf16.gmra.mxu0 %v13412_v8  ;;  %v7042_v56 = vadd.f32 %v6273_v63, %v12968_v31  ;;  %6516 = vmatmul.bf16.gmra.mxu2 %v13412_v8  ;;  %v13598_v20 = vmul.f32 %v7035_v40, %v7035_v40  ;;  %v10246_v63 = vld [vmem:[#allocation4 + $0xe50] sm:$0xf] }
 0x71a   : > { %6592 = vmatpush.bf16.msra.mxu0 %v9991_v3  ;;  %v11177_v40 = vld [vmem:[#allocation4 + $0xe6c] sm:$0xf0] }
 0x71b   : > { %15122 = vst [vmem:[#allocation124_spill] sm:$0xff] %v13598_v20  ;;  %v6370_v29 = vpop.f32.mrf.mxu3  ;;  %v6274_v30 = vpop.f32.mrf.mxu1  ;;  %v13605_v58 = vmul.f32 %v7042_v56, %v7042_v56  ;;  %v10247_v31 = vor.u32 %v11177_v40, %v10246_v63  ;;  %v10216_v63 = vld [vmem:[#allocation4 + $0xe30] sm:$0xf0] }
 0x71c   : > { %v6321_v24 = vpop.f32.mrf.mxu2 }
 0x71d   : > { %v6371_v53 = vadd.f32 %v6370_v29, %v6321_v24  ;;  %15123 = vst [vmem:[#allocation134_spill] sm:$0xff] %v13605_v58  ;;  %6641 = vmatpush.bf16.msra.mxu1 %v10247_v31  ;;  %v15126_v29 = vld [vmem:[#allocation125_spill] sm:$0xff]  ;;  %v11101_v31 = vld [vmem:[#allocation4 + $0xc14] sm:$0xf] }
 0x71e   : > { %v6225_v1 = vpop.f32.mrf.mxu0 }
 0x71f   : > { %v6275_v14 = vadd.f32 %v6274_v30, %v6225_v1  ;;  %v7043_v22 = vadd.f32 %v6371_v53, %v12974_v52  ;;  %v15127_v1 = vld [vmem:[#allocation110_spill] sm:$0xff]  ;;  %v9958_v53 = vld [vmem:[#allocation4 + $0xc10] sm:$0xf] }
 0x721   : > { %v7050_v44 = vadd.f32 %v6275_v14, %v12977_v12  ;;  %v15125_v12 = vld [vmem:[#allocation109_spill] sm:$0xff]  ;;  %v13616_v3 = vmul.f32 %v7043_v22, %v7043_v22 }
 0x723   : > { %v13607_v42 = vmul.f32 %v7050_v44, %v7050_v44  ;;  %v6372_v41 = vpop.f32.mrf.mxu3  ;;  %v6277_v50 = vpop.f32.mrf.mxu1  ;;  %15128 = vst [vmem:[#allocation109_spill] sm:$0xff] %v13616_v3  ;;  %v11165_v44 = vld [vmem:[#allocation4 + $0xe14] sm:$0xf]  ;;  %v11194_v3 = vld [vmem:[#allocation4 + $0xef4] sm:$0xf0] }
 0x724   : > { %v6323_v6 = vpop.f32.mrf.mxu2  ;;  %v10219_v22 = vor.u32 %v11165_v44, %v10216_v63 }
 0x725   : > { %15124 = vst [vmem:[#allocation135_spill] sm:$0xff] %v13607_v42  ;;  %v6373_v17 = vadd.f32 %v6372_v41, %v6323_v6  ;;  %v9960_v6 = vld [vmem:[#allocation4 + $0xc30] sm:$0xf0] }
 0x726   : > { %v6228_v0 = vpop.f32.mrf.mxu0  ;;  %6472 = vmatmul.bf16.gmra.mxu1 %v15127_v1  ;;  %6570 = vmatmul.bf16.gmra.mxu3 %v15127_v1  ;;  %v9963_v14 = vor.u32 %v11101_v31, %v9960_v6  ;;  %v10214_v6 = vld [vmem:[#allocation4 + $0xe10] sm:$0xf] }
 0x727   : > { %v6278_v21 = vadd.f32 %v6277_v50, %v6228_v0  ;;  %v7051_v52 = vadd.f32 %v6373_v17, %v12980_v39  ;;  %v11105_v39 = vld [vmem:[#allocation4 + $0xc2c] sm:$0xf0]  ;;  %6740 = vmatpush.bf16.msra.mxu3 %v10219_v22  ;;  %v10215_v40 = vor.u32 %v11169_v5, %v10214_v6  ;;  %v15137_v22 = vld [vmem:[#allocation114_spill] sm:$0xff]  ;;  %v11222_v6 = vld [vmem:[#allocation4 + $0xfdc] sm:$0xf] }
 0x728   : > { %v9959_v17 = vor.u32 %v11105_v39, %v9958_v53  ;;  %6691 = vmatpush.bf16.msra.mxu2 %v9963_v14 }
 0x729   : > { %6423 = vmatmul.bf16.gmra.mxu0 %v15125_v12  ;;  %v7058_v56 = vadd.f32 %v6278_v21, %v15126_v29  ;;  %6521 = vmatmul.bf16.gmra.mxu2 %v15125_v12  ;;  %v13618_v45 = vmul.f32 %v7051_v52, %v7051_v52  ;;  %v15130_v29 = vld [vmem:[#allocation126_spill] sm:$0xff] }
 0x72a   : > { %6593 = vmatpush.bf16.msra.mxu0 %v9959_v17  ;;  %6642 = vmatpush.bf16.msra.mxu1 %v10215_v40  ;;  %v15136_v17 = vld [vmem:[#allocation129_spill] sm:$0xff] }
 0x72b   : > { %15129 = vst [vmem:[#allocation125_spill] sm:$0xff] %v13618_v45  ;;  %v6375_v41 = vpop.f32.mrf.mxu3  ;;  %v6279_v21 = vpop.f32.mrf.mxu1  ;;  %v13625_v62 = vmul.f32 %v7058_v56, %v7058_v56  ;;  %v11158_v40 = vld [vmem:[#allocation4 + $0xddc] sm:$0xf] }
 0x72c   : > { %v6326_v30 = vpop.f32.mrf.mxu2 }
 0x72d   : > { %v6376_v50 = vadd.f32 %v6375_v41, %v6326_v30  ;;  %15132 = vst [vmem:[#allocation110_spill] sm:$0xff] %v13625_v62  ;;  %v15134_v41 = vld [vmem:[#allocation128_spill] sm:$0xff]  ;;  %v15140_v30 = vld [vmem:[#allocation130_spill] sm:$0xff] }
 0x72e   : > { %v6230_v0 = vpop.f32.mrf.mxu0 }
 0x72f   : > { %v6280_v52 = vadd.f32 %v6279_v21, %v6230_v0  ;;  %v7059_v24 = vadd.f32 %v6376_v50, %v15130_v29  ;;  %v10190_v21 = vld [vmem:[#allocation4 + $0xdd8] sm:$0xf] }
 0x731   : > { %v7066_v31 = vadd.f32 %v6280_v52, %v15131_v34  ;;  %v15135_v34 = vld [vmem:[#allocation113_spill] sm:$0xff]  ;;  %v13636_v5 = vmul.f32 %v7059_v24, %v7059_v24 }
 0x733   : > { %v13627_v18 = vmul.f32 %v7066_v31, %v7066_v31  ;;  %v6377_v53 = vpop.f32.mrf.mxu3  ;;  %v6282_v44 = vpop.f32.mrf.mxu1  ;;  %15138 = vst [vmem:[#allocation127_spill] sm:$0xff] %v13636_v5  ;;  %v11162_v31 = vld [vmem:[#allocation4 + $0xdf4] sm:$0xf0] }
 0x734   : > { %v6328_v28 = vpop.f32.mrf.mxu2 }
 0x735   : > { %15133 = vst [vmem:[#allocation126_spill] sm:$0xff] %v13627_v18  ;;  %v6378_v14 = vadd.f32 %v6377_v53, %v6328_v28  ;;  %v10192_v28 = vld [vmem:[#allocation4 + $0xdf8] sm:$0xf0] }
 0x736   : > { %v6233_v39 = vpop.f32.mrf.mxu0  ;;  %6477 = vmatmul.bf16.gmra.mxu1 %v15137_v22  ;;  %6575 = vmatmul.bf16.gmra.mxu3 %v15137_v22  ;;  %v10195_v29 = vor.u32 %v11158_v40, %v10192_v28  ;;  %v10448_v53 = vld [vmem:[#allocation4 + $0xff8] sm:$0xf0]  ;;  %v10446_v28 = vld [vmem:[#allocation4 + $0xfd8] sm:$0xf] }
 0x737   : > { %v6283_v63 = vadd.f32 %v6282_v44, %v6233_v39  ;;  %v7067_v0 = vadd.f32 %v6378_v14, %v15134_v41  ;;  %v10451_v24 = vor.u32 %v11222_v6, %v10448_v53  ;;  %v10447_v39 = vor.u32 %v11226_v25, %v10446_v28  ;;  %v11154_v28 = vld [vmem:[#allocation4 + $0xdb4] sm:$0xf0] }
 0x738   : > { %6880 = vmatpush.bf16.msrb.mxu2 %v10195_v29 }
 0x739   : > { %6428 = vmatmul.bf16.gmra.mxu0 %v15135_v34  ;;  %v7074_v56 = vadd.f32 %v6283_v63, %v15136_v17  ;;  %6526 = vmatmul.bf16.gmra.mxu2 %v15135_v34  ;;  %v13638_v50 = vmul.f32 %v7067_v0, %v7067_v0  ;;  %v10191_v63 = vor.u32 %v11162_v31, %v10190_v21 }
 0x73a   : > { %6929 = vmatpush.bf16.msrb.mxu3 %v10451_v24  ;;  %6831 = vmatpush.bf16.msrb.mxu1 %v10447_v39  ;;  %v10158_v24 = vld [vmem:[#allocation4 + $0xd98] sm:$0xf] }
 0x73b   : > { %15139 = vst [vmem:[#allocation128_spill] sm:$0xff] %v13638_v50  ;;  %v6380_v14 = vpop.f32.mrf.mxu3  ;;  %v6284_v0 = vpop.f32.mrf.mxu1  ;;  %6782 = vmatpush.bf16.msrb.mxu0 %v10191_v63  ;;  %v13645_v55 = vmul.f32 %v7074_v56, %v7074_v56  ;;  %v10160_v63 = vld [vmem:[#allocation4 + $0xdb8] sm:$0xf0]  ;;  %v11202_v50 = vld [vmem:[#allocation4 + $0xf34] sm:$0xf0] }
 0x73c   : > { %v6331_v52 = vpop.f32.mrf.mxu2 }
 0x73d   : > { %v6381_v41 = vadd.f32 %v6380_v14, %v6331_v52  ;;  %15142 = vst [vmem:[#allocation113_spill] sm:$0xff] %v13645_v55  ;;  %v15149_v52 = vld [vmem:[#allocation133_spill] sm:$0xff] }
 0x73e   : > { %v6235_v44 = vpop.f32.mrf.mxu0 }
 0x73f   : > { %v6285_v17 = vadd.f32 %v6284_v0, %v6235_v44  ;;  %v7075_v32 = vadd.f32 %v6381_v41, %v15140_v30  ;;  %v15144_v30 = vld [vmem:[#allocation131_spill] sm:$0xff]  ;;  %v11218_v41 = vld [vmem:[#allocation4 + $0xfb4] sm:$0xf0] }
 0x741   : > { %v7082_v40 = vadd.f32 %v6285_v17, %v15141_v48  ;;  %v15145_v48 = vld [vmem:[#allocation132_spill] sm:$0xff]  ;;  %v13656_v25 = vmul.f32 %v7075_v32, %v7075_v32 }
 0x743   : > { %v13647_v43 = vmul.f32 %v7082_v40, %v7082_v40  ;;  %v6382_v21 = vpop.f32.mrf.mxu3  ;;  %v6287_v6 = vpop.f32.mrf.mxu1  ;;  %15146 = vst [vmem:[#allocation114_spill] sm:$0xff] %v13656_v25 }
 0x744   : > { %v6333_v51 = vpop.f32.mrf.mxu2 }
 0x745   : > { %15143 = vst [vmem:[#allocation129_spill] sm:$0xff] %v13647_v43  ;;  %v6383_v29 = vadd.f32 %v6382_v21, %v6333_v51  ;;  %v11150_v51 = vld [vmem:[#allocation4 + $0xd9c] sm:$0xf]  ;;  %v10414_v43 = vld [vmem:[#allocation4 + $0xf98] sm:$0xf] }
 0x746   : > { %v6238_v31 = vpop.f32.mrf.mxu0  ;;  %6482 = vmatmul.bf16.gmra.mxu1 %v13497_v33  ;;  %6580 = vmatmul.bf16.gmra.mxu3 %v13497_v33  ;;  %v10163_v40 = vor.u32 %v11150_v51, %v10160_v63  ;;  %v11214_v21 = vld [vmem:[#allocation4 + $0xf9c] sm:$0xf]  ;;  %v10415_v63 = vor.u32 %v11218_v41, %v10414_v43 }
 0x747   : > { %v6288_v53 = vadd.f32 %v6287_v6, %v6238_v31  ;;  %v7083_v14 = vadd.f32 %v6383_v29, %v15144_v30  ;;  %v10416_v31 = vld [vmem:[#allocation4 + $0xfb8] sm:$0xf0]  ;;  %v10159_v6 = vor.u32 %v11154_v28, %v10158_v24  ;;  %v15157_v24 = vld [vmem:[#allocation36_spill] sm:$0xff] }
 0x748   : > { %6881 = vmatpush.bf16.msrb.mxu2 %v10163_v40  ;;  %6832 = vmatpush.bf16.msrb.mxu1 %v10415_v63  ;;  %v11142_v41 = vld [vmem:[#allocation4 + $0xd5c] sm:$0xf] }
 0x749   : > { %6433 = vmatmul.bf16.gmra.mxu0 %v13494_v26  ;;  %v7090_v56 = vadd.f32 %v6288_v53, %v15145_v48  ;;  %6531 = vmatmul.bf16.gmra.mxu2 %v13494_v26  ;;  %v13658_v44 = vmul.f32 %v7083_v14, %v7083_v14  ;;  %v10419_v53 = vor.u32 %v11214_v21, %v10416_v31  ;;  %v15148_v14 = vld [vmem:[#allocation32_spill] sm:$0xff]  ;;  %v15152_v21 = vld [vmem:[#allocation33_spill] sm:$0xff] }
 0x74a   : > { %6783 = vmatpush.bf16.msrb.mxu0 %v10159_v6 }
 0x74b   : > { %15147 = vst [vmem:[#allocation130_spill] sm:$0xff] %v13658_v44  ;;  %v6385_v0 = vpop.f32.mrf.mxu3  ;;  %v6289_v32 = vpop.f32.mrf.mxu1  ;;  %6930 = vmatpush.bf16.msrb.mxu3 %v10419_v53  ;;  %v13665_v25 = vmul.f32 %v7090_v56, %v7090_v56  ;;  %v11146_v53 = vld [vmem:[#allocation4 + $0xd74] sm:$0xf0] }
 0x74c   : > { %v6336_v39 = vpop.f32.mrf.mxu2 }
 0x74d   : > { %v6386_v29 = vadd.f32 %v6385_v0, %v6336_v39  ;;  %15150 = vst [vmem:[#allocation123_spill] sm:$0xff] %v13665_v25  ;;  %v11210_v25 = vld [vmem:[#allocation4 + $0xf74] sm:$0xf0] }
 0x74e   : > { %v6240_v17 = vpop.f32.mrf.mxu0 }
 0x74f   : > { %v6290_v30 = vadd.f32 %v6289_v32, %v6240_v17  ;;  %v7091_v48 = vadd.f32 %v6386_v29, %v15148_v14  ;;  %v10126_v29 = vld [vmem:[#allocation4 + $0xd58] sm:$0xf]  ;;  %v10384_v14 = vld [vmem:[#allocation4 + $0xf78] sm:$0xf0] }
 0x751   : > { %v7098_v55 = vadd.f32 %v6290_v30, %v15149_v52  ;;  %v15153_v52 = vld [vmem:[#allocation34_spill] sm:$0xff]  ;;  %v13676_v43 = vmul.f32 %v7091_v48, %v7091_v48  ;;  %v11206_v30 = vld [vmem:[#allocation4 + $0xf5c] sm:$0xf] }
 0x752   : > { %v10387_v48 = vor.u32 %v11206_v30, %v10384_v14 }
 0x753   : > { %v13667_v51 = vmul.f32 %v7098_v55, %v7098_v55  ;;  %v6387_v39 = vpop.f32.mrf.mxu3  ;;  %v6448_v40 = vpop.f32.mrf.mxu1  ;;  %15154 = vst [vmem:[#allocation132_spill] sm:$0xff] %v13676_v43 }
 0x754   : > { %v6338_v44 = vpop.f32.mrf.mxu2  ;;  %6931 = vmatpush.bf16.msrb.mxu3 %v10387_v48  ;;  %v10094_v48 = vld [vmem:[#allocation4 + $0xd18] sm:$0xf] }
 0x755   : > { %15151 = vst [vmem:[#allocation131_spill] sm:$0xff] %v13667_v51  ;;  %v6388_v17 = vadd.f32 %v6387_v39, %v6338_v44  ;;  %v10128_v44 = vld [vmem:[#allocation4 + $0xd78] sm:$0xf0] }
 0x756   : > { %v6399_v0 = vpop.f32.mrf.mxu0  ;;  %6643 = vmatmul.bf16.vlgmr.msra.gmra.mxu1 %v13295_v19  ;;  %6741 = vmatmul.bf16.vlgmr.msra.gmra.mxu3 %v13295_v19  ;;  %v10131_v6 = vor.u32 %v11142_v41, %v10128_v44  ;;  %v10382_v44 = vld [vmem:[#allocation4 + $0xf58] sm:$0xf] }
 0x757   : > { %v6449_v28 = vadd.f32 %v6448_v40, %v6399_v0  ;;  %v7099_v31 = vadd.f32 %v6388_v17, %v15152_v21  ;;  %v10127_v17 = vor.u32 %v11146_v53, %v10126_v29  ;;  %v10383_v63 = vor.u32 %v11210_v25, %v10382_v44  ;;  %v10352_v44 = vld [vmem:[#allocation4 + $0xf38] sm:$0xf0]  ;;  %v15161_v29 = vld [vmem:[#allocation40_spill] sm:$0xff] }
 0x758   : > { %6882 = vmatpush.bf16.msrb.mxu2 %v10131_v6 }
 0x759   : > { %6594 = vmatmul.bf16.vlgmr.msra.gmra.mxu0 %v13292_v49  ;;  %v6980_v56 = vadd.f32 %v6449_v28, %v15153_v52  ;;  %6692 = vmatmul.bf16.vlgmr.msra.gmra.mxu2 %v13292_v49  ;;  %v13678_v55 = vmul.f32 %v7099_v31, %v7099_v31  ;;  %v15156_v31 = vld [vmem:[#allocation35_spill] sm:$0xff] }
 0x75a   : > { %6784 = vmatpush.bf16.msrb.mxu0 %v10127_v17  ;;  %6833 = vmatpush.bf16.msrb.mxu1 %v10383_v63  ;;  %v11134_v63 = vld [vmem:[#allocation4 + $0xd1c] sm:$0xf] }
 0x75b   : > { %15155 = vst [vmem:[#allocation32_spill] sm:$0xff] %v13678_v55  ;;  %v6546_v39 = vpop.f32.mrf.mxu3  ;;  %v6450_v28 = vpop.f32.mrf.mxu1  ;;  %v13685_v51 = vmul.f32 %v6980_v56, %v6980_v56 }
 0x75c   : > { %v6497_v32 = vpop.f32.mrf.mxu2 }
 0x75d   : > { %v6547_v40 = vadd.f32 %v6546_v39, %v6497_v32  ;;  %v15158_v39 = vld [vmem:[#allocation37_spill] sm:$0xff] }
 0x75e   : > { %v6401_v0 = vpop.f32.mrf.mxu0 }
 0x75f   : > { %v6451_v21 = vadd.f32 %v6450_v28, %v6401_v0  ;;  %v6981_v52 = vadd.f32 %v6547_v40, %v15156_v31  ;;  %v11138_v31 = vld [vmem:[#allocation4 + $0xd34] sm:$0xf0] }
 0x760   : > { %v10350_v40 = vld [vmem:[#allocation4 + $0xf18] sm:$0xf] }
 0x761   : > { %v6988_v41 = vadd.f32 %v6451_v21, %v15157_v24  ;;  %v15159_v24 = vld [vmem:[#allocation38_spill] sm:$0xff]  ;;  %v13696_v25 = vmul.f32 %v6981_v52, %v6981_v52  ;;  %v10351_v62 = vor.u32 %v11202_v50, %v10350_v40  ;;  %v10062_v40 = vld [vmem:[#allocation4 + $0xcd8] sm:$0xf] }
 0x763   : > { %v13687_v5 = vmul.f32 %v6988_v41, %v6988_v41  ;;  %v6548_v32 = vpop.f32.mrf.mxu3  ;;  %v6453_v30 = vpop.f32.mrf.mxu1  ;;  %v11198_v41 = vld [vmem:[#allocation4 + $0xf1c] sm:$0xf]  ;;  %6834 = vmatpush.bf16.msrb.mxu1 %v10351_v62 }
 0x764   : > { %v6499_v43 = vpop.f32.mrf.mxu2  ;;  %v10355_v52 = vor.u32 %v11198_v41, %v10352_v44  ;;  %v11126_v62 = vld [vmem:[#allocation4 + $0xcdc] sm:$0xf] }
 0x765   : > { %v6549_v53 = vadd.f32 %v6548_v32, %v6499_v43  ;;  %v10096_v43 = vld [vmem:[#allocation4 + $0xd38] sm:$0xf0] }
 0x766   : > { %v6404_v6 = vpop.f32.mrf.mxu0  ;;  %6648 = vmatmul.bf16.gmra.mxu1 %v13325_v35  ;;  %6746 = vmatmul.bf16.gmra.mxu3 %v13325_v35  ;;  %v10099_v21 = vor.u32 %v11134_v63, %v10096_v43 }
 0x767   : > { %v6454_v14 = vadd.f32 %v6453_v30, %v6404_v6  ;;  %v6989_v0 = vadd.f32 %v6549_v53, %v15158_v39  ;;  %v10095_v53 = vor.u32 %v11138_v31, %v10094_v48  ;;  %6932 = vmatpush.bf16.msrb.mxu3 %v10355_v52 }
 0x768   : > { %6883 = vmatpush.bf16.msrb.mxu2 %v10099_v21 }
 0x769   : > { %6599 = vmatmul.bf16.gmra.mxu0 %v13322_v7  ;;  %v6996_v56 = vadd.f32 %v6454_v14, %v15159_v24  ;;  %6697 = vmatmul.bf16.gmra.mxu2 %v13322_v7  ;;  %v13698_v17 = vmul.f32 %v6989_v0, %v6989_v0  ;;  %v15160_v0 = vld [vmem:[#allocation39_spill] sm:$0xff] }
 0x76a   : > { %6785 = vmatpush.bf16.msrb.mxu0 %v10095_v53 }
 0x76b   : > { %v6551_v32 = vpop.f32.mrf.mxu3  ;;  %v6455_v14 = vpop.f32.mrf.mxu1  ;;  %v13705_v63 = vmul.f32 %v6996_v56, %v6996_v56 }
 0x76c   : > { %v6502_v28 = vpop.f32.mrf.mxu2 }
 0x76d   : > { %v6552_v30 = vadd.f32 %v6551_v32, %v6502_v28  ;;  %v15162_v32 = vld [vmem:[#allocation41_spill] sm:$0xff]  ;;  %v15165_v28 = vld [vmem:[#allocation44_spill] sm:$0xff] }
 0x76e   : > { %v6406_v6 = vpop.f32.mrf.mxu0 }
 0x76f   : > { %v6456_v39 = vadd.f32 %v6455_v14, %v6406_v6  ;;  %v6997_v24 = vadd.f32 %v6552_v30, %v15160_v0  ;;  %v11130_v30 = vld [vmem:[#allocation4 + $0xcf4] sm:$0xf0]  ;;  %v11190_v14 = vld [vmem:[#allocation4 + $0xedc] sm:$0xf] }
 0x771   : > { %v7004_v55 = vadd.f32 %v6456_v39, %v15161_v29  ;;  %v15163_v29 = vld [vmem:[#allocation42_spill] sm:$0xff]  ;;  %v13716_v50 = vmul.f32 %v6997_v24, %v6997_v24  ;;  %v10320_v39 = vld [vmem:[#allocation4 + $0xef8] sm:$0xf0] }
 0x772   : > { %v10323_v24 = vor.u32 %v11190_v14, %v10320_v39 }
 0x773   : > { %v13707_v43 = vmul.f32 %v7004_v55, %v7004_v55  ;;  %v6553_v48 = vpop.f32.mrf.mxu3  ;;  %v6458_v41 = vpop.f32.mrf.mxu1 }
 0x774   : > { %v6504_v18 = vpop.f32.mrf.mxu2  ;;  %6933 = vmatpush.bf16.msrb.mxu3 %v10323_v24  ;;  %v10030_v24 = vld [vmem:[#allocation4 + $0xc98] sm:$0xf] }
 0x775   : > { %v6554_v21 = vadd.f32 %v6553_v48, %v6504_v18  ;;  %v10064_v18 = vld [vmem:[#allocation4 + $0xcf8] sm:$0xf0] }
 0x776   : > { %v6409_v31 = vpop.f32.mrf.mxu0  ;;  %6653 = vmatmul.bf16.gmra.mxu1 %v13355_v54  ;;  %6751 = vmatmul.bf16.gmra.mxu3 %v13355_v54  ;;  %v10067_v52 = vor.u32 %v11126_v62, %v10064_v18  ;;  %v10318_v18 = vld [vmem:[#allocation4 + $0xed8] sm:$0xf] }
 0x777   : > { %v6459_v44 = vadd.f32 %v6458_v41, %v6409_v31  ;;  %v7005_v6 = vadd.f32 %v6554_v21, %v15162_v32  ;;  %v10063_v21 = vor.u32 %v11130_v30, %v10062_v40  ;;  %v10319_v0 = vor.u32 %v11194_v3, %v10318_v18 }
 0x778   : > { %6884 = vmatpush.bf16.msrb.mxu2 %v10067_v52 }
 0x779   : > { %6604 = vmatmul.bf16.gmra.mxu0 %v13352_v23  ;;  %v7012_v56 = vadd.f32 %v6459_v44, %v15163_v29  ;;  %6702 = vmatmul.bf16.gmra.mxu2 %v13352_v23  ;;  %v13718_v55 = vmul.f32 %v7005_v6, %v7005_v6  ;;  %v15164_v6 = vld [vmem:[#allocation43_spill] sm:$0xff] }
 0x77a   : > { %6786 = vmatpush.bf16.msrb.mxu0 %v10063_v21  ;;  %6835 = vmatpush.bf16.msrb.mxu1 %v10319_v0  ;;  %v11118_v0 = vld [vmem:[#allocation4 + $0xc9c] sm:$0xf] }
 0x77b   : > { %v6556_v48 = vpop.f32.mrf.mxu3  ;;  %v6460_v44 = vpop.f32.mrf.mxu1  ;;  %v13725_v45 = vmul.f32 %v7012_v56, %v7012_v56 }
 0x77c   : > { %v6507_v53 = vpop.f32.mrf.mxu2 }
 0x77d   : > { %v6557_v41 = vadd.f32 %v6556_v48, %v6507_v53  ;;  %v15166_v48 = vld [vmem:[#allocation45_spill] sm:$0xff]  ;;  %v15170_v53 = vld [vmem:[#allocation48_spill] sm:$0xff] }
 0x77e   : > { %v6411_v31 = vpop.f32.mrf.mxu0 }
 0x77f   : > { %v6461_v32 = vadd.f32 %v6460_v44, %v6411_v31  ;;  %v7013_v29 = vadd.f32 %v6557_v41, %v15164_v6  ;;  %v11182_v6 = vld [vmem:[#allocation4 + $0xe9c] sm:$0xf] }
 0x781   : > { %v7020_v62 = vadd.f32 %v6461_v32, %v15165_v28  ;;  %v15167_v28 = vld [vmem:[#allocation46_spill] sm:$0xff]  ;;  %v13736_v3 = vmul.f32 %v7013_v29, %v7013_v29  ;;  %v11122_v32 = vld [vmem:[#allocation4 + $0xcb4] sm:$0xf0] }
 0x783   : > { %v13727_v58 = vmul.f32 %v7020_v62, %v7020_v62  ;;  %v6558_v40 = vpop.f32.mrf.mxu3  ;;  %v6463_v14 = vpop.f32.mrf.mxu1  ;;  %15168 = vst [vmem:[#allocation133_spill] sm:$0xff] %v13736_v3  ;;  %v10288_v62 = vld [vmem:[#allocation4 + $0xeb8] sm:$0xf0] }
 0x784   : > { %v6509_v42 = vpop.f32.mrf.mxu2  ;;  %v10291_v29 = vor.u32 %v11182_v6, %v10288_v62 }
 0x785   : > { %v6559_v52 = vadd.f32 %v6558_v40, %v6509_v42  ;;  %v10032_v42 = vld [vmem:[#allocation4 + $0xcb8] sm:$0xf0] }
 0x786   : > { %v6414_v30 = vpop.f32.mrf.mxu0  ;;  %6658 = vmatmul.bf16.gmra.mxu1 %v13385_v61  ;;  %6756 = vmatmul.bf16.gmra.mxu3 %v13385_v61  ;;  %v10035_v44 = vor.u32 %v11118_v0, %v10032_v42  ;;  %v10286_v42 = vld [vmem:[#allocation4 + $0xe98] sm:$0xf] }
 0x787   : > { %v6464_v39 = vadd.f32 %v6463_v14, %v6414_v30  ;;  %v7021_v31 = vadd.f32 %v6559_v52, %v15166_v48  ;;  %v10031_v52 = vor.u32 %v11122_v32, %v10030_v24  ;;  %6934 = vmatpush.bf16.msrb.mxu3 %v10291_v29  ;;  %v10287_v18 = vor.u32 %v11186_v47, %v10286_v42  ;;  %v9998_v29 = vld [vmem:[#allocation4 + $0xc58] sm:$0xf] }
 0x788   : > { %6885 = vmatpush.bf16.msrb.mxu2 %v10035_v44 }
 0x789   : > { %6609 = vmatmul.bf16.gmra.mxu0 %v13382_v57  ;;  %v7028_v56 = vadd.f32 %v6464_v39, %v15167_v28  ;;  %6707 = vmatmul.bf16.gmra.mxu2 %v13382_v57  ;;  %v13738_v21 = vmul.f32 %v7021_v31, %v7021_v31  ;;  %v15169_v31 = vld [vmem:[#allocation47_spill] sm:$0xff] }
 0x78a   : > { %6787 = vmatpush.bf16.msrb.mxu0 %v10031_v52  ;;  %6836 = vmatpush.bf16.msrb.mxu1 %v10287_v18  ;;  %v11110_v18 = vld [vmem:[#allocation4 + $0xc5c] sm:$0xf] }
 0x78b   : > { %v6561_v40 = vpop.f32.mrf.mxu3  ;;  %v6465_v39 = vpop.f32.mrf.mxu1  ;;  %v13745_v20 = vmul.f32 %v7028_v56, %v7028_v56 }
 0x78c   : > { %v6512_v41 = vpop.f32.mrf.mxu2 }
 0x78d   : > { %v6562_v14 = vadd.f32 %v6561_v40, %v6512_v41  ;;  %15171 = vst [vmem:[#allocation33_spill] sm:$0xff] %v13745_v20  ;;  %v15173_v40 = vld [vmem:[#allocation49_spill] sm:$0xff]  ;;  %v15178_v41 = vld [vmem:[#allocation52_spill] sm:$0xff] }
 0x78e   : > { %v6416_v30 = vpop.f32.mrf.mxu0  ;;  %v11178_v20 = vld [vmem:[#allocation4 + $0xe74] sm:$0xf0] }
 0x78f   : > { %v6466_v48 = vadd.f32 %v6465_v39, %v6416_v30  ;;  %v7029_v28 = vadd.f32 %v6562_v14, %v15169_v31  ;;  %v11174_v31 = vld [vmem:[#allocation4 + $0xe5c] sm:$0xf] }
 0x791   : > { %v7036_v0 = vadd.f32 %v6466_v48, %v15170_v53  ;;  %v15174_v53 = vld [vmem:[#allocation50_spill] sm:$0xff]  ;;  %v13756_v47 = vmul.f32 %v7029_v28, %v7029_v28  ;;  %v11114_v48 = vld [vmem:[#allocation4 + $0xc74] sm:$0xf0] }
 0x793   : > { %v13747_v4 = vmul.f32 %v7036_v0, %v7036_v0  ;;  %v6563_v24 = vpop.f32.mrf.mxu3  ;;  %v6468_v6 = vpop.f32.mrf.mxu1  ;;  %15175 = vst [vmem:[#allocation35_spill] sm:$0xff] %v13756_v47  ;;  %v10256_v0 = vld [vmem:[#allocation4 + $0xe78] sm:$0xf0] }
 0x794   : > { %v6514_v16 = vpop.f32.mrf.mxu2  ;;  %v10259_v28 = vor.u32 %v11174_v31, %v10256_v0 }
 0x795   : > { %15172 = vst [vmem:[#allocation34_spill] sm:$0xff] %v13747_v4  ;;  %v6564_v44 = vadd.f32 %v6563_v24, %v6514_v16  ;;  %v10000_v16 = vld [vmem:[#allocation4 + $0xc78] sm:$0xf0] }
 0x796   : > { %v6419_v32 = vpop.f32.mrf.mxu0  ;;  %6663 = vmatmul.bf16.gmra.mxu1 %v13415_v38  ;;  %6761 = vmatmul.bf16.gmra.mxu3 %v13415_v38  ;;  %v10003_v39 = vor.u32 %v11110_v18, %v10000_v16  ;;  %v10254_v16 = vld [vmem:[#allocation4 + $0xe58] sm:$0xf] }
 0x797   : > { %v6469_v62 = vadd.f32 %v6468_v6, %v6419_v32  ;;  %v7037_v30 = vadd.f32 %v6564_v44, %v15173_v40  ;;  %v9999_v44 = vor.u32 %v11114_v48, %v9998_v29  ;;  %6935 = vmatpush.bf16.msrb.mxu3 %v10259_v28  ;;  %v10255_v42 = vor.u32 %v11178_v20, %v10254_v16  ;;  %v9966_v28 = vld [vmem:[#allocation4 + $0xc18] sm:$0xf] }
 0x798   : > { %6886 = vmatpush.bf16.msrb.mxu2 %v10003_v39 }
 0x799   : > { %6614 = vmatmul.bf16.gmra.mxu0 %v13412_v8  ;;  %v7044_v56 = vadd.f32 %v6469_v62, %v15174_v53  ;;  %6712 = vmatmul.bf16.gmra.mxu2 %v13412_v8  ;;  %v13758_v52 = vmul.f32 %v7037_v30, %v7037_v30  ;;  %v15177_v30 = vld [vmem:[#allocation51_spill] sm:$0xff] }
 0x79a   : > { %6788 = vmatpush.bf16.msrb.mxu0 %v9999_v44  ;;  %6837 = vmatpush.bf16.msrb.mxu1 %v10255_v42  ;;  %v11102_v42 = vld [vmem:[#allocation4 + $0xc1c] sm:$0xf] }
 0x79b   : > { %15176 = vst [vmem:[#allocation36_spill] sm:$0xff] %v13758_v52  ;;  %v6566_v24 = vpop.f32.mrf.mxu3  ;;  %v6470_v62 = vpop.f32.mrf.mxu1  ;;  %v13765_v4 = vmul.f32 %v7044_v56, %v7044_v56 }
 0x79c   : > { %v6517_v14 = vpop.f32.mrf.mxu2 }
 0x79d   : > { %v6567_v6 = vadd.f32 %v6566_v24, %v6517_v14  ;;  %15179 = vst [vmem:[#allocation37_spill] sm:$0xff] %v13765_v4  ;;  %v15181_v24 = vld [vmem:[#allocation53_spill] sm:$0xff]  ;;  %v15185_v14 = vld [vmem:[#allocation56_spill] sm:$0xff] }
 0x79e   : > { %v6421_v32 = vpop.f32.mrf.mxu0  ;;  %v11170_v4 = vld [vmem:[#allocation4 + $0xe34] sm:$0xf0] }
 0x79f   : > { %v6471_v40 = vadd.f32 %v6470_v62, %v6421_v32  ;;  %v7045_v53 = vadd.f32 %v6567_v6, %v15177_v30  ;;  %v11166_v30 = vld [vmem:[#allocation4 + $0xe1c] sm:$0xf] }
 0x7a1   : > { %v7052_v18 = vadd.f32 %v6471_v40, %v15178_v41  ;;  %v15182_v41 = vld [vmem:[#allocation54_spill] sm:$0xff]  ;;  %v13776_v20 = vmul.f32 %v7045_v53, %v7045_v53  ;;  %v11106_v40 = vld [vmem:[#allocation4 + $0xc34] sm:$0xf0] }
 0x7a3   : > { %v13767_v3 = vmul.f32 %v7052_v18, %v7052_v18  ;;  %v6568_v29 = vpop.f32.mrf.mxu3  ;;  %v6473_v31 = vpop.f32.mrf.mxu1  ;;  %15183 = vst [vmem:[#allocation39_spill] sm:$0xff] %v13776_v20  ;;  %v10224_v18 = vld [vmem:[#allocation4 + $0xe38] sm:$0xf0] }
 0x7a4   : > { %v6519_v47 = vpop.f32.mrf.mxu2  ;;  %v10227_v53 = vor.u32 %v11166_v30, %v10224_v18 }
 0x7a5   : > { %15180 = vst [vmem:[#allocation38_spill] sm:$0xff] %v13767_v3  ;;  %v6569_v39 = vadd.f32 %v6568_v29, %v6519_v47  ;;  %v9968_v47 = vld [vmem:[#allocation4 + $0xc38] sm:$0xf0] }
 0x7a6   : > { %v6424_v48 = vpop.f32.mrf.mxu0  ;;  %6668 = vmatmul.bf16.gmra.mxu1 %v15127_v1  ;;  %6766 = vmatmul.bf16.gmra.mxu3 %v15127_v1  ;;  %v9971_v62 = vor.u32 %v11102_v42, %v9968_v47  ;;  %v10222_v47 = vld [vmem:[#allocation4 + $0xe18] sm:$0xf] }
 0x7a7   : > { %v6474_v0 = vadd.f32 %v6473_v31, %v6424_v48  ;;  %v7053_v32 = vadd.f32 %v6569_v39, %v15181_v24  ;;  %v9967_v39 = vor.u32 %v11106_v40, %v9966_v28  ;;  %6936 = vmatpush.bf16.msrb.mxu3 %v10227_v53  ;;  %v10223_v16 = vor.u32 %v11170_v4, %v10222_v47  ;;  %v11258_v53 = vld [vmem:[#allocation7 + $0xf8] sm:$0xff] }
 0x7a8   : > { %6887 = vmatpush.bf16.msrb.mxu2 %v9971_v62 }
 0x7a9   : > { %6619 = vmatmul.bf16.gmra.mxu0 %v15125_v12  ;;  %v7060_v56 = vadd.f32 %v6474_v0, %v15182_v41  ;;  %6717 = vmatmul.bf16.gmra.mxu2 %v15125_v12  ;;  %v13778_v44 = vmul.f32 %v7053_v32, %v7053_v32  ;;  %v15184_v32 = vld [vmem:[#allocation55_spill] sm:$0xff] }
 0x7aa   : > { %6789 = vmatpush.bf16.msrb.mxu0 %v9967_v39  ;;  %6838 = vmatpush.bf16.msrb.mxu1 %v10223_v16  ;;  %v11250_v16 = vld [vmem:[#allocation7 + $0xb8] sm:$0xff] }
 0x7ab   : > { %v6571_v29 = vpop.f32.mrf.mxu3  ;;  %v6475_v0 = vpop.f32.mrf.mxu1  ;;  %v13785_v3 = vmul.f32 %v7060_v56, %v7060_v56  ;;  %7957 = vmatpush.bf16.msra.mxu3 %v11258_v53 }
 0x7ac   : > { %v6522_v6 = vpop.f32.mrf.mxu2  ;;  %7908 = vmatpush.bf16.msra.mxu2 %v11250_v16  ;;  %v11241_v16 = vld [vmem:[#allocation7 + $0x70] sm:$0xff] }
 0x7ad   : > { %v6572_v31 = vadd.f32 %v6571_v29, %v6522_v6  ;;  %v15186_v29 = vld [vmem:[#allocation57_spill] sm:$0xff] }
 0x7ae   : > { %v6426_v48 = vpop.f32.mrf.mxu0 }
 0x7af   : > { %v6476_v24 = vadd.f32 %v6475_v0, %v6426_v48  ;;  %v7061_v41 = vadd.f32 %v6572_v31, %v15184_v32 }
 0x7b1   : > { %v7068_v42 = vadd.f32 %v6476_v24, %v15185_v14  ;;  %v15187_v14 = vld [vmem:[#allocation58_spill] sm:$0xff]  ;;  %v13796_v4 = vmul.f32 %v7061_v41, %v7061_v41 }
 0x7b3   : > { %v13787_v52 = vmul.f32 %v7068_v42, %v7068_v42  ;;  %v6573_v28 = vpop.f32.mrf.mxu3  ;;  %v6478_v30 = vpop.f32.mrf.mxu1  ;;  %15188 = vst [vmem:[#allocation40_spill] sm:$0xff] %v13796_v4 }
 0x7b4   : > { %v6524_v20 = vpop.f32.mrf.mxu2 }
 0x7b5   : > { %v6574_v62 = vadd.f32 %v6573_v28, %v6524_v20  ;;  %v11234_v20 = vld [vmem:[#allocation7 + $0x38] sm:$0xff]  ;;  %v15189_v28 = vld [vmem:[#allocation59_spill] sm:$0xff] }
 0x7b6   : > { %v6429_v40 = vpop.f32.mrf.mxu0  ;;  %6673 = vmatmul.bf16.gmra.mxu1 %v15137_v22  ;;  %6771 = vmatmul.bf16.gmra.mxu3 %v15137_v22 }
 0x7b7   : > { %v6479_v18 = vadd.f32 %v6478_v30, %v6429_v40  ;;  %v7069_v48 = vadd.f32 %v6574_v62, %v15186_v29  ;;  %7810 = vmatpush.bf16.msra.mxu0 %v11234_v20  ;;  %v15190_v62 = vld [vmem:[#allocation60_spill] sm:$0xff] }
 0x7b9   : > { %6624 = vmatmul.bf16.gmra.mxu0 %v15135_v34  ;;  %v7076_v56 = vadd.f32 %v6479_v18, %v15187_v14  ;;  %6722 = vmatmul.bf16.gmra.mxu2 %v15135_v34  ;;  %v13798_v39 = vmul.f32 %v7069_v48, %v7069_v48  ;;  %v11242_v18 = vld [vmem:[#allocation7 + $0x78] sm:$0xff] }
 0x7ba   : > { %7859 = vmatpush.bf16.msra.mxu1 %v11242_v18 }
 0x7bb   : > { %v6576_v24 = vpop.f32.mrf.mxu3  ;;  %v6480_v47 = vpop.f32.mrf.mxu1  ;;  %v13805_v29 = vmul.f32 %v7076_v56, %v7076_v56 }
 0x7bc   : > { %v6527_v31 = vpop.f32.mrf.mxu2 }
 0x7bd   : > { %v6577_v42 = vadd.f32 %v6576_v24, %v6527_v31  ;;  %15191 = vst [vmem:[#allocation41_spill] sm:$0xff] %v13805_v29  ;;  %v15193_v24 = vld [vmem:[#allocation61_spill] sm:$0xff] }
 0x7be   : > { %v6431_v32 = vpop.f32.mrf.mxu0  ;;  %7860 = vmatpush.bf16.msra.mxu1 %v11241_v16 }
 0x7bf   : > { %v6481_v41 = vadd.f32 %v6480_v47, %v6431_v32  ;;  %v7077_v40 = vadd.f32 %v6577_v42, %v15189_v28  ;;  %v15194_v42 = vld [vmem:[#allocation62_spill] sm:$0xff] }
 0x7c1   : > { %v7084_v30 = vadd.f32 %v6481_v41, %v15190_v62  ;;  %v13816_v56 = vmul.f32 %v7077_v40, %v7077_v40  ;;  %v11233_v62 = vld [vmem:[#allocation7 + $0x30] sm:$0xff]  ;;  %v15196_v40 = vld [vmem:[#allocation63_spill] sm:$0xff] }
 0x7c2   : > { %7811 = vmatpush.bf16.msra.mxu0 %v11233_v62 }
 0x7c3   : > { %v13807_v48 = vmul.f32 %v7084_v30, %v7084_v30  ;;  %v6578_v0 = vpop.f32.mrf.mxu3  ;;  %v6483_v31 = vpop.f32.mrf.mxu1  ;;  %15195 = vst [vmem:[#allocation43_spill] sm:$0xff] %v13816_v56 }
 0x7c4   : > { %v6529_v14 = vpop.f32.mrf.mxu2 }
 0x7c5   : > { %15192 = vst [vmem:[#allocation42_spill] sm:$0xff] %v13807_v48  ;;  %v6579_v20 = vadd.f32 %v6578_v0, %v6529_v14  ;;  %v11249_v0 = vld [vmem:[#allocation7 + $0xb0] sm:$0xff] }
 0x7c6   : > { %v6434_v6 = vpop.f32.mrf.mxu0  ;;  %6678 = vmatmul.bf16.gmra.mxu1 %v13497_v33  ;;  %6776 = vmatmul.bf16.gmra.mxu3 %v13497_v33 }
 0x7c7   : > { %v6484_v53 = vadd.f32 %v6483_v31, %v6434_v6  ;;  %v7085_v32 = vadd.f32 %v6579_v20, %v15193_v24  ;;  %v11257_v6 = vld [vmem:[#allocation7 + $0xf0] sm:$0xff]  ;;  %7909 = vmatpush.bf16.msra.mxu2 %v11249_v0 }
 0x7c8   : > { %7958 = vmatpush.bf16.msra.mxu3 %v11257_v6  ;;  %v15199_v6 = vld [vmem:[#allocation65_spill] sm:$0xff] }
 0x7c9   : > { %6629 = vmatmul.bf16.gmra.mxu0 %v13494_v26  ;;  %v7092_v47 = vadd.f32 %v6484_v53, %v15194_v42  ;;  %6727 = vmatmul.bf16.gmra.mxu2 %v13494_v26  ;;  %v13818_v41 = vmul.f32 %v7085_v32, %v7085_v32  ;;  %v15197_v32 = vld [vmem:[#allocation64_spill] sm:$0xff] }
 0x7cb   : > { %v6581_v18 = vpop.f32.mrf.mxu3  ;;  %v6485_v31 = vpop.f32.mrf.mxu1  ;;  %v13825_v29 = vmul.f32 %v7092_v47, %v7092_v47 }
 0x7cc   : > { %v6532_v28 = vpop.f32.mrf.mxu2 }
 0x7cd   : > { %v6582_v20 = vadd.f32 %v6581_v18, %v6532_v28  ;;  %15198 = vst [vmem:[#allocation44_spill] sm:$0xff] %v13825_v29 }
 0x7ce   : > { %v6436_v14 = vpop.f32.mrf.mxu0 }
 0x7cf   : > { %v6486_v53 = vadd.f32 %v6485_v31, %v6436_v14  ;;  %v7093_v24 = vadd.f32 %v6582_v20, %v15196_v40  ;;  %v15200_v20 = vld [vmem:[#allocation66_spill] sm:$0xff] }
 0x7d1   : > { %v7100_v42 = vadd.f32 %v6486_v53, %v15197_v32  ;;  %v13836_v47 = vmul.f32 %v7093_v24, %v7093_v24  ;;  %v11248_v53 = vld [vmem:[#allocation7 + $0xa8] sm:$0xff] }
 0x7d2   : > { %7910 = vmatpush.bf16.msra.mxu2 %v11248_v53  ;;  %v15201_v24 = vld [vmem:[#allocation67_spill] sm:$0xff] }
 0x7d3   : > { %v13827_v48 = vmul.f32 %v7100_v42, %v7100_v42  ;;  %v6583_v30 = vpop.f32.mrf.mxu3  ;;  %v6644_v62 = vpop.f32.mrf.mxu1 }
 0x7d4   : > { %v6534_v4 = vpop.f32.mrf.mxu2 }
 0x7d5   : > { %v6584_v0 = vadd.f32 %v6583_v30, %v6534_v4  ;;  %v11232_v4 = vld [vmem:[#allocation7 + $0x28] sm:$0xff] }
 0x7d6   : > { %v6595_v56 = vpop.f32.mrf.mxu0  ;;  %6839 = vmatmul.bf16.vlgmr.msrb.gmra.mxu1 %v13295_v19  ;;  %6937 = vmatmul.bf16.vlgmr.msrb.gmra.mxu3 %v13295_v19  ;;  %v11256_v30 = vld [vmem:[#allocation7 + $0xe8] sm:$0xff] }
 0x7d7   : > { %v6645_v18 = vadd.f32 %v6644_v62, %v6595_v56  ;;  %v7101_v14 = vadd.f32 %v6584_v0, %v15199_v6  ;;  %7812 = vmatpush.bf16.msra.mxu0 %v11232_v4  ;;  %7959 = vmatpush.bf16.msra.mxu3 %v11256_v30  ;;  %v15202_v6 = vld [vmem:[#allocation68_spill] sm:$0xff]  ;;  %v11240_v19 = vld [vmem:[#allocation7 + $0x68] sm:$0xff] }
 0x7d8   : > { %7861 = vmatpush.bf16.msra.mxu1 %v11240_v19 }
 0x7d9   : > { %6790 = vmatmul.bf16.vlgmr.msrb.gmra.mxu0 %v13292_v49  ;;  %v6982_v31 = vadd.f32 %v6645_v18, %v15200_v20  ;;  %6888 = vmatmul.bf16.vlgmr.msrb.gmra.mxu2 %v13292_v49  ;;  %v13838_v16 = vmul.f32 %v7101_v14, %v7101_v14 }
 0x7db   : > { %v6742_v32 = vpop.f32.mrf.mxu3  ;;  %v6646_v62 = vpop.f32.mrf.mxu1  ;;  %v13845_v20 = vmul.f32 %v6982_v31, %v6982_v31 }
 0x7dc   : > { %v6693_v56 = vpop.f32.mrf.mxu2 }
 0x7dd   : > { %v6743_v0 = vadd.f32 %v6742_v32, %v6693_v56  ;;  %15203 = vst [vmem:[#allocation45_spill] sm:$0xff] %v13845_v20 }
 0x7de   : > { %v6597_v42 = vpop.f32.mrf.mxu0 }
 0x7df   : > { %v6647_v49 = vadd.f32 %v6646_v62, %v6597_v42  ;;  %v6983_v18 = vadd.f32 %v6743_v0, %v15201_v24  ;;  %v15205_v42 = vld [vmem:[#allocation69_spill] sm:$0xff]  ;;  %v15206_v0 = vld [vmem:[#allocation70_spill] sm:$0xff] }
 0x7e1   : > { %v6990_v14 = vadd.f32 %v6647_v49, %v15202_v6  ;;  %v13856_v31 = vmul.f32 %v6983_v18, %v6983_v18  ;;  %v11247_v6 = vld [vmem:[#allocation7 + $0xa0] sm:$0xff]  ;;  %v15208_v18 = vld [vmem:[#allocation71_spill] sm:$0xff] }
 0x7e2   : > { %7911 = vmatpush.bf16.msra.mxu2 %v11247_v6 }
 0x7e3   : > { %v13847_v28 = vmul.f32 %v6990_v14, %v6990_v14  ;;  %v6744_v53 = vpop.f32.mrf.mxu3  ;;  %v6649_v32 = vpop.f32.mrf.mxu1  ;;  %15207 = vst [vmem:[#allocation47_spill] sm:$0xff] %v13856_v31  ;;  %v11255_v14 = vld [vmem:[#allocation7 + $0xe0] sm:$0xff] }
 0x7e4   : > { %v6695_v29 = vpop.f32.mrf.mxu2  ;;  %7960 = vmatpush.bf16.msra.mxu3 %v11255_v14 }
 0x7e5   : > { %15204 = vst [vmem:[#allocation46_spill] sm:$0xff] %v13847_v28  ;;  %v6745_v56 = vadd.f32 %v6744_v53, %v6695_v29  ;;  %v11231_v29 = vld [vmem:[#allocation7 + $0x20] sm:$0xff] }
 0x7e6   : > { %v6600_v4 = vpop.f32.mrf.mxu0  ;;  %6844 = vmatmul.bf16.gmra.mxu1 %v13325_v35  ;;  %6942 = vmatmul.bf16.gmra.mxu3 %v13325_v35  ;;  %v11239_v35 = vld [vmem:[#allocation7 + $0x60] sm:$0xff] }
 0x7e7   : > { %v6650_v30 = vadd.f32 %v6649_v32, %v6600_v4  ;;  %v6991_v62 = vadd.f32 %v6745_v56, %v15205_v42  ;;  %7813 = vmatpush.bf16.msra.mxu0 %v11231_v29  ;;  %7862 = vmatpush.bf16.msra.mxu1 %v11239_v35 }
 0x7e9   : > { %6795 = vmatmul.bf16.gmra.mxu0 %v13322_v7  ;;  %v6998_v49 = vadd.f32 %v6650_v30, %v15206_v0  ;;  %6893 = vmatmul.bf16.gmra.mxu2 %v13322_v7  ;;  %v13858_v24 = vmul.f32 %v6991_v62, %v6991_v62  ;;  %v15209_v62 = vld [vmem:[#allocation72_spill] sm:$0xff] }
 0x7eb   : > { %v6747_v4 = vpop.f32.mrf.mxu3  ;;  %v6651_v30 = vpop.f32.mrf.mxu1  ;;  %v13865_v40 = vmul.f32 %v6998_v49, %v6998_v49 }
 0x7ec   : > { %v6698_v53 = vpop.f32.mrf.mxu2 }
 0x7ed   : > { %v6748_v32 = vadd.f32 %v6747_v4, %v6698_v53  ;;  %15210 = vst [vmem:[#allocation48_spill] sm:$0xff] %v13865_v40  ;;  %v15211_v4 = vld [vmem:[#allocation73_spill] sm:$0xff] }
 0x7ee   : > { %v6602_v56 = vpop.f32.mrf.mxu0 }
 0x7ef   : > { %v6652_v7 = vadd.f32 %v6651_v30, %v6602_v56  ;;  %v6999_v42 = vadd.f32 %v6748_v32, %v15208_v18  ;;  %v15212_v32 = vld [vmem:[#allocation74_spill] sm:$0xff]  ;;  %v11246_v18 = vld [vmem:[#allocation7 + $0x98] sm:$0xff] }
 0x7f0   : > { %7912 = vmatpush.bf16.msra.mxu2 %v11246_v18 }
 0x7f1   : > { %v7006_v0 = vadd.f32 %v6652_v7, %v15209_v62  ;;  %v13876_v49 = vmul.f32 %v6999_v42, %v6999_v42  ;;  %v15214_v42 = vld [vmem:[#allocation75_spill] sm:$0xff] }
 0x7f3   : > { %v13867_v20 = vmul.f32 %v7006_v0, %v7006_v0  ;;  %v6749_v19 = vpop.f32.mrf.mxu3  ;;  %v6654_v53 = vpop.f32.mrf.mxu1  ;;  %15213 = vst [vmem:[#allocation49_spill] sm:$0xff] %v13876_v49 }
 0x7f4   : > { %v6700_v28 = vpop.f32.mrf.mxu2 }
 0x7f5   : > { %v6750_v29 = vadd.f32 %v6749_v19, %v6700_v28  ;;  %v11230_v28 = vld [vmem:[#allocation7 + $0x18] sm:$0xff] }
 0x7f6   : > { %v6605_v31 = vpop.f32.mrf.mxu0  ;;  %6849 = vmatmul.bf16.gmra.mxu1 %v13355_v54  ;;  %6947 = vmatmul.bf16.gmra.mxu3 %v13355_v54  ;;  %v11254_v19 = vld [vmem:[#allocation7 + $0xd8] sm:$0xff] }
 0x7f7   : > { %v6655_v14 = vadd.f32 %v6654_v53, %v6605_v31  ;;  %v7007_v56 = vadd.f32 %v6750_v29, %v15211_v4  ;;  %7814 = vmatpush.bf16.msra.mxu0 %v11230_v28  ;;  %7961 = vmatpush.bf16.msra.mxu3 %v11254_v19  ;;  %v15215_v4 = vld [vmem:[#allocation76_spill] sm:$0xff]  ;;  %v11238_v54 = vld [vmem:[#allocation7 + $0x58] sm:$0xff] }
 0x7f8   : > { %7863 = vmatpush.bf16.msra.mxu1 %v11238_v54 }
 0x7f9   : > { %6800 = vmatmul.bf16.gmra.mxu0 %v13352_v23  ;;  %v7014_v30 = vadd.f32 %v6655_v14, %v15212_v32  ;;  %6898 = vmatmul.bf16.gmra.mxu2 %v13352_v23  ;;  %v13878_v7 = vmul.f32 %v7007_v56, %v7007_v56 }
 0x7fb   : > { %v6752_v0 = vpop.f32.mrf.mxu3  ;;  %v6656_v53 = vpop.f32.mrf.mxu1  ;;  %v13885_v32 = vmul.f32 %v7014_v30, %v7014_v30 }
 0x7fc   : > { %v6703_v31 = vpop.f32.mrf.mxu2 }
 0x7fd   : > { %v6753_v29 = vadd.f32 %v6752_v0, %v6703_v31  ;;  %15216 = vst [vmem:[#allocation50_spill] sm:$0xff] %v13885_v32  ;;  %v15217_v0 = vld [vmem:[#allocation77_spill] sm:$0xff] }
 0x7fe   : > { %v6607_v35 = vpop.f32.mrf.mxu0 }
 0x7ff   : > { %v6657_v23 = vadd.f32 %v6656_v53, %v6607_v35  ;;  %v7015_v14 = vadd.f32 %v6753_v29, %v15214_v42  ;;  %v15218_v29 = vld [vmem:[#allocation78_spill] sm:$0xff]  ;;  %v11245_v42 = vld [vmem:[#allocation7 + $0x90] sm:$0xff] }
 0x800   : > { %7913 = vmatpush.bf16.msra.mxu2 %v11245_v42 }
 0x801   : > { %v7022_v56 = vadd.f32 %v6657_v23, %v15215_v4  ;;  %v13896_v30 = vmul.f32 %v7015_v14, %v7015_v14  ;;  %v15220_v14 = vld [vmem:[#allocation79_spill] sm:$0xff] }
 0x803   : > { %v13887_v6 = vmul.f32 %v7022_v56, %v7022_v56  ;;  %v6754_v62 = vpop.f32.mrf.mxu3  ;;  %v6659_v31 = vpop.f32.mrf.mxu1  ;;  %15219 = vst [vmem:[#allocation51_spill] sm:$0xff] %v13896_v30 }
 0x804   : > { %v6705_v40 = vpop.f32.mrf.mxu2 }
 0x805   : > { %v6755_v28 = vadd.f32 %v6754_v62, %v6705_v40  ;;  %v11229_v40 = vld [vmem:[#allocation7 + $0x10] sm:$0xff] }
 0x806   : > { %v6610_v49 = vpop.f32.mrf.mxu0  ;;  %6854 = vmatmul.bf16.gmra.mxu1 %v13385_v61  ;;  %6952 = vmatmul.bf16.gmra.mxu3 %v13385_v61  ;;  %v11253_v62 = vld [vmem:[#allocation7 + $0xd0] sm:$0xff] }
 0x807   : > { %v6660_v19 = vadd.f32 %v6659_v31, %v6610_v49  ;;  %v7023_v35 = vadd.f32 %v6755_v28, %v15217_v0  ;;  %7815 = vmatpush.bf16.msra.mxu0 %v11229_v40  ;;  %7962 = vmatpush.bf16.msra.mxu3 %v11253_v62  ;;  %v15221_v0 = vld [vmem:[#allocation80_spill] sm:$0xff] }
 0x808   : > { %v11237_v61 = vld [vmem:[#allocation7 + $0x50] sm:$0xff] }
 0x809   : > { %6805 = vmatmul.bf16.gmra.mxu0 %v13382_v57  ;;  %v7030_v53 = vadd.f32 %v6660_v19, %v15218_v29  ;;  %6903 = vmatmul.bf16.gmra.mxu2 %v13382_v57  ;;  %v13898_v23 = vmul.f32 %v7023_v35, %v7023_v35 }
 0x80a   : > { %7864 = vmatpush.bf16.msra.mxu1 %v11237_v61 }
 0x80b   : > { %v6757_v56 = vpop.f32.mrf.mxu3  ;;  %v6661_v31 = vpop.f32.mrf.mxu1  ;;  %v13905_v29 = vmul.f32 %v7030_v53, %v7030_v53 }
 0x80c   : > { %v6708_v49 = vpop.f32.mrf.mxu2 }
 0x80d   : > { %v6758_v28 = vadd.f32 %v6757_v56, %v6708_v49  ;;  %15222 = vst [vmem:[#allocation52_spill] sm:$0xff] %v13905_v29  ;;  %v15223_v56 = vld [vmem:[#allocation81_spill] sm:$0xff] }
 0x80e   : > { %v6612_v54 = vpop.f32.mrf.mxu0 }
 0x80f   : > { %v6662_v57 = vadd.f32 %v6661_v31, %v6612_v54  ;;  %v7031_v19 = vadd.f32 %v6758_v28, %v15220_v14  ;;  %v15224_v28 = vld [vmem:[#allocation82_spill] sm:$0xff]  ;;  %v11244_v14 = vld [vmem:[#allocation7 + $0x88] sm:$0xff] }
 0x810   : > { %7914 = vmatpush.bf16.msra.mxu2 %v11244_v14 }
 0x811   : > { %v7038_v35 = vadd.f32 %v6662_v57, %v15221_v0  ;;  %v13916_v53 = vmul.f32 %v7031_v19, %v7031_v19  ;;  %v15226_v19 = vld [vmem:[#allocation83_spill] sm:$0xff] }
 0x813   : > { %v13907_v18 = vmul.f32 %v7038_v35, %v7038_v35  ;;  %v6759_v4 = vpop.f32.mrf.mxu3  ;;  %v6664_v49 = vpop.f32.mrf.mxu1  ;;  %15225 = vst [vmem:[#allocation53_spill] sm:$0xff] %v13916_v53 }
 0x814   : > { %v6710_v32 = vpop.f32.mrf.mxu2 }
 0x815   : > { %v6760_v40 = vadd.f32 %v6759_v4, %v6710_v32  ;;  %v11228_v32 = vld [vmem:[#allocation7 + $0x8] sm:$0xff] }
 0x816   : > { %v6615_v30 = vpop.f32.mrf.mxu0  ;;  %6859 = vmatmul.bf16.gmra.mxu1 %v13415_v38  ;;  %6957 = vmatmul.bf16.gmra.mxu3 %v13415_v38  ;;  %v11252_v4 = vld [vmem:[#allocation7 + $0xc8] sm:$0xff] }
 0x817   : > { %v6665_v62 = vadd.f32 %v6664_v49, %v6615_v30  ;;  %v7039_v54 = vadd.f32 %v6760_v40, %v15223_v56  ;;  %7816 = vmatpush.bf16.msra.mxu0 %v11228_v32  ;;  %7963 = vmatpush.bf16.msra.mxu3 %v11252_v4  ;;  %v15227_v56 = vld [vmem:[#allocation84_spill] sm:$0xff]  ;;  %v11236_v38 = vld [vmem:[#allocation7 + $0x48] sm:$0xff] }
 0x818   : > { %7865 = vmatpush.bf16.msra.mxu1 %v11236_v38 }
 0x819   : > { %6810 = vmatmul.bf16.gmra.mxu0 %v13412_v8  ;;  %v7046_v31 = vadd.f32 %v6665_v62, %v15224_v28  ;;  %6908 = vmatmul.bf16.gmra.mxu2 %v13412_v8  ;;  %v13918_v57 = vmul.f32 %v7039_v54, %v7039_v54 }
 0x81b   : > { %v6762_v35 = vpop.f32.mrf.mxu3  ;;  %v6666_v49 = vpop.f32.mrf.mxu1  ;;  %v13925_v28 = vmul.f32 %v7046_v31, %v7046_v31 }
 0x81c   : > { %v6713_v30 = vpop.f32.mrf.mxu2 }
 0x81d   : > { %v6763_v40 = vadd.f32 %v6762_v35, %v6713_v30  ;;  %15228 = vst [vmem:[#allocation54_spill] sm:$0xff] %v13925_v28  ;;  %v15229_v35 = vld [vmem:[#allocation85_spill] sm:$0xff] }
 0x81e   : > { %v6617_v61 = vpop.f32.mrf.mxu0 }
 0x81f   : > { %v6667_v8 = vadd.f32 %v6666_v49, %v6617_v61  ;;  %v7047_v62 = vadd.f32 %v6763_v40, %v15226_v19  ;;  %v15230_v40 = vld [vmem:[#allocation86_spill] sm:$0xff] }
 0x820   : > { %v11243_v19 = vld [vmem:[#allocation7 + $0x80] sm:$0xff] }
 0x821   : > { %v7054_v54 = vadd.f32 %v6667_v8, %v15227_v56  ;;  %v13936_v31 = vmul.f32 %v7047_v62, %v7047_v62  ;;  %7915 = vmatpush.bf16.msra.mxu2 %v11243_v19  ;;  %v15232_v62 = vld [vmem:[#allocation87_spill] sm:$0xff] }
 0x823   : > { %v13927_v42 = vmul.f32 %v7054_v54, %v7054_v54  ;;  %v6764_v0 = vpop.f32.mrf.mxu3  ;;  %v6669_v30 = vpop.f32.mrf.mxu1  ;;  %15231 = vst [vmem:[#allocation55_spill] sm:$0xff] %v13936_v31 }
 0x824   : > { %v6715_v29 = vpop.f32.mrf.mxu2 }
 0x825   : > { %v6765_v32 = vadd.f32 %v6764_v0, %v6715_v29  ;;  %v11227_v29 = vld [vmem:[#allocation7] sm:$0xff] }
 0x826   : > { %v6620_v53 = vpop.f32.mrf.mxu0  ;;  %6864 = vmatmul.bf16.gmra.mxu1 %v15127_v1  ;;  %6962 = vmatmul.bf16.gmra.mxu3 %v15127_v1  ;;  %v11251_v0 = vld [vmem:[#allocation7 + $0xc0] sm:$0xff] }
 0x827   : > { %v6670_v4 = vadd.f32 %v6669_v30, %v6620_v53  ;;  %v7055_v61 = vadd.f32 %v6765_v32, %v15229_v35  ;;  %7817 = vmatpush.bf16.msra.mxu0 %v11227_v29  ;;  %7964 = vmatpush.bf16.msra.mxu3 %v11251_v0  ;;  %v15233_v35 = vld [vmem:[#allocation88_spill] sm:$0xff]  ;;  %v11235_v1 = vld [vmem:[#allocation7 + $0x40] sm:$0xff] }
 0x828   : > { %7866 = vmatpush.bf16.msra.mxu1 %v11235_v1 }
 0x829   : > { %6815 = vmatmul.bf16.gmra.mxu0 %v15125_v12  ;;  %v7062_v49 = vadd.f32 %v6670_v4, %v15230_v40  ;;  %6913 = vmatmul.bf16.gmra.mxu2 %v15125_v12  ;;  %v13938_v8 = vmul.f32 %v7055_v61, %v7055_v61 }
 0x82b   : > { %v6767_v54 = vpop.f32.mrf.mxu3  ;;  %v6671_v30 = vpop.f32.mrf.mxu1  ;;  %v13945_v40 = vmul.f32 %v7062_v49, %v7062_v49 }
 0x82c   : > { %v6718_v53 = vpop.f32.mrf.mxu2 }
 0x82d   : > { %v6768_v32 = vadd.f32 %v6767_v54, %v6718_v53  ;;  %15234 = vst [vmem:[#allocation56_spill] sm:$0xff] %v13945_v40  ;;  %v15235_v54 = vld [vmem:[#allocation89_spill] sm:$0xff] }
 0x82e   : > { %v6622_v38 = vpop.f32.mrf.mxu0 }
 0x82f   : > { %v6672_v12 = vadd.f32 %v6671_v30, %v6622_v38  ;;  %v7063_v4 = vadd.f32 %v6768_v32, %v15232_v62  ;;  %v15236_v32 = vld [vmem:[#allocation90_spill] sm:$0xff]  ;;  %v11282_v62 = vld [vmem:[#allocation7 + $0x1b8] sm:$0xff] }
 0x830   : > { %8104 = vmatpush.bf16.msrb.mxu2 %v11282_v62 }
 0x831   : > { %v7070_v61 = vadd.f32 %v6672_v12, %v15233_v35  ;;  %v13956_v49 = vmul.f32 %v7063_v4, %v7063_v4  ;;  %v15238_v4 = vld [vmem:[#allocation91_spill] sm:$0xff] }
 0x833   : > { %v13947_v14 = vmul.f32 %v7070_v61, %v7070_v61  ;;  %v6769_v56 = vpop.f32.mrf.mxu3  ;;  %v6674_v53 = vpop.f32.mrf.mxu1  ;;  %15237 = vst [vmem:[#allocation57_spill] sm:$0xff] %v13956_v49 }
 0x834   : > { %v6720_v28 = vpop.f32.mrf.mxu2 }
 0x835   : > { %v6770_v29 = vadd.f32 %v6769_v56, %v6720_v28  ;;  %v11266_v28 = vld [vmem:[#allocation7 + $0x138] sm:$0xff] }
 0x836   : > { %v6625_v31 = vpop.f32.mrf.mxu0  ;;  %6869 = vmatmul.bf16.gmra.mxu1 %v15137_v22  ;;  %6967 = vmatmul.bf16.gmra.mxu3 %v15137_v22  ;;  %v11290_v56 = vld [vmem:[#allocation7 + $0x1f8] sm:$0xff] }
 0x837   : > { %v6675_v0 = vadd.f32 %v6674_v53, %v6625_v31  ;;  %v7071_v38 = vadd.f32 %v6770_v29, %v15235_v54  ;;  %8006 = vmatpush.bf16.msrb.mxu0 %v11266_v28  ;;  %8153 = vmatpush.bf16.msrb.mxu3 %v11290_v56  ;;  %v15239_v54 = vld [vmem:[#allocation92_spill] sm:$0xff]  ;;  %v11274_v22 = vld [vmem:[#allocation7 + $0x178] sm:$0xff] }
 0x838   : > { %8055 = vmatpush.bf16.msrb.mxu1 %v11274_v22 }
 0x839   : > { %6820 = vmatmul.bf16.gmra.mxu0 %v15135_v34  ;;  %v7078_v30 = vadd.f32 %v6675_v0, %v15236_v32  ;;  %6918 = vmatmul.bf16.gmra.mxu2 %v15135_v34  ;;  %v13958_v12 = vmul.f32 %v7071_v38, %v7071_v38 }
 0x83b   : > { %v6772_v61 = vpop.f32.mrf.mxu3  ;;  %v6676_v53 = vpop.f32.mrf.mxu1  ;;  %v13965_v32 = vmul.f32 %v7078_v30, %v7078_v30 }
 0x83c   : > { %v6723_v31 = vpop.f32.mrf.mxu2 }
 0x83d   : > { %v6773_v29 = vadd.f32 %v6772_v61, %v6723_v31  ;;  %15240 = vst [vmem:[#allocation58_spill] sm:$0xff] %v13965_v32  ;;  %v15241_v61 = vld [vmem:[#allocation93_spill] sm:$0xff] }
 0x83e   : > { %v6627_v1 = vpop.f32.mrf.mxu0 }
 0x83f   : > { %v6677_v34 = vadd.f32 %v6676_v53, %v6627_v1  ;;  %v7079_v0 = vadd.f32 %v6773_v29, %v15238_v4  ;;  %v15242_v29 = vld [vmem:[#allocation94_spill] sm:$0xff] }
 0x841   : > { %v7086_v38 = vadd.f32 %v6677_v34, %v15239_v54  ;;  %v13976_v30 = vmul.f32 %v7079_v0, %v7079_v0  ;;  %v15244_v0 = vld [vmem:[#allocation95_spill] sm:$0xff] }
 0x843   : > { %v13967_v19 = vmul.f32 %v7086_v38, %v7086_v38  ;;  %v6774_v35 = vpop.f32.mrf.mxu3  ;;  %v6679_v31 = vpop.f32.mrf.mxu1  ;;  %15243 = vst [vmem:[#allocation59_spill] sm:$0xff] %v13976_v30 }
 0x844   : > { %v6725_v40 = vpop.f32.mrf.mxu2 }
 0x845   : > { %v6775_v28 = vadd.f32 %v6774_v35, %v6725_v40  ;;  %v11281_v40 = vld [vmem:[#allocation7 + $0x1b0] sm:$0xff] }
 0x846   : > { %v6630_v49 = vpop.f32.mrf.mxu0  ;;  %6874 = vmatmul.bf16.gmra.mxu1 %v13497_v33  ;;  %6972 = vmatmul.bf16.gmra.mxu3 %v13497_v33  ;;  %v11265_v35 = vld [vmem:[#allocation7 + $0x130] sm:$0xff] }
 0x847   : > { %v6680_v56 = vadd.f32 %v6679_v31, %v6630_v49  ;;  %v7087_v1 = vadd.f32 %v6775_v28, %v15241_v61  ;;  %v11289_v49 = vld [vmem:[#allocation7 + $0x1f0] sm:$0xff]  ;;  %8105 = vmatpush.bf16.msrb.mxu2 %v11281_v40  ;;  %8007 = vmatpush.bf16.msrb.mxu0 %v11265_v35 }
 0x848   : > { %8154 = vmatpush.bf16.msrb.mxu3 %v11289_v49  ;;  %v15245_v61 = vld [vmem:[#allocation96_spill] sm:$0xff]  ;;  %v15246_v49 = vld [vmem:[#allocation18_spill] sm:$0xff] }
 0x849   : > { %6825 = vmatmul.bf16.gmra.mxu0 %v13494_v26  ;;  %v7094_v53 = vadd.f32 %v6680_v56, %v15242_v29  ;;  %6923 = vmatmul.bf16.gmra.mxu2 %v13494_v26  ;;  %v13978_v34 = vmul.f32 %v7087_v1, %v7087_v1  ;;  %v11273_v33 = vld [vmem:[#allocation7 + $0x170] sm:$0xff] }
 0x84a   : > { %8056 = vmatpush.bf16.msrb.mxu1 %v11273_v33 }
 0x84b   : > { %v6777_v38 = vpop.f32.mrf.mxu3  ;;  %v6681_v31 = vpop.f32.mrf.mxu1  ;;  %v13985_v29 = vmul.f32 %v7094_v53, %v7094_v53  ;;  %v15248_v53 = vld [vmem:[#allocation19_spill] sm:$0xff] }
 0x84c   : > { %v6728_v4 = vpop.f32.mrf.mxu2 }
 0x84d   : > { %v6778_v28 = vadd.f32 %v6777_v38, %v6728_v4 }
 0x84e   : > { %v6632_v22 = vpop.f32.mrf.mxu0 }
 0x84f   : > { %v6682_v26 = vadd.f32 %v6681_v31, %v6632_v22  ;;  %v7095_v56 = vadd.f32 %v6778_v28, %v15244_v0  ;;  %v15247_v28 = vpack.c.bf16 %v13527_v13, %v13525_v11  ;;  %v15250_v0 = vpack.c.bf16 %v13687_v5, %v13685_v51  ;;  %v11280_v11 = vld [vmem:[#allocation7 + $0x1a8] sm:$0xff] }
 0x850   : > { %v11264_v13 = vld [vmem:[#allocation7 + $0x128] sm:$0xff]  ;;  %8106 = vmatpush.bf16.msrb.mxu2 %v11280_v11 }
 0x851   : > { %v7102_v1 = vadd.f32 %v6682_v26, %v15245_v61  ;;  %v15249_v26 = vpack.c.bf16 %v13538_v46, %v13536_v9  ;;  %v14002_v61 = vmul.f32 %v7095_v56, %v7095_v56  ;;  %8008 = vmatpush.bf16.msrb.mxu0 %v11264_v13 }
 0x853   : > { %v13987_v62 = vmul.f32 %v7102_v1, %v7102_v1  ;;  %v6779_v54 = vpop.f32.mrf.mxu3  ;;  %v6840_v35 = vpop.f32.mrf.mxu1  ;;  %15251 = vst [vmem:[#allocation60_spill] sm:$0xff] %v14002_v61  ;;  %v15340_v61 = vld [vmem:[#allocation44_spill] sm:$0xff] }
 0x854   : > { %v6730_v32 = vpop.f32.mrf.mxu2 }
 0x855   : > { %v6780_v40 = vadd.f32 %v6779_v54, %v6730_v32  ;;  %v11288_v54 = vld [vmem:[#allocation7 + $0x1e8] sm:$0xff] }
 0x856   : > { %v6791_v30 = vpop.f32.mrf.mxu0  ;;  %7867 = vmatmul.bf16.vlgmr.msra.gmra.mxu1 %v15249_v26  ;;  %8155 = vmatpush.bf16.msrb.mxu3 %v11288_v54  ;;  %v15256_v54 = vld [vmem:[#allocation99_spill] sm:$0xff] }
 0x857   : > { %v6841_v38 = vadd.f32 %v6840_v35, %v6791_v30  ;;  %v7103_v22 = vadd.f32 %v6780_v40, %v15246_v49  ;;  %v15253_v30 = vpack.c.bf16 %v13698_v17, %v13696_v25  ;;  %v15254_v40 = vld [vmem:[#allocation97_spill] sm:$0xff]  ;;  %v11272_v17 = vld [vmem:[#allocation7 + $0x168] sm:$0xff] }
 0x858   : > { %8057 = vmatpush.bf16.msrb.mxu1 %v11272_v17  ;;  %v15326_v17 = vld [vmem:[#allocation41_spill] sm:$0xff] }
 0x859   : > { %7818 = vmatmul.bf16.vlgmr.msra.gmra.mxu0 %v15247_v28  ;;  %v6984_v31 = vadd.f32 %v6841_v38, %v15248_v53  ;;  %7916 = vmatmul.bf16.vlgmr.msra.gmra.mxu2 %v15250_v0  ;;  %v14004_v32 = vmul.f32 %v7103_v22, %v7103_v22  ;;  %v15255_v38 = vld [vmem:[#allocation98_spill] sm:$0xff] }
 0x85a   : > { %7965 = vmatmul.bf16.vlgmr.msra.gmra.mxu3 %v15253_v30 }
 0x85b   : > { %15252 = vst [vmem:[#allocation61_spill] sm:$0xff] %v14004_v32  ;;  %v6938_v46 = vpop.f32.mrf.mxu3  ;;  %v6842_v51 = vpop.f32.mrf.mxu1  ;;  %v14013_v49 = vmul.f32 %v6984_v31, %v6984_v31  ;;  %v15258_v31 = vld [vmem:[#allocation100_spill] sm:$0xff]  ;;  %v15341_v32 = vpack.c.bf16 %v13827_v48, %v15340_v61 }
 0x85c   : > { %v6889_v1 = vpop.f32.mrf.mxu2  ;;  %v15344_v61 = vld [vmem:[#allocation120_spill] sm:$0xff] }
 0x85d   : > { %v6939_v5 = vadd.f32 %v6938_v46, %v6889_v1  ;;  %v15257_v46 = vpack.c.bf16 %v13547_v2, %v13545_v15  ;;  %v11279_v15 = vld [vmem:[#allocation7 + $0x1a0] sm:$0xff] }
 0x85e   : > { %v6793_v33 = vpop.f32.mrf.mxu0  ;;  %v11263_v2 = vld [vmem:[#allocation7 + $0x120] sm:$0xff]  ;;  %8107 = vmatpush.bf16.msrb.mxu2 %v11279_v15  ;;  %v15264_v15 = vld [vmem:[#allocation101_spill] sm:$0xff] }
 0x85f   : > { %v6843_v56 = vadd.f32 %v6842_v51, %v6793_v33  ;;  %v6985_v35 = vadd.f32 %v6939_v5, %v15254_v40  ;;  %v15259_v5 = vpack.c.bf16 %v13558_v36, %v13556_v59  ;;  %v15260_v51 = vpack.c.bf16 %v13707_v43, %v13705_v63  ;;  %8009 = vmatpush.bf16.msrb.mxu0 %v11263_v2 }
 0x861   : > { %v6992_v25 = vadd.f32 %v6843_v56, %v15255_v38  ;;  %v14030_v56 = vmul.f32 %v6985_v35, %v6985_v35  ;;  %v15261_v38 = vpack.c.bf16 %v13718_v55, %v13716_v50  ;;  %v11271_v55 = vld [vmem:[#allocation7 + $0x160] sm:$0xff] }
 0x862   : > { %8058 = vmatpush.bf16.msrb.mxu1 %v11271_v55 }
 0x863   : > { %v14015_v22 = vmul.f32 %v6992_v25, %v6992_v25  ;;  %v6940_v26 = vpop.f32.mrf.mxu3  ;;  %v6845_v11 = vpop.f32.mrf.mxu1  ;;  %v11287_v25 = vld [vmem:[#allocation7 + $0x1e0] sm:$0xff] }
 0x864   : > { %v6891_v28 = vpop.f32.mrf.mxu2  ;;  %8156 = vmatpush.bf16.msrb.mxu3 %v11287_v25  ;;  %v15265_v25 = vpack.c.bf16 %v13567_v60, %v13565_v37  ;;  %v11278_v37 = vld [vmem:[#allocation7 + $0x198] sm:$0xff] }
 0x865   : > { %v6941_v30 = vadd.f32 %v6940_v26, %v6891_v28  ;;  %v15262_v26 = vld [vmem:[#allocation20_spill] sm:$0xff]  ;;  %v11262_v60 = vld [vmem:[#allocation7 + $0x118] sm:$0xff]  ;;  %8108 = vmatpush.bf16.msrb.mxu2 %v11278_v37 }
 0x866   : > { %v6796_v0 = vpop.f32.mrf.mxu0  ;;  %7872 = vmatmul.bf16.gmra.mxu1 %v15259_v5  ;;  %8010 = vmatpush.bf16.msrb.mxu0 %v11262_v60  ;;  %v15274_v60 = vld [vmem:[#allocation121_spill] sm:$0xff] }
 0x867   : > { %v6846_v13 = vadd.f32 %v6845_v11, %v6796_v0  ;;  %v6993_v1 = vadd.f32 %v6941_v30, %v15256_v54  ;;  %v15263_v30 = vld [vmem:[#allocation21_spill] sm:$0xff] }
 0x869   : > { %7823 = vmatmul.bf16.gmra.mxu0 %v15257_v46  ;;  %v7000_v33 = vadd.f32 %v6846_v13, %v15258_v31  ;;  %7921 = vmatmul.bf16.gmra.mxu2 %v15260_v51  ;;  %v14032_v40 = vmul.f32 %v6993_v1, %v6993_v1 }
 0x86a   : > { %7970 = vmatmul.bf16.gmra.mxu3 %v15261_v38 }
 0x86b   : > { %v6943_v36 = vpop.f32.mrf.mxu3  ;;  %v6847_v43 = vpop.f32.mrf.mxu1  ;;  %v14041_v11 = vmul.f32 %v7000_v33, %v7000_v33  ;;  %v15266_v33 = vld [vmem:[#allocation102_spill] sm:$0xff] }
 0x86c   : > { %v6894_v59 = vpop.f32.mrf.mxu2 }
 0x86d   : > { %v6944_v63 = vadd.f32 %v6943_v36, %v6894_v59  ;;  %v15267_v36 = vpack.c.bf16 %v13578_v27, %v13576_v10 }
 0x86e   : > { %v6798_v28 = vpop.f32.mrf.mxu0 }
 0x86f   : > { %v6848_v35 = vadd.f32 %v6847_v43, %v6798_v28  ;;  %v7001_v0 = vadd.f32 %v6944_v63, %v15262_v26  ;;  %v15268_v28 = vpack.c.bf16 %v13727_v58, %v13725_v45 }
 0x871   : > { %v7008_v50 = vadd.f32 %v6848_v35, %v15263_v30  ;;  %v14058_v63 = vmul.f32 %v7001_v0, %v7001_v0  ;;  %v15269_v35 = vld [vmem:[#allocation133_spill] sm:$0xff] }
 0x872   : > { %v15270_v26 = vpack.c.bf16 %v13738_v21, %v15269_v35  ;;  %v11286_v30 = vld [vmem:[#allocation7 + $0x1d8] sm:$0xff] }
 0x873   : > { %v14043_v13 = vmul.f32 %v7008_v50, %v7008_v50  ;;  %v6945_v1 = vpop.f32.mrf.mxu3  ;;  %v6850_v51 = vpop.f32.mrf.mxu1  ;;  %8157 = vmatpush.bf16.msrb.mxu3 %v11286_v30  ;;  %v15275_v30 = vld [vmem:[#allocation31_spill] sm:$0xff] }
 0x874   : > { %v6896_v54 = vpop.f32.mrf.mxu2 }
 0x875   : > { %v6946_v5 = vadd.f32 %v6945_v1, %v6896_v54  ;;  %v15271_v54 = vld [vmem:[#allocation103_spill] sm:$0xff] }
 0x876   : > { %v6801_v46 = vpop.f32.mrf.mxu0  ;;  %7877 = vmatmul.bf16.gmra.mxu1 %v15267_v36 }
 0x877   : > { %v6851_v38 = vadd.f32 %v6850_v51, %v6801_v46  ;;  %v7009_v2 = vadd.f32 %v6946_v5, %v15264_v15  ;;  %v15272_v46 = vld [vmem:[#allocation104_spill] sm:$0xff]  ;;  %v11270_v5 = vld [vmem:[#allocation7 + $0x158] sm:$0xff] }
 0x878   : > { %8059 = vmatpush.bf16.msrb.mxu1 %v11270_v5 }
 0x879   : > { %7828 = vmatmul.bf16.gmra.mxu0 %v15265_v25  ;;  %v7016_v59 = vadd.f32 %v6851_v38, %v15266_v33  ;;  %7926 = vmatmul.bf16.gmra.mxu2 %v15268_v28  ;;  %v14060_v43 = vmul.f32 %v7009_v2, %v7009_v2 }
 0x87a   : > { %7975 = vmatmul.bf16.gmra.mxu3 %v15270_v26  ;;  %v15273_v26 = vld [vmem:[#allocation22_spill] sm:$0xff] }
 0x87b   : > { %v6948_v27 = vpop.f32.mrf.mxu3  ;;  %v6852_v45 = vpop.f32.mrf.mxu1  ;;  %v14069_v51 = vmul.f32 %v7016_v59, %v7016_v59  ;;  %v15277_v59 = vld [vmem:[#allocation23_spill] sm:$0xff] }
 0x87c   : > { %v6899_v50 = vpop.f32.mrf.mxu2 }
 0x87d   : > { %v6949_v58 = vadd.f32 %v6948_v27, %v6899_v50  ;;  %v15276_v50 = vpack.c.bf16 %v15274_v60, %v15275_v30  ;;  %v15298_v60 = vld [vmem:[#allocation37_spill] sm:$0xff] }
 0x87e   : > { %v6803_v55 = vpop.f32.mrf.mxu0 }
 0x87f   : > { %v6853_v0 = vadd.f32 %v6852_v45, %v6803_v55  ;;  %v7017_v1 = vadd.f32 %v6949_v58, %v15271_v54  ;;  %v15278_v55 = vld [vmem:[#allocation124_spill] sm:$0xff]  ;;  %v15279_v58 = vld [vmem:[#allocation122_spill] sm:$0xff]  ;;  %v15282_v54 = vld [vmem:[#allocation33_spill] sm:$0xff] }
 0x880   : > { %v15280_v45 = vpack.c.bf16 %v15278_v55, %v15279_v58  ;;  %v15287_v55 = vld [vmem:[#allocation105_spill] sm:$0xff] }
 0x881   : > { %v7024_v21 = vadd.f32 %v6853_v0, %v15272_v46  ;;  %v15281_v0 = vld [vmem:[#allocation34_spill] sm:$0xff] }
 0x882   : > { %v15283_v46 = vpack.c.bf16 %v15281_v0, %v15282_v54  ;;  %v11269_v54 = vld [vmem:[#allocation7 + $0x150] sm:$0xff] }
 0x883   : > { %v14071_v38 = vmul.f32 %v7024_v21, %v7024_v21  ;;  %v6950_v2 = vpop.f32.mrf.mxu3  ;;  %v6855_v28 = vpop.f32.mrf.mxu1  ;;  %v14086_v21 = vmul.f32 %v7017_v1, %v7017_v1  ;;  %8060 = vmatpush.bf16.msrb.mxu1 %v11269_v54  ;;  %v15297_v54 = vld [vmem:[#allocation38_spill] sm:$0xff] }
 0x884   : > { %v6901_v15 = vpop.f32.mrf.mxu2  ;;  %v15299_v33 = vpack.c.bf16 %v15297_v54, %v15298_v60 }
 0x885   : > { %v6951_v36 = vadd.f32 %v6950_v2, %v6901_v15  ;;  %v15284_v15 = vld [vmem:[#allocation36_spill] sm:$0xff]  ;;  %v15285_v2 = vld [vmem:[#allocation35_spill] sm:$0xff] }
 0x886   : > { %v6806_v25 = vpop.f32.mrf.mxu0  ;;  %7882 = vmatmul.bf16.gmra.mxu1 %v15280_v45  ;;  %v15288_v45 = vld [vmem:[#allocation106_spill] sm:$0xff] }
 0x887   : > { %v6856_v35 = vadd.f32 %v6855_v28, %v6806_v25  ;;  %v7025_v37 = vadd.f32 %v6951_v36, %v15273_v26  ;;  %v15286_v25 = vpack.c.bf16 %v15284_v15, %v15285_v2  ;;  %v11277_v36 = vld [vmem:[#allocation7 + $0x190] sm:$0xff] }
 0x888   : > { %v11261_v28 = vld [vmem:[#allocation7 + $0x110] sm:$0xff]  ;;  %8109 = vmatpush.bf16.msrb.mxu2 %v11277_v36 }
 0x889   : > { %7833 = vmatmul.bf16.gmra.mxu0 %v15276_v50  ;;  %v7032_v27 = vadd.f32 %v6856_v35, %v15277_v59  ;;  %7931 = vmatmul.bf16.gmra.mxu2 %v15283_v46  ;;  %v14088_v5 = vmul.f32 %v7025_v37, %v7025_v37  ;;  %v11285_v26 = vld [vmem:[#allocation7 + $0x1d0] sm:$0xff] }
 0x88a   : > { %7980 = vmatmul.bf16.gmra.mxu3 %v15286_v25  ;;  %8011 = vmatpush.bf16.msrb.mxu0 %v11261_v28 }
 0x88b   : > { %v6953_v30 = vpop.f32.mrf.mxu3  ;;  %v6857_v1 = vpop.f32.mrf.mxu1  ;;  %8158 = vmatpush.bf16.msrb.mxu3 %v11285_v26  ;;  %v14097_v46 = vmul.f32 %v7032_v27, %v7032_v27  ;;  %v15293_v27 = vld [vmem:[#allocation108_spill] sm:$0xff] }
 0x88c   : > { %v6904_v35 = vpop.f32.mrf.mxu2 }
 0x88d   : > { %v6954_v59 = vadd.f32 %v6953_v30, %v6904_v35  ;;  %v15289_v30 = vld [vmem:[#allocation107_spill] sm:$0xff] }
 0x88e   : > { %v6808_v50 = vpop.f32.mrf.mxu0 }
 0x88f   : > { %v6858_v37 = vadd.f32 %v6857_v1, %v6808_v50  ;;  %v7033_v58 = vadd.f32 %v6954_v59, %v15287_v55  ;;  %v15290_v59 = vld [vmem:[#allocation135_spill] sm:$0xff]  ;;  %v15291_v1 = vld [vmem:[#allocation134_spill] sm:$0xff] }
 0x891   : > { %v7040_v0 = vadd.f32 %v6858_v37, %v15288_v45  ;;  %v15292_v37 = vpack.c.bf16 %v15290_v59, %v15291_v1  ;;  %v15294_v45 = vld [vmem:[#allocation125_spill] sm:$0xff]  ;;  %v14114_v36 = vmul.f32 %v7033_v58, %v7033_v58 }
 0x893   : > { %v14099_v15 = vmul.f32 %v7040_v0, %v7040_v0  ;;  %v6955_v25 = vpop.f32.mrf.mxu3  ;;  %v6860_v35 = vpop.f32.mrf.mxu1  ;;  %v15295_v0 = vld [vmem:[#allocation109_spill] sm:$0xff] }
 0x894   : > { %v6906_v2 = vpop.f32.mrf.mxu2  ;;  %v15296_v4 = vpack.c.bf16 %v15294_v45, %v15295_v0  ;;  %v11268_v45 = vld [vmem:[#allocation7 + $0x148] sm:$0xff] }
 0x895   : > { %v6956_v28 = vadd.f32 %v6955_v25, %v6906_v2  ;;  %8061 = vmatpush.bf16.msrb.mxu1 %v11268_v45  ;;  %v15312_v45 = vpack.c.bf16 %v13787_v52, %v13785_v3 }
 0x896   : > { %v6811_v9 = vpop.f32.mrf.mxu0  ;;  %7887 = vmatmul.bf16.gmra.mxu1 %v15296_v4 }
 0x897   : > { %v6861_v26 = vadd.f32 %v6860_v35, %v6811_v9  ;;  %v7041_v50 = vadd.f32 %v6956_v28, %v15289_v30  ;;  %v15300_v9 = vld [vmem:[#allocation39_spill] sm:$0xff] }
 0x898   : > { %v15301_v25 = vpack.c.bf16 %v13778_v44, %v15300_v9  ;;  %v11276_v28 = vld [vmem:[#allocation7 + $0x188] sm:$0xff] }
 0x899   : > { %7838 = vmatmul.bf16.gmra.mxu0 %v15292_v37  ;;  %v7048_v55 = vadd.f32 %v6861_v26, %v15293_v27  ;;  %7936 = vmatmul.bf16.gmra.mxu2 %v15299_v33  ;;  %v14116_v2 = vmul.f32 %v7041_v50, %v7041_v50  ;;  %v11260_v35 = vld [vmem:[#allocation7 + $0x108] sm:$0xff]  ;;  %v15302_v50 = vld [vmem:[#allocation24_spill] sm:$0xff]  ;;  %v15303_v27 = vld [vmem:[#allocation25_spill] sm:$0xff] }
 0x89a   : > { %7985 = vmatmul.bf16.gmra.mxu3 %v15301_v25  ;;  %v11284_v30 = vld [vmem:[#allocation7 + $0x1c8] sm:$0xff]  ;;  %8110 = vmatpush.bf16.msrb.mxu2 %v11276_v28 }
 0x89b   : > { %v6958_v4 = vpop.f32.mrf.mxu3  ;;  %8012 = vmatpush.bf16.msrb.mxu0 %v11260_v35  ;;  %v6862_v60 = vpop.f32.mrf.mxu1  ;;  %8159 = vmatpush.bf16.msrb.mxu3 %v11284_v30  ;;  %v14125_v0 = vmul.f32 %v7048_v55, %v7048_v55  ;;  %v15308_v55 = vld [vmem:[#allocation112_spill] sm:$0xff] }
 0x89c   : > { %v6909_v26 = vpop.f32.mrf.mxu2 }
 0x89d   : > { %v6959_v33 = vadd.f32 %v6958_v4, %v6909_v26  ;;  %v15304_v4 = vld [vmem:[#allocation111_spill] sm:$0xff] }
 0x89e   : > { %v6813_v1 = vpop.f32.mrf.mxu0 }
 0x89f   : > { %v6863_v58 = vadd.f32 %v6862_v60, %v6813_v1  ;;  %v7049_v37 = vadd.f32 %v6959_v33, %v15302_v50  ;;  %v15305_v33 = vld [vmem:[#allocation126_spill] sm:$0xff] }
 0x8a0   : > { %v15306_v60 = vld [vmem:[#allocation110_spill] sm:$0xff] }
 0x8a1   : > { %v7056_v44 = vadd.f32 %v6863_v58, %v15303_v27  ;;  %v15307_v58 = vpack.c.bf16 %v15305_v33, %v15306_v60  ;;  %v15309_v27 = vld [vmem:[#allocation128_spill] sm:$0xff]  ;;  %v14142_v28 = vmul.f32 %v7049_v37, %v7049_v37 }
 0x8a3   : > { %v14127_v54 = vmul.f32 %v7056_v44, %v7056_v44  ;;  %v6960_v25 = vpop.f32.mrf.mxu3  ;;  %v6865_v26 = vpop.f32.mrf.mxu1  ;;  %v15310_v44 = vld [vmem:[#allocation127_spill] sm:$0xff] }
 0x8a4   : > { %v6911_v9 = vpop.f32.mrf.mxu2  ;;  %v15311_v10 = vpack.c.bf16 %v15309_v27, %v15310_v44  ;;  %v11267_v27 = vld [vmem:[#allocation7 + $0x140] sm:$0xff] }
 0x8a5   : > { %v6961_v35 = vadd.f32 %v6960_v25, %v6911_v9  ;;  %8062 = vmatpush.bf16.msrb.mxu1 %v11267_v27  ;;  %v15325_v27 = vld [vmem:[#allocation42_spill] sm:$0xff] }
 0x8a6   : > { %v6816_v59 = vpop.f32.mrf.mxu0  ;;  %7892 = vmatmul.bf16.gmra.mxu1 %v15311_v10  ;;  %v15327_v53 = vpack.c.bf16 %v15325_v27, %v15326_v17 }
 0x8a7   : > { %v6866_v30 = vadd.f32 %v6865_v26, %v6816_v59  ;;  %v7057_v1 = vadd.f32 %v6961_v35, %v15304_v4  ;;  %v15313_v59 = vld [vmem:[#allocation40_spill] sm:$0xff]  ;;  %v11275_v35 = vld [vmem:[#allocation7 + $0x180] sm:$0xff] }
 0x8a8   : > { %v15314_v25 = vpack.c.bf16 %v13798_v39, %v15313_v59  ;;  %v11259_v26 = vld [vmem:[#allocation7 + $0x100] sm:$0xff]  ;;  %8111 = vmatpush.bf16.msrb.mxu2 %v11275_v35 }
 0x8a9   : > { %7843 = vmatmul.bf16.gmra.mxu0 %v15307_v58  ;;  %v7064_v50 = vadd.f32 %v6866_v30, %v15308_v55  ;;  %7941 = vmatmul.bf16.gmra.mxu2 %v15312_v45  ;;  %v14144_v9 = vmul.f32 %v7057_v1, %v7057_v1  ;;  %v11283_v4 = vld [vmem:[#allocation7 + $0x1c0] sm:$0xff]  ;;  %v15316_v55 = vld [vmem:[#allocation27_spill] sm:$0xff] }
 0x8aa   : > { %7990 = vmatmul.bf16.gmra.mxu3 %v15314_v25  ;;  %8013 = vmatpush.bf16.msrb.mxu0 %v11259_v26  ;;  %v15315_v1 = vld [vmem:[#allocation26_spill] sm:$0xff] }
 0x8ab   : > { %v6963_v10 = vpop.f32.mrf.mxu3  ;;  %v6867_v52 = vpop.f32.mrf.mxu1  ;;  %8160 = vmatpush.bf16.msrb.mxu3 %v11283_v4  ;;  %v14153_v44 = vmul.f32 %v7064_v50, %v7064_v50  ;;  %v15321_v50 = vld [vmem:[#allocation116_spill] sm:$0xff] }
 0x8ac   : > { %v6914_v30 = vpop.f32.mrf.mxu2 }
 0x8ad   : > { %v6964_v3 = vadd.f32 %v6963_v10, %v6914_v30  ;;  %v15317_v10 = vld [vmem:[#allocation115_spill] sm:$0xff] }
 0x8ae   : > { %v6818_v60 = vpop.f32.mrf.mxu0 }
 0x8af   : > { %v6868_v37 = vadd.f32 %v6867_v52, %v6818_v60  ;;  %v7065_v58 = vadd.f32 %v6964_v3, %v15315_v1  ;;  %v15318_v3 = vld [vmem:[#allocation129_spill] sm:$0xff] }
 0x8b0   : > { %v15319_v52 = vld [vmem:[#allocation113_spill] sm:$0xff] }
 0x8b1   : > { %v7072_v39 = vadd.f32 %v6868_v37, %v15316_v55  ;;  %v15320_v37 = vpack.c.bf16 %v15318_v3, %v15319_v52  ;;  %v15322_v55 = vld [vmem:[#allocation130_spill] sm:$0xff]  ;;  %v14170_v35 = vmul.f32 %v7065_v58, %v7065_v58 }
 0x8b3   : > { %v14155_v45 = vmul.f32 %v7072_v39, %v7072_v39  ;;  %v6965_v25 = vpop.f32.mrf.mxu3  ;;  %v6870_v30 = vpop.f32.mrf.mxu1  ;;  %v15323_v39 = vld [vmem:[#allocation114_spill] sm:$0xff] }
 0x8b4   : > { %v6916_v59 = vpop.f32.mrf.mxu2  ;;  %v15324_v31 = vpack.c.bf16 %v15322_v55, %v15323_v39 }
 0x8b5   : > { %v6966_v26 = vadd.f32 %v6965_v25, %v6916_v59 }
 0x8b6   : > { %v6821_v33 = vpop.f32.mrf.mxu0  ;;  %7897 = vmatmul.bf16.gmra.mxu1 %v15324_v31 }
 0x8b7   : > { %v6871_v4 = vadd.f32 %v6870_v30, %v6821_v33  ;;  %v7073_v60 = vadd.f32 %v6966_v26, %v15317_v10  ;;  %v15328_v33 = vld [vmem:[#allocation43_spill] sm:$0xff] }
 0x8b8   : > { %v15329_v25 = vpack.c.bf16 %v13818_v41, %v15328_v33 }
 0x8b9   : > { %7848 = vmatmul.bf16.gmra.mxu0 %v15320_v37  ;;  %v7080_v1 = vadd.f32 %v6871_v4, %v15321_v50  ;;  %7946 = vmatmul.bf16.gmra.mxu2 %v15327_v53  ;;  %v14172_v59 = vmul.f32 %v7073_v60, %v7073_v60  ;;  %v15330_v37 = vld [vmem:[#allocation28_spill] sm:$0xff]  ;;  %v15331_v53 = vld [vmem:[#allocation29_spill] sm:$0xff] }
 0x8ba   : > { %7995 = vmatmul.bf16.gmra.mxu3 %v15329_v25 }
 0x8bb   : > { %v6968_v4 = vpop.f32.mrf.mxu3  ;;  %v6872_v31 = vpop.f32.mrf.mxu1  ;;  %v14181_v50 = vmul.f32 %v7080_v1, %v7080_v1 }
 0x8bc   : > { %v6919_v26 = vpop.f32.mrf.mxu2 }
 0x8bd   : > { %v6969_v3 = vadd.f32 %v6968_v4, %v6919_v26  ;;  %v15332_v26 = vld [vmem:[#allocation117_spill] sm:$0xff] }
 0x8be   : > { %v6823_v10 = vpop.f32.mrf.mxu0 }
 0x8bf   : > { %v6873_v52 = vadd.f32 %v6872_v31, %v6823_v10  ;;  %v7081_v17 = vadd.f32 %v6969_v3, %v15330_v37  ;;  %v15333_v10 = vld [vmem:[#allocation131_spill] sm:$0xff]  ;;  %v15337_v37 = vld [vmem:[#allocation32_spill] sm:$0xff] }
 0x8c0   : > { %v15334_v31 = vld [vmem:[#allocation123_spill] sm:$0xff] }
 0x8c1   : > { %v7088_v58 = vadd.f32 %v6873_v52, %v15331_v53  ;;  %v15335_v3 = vpack.c.bf16 %v15333_v10, %v15334_v31  ;;  %v15336_v52 = vld [vmem:[#allocation118_spill] sm:$0xff]  ;;  %v15338_v53 = vld [vmem:[#allocation132_spill] sm:$0xff]  ;;  %v14198_v27 = vmul.f32 %v7081_v17, %v7081_v17 }
 0x8c3   : > { %v14183_v60 = vmul.f32 %v7088_v58, %v7088_v58  ;;  %v6970_v41 = vpop.f32.mrf.mxu3  ;;  %v6875_v25 = vpop.f32.mrf.mxu1  ;;  %v15339_v58 = vpack.c.bf16 %v15337_v37, %v15338_v53 }
 0x8c4   : > { %v6921_v55 = vpop.f32.mrf.mxu2 }
 0x8c5   : > { %v6971_v33 = vadd.f32 %v6970_v41, %v6921_v55  ;;  %v15342_v41 = vpack.c.bf16 %v13838_v16, %v13836_v47 }
 0x8c6   : > { %v6826_v39 = vpop.f32.mrf.mxu0  ;;  %7902 = vmatmul.bf16.gmra.mxu1 %v15339_v58 }
 0x8c7   : > { %v6876_v30 = vadd.f32 %v6875_v25, %v6826_v39  ;;  %v7089_v4 = vadd.f32 %v6971_v33, %v15332_v26 }
 0x8c9   : > { %7853 = vmatmul.bf16.gmra.mxu0 %v15335_v3  ;;  %v7096_v1 = vadd.f32 %v6876_v30, %v15336_v52  ;;  %7951 = vmatmul.bf16.gmra.mxu2 %v15341_v32  ;;  %v14200_v55 = vmul.f32 %v7089_v4, %v7089_v4  ;;  %v15343_v3 = vld [vmem:[#allocation119_spill] sm:$0xff] }
 0x8ca   : > { %8000 = vmatmul.bf16.gmra.mxu3 %v15342_v41 }
 0x8cb   : > { %v7289_v30 = vpack.c.bf16 %v14200_v55, %v14198_v27  ;;  %v6973_v33 = vpop.f32.mrf.mxu3  ;;  %v6877_v10 = vpop.f32.mrf.mxu1  ;;  %v14209_v17 = vmul.f32 %v7096_v1, %v7096_v1  ;;  %v15349_v1 = vld [vmem:[#allocation47_spill] sm:$0xff]  ;;  %v15389_v27 = vld [vmem:[#allocation61_spill] sm:$0xff]  ;;  %v15390_v55 = vld [vmem:[#allocation60_spill] sm:$0xff] }
 0x8cc   : > { %v6924_v39 = vpop.f32.mrf.mxu2 }
 0x8cd   : > { %v6974_v26 = vadd.f32 %v6973_v33, %v6924_v39  ;;  %v15345_v39 = vld [vmem:[#allocation30_spill] sm:$0xff] }
 0x8ce   : > { %v6828_v25 = vpop.f32.mrf.mxu0 }
 0x8cf   : > { %v6878_v31 = vadd.f32 %v6877_v10, %v6828_v25  ;;  %v7097_v48 = vadd.f32 %v6974_v26, %v15343_v3  ;;  %v15346_v25 = vld [vmem:[#allocation46_spill] sm:$0xff]  ;;  %v15347_v10 = vld [vmem:[#allocation45_spill] sm:$0xff]  ;;  %v15351_v3 = vpack.c.bf16 %v14015_v22, %v14013_v49 }
 0x8d0   : > { %v15348_v26 = vpack.c.bf16 %v15346_v25, %v15347_v10 }
 0x8d1   : > { %v7104_v32 = vadd.f32 %v6878_v31, %v15344_v61  ;;  %v15350_v31 = vpack.c.bf16 %v13858_v24, %v15349_v1  ;;  %v14225_v61 = vmul.f32 %v7097_v48, %v7097_v48 }
 0x8d3   : > { %v14211_v4 = vmul.f32 %v7104_v32, %v7104_v32  ;;  %v6975_v47 = vpop.f32.mrf.mxu3  ;;  %v7868_v58 = vpop.f32.mrf.mxu1 }
 0x8d4   : > { %v6926_v52 = vpop.f32.mrf.mxu2 }
 0x8d5   : > { %v7296_v37 = vpack.c.bf16 %v14211_v4, %v14209_v17  ;;  %v6976_v53 = vadd.f32 %v6975_v47, %v6926_v52  ;;  %v15352_v52 = vpack.c.bf16 %v14032_v40, %v14030_v56  ;;  %v15353_v40 = vld [vmem:[#allocation48_spill] sm:$0xff] }
 0x8d6   : > { %v7819_v16 = vpop.f32.mrf.mxu0  ;;  %8063 = vmatmul.bf16.vlgmr.msrb.gmra.mxu1 %v15350_v31  ;;  %v15354_v31 = vpack.c.bf16 %v13867_v20, %v15353_v40 }
 0x8d7   : > { %v7869_v41 = vadd.f32 %v7868_v58, %v7819_v16  ;;  %v7105_v33 = vadd.f32 %v6976_v53, %v15345_v39 }
 0x8d9   : > { %8014 = vmatmul.bf16.vlgmr.msrb.gmra.mxu0 %v15348_v26  ;;  %8112 = vmatmul.bf16.vlgmr.msrb.gmra.mxu2 %v15351_v3  ;;  %v14227_v32 = vmul.f32 %v7105_v33, %v7105_v33 }
 0x8da   : > { %8161 = vmatmul.bf16.vlgmr.msrb.gmra.mxu3 %v15352_v52  ;;  %v15357_v52 = vpack.c.bf16 %v14043_v13, %v14041_v11  ;;  %v15359_v13 = vld [vmem:[#allocation50_spill] sm:$0xff] }
 0x8db   : > { %v7297_v16 = vpack.c.bf16 %v14227_v32, %v14225_v61  ;;  %v7870_v39 = vpop.f32.mrf.mxu1 }
 0x8dc   : > { %v7917_v47 = vpop.f32.mrf.mxu2 }
 0x8dd   : > { %v7918_v53 = vadd.f32 %v7917_v47, %v7869_v41  ;;  %v7966_v58 = vpop.f32.mrf.mxu3  ;;  %v15355_v41 = vld [vmem:[#allocation49_spill] sm:$0xff]  ;;  %v15358_v47 = vpack.c.bf16 %v14060_v43, %v14058_v63  ;;  %v15360_v63 = vpack.c.bf16 %v13887_v6, %v15359_v13  ;;  %v15361_v43 = vld [vmem:[#allocation51_spill] sm:$0xff] }
 0x8de   : > { %v7821_v24 = vpop.f32.mrf.mxu0  ;;  %v15356_v3 = vpack.c.bf16 %v13878_v7, %v15355_v41  ;;  %v15364_v41 = vpack.c.bf16 %v14088_v5, %v14086_v21  ;;  %v15367_v5 = vld [vmem:[#allocation53_spill] sm:$0xff] }
 0x8df   : > { %v14234_v25 = vadd.f32 %v7966_v58, %v7918_v53  ;;  %v7871_v49 = vadd.f32 %v7870_v39, %v7821_v24 }
 0x8e3   : > { %v7873_v26 = vpop.f32.mrf.mxu1 }
 0x8e4   : > { %v7919_v22 = vpop.f32.mrf.mxu2 }
 0x8e5   : > { %v7920_v48 = vadd.f32 %v7919_v22, %v7871_v49  ;;  %v7968_v10 = vpop.f32.mrf.mxu3 }
 0x8e6   : > { %v7824_v33 = vpop.f32.mrf.mxu0  ;;  %8068 = vmatmul.bf16.gmra.mxu1 %v15356_v3 }
 0x8e7   : > { %v14236_v1 = vadd.f32 %v7968_v10, %v7920_v48  ;;  %v7874_v56 = vadd.f32 %v7873_v26, %v7824_v33 }
 0x8e9   : > { %8019 = vmatmul.bf16.gmra.mxu0 %v15354_v31  ;;  %8117 = vmatmul.bf16.gmra.mxu2 %v15357_v52  ;;  %v15363_v31 = vpack.c.bf16 %v14071_v38, %v14069_v51  ;;  %v15365_v38 = vld [vmem:[#allocation52_spill] sm:$0xff] }
 0x8ea   : > { %8166 = vmatmul.bf16.gmra.mxu3 %v15358_v47  ;;  %v15366_v21 = vpack.c.bf16 %v13907_v18, %v15365_v38 }
 0x8eb   : > { %v7875_v49 = vpop.f32.mrf.mxu1 }
 0x8ec   : > { %v7922_v53 = vpop.f32.mrf.mxu2 }
 0x8ed   : > { %v7923_v58 = vadd.f32 %v7922_v53, %v7874_v56  ;;  %v7971_v24 = vpop.f32.mrf.mxu3  ;;  %v15362_v56 = vpack.c.bf16 %v13898_v23, %v15361_v43 }
 0x8ee   : > { %v7826_v39 = vpop.f32.mrf.mxu0 }
 0x8ef   : > { %v14250_v22 = vadd.f32 %v7971_v24, %v7923_v58  ;;  %v7876_v20 = vadd.f32 %v7875_v49, %v7826_v39 }
 0x8f3   : > { %v7878_v26 = vpop.f32.mrf.mxu1 }
 0x8f4   : > { %v7924_v48 = vpop.f32.mrf.mxu2 }
 0x8f5   : > { %v7925_v10 = vadd.f32 %v7924_v48, %v7876_v20  ;;  %v7973_v7 = vpop.f32.mrf.mxu3 }
 0x8f6   : > { %v7829_v33 = vpop.f32.mrf.mxu0  ;;  %8073 = vmatmul.bf16.gmra.mxu1 %v15362_v56 }
 0x8f7   : > { %v14252_v40 = vadd.f32 %v7973_v7, %v7925_v10  ;;  %v7879_v11 = vadd.f32 %v7878_v26, %v7829_v33  ;;  %v15368_v7 = vpack.c.bf16 %v13918_v57, %v15367_v5  ;;  %v15369_v33 = vpack.c.bf16 %v14099_v15, %v14097_v46  ;;  %v15371_v15 = vld [vmem:[#allocation54_spill] sm:$0xff] }
 0x8f8   : > { %v15370_v26 = vpack.c.bf16 %v14116_v2, %v14114_v36  ;;  %v15372_v36 = vpack.c.bf16 %v13927_v42, %v15371_v15  ;;  %v15373_v2 = vld [vmem:[#allocation55_spill] sm:$0xff] }
 0x8f9   : > { %8024 = vmatmul.bf16.gmra.mxu0 %v15360_v63  ;;  %8122 = vmatmul.bf16.gmra.mxu2 %v15363_v31 }
 0x8fa   : > { %8171 = vmatmul.bf16.gmra.mxu3 %v15364_v41 }
 0x8fb   : > { %v7880_v58 = vpop.f32.mrf.mxu1 }
 0x8fc   : > { %v7927_v3 = vpop.f32.mrf.mxu2 }
 0x8fd   : > { %v7928_v52 = vadd.f32 %v7927_v3, %v7879_v11  ;;  %v7976_v47 = vpop.f32.mrf.mxu3 }
 0x8fe   : > { %v7831_v53 = vpop.f32.mrf.mxu0 }
 0x8ff   : > { %v14266_v24 = vadd.f32 %v7976_v47, %v7928_v52  ;;  %v7881_v6 = vadd.f32 %v7880_v58, %v7831_v53  ;;  %v15374_v58 = vpack.c.bf16 %v13938_v8, %v15373_v2 }
 0x903   : > { %v7883_v48 = vpop.f32.mrf.mxu1 }
 0x904   : > { %v7929_v39 = vpop.f32.mrf.mxu2 }
 0x905   : > { %v7930_v49 = vadd.f32 %v7929_v39, %v7881_v6  ;;  %v7978_v23 = vpop.f32.mrf.mxu3  ;;  %v15375_v6 = vpack.c.bf16 %v14127_v54, %v14125_v0  ;;  %v15376_v39 = vpack.c.bf16 %v14144_v9, %v14142_v28  ;;  %v15377_v54 = vld [vmem:[#allocation56_spill] sm:$0xff]  ;;  %v15379_v9 = vld [vmem:[#allocation57_spill] sm:$0xff] }
 0x906   : > { %v7834_v20 = vpop.f32.mrf.mxu0  ;;  %8078 = vmatmul.bf16.gmra.mxu1 %v15368_v7  ;;  %v15378_v28 = vpack.c.bf16 %v13947_v14, %v15377_v54 }
 0x907   : > { %v14268_v10 = vadd.f32 %v7978_v23, %v7930_v49  ;;  %v7884_v51 = vadd.f32 %v7883_v48, %v7834_v20 }
 0x909   : > { %8029 = vmatmul.bf16.gmra.mxu0 %v15366_v21  ;;  %8127 = vmatmul.bf16.gmra.mxu2 %v15369_v33 }
 0x90a   : > { %8176 = vmatmul.bf16.gmra.mxu3 %v15370_v26 }
 0x90b   : > { %v7885_v56 = vpop.f32.mrf.mxu1 }
 0x90c   : > { %v7932_v11 = vpop.f32.mrf.mxu2 }
 0x90d   : > { %v7933_v13 = vadd.f32 %v7932_v11, %v7884_v51  ;;  %v7981_v63 = vpop.f32.mrf.mxu3  ;;  %v15380_v11 = vpack.c.bf16 %v13958_v12, %v15379_v9 }
 0x90e   : > { %v7836_v43 = vpop.f32.mrf.mxu0 }
 0x90f   : > { %v14282_v31 = vadd.f32 %v7981_v63, %v7933_v13  ;;  %v7886_v18 = vadd.f32 %v7885_v56, %v7836_v43  ;;  %v15381_v13 = vpack.c.bf16 %v14155_v45, %v14153_v44  ;;  %v15382_v63 = vpack.c.bf16 %v14172_v59, %v14170_v35  ;;  %v15383_v45 = vld [vmem:[#allocation58_spill] sm:$0xff]  ;;  %v15385_v59 = vld [vmem:[#allocation59_spill] sm:$0xff] }
 0x910   : > { %v15384_v35 = vpack.c.bf16 %v13967_v19, %v15383_v45  ;;  %v15386_v2 = vpack.c.bf16 %v13978_v34, %v15385_v59 }
 0x913   : > { %v7888_v47 = vpop.f32.mrf.mxu1 }
 0x914   : > { %v7934_v41 = vpop.f32.mrf.mxu2 }
 0x915   : > { %v7935_v3 = vadd.f32 %v7934_v41, %v7886_v18  ;;  %v7983_v57 = vpop.f32.mrf.mxu3 }
 0x916   : > { %v7839_v52 = vpop.f32.mrf.mxu0  ;;  %8083 = vmatmul.bf16.gmra.mxu1 %v15374_v58  ;;  %v15387_v58 = vpack.c.bf16 %v14183_v60, %v14181_v50  ;;  %v15388_v60 = vpack.c.bf16 %v13987_v62, %v13985_v29 }
 0x917   : > { %v14284_v53 = vadd.f32 %v7983_v57, %v7935_v3  ;;  %v7889_v46 = vadd.f32 %v7888_v47, %v7839_v52 }
 0x919   : > { %8034 = vmatmul.bf16.gmra.mxu0 %v15372_v36  ;;  %8132 = vmatmul.bf16.gmra.mxu2 %v15375_v6 }
 0x91a   : > { %8181 = vmatmul.bf16.gmra.mxu3 %v15376_v39 }
 0x91b   : > { %v7890_v51 = vpop.f32.mrf.mxu1 }
 0x91c   : > { %v7937_v49 = vpop.f32.mrf.mxu2 }
 0x91d   : > { %v7938_v23 = vadd.f32 %v7937_v49, %v7889_v46  ;;  %v7986_v20 = vpop.f32.mrf.mxu3 }
 0x91e   : > { %v7841_v48 = vpop.f32.mrf.mxu0 }
 0x91f   : > { %v14298_v38 = vadd.f32 %v7986_v20, %v7938_v23  ;;  %v7891_v42 = vadd.f32 %v7890_v51, %v7841_v48 }
 0x923   : > { %v7893_v33 = vpop.f32.mrf.mxu1 }
 0x924   : > { %v7939_v21 = vpop.f32.mrf.mxu2 }
 0x925   : > { %v7940_v5 = vadd.f32 %v7939_v21, %v7891_v42  ;;  %v7988_v8 = vpop.f32.mrf.mxu3 }
 0x926   : > { %v7844_v7 = vpop.f32.mrf.mxu0  ;;  %8088 = vmatmul.bf16.gmra.mxu1 %v15380_v11 }
 0x927   : > { %v14300_v26 = vadd.f32 %v7988_v8, %v7940_v5  ;;  %v7894_v0 = vadd.f32 %v7893_v33, %v7844_v7 }
 0x929   : > { %8039 = vmatmul.bf16.gmra.mxu0 %v15378_v28  ;;  %8137 = vmatmul.bf16.gmra.mxu2 %v15381_v13 }
 0x92a   : > { %8186 = vmatmul.bf16.gmra.mxu3 %v15382_v63 }
 0x92b   : > { %v7895_v3 = vpop.f32.mrf.mxu1 }
 0x92c   : > { %v7942_v43 = vpop.f32.mrf.mxu2 }
 0x92d   : > { %v7943_v56 = vadd.f32 %v7942_v43, %v7894_v0  ;;  %v7991_v18 = vpop.f32.mrf.mxu3 }
 0x92e   : > { %v7846_v41 = vpop.f32.mrf.mxu0 }
 0x92f   : > { %v14314_v57 = vadd.f32 %v7991_v18, %v7943_v56  ;;  %v7896_v14 = vadd.f32 %v7895_v3, %v7846_v41 }
 0x933   : > { %v7898_v15 = vpop.f32.mrf.mxu1 }
 0x934   : > { %v7944_v52 = vpop.f32.mrf.mxu2 }
 0x935   : > { %v7945_v47 = vadd.f32 %v7944_v52, %v7896_v14  ;;  %v7993_v12 = vpop.f32.mrf.mxu3 }
 0x936   : > { %v7849_v46 = vpop.f32.mrf.mxu0  ;;  %8093 = vmatmul.bf16.gmra.mxu1 %v15386_v2 }
 0x937   : > { %v14316_v36 = vadd.f32 %v7993_v12, %v7945_v47  ;;  %v7899_v44 = vadd.f32 %v7898_v15, %v7849_v46 }
 0x939   : > { %8044 = vmatmul.bf16.gmra.mxu0 %v15384_v35  ;;  %8142 = vmatmul.bf16.gmra.mxu2 %v15387_v58 }
 0x93a   : > { %8191 = vmatmul.bf16.gmra.mxu3 %v7289_v30  ;;  %v15391_v30 = vpack.c.bf16 %v15389_v27, %v15390_v55 }
 0x93b   : > { %v7900_v20 = vpop.f32.mrf.mxu1 }
 0x93c   : > { %v7947_v6 = vpop.f32.mrf.mxu2 }
 0x93d   : > { %v7948_v39 = vadd.f32 %v7947_v6, %v7899_v44  ;;  %v7996_v49 = vpop.f32.mrf.mxu3 }
 0x93e   : > { %v7851_v23 = vpop.f32.mrf.mxu0 }
 0x93f   : > { %v14330_v48 = vadd.f32 %v7996_v49, %v7948_v39  ;;  %v7901_v19 = vadd.f32 %v7900_v20, %v7851_v23 }
 0x943   : > { %v7903_v5 = vpop.f32.mrf.mxu1 }
 0x944   : > { %v7949_v51 = vpop.f32.mrf.mxu2 }
 0x945   : > { %v7950_v42 = vadd.f32 %v7949_v51, %v7901_v19  ;;  %v7998_v34 = vpop.f32.mrf.mxu3 }
 0x946   : > { %v7854_v21 = vpop.f32.mrf.mxu0  ;;  %8098 = vmatmul.bf16.gmra.mxu1 %v15391_v30 }
 0x947   : > { %v14332_v8 = vadd.f32 %v7998_v34, %v7950_v42  ;;  %v7904_v50 = vadd.f32 %v7903_v5, %v7854_v21 }
 0x949   : > { %8049 = vmatmul.bf16.gmra.mxu0 %v15388_v60  ;;  %8147 = vmatmul.bf16.gmra.mxu2 %v7296_v37 }
 0x94a   : > { %8196 = vmatmul.bf16.gmra.mxu3 %v7297_v16 }
 0x94b   : > { %v7905_v28 = vpop.f32.mrf.mxu1 }
 0x94c   : > { %v7952_v7 = vpop.f32.mrf.mxu2 }
 0x94d   : > { %v7953_v33 = vadd.f32 %v7952_v7, %v7904_v50  ;;  %v8001_v0 = vpop.f32.mrf.mxu3 }
 0x94e   : > { %v7856_v54 = vpop.f32.mrf.mxu0 }
 0x94f   : > { %v14346_v9 = vadd.f32 %v8001_v0, %v7953_v33  ;;  %v7906_v62 = vadd.f32 %v7905_v28, %v7856_v54 }
 0x953   : > { %v8064_v43 = vpop.f32.mrf.mxu1 }
 0x954   : > { %v7954_v29 = vpop.f32.mrf.mxu2 }
 0x955   : > { %v7955_v11 = vadd.f32 %v7954_v29, %v7906_v62  ;;  %v8003_v13 = vpop.f32.mrf.mxu3 }
 0x956   : > { %v8015_v63 = vpop.f32.mrf.mxu0 }
 0x957   : > { %v14348_v56 = vadd.f32 %v8003_v13, %v7955_v11  ;;  %v8016_v17 = vadd.f32 %v8015_v63, %v14234_v25 }
 0x959   : > { %v8065_v4 = vadd.f32 %v8064_v43, %v8016_v17 }
 0x95b   : > { %v8066_v18 = vpop.f32.mrf.mxu1 }
 0x95c   : > { %v8113_v37 = vpop.f32.mrf.mxu2 }
 0x95d   : > { %v8114_v61 = vadd.f32 %v8113_v37, %v8065_v4  ;;  %v8162_v32 = vpop.f32.mrf.mxu3 }
 0x95e   : > { %v8017_v16 = vpop.f32.mrf.mxu0 }
 0x95f   : > { %v8163_v41 = vadd.f32 %v8162_v32, %v8114_v61  ;;  %v8018_v3 = vadd.f32 %v8017_v16, %v14236_v1 }
 0x961   : > { %v8202_v14 = vmax.f32 %v8163_v41, 1e-05  ;;  %v8067_v52 = vadd.f32 %v8066_v18, %v8018_v3 }
 0x963   : > { %11375 = vlog2.f32 %v8202_v14  ;;  %v8069_v44 = vpop.f32.mrf.mxu1 }
 0x964   : > { %v8115_v47 = vpop.f32.mrf.mxu2 }
 0x965   : > { %v8116_v12 = vadd.f32 %v8115_v47, %v8067_v52  ;;  %v8164_v46 = vpop.f32.mrf.mxu3 }
 0x966   : > { %v8020_v15 = vpop.f32.mrf.mxu0 }
 0x967   : > { %v8165_v45 = vadd.f32 %v8164_v46, %v8116_v12  ;;  %v8021_v25 = vadd.f32 %v8020_v15, %v14250_v22 }
 0x969   : > { %v11376_v35 = vpop.eup %11375  ;;  %v8203_v59 = vmax.f32 %v8165_v45, 1e-05  ;;  %v8070_v58 = vadd.f32 %v8069_v44, %v8021_v25 }
 0x96a   : > { %v8219_v2 = vmul.f32 0.6931472, %v11376_v35 }
 0x96b   : > { %11377 = vlog2.f32 %v8203_v59  ;;  %v8071_v20 = vpop.f32.mrf.mxu1 }
 0x96c   : > { %v8250_v6 = vmul.f32 0.4342945, %v8219_v2  ;;  %v8118_v39 = vpop.f32.mrf.mxu2 }
 0x96d   : > { %v8119_v1 = vadd.f32 %v8118_v39, %v8070_v58  ;;  %v8167_v49 = vpop.f32.mrf.mxu3 }
 0x96e   : > { %v8022_v23 = vpop.f32.mrf.mxu0  ;;  %8266 = vst [vmem:[%s11710_s21] sm:$0xff] %v8250_v6 }
 0x96f   : > { %v8168_v19 = vadd.f32 %v8167_v49, %v8119_v1  ;;  %v8023_v51 = vadd.f32 %v8022_v23, %v14252_v40 }
 0x971   : > { %v11378_v42 = vpop.eup %11377  ;;  %v8204_v34 = vmax.f32 %v8168_v19, 1e-05  ;;  %v8072_v22 = vadd.f32 %v8071_v20, %v8023_v51 }
 0x972   : > { %v8221_v21 = vmul.f32 0.6931472, %v11378_v42 }
 0x973   : > { %11379 = vlog2.f32 %v8204_v34  ;;  %v8074_v30 = vpop.f32.mrf.mxu1 }
 0x974   : > { %v8251_v5 = vmul.f32 0.4342945, %v8221_v21  ;;  %v8120_v50 = vpop.f32.mrf.mxu2 }
 0x975   : > { %v8121_v60 = vadd.f32 %v8120_v50, %v8072_v22  ;;  %v8169_v27 = vpop.f32.mrf.mxu3 }
 0x976   : > { %v8025_v55 = vpop.f32.mrf.mxu0  ;;  %8267 = vst [vmem:[%s11710_s21 + $0x8] sm:$0xff] %v8251_v5 }
 0x977   : > { %v8170_v7 = vadd.f32 %v8169_v27, %v8121_v60  ;;  %v8026_v33 = vadd.f32 %v8025_v55, %v14266_v24 }
 0x979   : > { %v11380_v0 = vpop.eup %11379  ;;  %v8205_v54 = vmax.f32 %v8170_v7, 1e-05  ;;  %v8075_v40 = vadd.f32 %v8074_v30, %v8026_v33 }
 0x97a   : > { %v8223_v28 = vmul.f32 0.6931472, %v11380_v0 }
 0x97b   : > { %11381 = vlog2.f32 %v8205_v54  ;;  %v8076_v43 = vpop.f32.mrf.mxu1 }
 0x97c   : > { %v8252_v62 = vmul.f32 0.4342945, %v8223_v28  ;;  %v8123_v29 = vpop.f32.mrf.mxu2 }
 0x97d   : > { %v8124_v11 = vadd.f32 %v8123_v29, %v8075_v40  ;;  %v8172_v13 = vpop.f32.mrf.mxu3 }
 0x97e   : > { %v8027_v63 = vpop.f32.mrf.mxu0  ;;  %8268 = vst [vmem:[%s11710_s21 + $0x10] sm:$0xff] %v8252_v62 }
 0x97f   : > { %v8173_v17 = vadd.f32 %v8172_v13, %v8124_v11  ;;  %v8028_v4 = vadd.f32 %v8027_v63, %v14268_v10 }
 0x981   : > { %v11382_v37 = vpop.eup %11381  ;;  %v8206_v61 = vmax.f32 %v8173_v17, 1e-05  ;;  %v8077_v24 = vadd.f32 %v8076_v43, %v8028_v4 }
 0x982   : > { %v8225_v32 = vmul.f32 0.6931472, %v11382_v37 }
 0x983   : > { %11383 = vlog2.f32 %v8206_v61  ;;  %v8079_v52 = vpop.f32.mrf.mxu1 }
 0x984   : > { %v8253_v16 = vmul.f32 0.4342945, %v8225_v32  ;;  %v8125_v18 = vpop.f32.mrf.mxu2 }
 0x985   : > { %v8126_v41 = vadd.f32 %v8125_v18, %v8077_v24  ;;  %v8174_v3 = vpop.f32.mrf.mxu3 }
 0x986   : > { %v8030_v14 = vpop.f32.mrf.mxu0  ;;  %8269 = vst [vmem:[%s11710_s21 + $0x18] sm:$0xff] %v8253_v16 }
 0x987   : > { %v8175_v47 = vadd.f32 %v8174_v3, %v8126_v41  ;;  %v8031_v12 = vadd.f32 %v8030_v14, %v14282_v31 }
 0x989   : > { %v11384_v46 = vpop.eup %11383  ;;  %v8207_v15 = vmax.f32 %v8175_v47, 1e-05  ;;  %v8080_v10 = vadd.f32 %v8079_v52, %v8031_v12 }
 0x98a   : > { %v8227_v44 = vmul.f32 0.6931472, %v11384_v46 }
 0x98b   : > { %11385 = vlog2.f32 %v8207_v15  ;;  %v8081_v58 = vpop.f32.mrf.mxu1 }
 0x98c   : > { %v8254_v45 = vmul.f32 0.4342945, %v8227_v44  ;;  %v8128_v25 = vpop.f32.mrf.mxu2 }
 0x98d   : > { %v8129_v35 = vadd.f32 %v8128_v25, %v8080_v10  ;;  %v8177_v59 = vpop.f32.mrf.mxu3 }
 0x98e   : > { %v8032_v2 = vpop.f32.mrf.mxu0  ;;  %8270 = vst [vmem:[%s11710_s21 + $0x20] sm:$0xff] %v8254_v45 }
 0x98f   : > { %v8178_v6 = vadd.f32 %v8177_v59, %v8129_v35  ;;  %v8033_v39 = vadd.f32 %v8032_v2, %v14284_v53 }
 0x991   : > { %v11386_v1 = vpop.eup %11385  ;;  %v8208_v49 = vmax.f32 %v8178_v6, 1e-05  ;;  %v8082_v31 = vadd.f32 %v8081_v58, %v8033_v39 }
 0x992   : > { %v8229_v23 = vmul.f32 0.6931472, %v11386_v1 }
 0x993   : > { %11387 = vlog2.f32 %v8208_v49  ;;  %v8084_v21 = vpop.f32.mrf.mxu1 }
 0x994   : > { %v8255_v20 = vmul.f32 0.4342945, %v8229_v23  ;;  %v8130_v19 = vpop.f32.mrf.mxu2 }
 0x995   : > { %v8131_v51 = vadd.f32 %v8130_v19, %v8082_v31  ;;  %v8179_v42 = vpop.f32.mrf.mxu3 }
 0x996   : > { %v8035_v34 = vpop.f32.mrf.mxu0  ;;  %8271 = vst [vmem:[%s11710_s21 + $0x28] sm:$0xff] %v8255_v20 }
 0x997   : > { %v8180_v22 = vadd.f32 %v8179_v42, %v8131_v51  ;;  %v8036_v5 = vadd.f32 %v8035_v34, %v14298_v38 }
 0x999   : > { %v11388_v50 = vpop.eup %11387  ;;  %v8209_v60 = vmax.f32 %v8180_v22, 1e-05  ;;  %v8085_v53 = vadd.f32 %v8084_v21, %v8036_v5 }
 0x99a   : > { %v8231_v27 = vmul.f32 0.6931472, %v11388_v50 }
 0x99b   : > { %11389 = vlog2.f32 %v8209_v60  ;;  %v8086_v54 = vpop.f32.mrf.mxu1 }
 0x99c   : > { %v8256_v55 = vmul.f32 0.4342945, %v8231_v27  ;;  %v8133_v30 = vpop.f32.mrf.mxu2 }
 0x99d   : > { %v8134_v7 = vadd.f32 %v8133_v30, %v8085_v53  ;;  %v8182_v33 = vpop.f32.mrf.mxu3 }
 0x99e   : > { %v8037_v0 = vpop.f32.mrf.mxu0  ;;  %8272 = vst [vmem:[%s11710_s21 + $0x30] sm:$0xff] %v8256_v55 }
 0x99f   : > { %v8183_v28 = vadd.f32 %v8182_v33, %v8134_v7  ;;  %v8038_v40 = vadd.f32 %v8037_v0, %v14300_v26 }
 0x9a1   : > { %v11390_v62 = vpop.eup %11389  ;;  %v8210_v29 = vmax.f32 %v8183_v28, 1e-05  ;;  %v8087_v38 = vadd.f32 %v8086_v54, %v8038_v40 }
 0x9a2   : > { %v8233_v11 = vmul.f32 0.6931472, %v11390_v62 }
 0x9a3   : > { %11391 = vlog2.f32 %v8210_v29  ;;  %v8089_v37 = vpop.f32.mrf.mxu1 }
 0x9a4   : > { %v8257_v13 = vmul.f32 0.4342945, %v8233_v11  ;;  %v8135_v63 = vpop.f32.mrf.mxu2 }
 0x9a5   : > { %v8136_v43 = vadd.f32 %v8135_v63, %v8087_v38  ;;  %v8184_v17 = vpop.f32.mrf.mxu3 }
 0x9a6   : > { %v8040_v4 = vpop.f32.mrf.mxu0  ;;  %8273 = vst [vmem:[%s11710_s21 + $0x38] sm:$0xff] %v8257_v13 }
 0x9a7   : > { %v8185_v61 = vadd.f32 %v8184_v17, %v8136_v43  ;;  %v8041_v32 = vadd.f32 %v8040_v4, %v14314_v57 }
 0x9a9   : > { %v11392_v24 = vpop.eup %11391  ;;  %v8211_v16 = vmax.f32 %v8185_v61, 1e-05  ;;  %v8090_v26 = vadd.f32 %v8089_v37, %v8041_v32 }
 0x9aa   : > { %v8235_v18 = vmul.f32 0.6931472, %v11392_v24 }
 0x9ab   : > { %11393 = vlog2.f32 %v8211_v16  ;;  %v8091_v12 = vpop.f32.mrf.mxu1 }
 0x9ac   : > { %v8258_v41 = vmul.f32 0.4342945, %v8235_v18  ;;  %v8138_v3 = vpop.f32.mrf.mxu2 }
 0x9ad   : > { %v8139_v14 = vadd.f32 %v8138_v3, %v8090_v26  ;;  %v8187_v52 = vpop.f32.mrf.mxu3 }
 0x9ae   : > { %v8042_v47 = vpop.f32.mrf.mxu0  ;;  %8274 = vst [vmem:[%s11710_s21 + $0x40] sm:$0xff] %v8258_v41 }
 0x9af   : > { %v8188_v46 = vadd.f32 %v8187_v52, %v8139_v14  ;;  %v8043_v15 = vadd.f32 %v8042_v47, %v14316_v36 }
 0x9b1   : > { %v11394_v44 = vpop.eup %11393  ;;  %v8212_v10 = vmax.f32 %v8188_v46, 1e-05  ;;  %v8092_v57 = vadd.f32 %v8091_v12, %v8043_v15 }
 0x9b2   : > { %v8237_v45 = vmul.f32 0.6931472, %v11394_v44 }
 0x9b3   : > { %11395 = vlog2.f32 %v8212_v10  ;;  %v8094_v6 = vpop.f32.mrf.mxu1 }
 0x9b4   : > { %v8259_v25 = vmul.f32 0.4342945, %v8237_v45  ;;  %v8140_v35 = vpop.f32.mrf.mxu2 }
 0x9b5   : > { %v8141_v59 = vadd.f32 %v8140_v35, %v8092_v57  ;;  %v8189_v2 = vpop.f32.mrf.mxu3 }
 0x9b6   : > { %v8045_v58 = vpop.f32.mrf.mxu0  ;;  %8275 = vst [vmem:[%s11710_s21 + $0x48] sm:$0xff] %v8259_v25 }
 0x9b7   : > { %v8190_v39 = vadd.f32 %v8189_v2, %v8141_v59  ;;  %v8046_v1 = vadd.f32 %v8045_v58, %v14330_v48 }
 0x9b9   : > { %v11396_v49 = vpop.eup %11395  ;;  %v8213_v23 = vmax.f32 %v8190_v39, 1e-05  ;;  %v8095_v36 = vadd.f32 %v8094_v6, %v8046_v1 }
 0x9ba   : > { %v8239_v31 = vmul.f32 0.6931472, %v11396_v49 }
 0x9bb   : > { %11397 = vlog2.f32 %v8213_v23  ;;  %v8096_v21 = vpop.f32.mrf.mxu1 }
 0x9bc   : > { %v8260_v20 = vmul.f32 0.4342945, %v8239_v31  ;;  %v8143_v19 = vpop.f32.mrf.mxu2 }
 0x9bd   : > { %v8144_v51 = vadd.f32 %v8143_v19, %v8095_v36  ;;  %v8192_v42 = vpop.f32.mrf.mxu3 }
 0x9be   : > { %v8047_v34 = vpop.f32.mrf.mxu0  ;;  %8276 = vst [vmem:[%s11710_s21 + $0x50] sm:$0xff] %v8260_v20 }
 0x9bf   : > { %v8193_v22 = vadd.f32 %v8192_v42, %v8144_v51  ;;  %v8048_v5 = vadd.f32 %v8047_v34, %v14332_v8 }
 0x9c1   : > { %v11398_v50 = vpop.eup %11397  ;;  %v8214_v60 = vmax.f32 %v8193_v22, 1e-05  ;;  %v8097_v48 = vadd.f32 %v8096_v21, %v8048_v5 }
 0x9c2   : > { %v8241_v27 = vmul.f32 0.6931472, %v11398_v50 }
 0x9c3   : > { %11399 = vlog2.f32 %v8214_v60  ;;  %v8099_v28 = vpop.f32.mrf.mxu1 }
 0x9c4   : > { %v8261_v53 = vmul.f32 0.4342945, %v8241_v27  ;;  %v8145_v55 = vpop.f32.mrf.mxu2 }
 0x9c5   : > { %v8146_v30 = vadd.f32 %v8145_v55, %v8097_v48  ;;  %v8194_v7 = vpop.f32.mrf.mxu3 }
 0x9c6   : > { %v8050_v33 = vpop.f32.mrf.mxu0  ;;  %8277 = vst [vmem:[%s11710_s21 + $0x58] sm:$0xff] %v8261_v53 }
 0x9c7   : > { %v8195_v0 = vadd.f32 %v8194_v7, %v8146_v30  ;;  %v8051_v54 = vadd.f32 %v8050_v33, %v14346_v9 }
 0x9c9   : > { %v11400_v40 = vpop.eup %11399  ;;  %v8215_v62 = vmax.f32 %v8195_v0, 1e-05  ;;  %v8100_v8 = vadd.f32 %v8099_v28, %v8051_v54 }
 0x9ca   : > { %v8243_v29 = vmul.f32 0.6931472, %v11400_v40 }
 0x9cb   : > { %11401 = vlog2.f32 %v8215_v62  ;;  %v8101_v32 = vpop.f32.mrf.mxu1 }
 0x9cc   : > { %v8262_v11 = vmul.f32 0.4342945, %v8243_v29  ;;  %v8148_v38 = vpop.f32.mrf.mxu2 }
 0x9cd   : > { %v8149_v13 = vadd.f32 %v8148_v38, %v8100_v8  ;;  %v8197_v63 = vpop.f32.mrf.mxu3 }
 0x9ce   : > { %v8052_v43 = vpop.f32.mrf.mxu0  ;;  %8278 = vst [vmem:[%s11710_s21 + $0x60] sm:$0xff] %v8262_v11 }
 0x9cf   : > { %v8198_v17 = vadd.f32 %v8197_v63, %v8149_v13  ;;  %v8053_v4 = vadd.f32 %v8052_v43, %v14348_v56 }
 0x9d1   : > { %v11402_v37 = vpop.eup %11401  ;;  %v8216_v61 = vmax.f32 %v8198_v17, 1e-05  ;;  %v8102_v24 = vadd.f32 %v8101_v32, %v8053_v4 }
 0x9d2   : > { %v8245_v9 = vmul.f32 0.6931472, %v11402_v37 }
 0x9d3   : > { %11403 = vlog2.f32 %v8216_v61 }
 0x9d4   : > { %v8263_v16 = vmul.f32 0.4342945, %v8245_v9  ;;  %v8150_v18 = vpop.f32.mrf.mxu2 }
 0x9d5   : > { %v8151_v26 = vadd.f32 %v8150_v18, %v8102_v24  ;;  %v8199_v41 = vpop.f32.mrf.mxu3 }
 0x9d6   : > { %8279 = vst [vmem:[%s11710_s21 + $0x68] sm:$0xff] %v8263_v16 }
 0x9d7   : > { %v8200_v3 = vadd.f32 %v8199_v41, %v8151_v26 }
 0x9d9   : > { %v11404_v14 = vpop.eup %11403  ;;  %v8217_v52 = vmax.f32 %v8200_v3, 1e-05 }
 0x9da   : > { %v8247_v56 = vmul.f32 0.6931472, %v11404_v14 }
 0x9db   : > { %11405 = vlog2.f32 %v8217_v52 }
 0x9dc   : > { %v8264_v47 = vmul.f32 0.4342945, %v8247_v56 }
 0x9de   : > { %8280 = vst [vmem:[%s11710_s21 + $0x70] sm:$0xff] %v8264_v47 }
 0x9e1   : > { %v11406_v12 = vpop.eup %11405 }
 0x9e2   : > { %v8249_v46 = vmul.f32 0.6931472, %v11406_v12 }
 0x9e4   : > { %v8265_v15 = vmul.f32 0.4342945, %v8249_v46 }
 0x9e6   : > { %8281 = vst [vmem:[%s11710_s21 + $0x78] sm:$0xff] %v8265_v15 }
 0x9e7   : > { %11522 = shalt.err (!%p11519_p13)
}
 0x9e8   : > { %s11592_s23 = smov 128   ;;  %s11593_s18 = smov 8  }
 0x9e9   : > { %11300 = dma.vmem_to_hbm [thread:$0]  (%p11654_p4), %s8298_s4, 2048, %s8300_s5, %s8283_s6, %s11592_s23, %s11592_s23, %s11593_s18  }
 0x9ea PF: > { %p11317_p0 = scmp.ge.s32.totalorder %s11583_s17, 2  ;;  %s8314_s19 = sand.u32 1, %s11563_s12  }
 0x9eb   : > { %s8315_s21 = scalar_lea.sflag [#allocation6], %s8314_s19 }
 0x9ec   : > { %p11310_p1 = pnand %p11317_p0, %p11661_p8 }
 0x9ee   : > { %p11311_p2 = pneg %p11310_p1 }
 0x9f0   : > { %11558 = dma.done.wait (%p11311_p2), %s8315_s21, 2048  }
 0x9f1   : > { %11560 = vsyncadd (%p11311_p2), %s8315_s21, 4294965248  ;;  %s18_s17 = sadd.s32 1, %s11583_s17   ;;  %s15392_s12 = smov %s11567_s13 }
 0x9f2   : > { %p15_p3 = scmp.ge.s32.totalorder %s18_s17, 4   ;;  %s15393_s13 = smov %s11571_s14 }
 0x9f3   : > { %s15394_s14 = smov %s11667_s25  ;;  %s15395_s15 = smov %s11579_s16 }
 0x9f4   : > { %s15396_s16 = smov %s15398_s20  ;;  %17 = sbr.rel (!%p15_p3) target bundleno = 6 (0x6), region = 74 }
 0x9f9   :  { %8321 = vsyncpa [#allocation5], 1 }
 0x9fa   :  { %8323 = vsyncpa [#allocation5 + $0x1], 1 }
 0x9fb   :  { %8324 = vsyncpa [#allocation8], 1 }
 0x9fc   :  { %8325 = vsyncpa [#allocation6], 1 }
 0x9fd   :  { %8327 = vsyncpa [#allocation6 + $0x1], 1 }
 0x9fe   :  { %8328 = vsyncmov [#allocation3] }
 0xa01   :  { %s8329_s22 = vpop.sfrf %8328 }
 0xa02   :  { %p10713_p4 = scmp.ne.s32.totalorder %s8329_s22, 0 }
 0xa04   :  { %8333 = shalt.err (%p10713_p4)  }

</bundles_post_ra>
